<compile_context>
chip_gen: v7x
topology: tpu7x:2x2x1
jax: 0.10.0
libtpu: 0.0.40
codegen_flags: <defaults>
</compile_context>

<pallas_src>
import functools

import jax
import jax.numpy as jnp
from jax.experimental import pallas as pl
from jax.experimental.pallas import tpu as pltpu

PRIMITIVES = [
    'none', 'max_pool_3x3', 'avg_pool_3x3', 'skip_connect',
    'sep_conv_3x3', 'sep_conv_5x5', 'dil_conv_3x3', 'dil_conv_5x5',
]

LANE = 128
_BUF_BUDGET = 1 << 20          # ~1 MiB per (double-buffered) input block
_BN_EPS = 1e-5
_MXU_DTYPE = jnp.bfloat16      # MXU operand dtype (accumulation stays f32)

_PARALLEL = pltpu.CompilerParams(dimension_semantics=("parallel",))


# --------------------------------------------------------------------------------------
# tiling / lane-packing helpers
# --------------------------------------------------------------------------------------

def _row_tile(R, bytes_per_row, granularity=8, budget=_BUF_BUDGET):
    """Largest multiple-of-`granularity` row tile that divides R, fits the per-buffer VMEM
    budget, and leaves >=2 grid steps when possible (pipelining + v7x megacore)."""
    if R <= granularity or R % granularity != 0:
        return R                      # full-extent block (allowed by the (8,128) rule)
    cap = min(R // 2, max(granularity, budget // max(bytes_per_row, 1)))
    cap = max(granularity, cap)
    best, t = granularity, granularity
    while t <= min(R, cap):
        if R % t == 0:
            best = t
        t += granularity
    return best


class _Pack:
    """Lane-dense view of an (M, C) activation: (M*C/128, 128) when C divides 128,
    otherwise the plain channels-last (M, C) layout (e.g. the stem's C=12)."""

    def __init__(self, M, C):
        self.M, self.C = M, C
        if C <= LANE and LANE % C == 0 and (M * C) % LANE == 0:
            self.packed, self.rep = True, LANE // C
            self.R, self.L = (M * C) // LANE, LANE
        else:
            self.packed, self.rep = False, 1
            self.R, self.L = M, C

    def pack(self, x2d):                    # (M, C) -> (R, L)   (free reshape)
        return x2d.reshape(self.R, self.L)

    def pack_stack(self, stack):            # (T, M, C) -> (T, R, L)
        return stack.reshape(stack.shape[0], self.R, self.L)

    def unpack(self, y):                    # (R, L) -> (M, C)
        return y.reshape(self.M, self.C)

    def vec(self, v):                       # per-channel (C,) -> (1, L), lane-tiled
        v = v.reshape(-1).astype(jnp.float32)
        if self.packed:
            v = jnp.tile(v, self.rep)
        return v.reshape(1, self.L)

    def reduce_stats(self, partials):       # (G, 2, L) partial sums -> (2, C)
        if self.packed:
            return partials.reshape(-1, 2, self.rep, self.C).sum(axis=(0, 2))
        return partials.sum(axis=0)


def _finalize_stats(s, ssq, count, eps=_BN_EPS):
    mean = s / count
    var = jnp.maximum(ssq / count - mean * mean, 0.0)
    return mean, jax.lax.rsqrt(var + eps)


# --------------------------------------------------------------------------------------
# Pallas kernels
# --------------------------------------------------------------------------------------

def _stat_rows(y):
    # per-channel partial sums for train-mode BatchNorm: -> (1, 2, C)
    return jnp.concatenate([jnp.sum(y, axis=0, keepdims=True),
                            jnp.sum(y * y, axis=0, keepdims=True)], axis=0)[None]


def _mm_kernel(*refs, relu_a, has_bias, want_stats):
    a_ref, w_ref = refs[0], refs[1]
    i = 2
    b_ref = None
    if has_bias:
        b_ref = refs[i]; i += 1
    o_ref = refs[i]; i += 1
    s_ref = refs[i] if want_stats else None
    a = a_ref[...]
    if relu_a:
        a = jnp.maximum(a, 0.0)
    y = jnp.dot(a.astype(_MXU_DTYPE), w_ref[...].astype(_MXU_DTYPE),
                preferred_element_type=jnp.float32)
    if has_bias:
        y = y + b_ref[...]
    o_ref[...] = y
    if want_stats:
        s_ref[...] = _stat_rows(y)


def pallas_matmul(a, w, *, relu_a=False, bias=None, want_stats=False):
    """y = (relu?)(a) @ w (+ bias); optionally also returns train-BN (mean, inv_std) of y
    via per-tile partial sums.  Tiled over M ("parallel"), bf16 MXU operands, f32 acc."""
    M, K = a.shape
    N = w.shape[1]
    gran = 16 if a.dtype == jnp.bfloat16 else 8
    tm = _row_tile(M, (K + N) * 4, granularity=gran)
    G = M // tm
    in_specs = [pl.BlockSpec((tm, K), lambda i: (i, 0)),
                pl.BlockSpec((K, N), lambda i: (0, 0))]
    inputs = [a, w]
    if bias is not None:
        in_specs.append(pl.BlockSpec((1, N), lambda i: (0, 0)))
        inputs.append(bias.reshape(1, N).astype(jnp.float32))
    out_shape = [jax.ShapeDtypeStruct((M, N), jnp.float32)]
    out_specs = [pl.BlockSpec((tm, N), lambda i: (i, 0))]
    if want_stats:
        out_shape.append(jax.ShapeDtypeStruct((G, 2, N), jnp.float32))
        out_specs.append(pl.BlockSpec((1, 2, N), lambda i: (i, 0, 0)))
    # TODO(synk): add K/N blocking (reduction axis marked "arbitrary") for channel counts
    #             large enough that the full (K, N) weight block stops fitting in VMEM.
    res = pl.pallas_call(
        functools.partial(_mm_kernel, relu_a=relu_a, has_bias=bias is not None,
                          want_stats=want_stats),
        grid=(G,),
        in_specs=in_specs,
        out_specs=tuple(out_specs) if want_stats else out_specs[0],
        out_shape=tuple(out_shape) if want_stats else out_shape[0],
        compiler_params=_PARALLEL,
    )(*inputs)
    if not want_stats:
        return res
    y, partial = res
    sums = jnp.sum(partial, axis=0)
    mean, inv = _finalize_stats(sums[0], sums[1], M)
    return y, mean, inv


def _edge_sum_kernel(*refs, n_in):
    w_ref, b_ref = refs[0], refs[1]
    x_refs = refs[2:2 + n_in]
    o_ref = refs[2 + n_in]
    w = w_ref[...]
    acc = x_refs[0][...] * w[0:1, :]
    for t in range(1, n_in):
        acc = acc + x_refs[t][...] * w[t:t + 1, :]
    o_ref[...] = acc + b_ref[...]


def pallas_edge_sum(entries, scales, bias):
    """out = sum_t scales[t] * entries[t] + bias.  Folds the MixedOp alpha weights, every
    primitive's trailing BatchNorm (affine-less) and the Cell state sum into one kernel."""
    T = len(entries)
    R, L = entries[0].shape
    tr = _row_tile(R, T * L * 4)
    G = R // tr
    in_specs = [pl.BlockSpec((T, L), lambda i: (0, 0)),
                pl.BlockSpec((1, L), lambda i: (0, 0))]
    in_specs += [pl.BlockSpec((tr, L), lambda i: (i, 0)) for _ in range(T)]
    return pl.pallas_call(
        functools.partial(_edge_sum_kernel, n_in=T),
        grid=(G,),
        in_specs=in_specs,
        out_specs=pl.BlockSpec((tr, L), lambda i: (i, 0)),
        out_shape=jax.ShapeDtypeStruct((R, L), jnp.float32),
        compiler_params=_PARALLEL,
    )(scales, bias, *entries)


def _tap_max_kernel(x_ref, o_ref, s_ref):
    m = jnp.max(x_ref[...], axis=0)
    o_ref[...] = m
    s_ref[...] = _stat_rows(m)


def _tap_avg_kernel(x_ref, r_ref, o_ref, s_ref):
    y = jnp.sum(x_ref[...], axis=0) * r_ref[...]
    o_ref[...] = y
    s_ref[...] = _stat_rows(y)


def _tap_call(kernel, stack, extra):
    T, R, L = stack.shape
    tr = _row_tile(R, (T + len(extra)) * L * 4)
    G = R // tr
    in_specs = [pl.BlockSpec((T, tr, L), lambda i: (0, i, 0))]
    in_specs += [pl.BlockSpec((tr, L), lambda i: (i, 0)) for _ in extra]
    return pl.pallas_call(
        kernel,
        grid=(G,),
        in_specs=in_specs,
        out_specs=(pl.BlockSpec((tr, L), lambda i: (i, 0)),
                   pl.BlockSpec((1, 2, L), lambda i: (i, 0, 0))),
        out_shape=(jax.ShapeDtypeStruct((R, L), jnp.float32),
                   jax.ShapeDtypeStruct((G, 2, L), jnp.float32)),
        compiler_params=_PARALLEL,
    )(stack, *extra)


def pallas_tap_max(stack):
    return _tap_call(_tap_max_kernel, stack, ())


def pallas_tap_avg(stack, recip):
    return _tap_call(_tap_avg_kernel, stack, (recip,))


def _affine_kernel(x_ref, sc_ref, sh_ref, o_ref):
    o_ref[...] = x_ref[...] * sc_ref[...] + sh_ref[...]


def pallas_affine(x, scale, shift):
    """Per-lane affine (BatchNorm apply), lane-packed, tiled over rows."""
    R, L = x.shape
    tr = _row_tile(R, L * 4)
    G = R // tr
    return pl.pallas_call(
        _affine_kernel,
        grid=(G,),
        in_specs=[pl.BlockSpec((tr, L), lambda i: (i, 0)),
                  pl.BlockSpec((1, L), lambda i: (0, 0)),
                  pl.BlockSpec((1, L), lambda i: (0, 0))],
        out_specs=pl.BlockSpec((tr, L), lambda i: (i, 0)),
        out_shape=jax.ShapeDtypeStruct((R, L), jnp.float32),
        compiler_params=_PARALLEL,
    )(x, scale, shift)


def _pool_sum_kernel(x_ref, o_ref):
    o_ref[...] = jnp.sum(x_ref[...], axis=1)[None, :, :]


def pallas_global_pool(x):
    """AdaptiveAvgPool2d(1): (N, HW, C) -> (N, C) via per-HW-tile partial sums."""
    N, HW, C = x.shape
    thw = _row_tile(HW, N * C * 4)
    G = HW // thw
    partials = pl.pallas_call(
        _pool_sum_kernel,
        grid=(G,),
        in_specs=[pl.BlockSpec((N, thw, C), lambda i: (0, i, 0))],
        out_specs=pl.BlockSpec((1, N, C), lambda i: (i, 0, 0)),
        out_shape=jax.ShapeDtypeStruct((G, N, C), jnp.float32),
        compiler_params=_PARALLEL,
    )(x)
    return jnp.sum(partials, axis=0) / HW


# --------------------------------------------------------------------------------------
# JAX glue: patch extraction, op wrappers (heavy math runs in the Pallas kernels above)
# --------------------------------------------------------------------------------------

def _im2col(x, k, stride, pad, dilation=1, relu=False):
    """x: (N,H,W,C) -> bf16 im2col matrix (N*Ho*Wo, k*k*C) [tap-major, channel-minor]."""
    N, H, W, C = x.shape
    xp = jnp.pad(x, ((0, 0), (pad, pad), (pad, pad), (0, 0)))
    Ho = (H + 2 * pad - dilation * (k - 1) - 1) // stride + 1
    Wo = (W + 2 * pad - dilation * (k - 1) - 1) // stride + 1
    taps = []
    for kh in range(k):
        for kw in range(k):
            h0, w0 = kh * dilation, kw * dilation
            taps.append(xp[:, h0:h0 + (Ho - 1) * stride + 1:stride,
                              w0:w0 + (Wo - 1) * stride + 1:stride, :])
    A = jnp.stack(taps, axis=-2)                      # (N, Ho, Wo, k*k, C)
    if relu:
        A = jnp.maximum(A, 0.0)
    return A.reshape(N * Ho * Wo, k * k * C).astype(_MXU_DTYPE), (N, Ho, Wo)


def _pool_taps(x, stride, pad_value):
    """3x3 / pad=1 pooling taps: (9, N*Ho*Wo, C)."""
    N, H, W, C = x.shape
    xp = jnp.pad(x, ((0, 0), (1, 1), (1, 1), (0, 0)), constant_values=pad_value)
    Ho, Wo = (H - 1) // stride + 1, (W - 1) // stride + 1
    taps = [xp[:, kh:kh + (Ho - 1) * stride + 1:stride,
                  kw:kw + (Wo - 1) * stride + 1:stride, :]
            for kh in range(3) for kw in range(3)]
    return jnp.stack(taps, axis=0).reshape(9, N * Ho * Wo, C), (N, Ho, Wo)


def _pool_stats(partials, pk, M):
    s = pk.reduce_stats(partials)
    return _finalize_stats(s[0], s[1], M)


def max_pool_bn_raw(x, stride):
    N, H, W, C = x.shape
    stack, (_, Ho, Wo) = _pool_taps(x, stride, -jnp.inf)
    M = N * Ho * Wo
    pk = _Pack(M, C)
    raw, partial = pallas_tap_max(pk.pack_stack(stack))
    mean, inv = _pool_stats(partial, pk, M)
    return pk.unpack(raw), mean, inv, (N, Ho, Wo, C)


def avg_pool_bn_raw(x, stride):
    # AvgPool2d(3, stride, 1, count_include_pad=False): divide by #valid taps per position
    N, H, W, C = x.shape
    stack, (_, Ho, Wo) = _pool_taps(x, stride, 0.0)
    cnt, _ = _pool_taps(jnp.ones((1, H, W, 1), jnp.float32), stride, 0.0)
    recip = (1.0 / jnp.sum(cnt, axis=0)).reshape(1, Ho, Wo, 1)
    M = N * Ho * Wo
    recip_full = jnp.broadcast_to(recip, (N, Ho, Wo, C)).reshape(M, C)
    pk = _Pack(M, C)
    raw, partial = pallas_tap_avg(pk.pack_stack(stack), pk.pack(recip_full))
    mean, inv = _pool_stats(partial, pk, M)
    return pk.unpack(raw), mean, inv, (N, Ho, Wo, C)


def _apply_bn(y2d, mean, inv):
    M, C = y2d.shape
    pk = _Pack(M, C)
    z = pallas_affine(pk.pack(y2d), pk.vec(inv), pk.vec(-mean * inv))
    return pk.unpack(z)


def relu_conv_bn_1x1(x, w):
    N, H, W, Ci = x.shape
    y, mean, inv = pallas_matmul(x.reshape(N * H * W, Ci), w, relu_a=True, want_stats=True)
    return _apply_bn(y, mean, inv).reshape(N, H, W, w.shape[1])


def stem_forward(x, p):
    A, (N, Ho, Wo) = _im2col(x, 3, 1, 1, relu=False)
    y, mean, inv = pallas_matmul(A, p['w'], want_stats=True)
    return _apply_bn(y, mean, inv).reshape(N, Ho, Wo, p['w'].shape[1])


def factorized_reduce_raw(x, p):
    # ReLU -> two stride-2 1x1 convs (second on the (1,1)-shifted input) -> concat
    x1 = x[:, ::2, ::2, :]
    x2 = x[:, 1::2, 1::2, :]
    N, Ho, Wo, Ci = x1.shape
    M = N * Ho * Wo
    y1, m1, i1 = pallas_matmul(x1.reshape(M, Ci), p['w1'], relu_a=True, want_stats=True)
    y2, m2, i2 = pallas_matmul(x2.reshape(M, Ci), p['w2'], relu_a=True, want_stats=True)
    y = jnp.concatenate([y1, y2], axis=-1)
    return y, jnp.concatenate([m1, m2]), jnp.concatenate([i1, i2]), (N, Ho, Wo, y.shape[-1])


def factorized_reduce(x, p):
    y, mean, inv, (N, Ho, Wo, Co) = factorized_reduce_raw(x, p)
    return _apply_bn(y, mean, inv).reshape(N, Ho, Wo, Co)


def _sep_weight(dw, pw):
    # fold depthwise (k*k, C) and pointwise (C, Co) into one im2col weight (k*k*C, Co)
    return (dw[:, :, None] * pw[None, :, :]).reshape(-1, pw.shape[1])


def sep_conv_raw(x, p, k, stride, pad):
    """ReLU-dw-pw-BN-ReLU-dw-pw: returns the final pre-BN output plus its BN stats."""
    C = x.shape[-1]
    A1, (N, Ho, Wo) = _im2col(x, k, stride, pad, relu=True)
    y1, m1, i1 = pallas_matmul(A1, _sep_weight(p['dw1'], p['pw1']), want_stats=True)
    z1 = _apply_bn(y1, m1, i1).reshape(N, Ho, Wo, C)
    A2, _ = _im2col(z1, k, 1, pad, relu=True)
    y2, m2, i2 = pallas_matmul(A2, _sep_weight(p['dw2'], p['pw2']), want_stats=True)
    return y2, m2, i2, (N, Ho, Wo, C)


def dil_conv_raw(x, p, k, stride, pad, dilation):
    C = x.shape[-1]
    A, (N, Ho, Wo) = _im2col(x, k, stride, pad, dilation, relu=True)
    y, mean, inv = pallas_matmul(A, _sep_weight(p['dw'], p['pw']), want_stats=True)
    return y, mean, inv, (N, Ho, Wo, C)


def edge_entries(h, w_row, p, stride):
    """One MixedOp edge -> raw (M', C) entries plus per-channel (scale, shift) such that
    sum_t scale_t * entry_t + sum_t shift_t == sum_p w_p * op_p(h).  Trailing BatchNorms of
    pools / convs / FactorizedReduce are folded into (scale, shift); 'none' is dropped."""
    C = h.shape[-1]
    entries, scales, shifts = [], [], []

    def add(raw2d, mean, inv, w):
        entries.append(raw2d)
        scales.append(w * inv)
        shifts.append(-(w * inv) * mean)

    raw, mean, inv, osh = max_pool_bn_raw(h, stride)                       # max_pool_3x3 + BN
    add(raw, mean, inv, w_row[1])
    raw, mean, inv, _ = avg_pool_bn_raw(h, stride)                         # avg_pool_3x3 + BN
    add(raw, mean, inv, w_row[2])
    if stride == 1:                                                        # skip_connect
        entries.append(h.reshape(-1, C))
        scales.append(w_row[3] * jnp.ones((C,), jnp.float32))
        shifts.append(jnp.zeros((C,), jnp.float32))
    else:
        y, mean, inv, _ = factorized_reduce_raw(h, p['skip_connect'])
        add(y, mean, inv, w_row[3])
    y, mean, inv, _ = sep_conv_raw(h, p['sep_conv_3x3'], 3, stride, 1)     # sep_conv_3x3
    add(y, mean, inv, w_row[4])
    y, mean, inv, _ = sep_conv_raw(h, p['sep_conv_5x5'], 5, stride, 2)     # sep_conv_5x5
    add(y, mean, inv, w_row[5])
    y, mean, inv, _ = dil_conv_raw(h, p['dil_conv_3x3'], 3, stride, 2, 2)  # dil_conv_3x3
    add(y, mean, inv, w_row[6])
    y, mean, inv, _ = dil_conv_raw(h, p['dil_conv_5x5'], 5, stride, 4, 2)  # dil_conv_5x5
    add(y, mean, inv, w_row[7])
    return entries, scales, shifts, osh


def cell_forward(s0, s1, weights, cp, steps, multiplier, reduction):
    if 'w1' in cp['pre0']:
        s0 = factorized_reduce(s0, cp['pre0'])            # reduction_prev
    else:
        s0 = relu_conv_bn_1x1(s0, cp['pre0']['w'])
    s1 = relu_conv_bn_1x1(s1, cp['pre1']['w'])
    states = [s0, s1]
    offset = 0
    for _ in range(steps):
        entries, scales, shifts, osh = [], [], [], None
        for j, h in enumerate(states):
            stride = 2 if reduction and j < 2 else 1
            e, sc, sh, osh = edge_entries(h, weights[offset + j], cp['ops'][offset + j], stride)
            entries += e
            scales += sc
            shifts += sh
        N, Ho, Wo, C = osh
        pk = _Pack(N * Ho * Wo, C)
        scale_mat = jnp.concatenate([pk.vec(s) for s in scales], axis=0)   # (T, L)
        bias = pk.vec(sum(shifts))
        s_new = pallas_edge_sum([pk.pack(e) for e in entries], scale_mat, bias)
        offset += len(states)
        states.append(pk.unpack(s_new).reshape(N, Ho, Wo, C))
    return jnp.concatenate(states[-multiplier:], axis=-1)


def network_forward(x_nchw, params, alphas_normal, alphas_reduce, cfg):
    x = jnp.transpose(x_nchw, (0, 2, 3, 1)).astype(jnp.float32)            # NCHW -> NHWC
    s0 = s1 = stem_forward(x, params['stem'])
    for i, cp in enumerate(params['cells']):
        reduction = cfg['reductions'][i]
        alphas = alphas_reduce if reduction else alphas_normal
        weights = jax.nn.softmax(alphas, axis=-1)                          # tiny (k, 8) glue op
        s0, s1 = s1, cell_forward(s0, s1, weights, cp, cfg['steps'], cfg['multiplier'], reduction)
    N, H, W, C = s1.shape
    pooled = pallas_global_pool(s1.reshape(N, H * W, C))                   # AdaptiveAvgPool2d(1)
    return pallas_matmul(pooled, params['classifier']['w'],
                         bias=params['classifier']['b'])


# --------------------------------------------------------------------------------------
# Deterministic parameter init mirroring Network.__init__
# --------------------------------------------------------------------------------------

def init_params(key, C, num_classes, layers, steps, multiplier, stem_multiplier):
    counter = [0]

    def nrm(shape, scale=0.1):
        counter[0] += 1
        return scale * jax.random.normal(jax.random.fold_in(key, counter[0]), shape, jnp.float32)

    params = {}
    C_curr = stem_multiplier * C
    params['stem'] = {'w': nrm((3 * 3 * 3, C_curr))}
    C_pp, C_p, C_curr = C_curr, C_curr, C
    cells, reductions = [], []
    reduction_prev = False
    for i in range(layers):
        if i in [layers // 3, 2 * layers // 3]:
            C_curr *= 2
            reduction = True
        else:
            reduction = False
        reductions.append(reduction)
        cell = {}
        if reduction_prev:
            cell['pre0'] = {'w1': nrm((C_pp, C_curr // 2)), 'w2': nrm((C_pp, C_curr // 2))}
        else:
            cell['pre0'] = {'w': nrm((C_pp, C_curr))}
        cell['pre1'] = {'w': nrm((C_p, C_curr))}
        ops = []
        for ii in range(steps):
            for j in range(2 + ii):
                stride = 2 if reduction and j < 2 else 1
                op = {}
                for prim in PRIMITIVES:
                    if prim == 'skip_connect' and stride == 2:
                        op[prim] = {'w1': nrm((C_curr, C_curr // 2)),
                                    'w2': nrm((C_curr, C_curr // 2))}
                    elif prim.startswith('sep_conv'):
                        kk = 3 if prim.endswith('3x3') else 5
                        op[prim] = {'dw1': nrm((kk * kk, C_curr)), 'pw1': nrm((C_curr, C_curr)),
                                    'dw2': nrm((kk * kk, C_curr)), 'pw2': nrm((C_curr, C_curr))}
                    elif prim.startswith('dil_conv'):
                        kk = 3 if prim.endswith('3x3') else 5
                        op[prim] = {'dw': nrm((kk * kk, C_curr)), 'pw': nrm((C_curr, C_curr))}
                    else:
                        op[prim] = {}
                ops.append(op)
        cell['ops'] = ops
        cells.append(cell)
        reduction_prev = reduction
        C_pp, C_p = C_p, multiplier * C_curr
    params['cells'] = cells
    params['classifier'] = {'w': nrm((C_p, num_classes)),
                            'b': jnp.zeros((1, num_classes), jnp.float32)}
    k_edges = sum(1 for i in range(steps) for _ in range(2 + i))
    alphas_normal = jax.random.normal(jax.random.fold_in(key, 10001), (k_edges, len(PRIMITIVES)))
    alphas_reduce = jax.random.normal(jax.random.fold_in(key, 10002), (k_edges, len(PRIMITIVES)))
    cfg = {'reductions': reductions, 'steps': steps, 'multiplier': multiplier}
    return params, alphas_normal, alphas_reduce, cfg


if __name__ == "__main__":
    key = jax.random.PRNGKey(0)
    # small search-space config: C=4, 2 layers, steps=2, multiplier=2, stem_multiplier=3
    C, num_classes, layers, steps, multiplier, stem_multiplier = 4, 10, 2, 2, 2, 3
    params, a_norm, a_red, cfg = init_params(key, C, num_classes, layers, steps,
                                             multiplier, stem_multiplier)
    x = jax.random.normal(jax.random.fold_in(key, 999), (2, 3, 16, 16), jnp.float32)  # NCHW
    fwd = jax.jit(functools.partial(network_forward, cfg=cfg))
    logits = fwd(x, params, a_norm, a_red)
    jax.block_until_ready(logits)
    assert logits.shape == (2, num_classes)
    print("KERNEL_OK")
</pallas_src>

<mosaic_0001>
module attributes {stable_mosaic.version = 11 : i64} {
  func.func @_affine_kernel(%arg0: i32, %arg1: memref<256x12xf32, #tpu.memory_space<vmem>>, %arg2: memref<1x12xf32, #tpu.memory_space<vmem>>, %arg3: memref<1x12xf32, #tpu.memory_space<vmem>>, %arg4: memref<256x12xf32, #tpu.memory_space<vmem>>) attributes {dimension_semantics = [#tpu.dimension_semantics<parallel>], iteration_bounds = array<i64: 2>, scalar_prefetch = 0 : i64, scratch_operands = 0 : i64, tpu.core_type = #tpu.core_type<tc>, window_params = [{transform_indices = @transform_0, window_bounds = array<i64: 256, 12>}, {pipeline_mode = #tpu.pipeline_mode<synchronous>, transform_indices = @transform_1, window_bounds = array<i64: 1, 12>}, {pipeline_mode = #tpu.pipeline_mode<synchronous>, transform_indices = @transform_2, window_bounds = array<i64: 1, 12>}, {transform_indices = @transform_3, window_bounds = array<i64: 256, 12>}]} {
    %c0 = arith.constant 0 : index
    %c0_0 = arith.constant 0 : index
    %0 = vector.load %arg1[%c0, %c0_0] : memref<256x12xf32, #tpu.memory_space<vmem>>, vector<256x12xf32>
    %c0_1 = arith.constant 0 : index
    %c0_2 = arith.constant 0 : index
    %1 = vector.load %arg2[%c0_1, %c0_2] : memref<1x12xf32, #tpu.memory_space<vmem>>, vector<1x12xf32>
    %2 = vector.broadcast %1 : vector<1x12xf32> to vector<256x12xf32>
    %3 = arith.mulf %0, %2 : vector<256x12xf32>
    %c0_3 = arith.constant 0 : index
    %c0_4 = arith.constant 0 : index
    %4 = vector.load %arg3[%c0_3, %c0_4] : memref<1x12xf32, #tpu.memory_space<vmem>>, vector<1x12xf32>
    %5 = vector.broadcast %4 : vector<1x12xf32> to vector<256x12xf32>
    %6 = arith.addf %3, %5 : vector<256x12xf32>
    %c0_5 = arith.constant 0 : index
    %c0_6 = arith.constant 0 : index
    %7 = vector.load %arg4[%c0_5, %c0_6] : memref<256x12xf32, #tpu.memory_space<vmem>>, vector<256x12xf32>
    tpu.vector_store %arg4[%c0_5, %c0_6], %6 {strides = array<i32>} : memref<256x12xf32, #tpu.memory_space<vmem>>, vector<256x12xf32>,
    return
  }
  func.func @transform_0(%arg0: i32) -> (i32, i32) {
    %c0_i32 = arith.constant 0 : i32
    %c0_i32_0 = arith.constant 0 : i32
    return %arg0, %c0_i32 : i32, i32
  }
  func.func @transform_1(%arg0: i32) -> (i32, i32) {
    %c0_i32 = arith.constant 0 : i32
    %c0_i32_0 = arith.constant 0 : i32
    %c0_i32_1 = arith.constant 0 : i32
    return %c0_i32, %c0_i32_0 : i32, i32
  }
  func.func @transform_2(%arg0: i32) -> (i32, i32) {
    %c0_i32 = arith.constant 0 : i32
    %c0_i32_0 = arith.constant 0 : i32
    %c0_i32_1 = arith.constant 0 : i32
    return %c0_i32, %c0_i32_0 : i32, i32
  }
  func.func @transform_3(%arg0: i32) -> (i32, i32) {
    %c0_i32 = arith.constant 0 : i32
    %c0_i32_0 = arith.constant 0 : i32
    return %arg0, %c0_i32 : i32, i32
  }
}

module attributes {stable_mosaic.version = 11 : i64} {
  func.func @_mm_kernel(%arg0: i32, %arg1: memref<256x27xbf16, #tpu.memory_space<vmem>>, %arg2: memref<27x12xf32, #tpu.memory_space<vmem>>, %arg3: memref<256x12xf32, #tpu.memory_space<vmem>>, %arg4: memref<1x2x12xf32, #tpu.memory_space<vmem>>) attributes {dimension_semantics = [#tpu.dimension_semantics<parallel>], iteration_bounds = array<i64: 2>, scalar_prefetch = 0 : i64, scratch_operands = 0 : i64, tpu.core_type = #tpu.core_type<tc>, window_params = [{transform_indices = @transform_0, window_bounds = array<i64: 256, 27>}, {pipeline_mode = #tpu.pipeline_mode<synchronous>, transform_indices = @transform_1, window_bounds = array<i64: 27, 12>}, {transform_indices = @transform_2, window_bounds = array<i64: 256, 12>}, {transform_indices = @transform_3, window_bounds = array<i64: 1, 2, 12>}]} {
    %c0 = arith.constant 0 : index
    %c0_0 = arith.constant 0 : index
    %0 = vector.load %arg1[%c0, %c0_0] : memref<256x27xbf16, #tpu.memory_space<vmem>>, vector<256x27xbf16>
    %c0_1 = arith.constant 0 : index
    %c0_2 = arith.constant 0 : index
    %1 = vector.load %arg2[%c0_1, %c0_2] : memref<27x12xf32, #tpu.memory_space<vmem>>, vector<27x12xf32>
    %2 = arith.truncf %1 : vector<27x12xf32> to vector<27x12xbf16>
    %cst = arith.constant dense<0.000000e+00> : vector<256x12xf32>
    %3 = tpu.matmul %0, %2, %cst {dimension_numbers = #tpu.dot_dimension_numbers<[1], [0], [0], [1], [0, 0, 1, 1], [], []>} : vector<256x27xbf16>, vector<27x12xbf16>, vector<256x12xf32> -> vector<256x12xf32>
    %c0_3 = arith.constant 0 : index
    %c0_4 = arith.constant 0 : index
    %4 = vector.load %arg3[%c0_3, %c0_4] : memref<256x12xf32, #tpu.memory_space<vmem>>, vector<256x12xf32>
    tpu.vector_store %arg3[%c0_3, %c0_4], %3 {strides = array<i32>} : memref<256x12xf32, #tpu.memory_space<vmem>>, vector<256x12xf32>,
    %cst_5 = arith.constant dense<0.000000e+00> : vector<12xf32>
    %5 = vector.multi_reduction <add>, %3, %cst_5 [0] : vector<256x12xf32> to vector<12xf32>
    %6 = vector.shape_cast %5 : vector<12xf32> to vector<1x12xf32>
    %7 = arith.mulf %3, %3 : vector<256x12xf32>
    %cst_6 = arith.constant dense<0.000000e+00> : vector<12xf32>
    %8 = vector.multi_reduction <add>, %7, %cst_6 [0] : vector<256x12xf32> to vector<12xf32>
    %9 = vector.shape_cast %8 : vector<12xf32> to vector<1x12xf32>
    %10 = tpu.concatenate %6, %9 in 0 : vector<1x12xf32>, vector<1x12xf32> -> vector<2x12xf32>
    %11 = vector.shape_cast %10 : vector<2x12xf32> to vector<1x2x12xf32>
    %c0_7 = arith.constant 0 : index
    %c0_8 = arith.constant 0 : index
    %c0_9 = arith.constant 0 : index
    %12 = vector.load %arg4[%c0_7, %c0_8, %c0_9] : memref<1x2x12xf32, #tpu.memory_space<vmem>>, vector<1x2x12xf32>
    tpu.vector_store %arg4[%c0_7, %c0_8, %c0_9], %11 {strides = array<i32>} : memref<1x2x12xf32, #tpu.memory_space<vmem>>, vector<1x2x12xf32>,
    return
  }
  func.func @transform_0(%arg0: i32) -> (i32, i32) {
    %c0_i32 = arith.constant 0 : i32
    %c0_i32_0 = arith.constant 0 : i32
    return %arg0, %c0_i32 : i32, i32
  }
  func.func @transform_1(%arg0: i32) -> (i32, i32) {
    %c0_i32 = arith.constant 0 : i32
    %c0_i32_0 = arith.constant 0 : i32
    %c0_i32_1 = arith.constant 0 : i32
    return %c0_i32, %c0_i32_0 : i32, i32
  }
  func.func @transform_2(%arg0: i32) -> (i32, i32) {
    %c0_i32 = arith.constant 0 : i32
    %c0_i32_0 = arith.constant 0 : i32
    return %arg0, %c0_i32 : i32, i32
  }
  func.func @transform_3(%arg0: i32) -> (i32, i32, i32) {
    %c0_i32 = arith.constant 0 : i32
    %c0_i32_0 = arith.constant 0 : i32
    %c0_i32_1 = arith.constant 0 : i32
    return %arg0, %c0_i32, %c0_i32_0 : i32, i32, i32
  }
}

module attributes {stable_mosaic.version = 11 : i64} {
  func.func @_mm_kernel(%arg0: i32, %arg1: memref<256x12xf32, #tpu.memory_space<vmem>>, %arg2: memref<12x8xf32, #tpu.memory_space<vmem>>, %arg3: memref<256x8xf32, #tpu.memory_space<vmem>>, %arg4: memref<1x2x8xf32, #tpu.memory_space<vmem>>) attributes {dimension_semantics = [#tpu.dimension_semantics<parallel>], iteration_bounds = array<i64: 2>, scalar_prefetch = 0 : i64, scratch_operands = 0 : i64, tpu.core_type = #tpu.core_type<tc>, window_params = [{transform_indices = @transform_0, window_bounds = array<i64: 256, 12>}, {pipeline_mode = #tpu.pipeline_mode<synchronous>, transform_indices = @transform_1, window_bounds = array<i64: 12, 8>}, {transform_indices = @transform_2, window_bounds = array<i64: 256, 8>}, {transform_indices = @transform_3, window_bounds = array<i64: 1, 2, 8>}]} {
    %c0 = arith.constant 0 : index
    %c0_0 = arith.constant 0 : index
    %0 = vector.load %arg1[%c0, %c0_0] : memref<256x12xf32, #tpu.memory_space<vmem>>, vector<256x12xf32>
    %cst = arith.constant 0.000000e+00 : f32
    %1 = vector.broadcast %cst : f32 to vector<256x12xf32>
    %2 = arith.maximumf %0, %1 : vector<256x12xf32>
    %3 = arith.truncf %2 : vector<256x12xf32> to vector<256x12xbf16>
    %c0_1 = arith.constant 0 : index
    %c0_2 = arith.constant 0 : index
    %4 = vector.load %arg2[%c0_1, %c0_2] : memref<12x8xf32, #tpu.memory_space<vmem>>, vector<12x8xf32>
    %5 = arith.truncf %4 : vector<12x8xf32> to vector<12x8xbf16>
    %cst_3 = arith.constant dense<0.000000e+00> : vector<256x8xf32>
    %6 = tpu.matmul %3, %5, %cst_3 {dimension_numbers = #tpu.dot_dimension_numbers<[1], [0], [0], [1], [0, 0, 1, 1], [], []>} : vector<256x12xbf16>, vector<12x8xbf16>, vector<256x8xf32> -> vector<256x8xf32>
    %c0_4 = arith.constant 0 : index
    %c0_5 = arith.constant 0 : index
    %7 = vector.load %arg3[%c0_4, %c0_5] : memref<256x8xf32, #tpu.memory_space<vmem>>, vector<256x8xf32>
    tpu.vector_store %arg3[%c0_4, %c0_5], %6 {strides = array<i32>} : memref<256x8xf32, #tpu.memory_space<vmem>>, vector<256x8xf32>,
    %cst_6 = arith.constant dense<0.000000e+00> : vector<8xf32>
    %8 = vector.multi_reduction <add>, %6, %cst_6 [0] : vector<256x8xf32> to vector<8xf32>
    %9 = vector.shape_cast %8 : vector<8xf32> to vector<1x8xf32>
    %10 = arith.mulf %6, %6 : vector<256x8xf32>
    %cst_7 = arith.constant dense<0.000000e+00> : vector<8xf32>
    %11 = vector.multi_reduction <add>, %10, %cst_7 [0] : vector<256x8xf32> to vector<8xf32>
    %12 = vector.shape_cast %11 : vector<8xf32> to vector<1x8xf32>
    %13 = tpu.concatenate %9, %12 in 0 : vector<1x8xf32>, vector<1x8xf32> -> vector<2x8xf32>
    %14 = vector.shape_cast %13 : vector<2x8xf32> to vector<1x2x8xf32>
    %c0_8 = arith.constant 0 : index
    %c0_9 = arith.constant 0 : index
    %c0_10 = arith.constant 0 : index
    %15 = vector.load %arg4[%c0_8, %c0_9, %c0_10] : memref<1x2x8xf32, #tpu.memory_space<vmem>>, vector<1x2x8xf32>
    tpu.vector_store %arg4[%c0_8, %c0_9, %c0_10], %14 {strides = array<i32>} : memref<1x2x8xf32, #tpu.memory_space<vmem>>, vector<1x2x8xf32>,
    return
  }
  func.func @transform_0(%arg0: i32) -> (i32, i32) {
    %c0_i32 = arith.constant 0 : i32
    %c0_i32_0 = arith.constant 0 : i32
    return %arg0, %c0_i32 : i32, i32
  }
  func.func @transform_1(%arg0: i32) -> (i32, i32) {
    %c0_i32 = arith.constant 0 : i32
    %c0_i32_0 = arith.constant 0 : i32
    %c0_i32_1 = arith.constant 0 : i32
    return %c0_i32, %c0_i32_0 : i32, i32
  }
  func.func @transform_2(%arg0: i32) -> (i32, i32) {
    %c0_i32 = arith.constant 0 : i32
    %c0_i32_0 = arith.constant 0 : i32
    return %arg0, %c0_i32 : i32, i32
  }
  func.func @transform_3(%arg0: i32) -> (i32, i32, i32) {
    %c0_i32 = arith.constant 0 : i32
    %c0_i32_0 = arith.constant 0 : i32
    %c0_i32_1 = arith.constant 0 : i32
    return %arg0, %c0_i32, %c0_i32_0 : i32, i32, i32
  }
}

module attributes {stable_mosaic.version = 11 : i64} {
  func.func @_affine_kernel(%arg0: i32, %arg1: memref<16x128xf32, #tpu.memory_space<vmem>>, %arg2: memref<1x128xf32, #tpu.memory_space<vmem>>, %arg3: memref<1x128xf32, #tpu.memory_space<vmem>>, %arg4: memref<16x128xf32, #tpu.memory_space<vmem>>) attributes {dimension_semantics = [#tpu.dimension_semantics<parallel>], iteration_bounds = array<i64: 2>, scalar_prefetch = 0 : i64, scratch_operands = 0 : i64, tpu.core_type = #tpu.core_type<tc>, window_params = [{transform_indices = @transform_0, window_bounds = array<i64: 16, 128>}, {pipeline_mode = #tpu.pipeline_mode<synchronous>, transform_indices = @transform_1, window_bounds = array<i64: 1, 128>}, {pipeline_mode = #tpu.pipeline_mode<synchronous>, transform_indices = @transform_2, window_bounds = array<i64: 1, 128>}, {transform_indices = @transform_3, window_bounds = array<i64: 16, 128>}]} {
    %c0 = arith.constant 0 : index
    %c0_0 = arith.constant 0 : index
    %0 = vector.load %arg1[%c0, %c0_0] : memref<16x128xf32, #tpu.memory_space<vmem>>, vector<16x128xf32>
    %c0_1 = arith.constant 0 : index
    %c0_2 = arith.constant 0 : index
    %1 = vector.load %arg2[%c0_1, %c0_2] : memref<1x128xf32, #tpu.memory_space<vmem>>, vector<1x128xf32>
    %2 = vector.broadcast %1 : vector<1x128xf32> to vector<16x128xf32>
    %3 = arith.mulf %0, %2 : vector<16x128xf32>
    %c0_3 = arith.constant 0 : index
    %c0_4 = arith.constant 0 : index
    %4 = vector.load %arg3[%c0_3, %c0_4] : memref<1x128xf32, #tpu.memory_space<vmem>>, vector<1x128xf32>
    %5 = vector.broadcast %4 : vector<1x128xf32> to vector<16x128xf32>
    %6 = arith.addf %3, %5 : vector<16x128xf32>
    %c0_5 = arith.constant 0 : index
    %c0_6 = arith.constant 0 : index
    %7 = vector.load %arg4[%c0_5, %c0_6] : memref<16x128xf32, #tpu.memory_space<vmem>>, vector<16x128xf32>
    tpu.vector_store %arg4[%c0_5, %c0_6], %6 {strides = array<i32>} : memref<16x128xf32, #tpu.memory_space<vmem>>, vector<16x128xf32>,
    return
  }
  func.func @transform_0(%arg0: i32) -> (i32, i32) {
    %c0_i32 = arith.constant 0 : i32
    %c0_i32_0 = arith.constant 0 : i32
    return %arg0, %c0_i32 : i32, i32
  }
  func.func @transform_1(%arg0: i32) -> (i32, i32) {
    %c0_i32 = arith.constant 0 : i32
    %c0_i32_0 = arith.constant 0 : i32
    %c0_i32_1 = arith.constant 0 : i32
    return %c0_i32, %c0_i32_0 : i32, i32
  }
  func.func @transform_2(%arg0: i32) -> (i32, i32) {
    %c0_i32 = arith.constant 0 : i32
    %c0_i32_0 = arith.constant 0 : i32
    %c0_i32_1 = arith.constant 0 : i32
    return %c0_i32, %c0_i32_0 : i32, i32
  }
  func.func @transform_3(%arg0: i32) -> (i32, i32) {
    %c0_i32 = arith.constant 0 : i32
    %c0_i32_0 = arith.constant 0 : i32
    return %arg0, %c0_i32 : i32, i32
  }
}

module attributes {stable_mosaic.version = 11 : i64} {
  func.func @_mm_kernel(%arg0: i32, %arg1: memref<64x200xbf16, #tpu.memory_space<vmem>>, %arg2: memref<200x8xf32, #tpu.memory_space<vmem>>, %arg3: memref<64x8xf32, #tpu.memory_space<vmem>>, %arg4: memref<1x2x8xf32, #tpu.memory_space<vmem>>) attributes {dimension_semantics = [#tpu.dimension_semantics<parallel>], iteration_bounds = array<i64: 2>, scalar_prefetch = 0 : i64, scratch_operands = 0 : i64, tpu.core_type = #tpu.core_type<tc>, window_params = [{transform_indices = @transform_0, window_bounds = array<i64: 64, 200>}, {pipeline_mode = #tpu.pipeline_mode<synchronous>, transform_indices = @transform_1, window_bounds = array<i64: 200, 8>}, {transform_indices = @transform_2, window_bounds = array<i64: 64, 8>}, {transform_indices = @transform_3, window_bounds = array<i64: 1, 2, 8>}]} {
    %c0 = arith.constant 0 : index
    %c0_0 = arith.constant 0 : index
    %0 = vector.load %arg1[%c0, %c0_0] : memref<64x200xbf16, #tpu.memory_space<vmem>>, vector<64x200xbf16>
    %c0_1 = arith.constant 0 : index
    %c0_2 = arith.constant 0 : index
    %1 = vector.load %arg2[%c0_1, %c0_2] : memref<200x8xf32, #tpu.memory_space<vmem>>, vector<200x8xf32>
    %2 = arith.truncf %1 : vector<200x8xf32> to vector<200x8xbf16>
    %cst = arith.constant dense<0.000000e+00> : vector<64x8xf32>
    %3 = tpu.matmul %0, %2, %cst {dimension_numbers = #tpu.dot_dimension_numbers<[1], [0], [0], [1], [0, 0, 1, 1], [], []>} : vector<64x200xbf16>, vector<200x8xbf16>, vector<64x8xf32> -> vector<64x8xf32>
    %c0_3 = arith.constant 0 : index
    %c0_4 = arith.constant 0 : index
    %4 = vector.load %arg3[%c0_3, %c0_4] : memref<64x8xf32, #tpu.memory_space<vmem>>, vector<64x8xf32>
    tpu.vector_store %arg3[%c0_3, %c0_4], %3 {strides = array<i32>} : memref<64x8xf32, #tpu.memory_space<vmem>>, vector<64x8xf32>,
    %cst_5 = arith.constant dense<0.000000e+00> : vector<8xf32>
    %5 = vector.multi_reduction <add>, %3, %cst_5 [0] : vector<64x8xf32> to vector<8xf32>
    %6 = vector.shape_cast %5 : vector<8xf32> to vector<1x8xf32>
    %7 = arith.mulf %3, %3 : vector<64x8xf32>
    %cst_6 = arith.constant dense<0.000000e+00> : vector<8xf32>
    %8 = vector.multi_reduction <add>, %7, %cst_6 [0] : vector<64x8xf32> to vector<8xf32>
    %9 = vector.shape_cast %8 : vector<8xf32> to vector<1x8xf32>
    %10 = tpu.concatenate %6, %9 in 0 : vector<1x8xf32>, vector<1x8xf32> -> vector<2x8xf32>
    %11 = vector.shape_cast %10 : vector<2x8xf32> to vector<1x2x8xf32>
    %c0_7 = arith.constant 0 : index
    %c0_8 = arith.constant 0 : index
    %c0_9 = arith.constant 0 : index
    %12 = vector.load %arg4[%c0_7, %c0_8, %c0_9] : memref<1x2x8xf32, #tpu.memory_space<vmem>>, vector<1x2x8xf32>
    tpu.vector_store %arg4[%c0_7, %c0_8, %c0_9], %11 {strides = array<i32>} : memref<1x2x8xf32, #tpu.memory_space<vmem>>, vector<1x2x8xf32>,
    return
  }
  func.func @transform_0(%arg0: i32) -> (i32, i32) {
    %c0_i32 = arith.constant 0 : i32
    %c0_i32_0 = arith.constant 0 : i32
    return %arg0, %c0_i32 : i32, i32
  }
  func.func @transform_1(%arg0: i32) -> (i32, i32) {
    %c0_i32 = arith.constant 0 : i32
    %c0_i32_0 = arith.constant 0 : i32
    %c0_i32_1 = arith.constant 0 : i32
    return %c0_i32, %c0_i32_0 : i32, i32
  }
  func.func @transform_2(%arg0: i32) -> (i32, i32) {
    %c0_i32 = arith.constant 0 : i32
    %c0_i32_0 = arith.constant 0 : i32
    return %arg0, %c0_i32 : i32, i32
  }
  func.func @transform_3(%arg0: i32) -> (i32, i32, i32) {
    %c0_i32 = arith.constant 0 : i32
    %c0_i32_0 = arith.constant 0 : i32
    %c0_i32_1 = arith.constant 0 : i32
    return %arg0, %c0_i32, %c0_i32_0 : i32, i32, i32
  }
}

module attributes {stable_mosaic.version = 11 : i64} {
  func.func @_affine_kernel(%arg0: i32, %arg1: memref<8x128xf32, #tpu.memory_space<vmem>>, %arg2: memref<1x128xf32, #tpu.memory_space<vmem>>, %arg3: memref<1x128xf32, #tpu.memory_space<vmem>>, %arg4: memref<8x128xf32, #tpu.memory_space<vmem>>) attributes {dimension_semantics = [#tpu.dimension_semantics<parallel>], iteration_bounds = array<i64: 1>, scalar_prefetch = 0 : i64, scratch_operands = 0 : i64, tpu.core_type = #tpu.core_type<tc>, window_params = [{transform_indices = @transform_0, window_bounds = array<i64: 8, 128>}, {pipeline_mode = #tpu.pipeline_mode<synchronous>, transform_indices = @transform_1, window_bounds = array<i64: 1, 128>}, {pipeline_mode = #tpu.pipeline_mode<synchronous>, transform_indices = @transform_2, window_bounds = array<i64: 1, 128>}, {transform_indices = @transform_3, window_bounds = array<i64: 8, 128>}]} {
    %c0 = arith.constant 0 : index
    %c0_0 = arith.constant 0 : index
    %0 = vector.load %arg1[%c0, %c0_0] : memref<8x128xf32, #tpu.memory_space<vmem>>, vector<8x128xf32>
    %c0_1 = arith.constant 0 : index
    %c0_2 = arith.constant 0 : index
    %1 = vector.load %arg2[%c0_1, %c0_2] : memref<1x128xf32, #tpu.memory_space<vmem>>, vector<1x128xf32>
    %2 = vector.broadcast %1 : vector<1x128xf32> to vector<8x128xf32>
    %3 = arith.mulf %0, %2 : vector<8x128xf32>
    %c0_3 = arith.constant 0 : index
    %c0_4 = arith.constant 0 : index
    %4 = vector.load %arg3[%c0_3, %c0_4] : memref<1x128xf32, #tpu.memory_space<vmem>>, vector<1x128xf32>
    %5 = vector.broadcast %4 : vector<1x128xf32> to vector<8x128xf32>
    %6 = arith.addf %3, %5 : vector<8x128xf32>
    %c0_5 = arith.constant 0 : index
    %c0_6 = arith.constant 0 : index
    %7 = vector.load %arg4[%c0_5, %c0_6] : memref<8x128xf32, #tpu.memory_space<vmem>>, vector<8x128xf32>
    tpu.vector_store %arg4[%c0_5, %c0_6], %6 {strides = array<i32>} : memref<8x128xf32, #tpu.memory_space<vmem>>, vector<8x128xf32>,
    return
  }
  func.func @transform_0(%arg0: i32) -> (i32, i32) {
    %c0_i32 = arith.constant 0 : i32
    %c0_i32_0 = arith.constant 0 : i32
    return %arg0, %c0_i32 : i32, i32
  }
  func.func @transform_1(%arg0: i32) -> (i32, i32) {
    %c0_i32 = arith.constant 0 : i32
    %c0_i32_0 = arith.constant 0 : i32
    %c0_i32_1 = arith.constant 0 : i32
    return %c0_i32, %c0_i32_0 : i32, i32
  }
  func.func @transform_2(%arg0: i32) -> (i32, i32) {
    %c0_i32 = arith.constant 0 : i32
    %c0_i32_0 = arith.constant 0 : i32
    %c0_i32_1 = arith.constant 0 : i32
    return %c0_i32, %c0_i32_0 : i32, i32
  }
  func.func @transform_3(%arg0: i32) -> (i32, i32) {
    %c0_i32 = arith.constant 0 : i32
    %c0_i32_0 = arith.constant 0 : i32
    return %arg0, %c0_i32 : i32, i32
  }
}

module attributes {stable_mosaic.version = 11 : i64} {
  func.func @_tap_avg_kernel(%arg0: i32, %arg1: memref<9x8x128xf32, #tpu.memory_space<vmem>>, %arg2: memref<8x128xf32, #tpu.memory_space<vmem>>, %arg3: memref<8x128xf32, #tpu.memory_space<vmem>>, %arg4: memref<1x2x128xf32, #tpu.memory_space<vmem>>) attributes {dimension_semantics = [#tpu.dimension_semantics<parallel>], iteration_bounds = array<i64: 1>, scalar_prefetch = 0 : i64, scratch_operands = 0 : i64, tpu.core_type = #tpu.core_type<tc>, window_params = [{transform_indices = @transform_0, window_bounds = array<i64: 9, 8, 128>}, {transform_indices = @transform_1, window_bounds = array<i64: 8, 128>}, {transform_indices = @transform_2, window_bounds = array<i64: 8, 128>}, {transform_indices = @transform_3, window_bounds = array<i64: 1, 2, 128>}]} {
    %c0 = arith.constant 0 : index
    %c0_0 = arith.constant 0 : index
    %c0_1 = arith.constant 0 : index
    %0 = vector.load %arg1[%c0, %c0_0, %c0_1] : memref<9x8x128xf32, #tpu.memory_space<vmem>>, vector<9x8x128xf32>
    %cst = arith.constant dense<0.000000e+00> : vector<8x128xf32>
    %1 = vector.multi_reduction <add>, %0, %cst [0] : vector<9x8x128xf32> to vector<8x128xf32>
    %c0_2 = arith.constant 0 : index
    %c0_3 = arith.constant 0 : index
    %2 = vector.load %arg2[%c0_2, %c0_3] : memref<8x128xf32, #tpu.memory_space<vmem>>, vector<8x128xf32>
    %3 = arith.mulf %1, %2 : vector<8x128xf32>
    %c0_4 = arith.constant 0 : index
    %c0_5 = arith.constant 0 : index
    %4 = vector.load %arg3[%c0_4, %c0_5] : memref<8x128xf32, #tpu.memory_space<vmem>>, vector<8x128xf32>
    tpu.vector_store %arg3[%c0_4, %c0_5], %3 {strides = array<i32>} : memref<8x128xf32, #tpu.memory_space<vmem>>, vector<8x128xf32>,
    %cst_6 = arith.constant dense<0.000000e+00> : vector<128xf32>
    %5 = vector.multi_reduction <add>, %3, %cst_6 [0] : vector<8x128xf32> to vector<128xf32>
    %6 = vector.shape_cast %5 : vector<128xf32> to vector<1x128xf32>
    %7 = arith.mulf %3, %3 : vector<8x128xf32>
    %cst_7 = arith.constant dense<0.000000e+00> : vector<128xf32>
    %8 = vector.multi_reduction <add>, %7, %cst_7 [0] : vector<8x128xf32> to vector<128xf32>
    %9 = vector.shape_cast %8 : vector<128xf32> to vector<1x128xf32>
    %10 = tpu.concatenate %6, %9 in 0 : vector<1x128xf32>, vector<1x128xf32> -> vector<2x128xf32>
    %11 = vector.shape_cast %10 : vector<2x128xf32> to vector<1x2x128xf32>
    %c0_8 = arith.constant 0 : index
    %c0_9 = arith.constant 0 : index
    %c0_10 = arith.constant 0 : index
    %12 = vector.load %arg4[%c0_8, %c0_9, %c0_10] : memref<1x2x128xf32, #tpu.memory_space<vmem>>, vector<1x2x128xf32>
    tpu.vector_store %arg4[%c0_8, %c0_9, %c0_10], %11 {strides = array<i32>} : memref<1x2x128xf32, #tpu.memory_space<vmem>>, vector<1x2x128xf32>,
    return
  }
  func.func @transform_0(%arg0: i32) -> (i32, i32, i32) {
    %c0_i32 = arith.constant 0 : i32
    %c0_i32_0 = arith.constant 0 : i32
    %c0_i32_1 = arith.constant 0 : i32
    return %c0_i32, %arg0, %c0_i32_0 : i32, i32, i32
  }
  func.func @transform_1(%arg0: i32) -> (i32, i32) {
    %c0_i32 = arith.constant 0 : i32
    %c0_i32_0 = arith.constant 0 : i32
    return %arg0, %c0_i32 : i32, i32
  }
  func.func @transform_2(%arg0: i32) -> (i32, i32) {
    %c0_i32 = arith.constant 0 : i32
    %c0_i32_0 = arith.constant 0 : i32
    return %arg0, %c0_i32 : i32, i32
  }
  func.func @transform_3(%arg0: i32) -> (i32, i32, i32) {
    %c0_i32 = arith.constant 0 : i32
    %c0_i32_0 = arith.constant 0 : i32
    %c0_i32_1 = arith.constant 0 : i32
    return %arg0, %c0_i32, %c0_i32_0 : i32, i32, i32
  }
}

module attributes {stable_mosaic.version = 11 : i64} {
  func.func @_tap_max_kernel(%arg0: i32, %arg1: memref<9x8x128xf32, #tpu.memory_space<vmem>>, %arg2: memref<8x128xf32, #tpu.memory_space<vmem>>, %arg3: memref<1x2x128xf32, #tpu.memory_space<vmem>>) attributes {dimension_semantics = [#tpu.dimension_semantics<parallel>], iteration_bounds = array<i64: 1>, scalar_prefetch = 0 : i64, scratch_operands = 0 : i64, tpu.core_type = #tpu.core_type<tc>, window_params = [{transform_indices = @transform_0, window_bounds = array<i64: 9, 8, 128>}, {transform_indices = @transform_1, window_bounds = array<i64: 8, 128>}, {transform_indices = @transform_2, window_bounds = array<i64: 1, 2, 128>}]} {
    %c0 = arith.constant 0 : index
    %c0_0 = arith.constant 0 : index
    %c0_1 = arith.constant 0 : index
    %0 = vector.load %arg1[%c0, %c0_0, %c0_1] : memref<9x8x128xf32, #tpu.memory_space<vmem>>, vector<9x8x128xf32>
    %cst = arith.constant dense<0xFF800000> : vector<8x128xf32>
    %1 = vector.multi_reduction <maximumf>, %0, %cst [0] : vector<9x8x128xf32> to vector<8x128xf32>
    %c0_2 = arith.constant 0 : index
    %c0_3 = arith.constant 0 : index
    %2 = vector.load %arg2[%c0_2, %c0_3] : memref<8x128xf32, #tpu.memory_space<vmem>>, vector<8x128xf32>
    tpu.vector_store %arg2[%c0_2, %c0_3], %1 {strides = array<i32>} : memref<8x128xf32, #tpu.memory_space<vmem>>, vector<8x128xf32>,
    %cst_4 = arith.constant dense<0.000000e+00> : vector<128xf32>
    %3 = vector.multi_reduction <add>, %1, %cst_4 [0] : vector<8x128xf32> to vector<128xf32>
    %4 = vector.shape_cast %3 : vector<128xf32> to vector<1x128xf32>
    %5 = arith.mulf %1, %1 : vector<8x128xf32>
    %cst_5 = arith.constant dense<0.000000e+00> : vector<128xf32>
    %6 = vector.multi_reduction <add>, %5, %cst_5 [0] : vector<8x128xf32> to vector<128xf32>
    %7 = vector.shape_cast %6 : vector<128xf32> to vector<1x128xf32>
    %8 = tpu.concatenate %4, %7 in 0 : vector<1x128xf32>, vector<1x128xf32> -> vector<2x128xf32>
    %9 = vector.shape_cast %8 : vector<2x128xf32> to vector<1x2x128xf32>
    %c0_6 = arith.constant 0 : index
    %c0_7 = arith.constant 0 : index
    %c0_8 = arith.constant 0 : index
    %10 = vector.load %arg3[%c0_6, %c0_7, %c0_8] : memref<1x2x128xf32, #tpu.memory_space<vmem>>, vector<1x2x128xf32>
    tpu.vector_store %arg3[%c0_6, %c0_7, %c0_8], %9 {strides = array<i32>} : memref<1x2x128xf32, #tpu.memory_space<vmem>>, vector<1x2x128xf32>,
    return
  }
  func.func @transform_0(%arg0: i32) -> (i32, i32, i32) {
    %c0_i32 = arith.constant 0 : i32
    %c0_i32_0 = arith.constant 0 : i32
    %c0_i32_1 = arith.constant 0 : i32
    return %c0_i32, %arg0, %c0_i32_0 : i32, i32, i32
  }
  func.func @transform_1(%arg0: i32) -> (i32, i32) {
    %c0_i32 = arith.constant 0 : i32
    %c0_i32_0 = arith.constant 0 : i32
    return %arg0, %c0_i32 : i32, i32
  }
  func.func @transform_2(%arg0: i32) -> (i32, i32, i32) {
    %c0_i32 = arith.constant 0 : i32
    %c0_i32_0 = arith.constant 0 : i32
    %c0_i32_1 = arith.constant 0 : i32
    return %arg0, %c0_i32, %c0_i32_0 : i32, i32, i32
  }
}

module attributes {stable_mosaic.version = 11 : i64} {
  func.func @_mm_kernel(%arg0: i32, %arg1: memref<64x72xbf16, #tpu.memory_space<vmem>>, %arg2: memref<72x8xf32, #tpu.memory_space<vmem>>, %arg3: memref<64x8xf32, #tpu.memory_space<vmem>>, %arg4: memref<1x2x8xf32, #tpu.memory_space<vmem>>) attributes {dimension_semantics = [#tpu.dimension_semantics<parallel>], iteration_bounds = array<i64: 2>, scalar_prefetch = 0 : i64, scratch_operands = 0 : i64, tpu.core_type = #tpu.core_type<tc>, window_params = [{transform_indices = @transform_0, window_bounds = array<i64: 64, 72>}, {pipeline_mode = #tpu.pipeline_mode<synchronous>, transform_indices = @transform_1, window_bounds = array<i64: 72, 8>}, {transform_indices = @transform_2, window_bounds = array<i64: 64, 8>}, {transform_indices = @transform_3, window_bounds = array<i64: 1, 2, 8>}]} {
    %c0 = arith.constant 0 : index
    %c0_0 = arith.constant 0 : index
    %0 = vector.load %arg1[%c0, %c0_0] : memref<64x72xbf16, #tpu.memory_space<vmem>>, vector<64x72xbf16>
    %c0_1 = arith.constant 0 : index
    %c0_2 = arith.constant 0 : index
    %1 = vector.load %arg2[%c0_1, %c0_2] : memref<72x8xf32, #tpu.memory_space<vmem>>, vector<72x8xf32>
    %2 = arith.truncf %1 : vector<72x8xf32> to vector<72x8xbf16>
    %cst = arith.constant dense<0.000000e+00> : vector<64x8xf32>
    %3 = tpu.matmul %0, %2, %cst {dimension_numbers = #tpu.dot_dimension_numbers<[1], [0], [0], [1], [0, 0, 1, 1], [], []>} : vector<64x72xbf16>, vector<72x8xbf16>, vector<64x8xf32> -> vector<64x8xf32>
    %c0_3 = arith.constant 0 : index
    %c0_4 = arith.constant 0 : index
    %4 = vector.load %arg3[%c0_3, %c0_4] : memref<64x8xf32, #tpu.memory_space<vmem>>, vector<64x8xf32>
    tpu.vector_store %arg3[%c0_3, %c0_4], %3 {strides = array<i32>} : memref<64x8xf32, #tpu.memory_space<vmem>>, vector<64x8xf32>,
    %cst_5 = arith.constant dense<0.000000e+00> : vector<8xf32>
    %5 = vector.multi_reduction <add>, %3, %cst_5 [0] : vector<64x8xf32> to vector<8xf32>
    %6 = vector.shape_cast %5 : vector<8xf32> to vector<1x8xf32>
    %7 = arith.mulf %3, %3 : vector<64x8xf32>
    %cst_6 = arith.constant dense<0.000000e+00> : vector<8xf32>
    %8 = vector.multi_reduction <add>, %7, %cst_6 [0] : vector<64x8xf32> to vector<8xf32>
    %9 = vector.shape_cast %8 : vector<8xf32> to vector<1x8xf32>
    %10 = tpu.concatenate %6, %9 in 0 : vector<1x8xf32>, vector<1x8xf32> -> vector<2x8xf32>
    %11 = vector.shape_cast %10 : vector<2x8xf32> to vector<1x2x8xf32>
    %c0_7 = arith.constant 0 : index
    %c0_8 = arith.constant 0 : index
    %c0_9 = arith.constant 0 : index
    %12 = vector.load %arg4[%c0_7, %c0_8, %c0_9] : memref<1x2x8xf32, #tpu.memory_space<vmem>>, vector<1x2x8xf32>
    tpu.vector_store %arg4[%c0_7, %c0_8, %c0_9], %11 {strides = array<i32>} : memref<1x2x8xf32, #tpu.memory_space<vmem>>, vector<1x2x8xf32>,
    return
  }
  func.func @transform_0(%arg0: i32) -> (i32, i32) {
    %c0_i32 = arith.constant 0 : i32
    %c0_i32_0 = arith.constant 0 : i32
    return %arg0, %c0_i32 : i32, i32
  }
  func.func @transform_1(%arg0: i32) -> (i32, i32) {
    %c0_i32 = arith.constant 0 : i32
    %c0_i32_0 = arith.constant 0 : i32
    %c0_i32_1 = arith.constant 0 : i32
    return %c0_i32, %c0_i32_0 : i32, i32
  }
  func.func @transform_2(%arg0: i32) -> (i32, i32) {
    %c0_i32 = arith.constant 0 : i32
    %c0_i32_0 = arith.constant 0 : i32
    return %arg0, %c0_i32 : i32, i32
  }
  func.func @transform_3(%arg0: i32) -> (i32, i32, i32) {
    %c0_i32 = arith.constant 0 : i32
    %c0_i32_0 = arith.constant 0 : i32
    %c0_i32_1 = arith.constant 0 : i32
    return %arg0, %c0_i32, %c0_i32_0 : i32, i32, i32
  }
}

module attributes {stable_mosaic.version = 11 : i64} {
  func.func @_mm_kernel(%arg0: i32, %arg1: memref<64x8xf32, #tpu.memory_space<vmem>>, %arg2: memref<8x4xf32, #tpu.memory_space<vmem>>, %arg3: memref<64x4xf32, #tpu.memory_space<vmem>>, %arg4: memref<1x2x4xf32, #tpu.memory_space<vmem>>) attributes {dimension_semantics = [#tpu.dimension_semantics<parallel>], iteration_bounds = array<i64: 2>, scalar_prefetch = 0 : i64, scratch_operands = 0 : i64, tpu.core_type = #tpu.core_type<tc>, window_params = [{transform_indices = @transform_0, window_bounds = array<i64: 64, 8>}, {pipeline_mode = #tpu.pipeline_mode<synchronous>, transform_indices = @transform_1, window_bounds = array<i64: 8, 4>}, {transform_indices = @transform_2, window_bounds = array<i64: 64, 4>}, {transform_indices = @transform_3, window_bounds = array<i64: 1, 2, 4>}]} {
    %c0 = arith.constant 0 : index
    %c0_0 = arith.constant 0 : index
    %0 = vector.load %arg1[%c0, %c0_0] : memref<64x8xf32, #tpu.memory_space<vmem>>, vector<64x8xf32>
    %cst = arith.constant 0.000000e+00 : f32
    %1 = vector.broadcast %cst : f32 to vector<64x8xf32>
    %2 = arith.maximumf %0, %1 : vector<64x8xf32>
    %3 = arith.truncf %2 : vector<64x8xf32> to vector<64x8xbf16>
    %c0_1 = arith.constant 0 : index
    %c0_2 = arith.constant 0 : index
    %4 = vector.load %arg2[%c0_1, %c0_2] : memref<8x4xf32, #tpu.memory_space<vmem>>, vector<8x4xf32>
    %5 = arith.truncf %4 : vector<8x4xf32> to vector<8x4xbf16>
    %cst_3 = arith.constant dense<0.000000e+00> : vector<64x4xf32>
    %6 = tpu.matmul %3, %5, %cst_3 {dimension_numbers = #tpu.dot_dimension_numbers<[1], [0], [0], [1], [0, 0, 1, 1], [], []>} : vector<64x8xbf16>, vector<8x4xbf16>, vector<64x4xf32> -> vector<64x4xf32>
    %c0_4 = arith.constant 0 : index
    %c0_5 = arith.constant 0 : index
    %7 = vector.load %arg3[%c0_4, %c0_5] : memref<64x4xf32, #tpu.memory_space<vmem>>, vector<64x4xf32>
    tpu.vector_store %arg3[%c0_4, %c0_5], %6 {strides = array<i32>} : memref<64x4xf32, #tpu.memory_space<vmem>>, vector<64x4xf32>,
    %cst_6 = arith.constant dense<0.000000e+00> : vector<4xf32>
    %8 = vector.multi_reduction <add>, %6, %cst_6 [0] : vector<64x4xf32> to vector<4xf32>
    %9 = vector.shape_cast %8 : vector<4xf32> to vector<1x4xf32>
    %10 = arith.mulf %6, %6 : vector<64x4xf32>
    %cst_7 = arith.constant dense<0.000000e+00> : vector<4xf32>
    %11 = vector.multi_reduction <add>, %10, %cst_7 [0] : vector<64x4xf32> to vector<4xf32>
    %12 = vector.shape_cast %11 : vector<4xf32> to vector<1x4xf32>
    %13 = tpu.concatenate %9, %12 in 0 : vector<1x4xf32>, vector<1x4xf32> -> vector<2x4xf32>
    %14 = vector.shape_cast %13 : vector<2x4xf32> to vector<1x2x4xf32>
    %c0_8 = arith.constant 0 : index
    %c0_9 = arith.constant 0 : index
    %c0_10 = arith.constant 0 : index
    %15 = vector.load %arg4[%c0_8, %c0_9, %c0_10] : memref<1x2x4xf32, #tpu.memory_space<vmem>>, vector<1x2x4xf32>
    tpu.vector_store %arg4[%c0_8, %c0_9, %c0_10], %14 {strides = array<i32>} : memref<1x2x4xf32, #tpu.memory_space<vmem>>, vector<1x2x4xf32>,
    return
  }
  func.func @transform_0(%arg0: i32) -> (i32, i32) {
    %c0_i32 = arith.constant 0 : i32
    %c0_i32_0 = arith.constant 0 : i32
    return %arg0, %c0_i32 : i32, i32
  }
  func.func @transform_1(%arg0: i32) -> (i32, i32) {
    %c0_i32 = arith.constant 0 : i32
    %c0_i32_0 = arith.constant 0 : i32
    %c0_i32_1 = arith.constant 0 : i32
    return %c0_i32, %c0_i32_0 : i32, i32
  }
  func.func @transform_2(%arg0: i32) -> (i32, i32) {
    %c0_i32 = arith.constant 0 : i32
    %c0_i32_0 = arith.constant 0 : i32
    return %arg0, %c0_i32 : i32, i32
  }
  func.func @transform_3(%arg0: i32) -> (i32, i32, i32) {
    %c0_i32 = arith.constant 0 : i32
    %c0_i32_0 = arith.constant 0 : i32
    %c0_i32_1 = arith.constant 0 : i32
    return %arg0, %c0_i32, %c0_i32_0 : i32, i32, i32
  }
}

module attributes {stable_mosaic.version = 11 : i64} {
  func.func @_edge_sum_kernel(%arg0: i32, %arg1: memref<14x128xf32, #tpu.memory_space<vmem>>, %arg2: memref<1x128xf32, #tpu.memory_space<vmem>>, %arg3: memref<8x128xf32, #tpu.memory_space<vmem>>, %arg4: memref<8x128xf32, #tpu.memory_space<vmem>>, %arg5: memref<8x128xf32, #tpu.memory_space<vmem>>, %arg6: memref<8x128xf32, #tpu.memory_space<vmem>>, %arg7: memref<8x128xf32, #tpu.memory_space<vmem>>, %arg8: memref<8x128xf32, #tpu.memory_space<vmem>>, %arg9: memref<8x128xf32, #tpu.memory_space<vmem>>, %arg10: memref<8x128xf32, #tpu.memory_space<vmem>>, %arg11: memref<8x128xf32, #tpu.memory_space<vmem>>, %arg12: memref<8x128xf32, #tpu.memory_space<vmem>>, %arg13: memref<8x128xf32, #tpu.memory_space<vmem>>, %arg14: memref<8x128xf32, #tpu.memory_space<vmem>>, %arg15: memref<8x128xf32, #tpu.memory_space<vmem>>, %arg16: memref<8x128xf32, #tpu.memory_space<vmem>>, %arg17: memref<8x128xf32, #tpu.memory_space<vmem>>) attributes {dimension_semantics = [#tpu.dimension_semantics<parallel>], iteration_bounds = array<i64: 1>, scalar_prefetch = 0 : i64, scratch_operands = 0 : i64, tpu.core_type = #tpu.core_type<tc>, window_params = [{pipeline_mode = #tpu.pipeline_mode<synchronous>, transform_indices = @transform_0, window_bounds = array<i64: 14, 128>}, {pipeline_mode = #tpu.pipeline_mode<synchronous>, transform_indices = @transform_1, window_bounds = array<i64: 1, 128>}, {transform_indices = @transform_2, window_bounds = array<i64: 8, 128>}, {transform_indices = @transform_3, window_bounds = array<i64: 8, 128>}, {transform_indices = @transform_4, window_bounds = array<i64: 8, 128>}, {transform_indices = @transform_5, window_bounds = array<i64: 8, 128>}, {transform_indices = @transform_6, window_bounds = array<i64: 8, 128>}, {transform_indices = @transform_7, window_bounds = array<i64: 8, 128>}, {transform_indices = @transform_8, window_bounds = array<i64: 8, 128>}, {transform_indices = @transform_9, window_bounds = array<i64: 8, 128>}, {transform_indices = @transform_10, window_bounds = array<i64: 8, 128>}, {transform_indices = @transform_11, window_bounds = array<i64: 8, 128>}, {transform_indices = @transform_12, window_bounds = array<i64: 8, 128>}, {transform_indices = @transform_13, window_bounds = array<i64: 8, 128>}, {transform_indices = @transform_14, window_bounds = array<i64: 8, 128>}, {transform_indices = @transform_15, window_bounds = array<i64: 8, 128>}, {transform_indices = @transform_16, window_bounds = array<i64: 8, 128>}]} {
    %c0 = arith.constant 0 : index
    %c0_0 = arith.constant 0 : index
    %0 = vector.load %arg1[%c0, %c0_0] : memref<14x128xf32, #tpu.memory_space<vmem>>, vector<14x128xf32>
    %c0_1 = arith.constant 0 : index
    %c0_2 = arith.constant 0 : index
    %1 = vector.load %arg3[%c0_1, %c0_2] : memref<8x128xf32, #tpu.memory_space<vmem>>, vector<8x128xf32>
    %2 = vector.extract_strided_slice %0 {offsets = [0, 0], sizes = [1, 128], strides = [1, 1]} : vector<14x128xf32> to vector<1x128xf32>
    %3 = vector.broadcast %2 : vector<1x128xf32> to vector<8x128xf32>
    %4 = arith.mulf %1, %3 : vector<8x128xf32>
    %c0_3 = arith.constant 0 : index
    %c0_4 = arith.constant 0 : index
    %5 = vector.load %arg4[%c0_3, %c0_4] : memref<8x128xf32, #tpu.memory_space<vmem>>, vector<8x128xf32>
    %6 = vector.extract_strided_slice %0 {offsets = [1, 0], sizes = [1, 128], strides = [1, 1]} : vector<14x128xf32> to vector<1x128xf32>
    %7 = vector.broadcast %6 : vector<1x128xf32> to vector<8x128xf32>
    %8 = arith.mulf %5, %7 : vector<8x128xf32>
    %9 = arith.addf %4, %8 : vector<8x128xf32>
    %c0_5 = arith.constant 0 : index
    %c0_6 = arith.constant 0 : index
    %10 = vector.load %arg5[%c0_5, %c0_6] : memref<8x128xf32, #tpu.memory_space<vmem>>, vector<8x128xf32>
    %11 = vector.extract_strided_slice %0 {offsets = [2, 0], sizes = [1, 128], strides = [1, 1]} : vector<14x128xf32> to vector<1x128xf32>
    %12 = vector.broadcast %11 : vector<1x128xf32> to vector<8x128xf32>
    %13 = arith.mulf %10, %12 : vector<8x128xf32>
    %14 = arith.addf %9, %13 : vector<8x128xf32>
    %c0_7 = arith.constant 0 : index
    %c0_8 = arith.constant 0 : index
    %15 = vector.load %arg6[%c0_7, %c0_8] : memref<8x128xf32, #tpu.memory_space<vmem>>, vector<8x128xf32>
    %16 = vector.extract_strided_slice %0 {offsets = [3, 0], sizes = [1, 128], strides = [1, 1]} : vector<14x128xf32> to vector<1x128xf32>
    %17 = vector.broadcast %16 : vector<1x128xf32> to vector<8x128xf32>
    %18 = arith.mulf %15, %17 : vector<8x128xf32>
    %19 = arith.addf %14, %18 : vector<8x128xf32>
    %c0_9 = arith.constant 0 : index
    %c0_10 = arith.constant 0 : index
    %20 = vector.load %arg7[%c0_9, %c0_10] : memref<8x128xf32, #tpu.memory_space<vmem>>, vector<8x128xf32>
    %21 = vector.extract_strided_slice %0 {offsets = [4, 0], sizes = [1, 128], strides = [1, 1]} : vector<14x128xf32> to vector<1x128xf32>
    %22 = vector.broadcast %21 : vector<1x128xf32> to vector<8x128xf32>
    %23 = arith.mulf %20, %22 : vector<8x128xf32>
    %24 = arith.addf %19, %23 : vector<8x128xf32>
    %c0_11 = arith.constant 0 : index
    %c0_12 = arith.constant 0 : index
    %25 = vector.load %arg8[%c0_11, %c0_12] : memref<8x128xf32, #tpu.memory_space<vmem>>, vector<8x128xf32>
    %26 = vector.extract_strided_slice %0 {offsets = [5, 0], sizes = [1, 128], strides = [1, 1]} : vector<14x128xf32> to vector<1x128xf32>
    %27 = vector.broadcast %26 : vector<1x128xf32> to vector<8x128xf32>
    %28 = arith.mulf %25, %27 : vector<8x128xf32>
    %29 = arith.addf %24, %28 : vector<8x128xf32>
    %c0_13 = arith.constant 0 : index
    %c0_14 = arith.constant 0 : index
    %30 = vector.load %arg9[%c0_13, %c0_14] : memref<8x128xf32, #tpu.memory_space<vmem>>, vector<8x128xf32>
    %31 = vector.extract_strided_slice %0 {offsets = [6, 0], sizes = [1, 128], strides = [1, 1]} : vector<14x128xf32> to vector<1x128xf32>
    %32 = vector.broadcast %31 : vector<1x128xf32> to vector<8x128xf32>
    %33 = arith.mulf %30, %32 : vector<8x128xf32>
    %34 = arith.addf %29, %33 : vector<8x128xf32>
    %c0_15 = arith.constant 0 : index
    %c0_16 = arith.constant 0 : index
    %35 = vector.load %arg10[%c0_15, %c0_16] : memref<8x128xf32, #tpu.memory_space<vmem>>, vector<8x128xf32>
    %36 = vector.extract_strided_slice %0 {offsets = [7, 0], sizes = [1, 128], strides = [1, 1]} : vector<14x128xf32> to vector<1x128xf32>
    %37 = vector.broadcast %36 : vector<1x128xf32> to vector<8x128xf32>
    %38 = arith.mulf %35, %37 : vector<8x128xf32>
    %39 = arith.addf %34, %38 : vector<8x128xf32>
    %c0_17 = arith.constant 0 : index
    %c0_18 = arith.constant 0 : index
    %40 = vector.load %arg11[%c0_17, %c0_18] : memref<8x128xf32, #tpu.memory_space<vmem>>, vector<8x128xf32>
    %41 = vector.extract_strided_slice %0 {offsets = [8, 0], sizes = [1, 128], strides = [1, 1]} : vector<14x128xf32> to vector<1x128xf32>
    %42 = vector.broadcast %41 : vector<1x128xf32> to vector<8x128xf32>
    %43 = arith.mulf %40, %42 : vector<8x128xf32>
    %44 = arith.addf %39, %43 : vector<8x128xf32>
    %c0_19 = arith.constant 0 : index
    %c0_20 = arith.constant 0 : index
    %45 = vector.load %arg12[%c0_19, %c0_20] : memref<8x128xf32, #tpu.memory_space<vmem>>, vector<8x128xf32>
    %46 = vector.extract_strided_slice %0 {offsets = [9, 0], sizes = [1, 128], strides = [1, 1]} : vector<14x128xf32> to vector<1x128xf32>
    %47 = vector.broadcast %46 : vector<1x128xf32> to vector<8x128xf32>
    %48 = arith.mulf %45, %47 : vector<8x128xf32>
    %49 = arith.addf %44, %48 : vector<8x128xf32>
    %c0_21 = arith.constant 0 : index
    %c0_22 = arith.constant 0 : index
    %50 = vector.load %arg13[%c0_21, %c0_22] : memref<8x128xf32, #tpu.memory_space<vmem>>, vector<8x128xf32>
    %51 = vector.extract_strided_slice %0 {offsets = [10, 0], sizes = [1, 128], strides = [1, 1]} : vector<14x128xf32> to vector<1x128xf32>
    %52 = vector.broadcast %51 : vector<1x128xf32> to vector<8x128xf32>
    %53 = arith.mulf %50, %52 : vector<8x128xf32>
    %54 = arith.addf %49, %53 : vector<8x128xf32>
    %c0_23 = arith.constant 0 : index
    %c0_24 = arith.constant 0 : index
    %55 = vector.load %arg14[%c0_23, %c0_24] : memref<8x128xf32, #tpu.memory_space<vmem>>, vector<8x128xf32>
    %56 = vector.extract_strided_slice %0 {offsets = [11, 0], sizes = [1, 128], strides = [1, 1]} : vector<14x128xf32> to vector<1x128xf32>
    %57 = vector.broadcast %56 : vector<1x128xf32> to vector<8x128xf32>
    %58 = arith.mulf %55, %57 : vector<8x128xf32>
    %59 = arith.addf %54, %58 : vector<8x128xf32>
    %c0_25 = arith.constant 0 : index
    %c0_26 = arith.constant 0 : index
    %60 = vector.load %arg15[%c0_25, %c0_26] : memref<8x128xf32, #tpu.memory_space<vmem>>, vector<8x128xf32>
    %61 = vector.extract_strided_slice %0 {offsets = [12, 0], sizes = [1, 128], strides = [1, 1]} : vector<14x128xf32> to vector<1x128xf32>
    %62 = vector.broadcast %61 : vector<1x128xf32> to vector<8x128xf32>
    %63 = arith.mulf %60, %62 : vector<8x128xf32>
    %64 = arith.addf %59, %63 : vector<8x128xf32>
    %c0_27 = arith.constant 0 : index
    %c0_28 = arith.constant 0 : index
    %65 = vector.load %arg16[%c0_27, %c0_28] : memref<8x128xf32, #tpu.memory_space<vmem>>, vector<8x128xf32>
    %66 = vector.extract_strided_slice %0 {offsets = [13, 0], sizes = [1, 128], strides = [1, 1]} : vector<14x128xf32> to vector<1x128xf32>
    %67 = vector.broadcast %66 : vector<1x128xf32> to vector<8x128xf32>
    %68 = arith.mulf %65, %67 : vector<8x128xf32>
    %69 = arith.addf %64, %68 : vector<8x128xf32>
    %c0_29 = arith.constant 0 : index
    %c0_30 = arith.constant 0 : index
    %70 = vector.load %arg2[%c0_29, %c0_30] : memref<1x128xf32, #tpu.memory_space<vmem>>, vector<1x128xf32>
    %71 = vector.broadcast %70 : vector<1x128xf32> to vector<8x128xf32>
    %72 = arith.addf %69, %71 : vector<8x128xf32>
    %c0_31 = arith.constant 0 : index
    %c0_32 = arith.constant 0 : index
    %73 = vector.load %arg17[%c0_31, %c0_32] : memref<8x128xf32, #tpu.memory_space<vmem>>, vector<8x128xf32>
    tpu.vector_store %arg17[%c0_31, %c0_32], %72 {strides = array<i32>} : memref<8x128xf32, #tpu.memory_space<vmem>>, vector<8x128xf32>,
    return
  }
  func.func @transform_0(%arg0: i32) -> (i32, i32) {
    %c0_i32 = arith.constant 0 : i32
    %c0_i32_0 = arith.constant 0 : i32
    %c0_i32_1 = arith.constant 0 : i32
    return %c0_i32, %c0_i32_0 : i32, i32
  }
  func.func @transform_1(%arg0: i32) -> (i32, i32) {
    %c0_i32 = arith.constant 0 : i32
    %c0_i32_0 = arith.constant 0 : i32
    %c0_i32_1 = arith.constant 0 : i32
    return %c0_i32, %c0_i32_0 : i32, i32
  }
  func.func @transform_2(%arg0: i32) -> (i32, i32) {
    %c0_i32 = arith.constant 0 : i32
    %c0_i32_0 = arith.constant 0 : i32
    return %arg0, %c0_i32 : i32, i32
  }
  func.func @transform_3(%arg0: i32) -> (i32, i32) {
    %c0_i32 = arith.constant 0 : i32
    %c0_i32_0 = arith.constant 0 : i32
    return %arg0, %c0_i32 : i32, i32
  }
  func.func @transform_4(%arg0: i32) -> (i32, i32) {
    %c0_i32 = arith.constant 0 : i32
    %c0_i32_0 = arith.constant 0 : i32
    return %arg0, %c0_i32 : i32, i32
  }
  func.func @transform_5(%arg0: i32) -> (i32, i32) {
    %c0_i32 = arith.constant 0 : i32
    %c0_i32_0 = arith.constant 0 : i32
    return %arg0, %c0_i32 : i32, i32
  }
  func.func @transform_6(%arg0: i32) -> (i32, i32) {
    %c0_i32 = arith.constant 0 : i32
    %c0_i32_0 = arith.constant 0 : i32
    return %arg0, %c0_i32 : i32, i32
  }
  func.func @transform_7(%arg0: i32) -> (i32, i32) {
    %c0_i32 = arith.constant 0 : i32
    %c0_i32_0 = arith.constant 0 : i32
    return %arg0, %c0_i32 : i32, i32
  }
  func.func @transform_8(%arg0: i32) -> (i32, i32) {
    %c0_i32 = arith.constant 0 : i32
    %c0_i32_0 = arith.constant 0 : i32
    return %arg0, %c0_i32 : i32, i32
  }
  func.func @transform_9(%arg0: i32) -> (i32, i32) {
    %c0_i32 = arith.constant 0 : i32
    %c0_i32_0 = arith.constant 0 : i32
    return %arg0, %c0_i32 : i32, i32
  }
  func.func @transform_10(%arg0: i32) -> (i32, i32) {
    %c0_i32 = arith.constant 0 : i32
    %c0_i32_0 = arith.constant 0 : i32
    return %arg0, %c0_i32 : i32, i32
  }
  func.func @transform_11(%arg0: i32) -> (i32, i32) {
    %c0_i32 = arith.constant 0 : i32
    %c0_i32_0 = arith.constant 0 : i32
    return %arg0, %c0_i32 : i32, i32
  }
  func.func @transform_12(%arg0: i32) -> (i32, i32) {
    %c0_i32 = arith.constant 0 : i32
    %c0_i32_0 = arith.constant 0 : i32
    return %arg0, %c0_i32 : i32, i32
  }
  func.func @transform_13(%arg0: i32) -> (i32, i32) {
    %c0_i32 = arith.constant 0 : i32
    %c0_i32_0 = arith.constant 0 : i32
    return %arg0, %c0_i32 : i32, i32
  }
  func.func @transform_14(%arg0: i32) -> (i32, i32) {
    %c0_i32 = arith.constant 0 : i32
    %c0_i32_0 = arith.constant 0 : i32
    return %arg0, %c0_i32 : i32, i32
  }
  func.func @transform_15(%arg0: i32) -> (i32, i32) {
    %c0_i32 = arith.constant 0 : i32
    %c0_i32_0 = arith.constant 0 : i32
    return %arg0, %c0_i32 : i32, i32
  }
  func.func @transform_16(%arg0: i32) -> (i32, i32) {
    %c0_i32 = arith.constant 0 : i32
    %c0_i32_0 = arith.constant 0 : i32
    return %arg0, %c0_i32 : i32, i32
  }
}

module attributes {stable_mosaic.version = 11 : i64} {
  func.func @_edge_sum_kernel(%arg0: i32, %arg1: memref<21x128xf32, #tpu.memory_space<vmem>>, %arg2: memref<1x128xf32, #tpu.memory_space<vmem>>, %arg3: memref<8x128xf32, #tpu.memory_space<vmem>>, %arg4: memref<8x128xf32, #tpu.memory_space<vmem>>, %arg5: memref<8x128xf32, #tpu.memory_space<vmem>>, %arg6: memref<8x128xf32, #tpu.memory_space<vmem>>, %arg7: memref<8x128xf32, #tpu.memory_space<vmem>>, %arg8: memref<8x128xf32, #tpu.memory_space<vmem>>, %arg9: memref<8x128xf32, #tpu.memory_space<vmem>>, %arg10: memref<8x128xf32, #tpu.memory_space<vmem>>, %arg11: memref<8x128xf32, #tpu.memory_space<vmem>>, %arg12: memref<8x128xf32, #tpu.memory_space<vmem>>, %arg13: memref<8x128xf32, #tpu.memory_space<vmem>>, %arg14: memref<8x128xf32, #tpu.memory_space<vmem>>, %arg15: memref<8x128xf32, #tpu.memory_space<vmem>>, %arg16: memref<8x128xf32, #tpu.memory_space<vmem>>, %arg17: memref<8x128xf32, #tpu.memory_space<vmem>>, %arg18: memref<8x128xf32, #tpu.memory_space<vmem>>, %arg19: memref<8x128xf32, #tpu.memory_space<vmem>>, %arg20: memref<8x128xf32, #tpu.memory_space<vmem>>, %arg21: memref<8x128xf32, #tpu.memory_space<vmem>>, %arg22: memref<8x128xf32, #tpu.memory_space<vmem>>, %arg23: memref<8x128xf32, #tpu.memory_space<vmem>>, %arg24: memref<8x128xf32, #tpu.memory_space<vmem>>) attributes {dimension_semantics = [#tpu.dimension_semantics<parallel>], iteration_bounds = array<i64: 1>, scalar_prefetch = 0 : i64, scratch_operands = 0 : i64, tpu.core_type = #tpu.core_type<tc>, window_params = [{pipeline_mode = #tpu.pipeline_mode<synchronous>, transform_indices = @transform_0, window_bounds = array<i64: 21, 128>}, {pipeline_mode = #tpu.pipeline_mode<synchronous>, transform_indices = @transform_1, window_bounds = array<i64: 1, 128>}, {transform_indices = @transform_2, window_bounds = array<i64: 8, 128>}, {transform_indices = @transform_3, window_bounds = array<i64: 8, 128>}, {transform_indices = @transform_4, window_bounds = array<i64: 8, 128>}, {transform_indices = @transform_5, window_bounds = array<i64: 8, 128>}, {transform_indices = @transform_6, window_bounds = array<i64: 8, 128>}, {transform_indices = @transform_7, window_bounds = array<i64: 8, 128>}, {transform_indices = @transform_8, window_bounds = array<i64: 8, 128>}, {transform_indices = @transform_9, window_bounds = array<i64: 8, 128>}, {transform_indices = @transform_10, window_bounds = array<i64: 8, 128>}, {transform_indices = @transform_11, window_bounds = array<i64: 8, 128>}, {transform_indices = @transform_12, window_bounds = array<i64: 8, 128>}, {transform_indices = @transform_13, window_bounds = array<i64: 8, 128>}, {transform_indices = @transform_14, window_bounds = array<i64: 8, 128>}, {transform_indices = @transform_15, window_bounds = array<i64: 8, 128>}, {transform_indices = @transform_16, window_bounds = array<i64: 8, 128>}, {transform_indices = @transform_17, window_bounds = array<i64: 8, 128>}, {transform_indices = @transform_18, window_bounds = array<i64: 8, 128>}, {transform_indices = @transform_19, window_bounds = array<i64: 8, 128>}, {transform_indices = @transform_20, window_bounds = array<i64: 8, 128>}, {transform_indices = @transform_21, window_bounds = array<i64: 8, 128>}, {transform_indices = @transform_22, window_bounds = array<i64: 8, 128>}, {transform_indices = @transform_23, window_bounds = array<i64: 8, 128>}]} {
    %c0 = arith.constant 0 : index
    %c0_0 = arith.constant 0 : index
    %0 = vector.load %arg1[%c0, %c0_0] : memref<21x128xf32, #tpu.memory_space<vmem>>, vector<21x128xf32>
    %c0_1 = arith.constant 0 : index
    %c0_2 = arith.constant 0 : index
    %1 = vector.load %arg3[%c0_1, %c0_2] : memref<8x128xf32, #tpu.memory_space<vmem>>, vector<8x128xf32>
    %2 = vector.extract_strided_slice %0 {offsets = [0, 0], sizes = [1, 128], strides = [1, 1]} : vector<21x128xf32> to vector<1x128xf32>
    %3 = vector.broadcast %2 : vector<1x128xf32> to vector<8x128xf32>
    %4 = arith.mulf %1, %3 : vector<8x128xf32>
    %c0_3 = arith.constant 0 : index
    %c0_4 = arith.constant 0 : index
    %5 = vector.load %arg4[%c0_3, %c0_4] : memref<8x128xf32, #tpu.memory_space<vmem>>, vector<8x128xf32>
    %6 = vector.extract_strided_slice %0 {offsets = [1, 0], sizes = [1, 128], strides = [1, 1]} : vector<21x128xf32> to vector<1x128xf32>
    %7 = vector.broadcast %6 : vector<1x128xf32> to vector<8x128xf32>
    %8 = arith.mulf %5, %7 : vector<8x128xf32>
    %9 = arith.addf %4, %8 : vector<8x128xf32>
    %c0_5 = arith.constant 0 : index
    %c0_6 = arith.constant 0 : index
    %10 = vector.load %arg5[%c0_5, %c0_6] : memref<8x128xf32, #tpu.memory_space<vmem>>, vector<8x128xf32>
    %11 = vector.extract_strided_slice %0 {offsets = [2, 0], sizes = [1, 128], strides = [1, 1]} : vector<21x128xf32> to vector<1x128xf32>
    %12 = vector.broadcast %11 : vector<1x128xf32> to vector<8x128xf32>
    %13 = arith.mulf %10, %12 : vector<8x128xf32>
    %14 = arith.addf %9, %13 : vector<8x128xf32>
    %c0_7 = arith.constant 0 : index
    %c0_8 = arith.constant 0 : index
    %15 = vector.load %arg6[%c0_7, %c0_8] : memref<8x128xf32, #tpu.memory_space<vmem>>, vector<8x128xf32>
    %16 = vector.extract_strided_slice %0 {offsets = [3, 0], sizes = [1, 128], strides = [1, 1]} : vector<21x128xf32> to vector<1x128xf32>
    %17 = vector.broadcast %16 : vector<1x128xf32> to vector<8x128xf32>
    %18 = arith.mulf %15, %17 : vector<8x128xf32>
    %19 = arith.addf %14, %18 : vector<8x128xf32>
    %c0_9 = arith.constant 0 : index
    %c0_10 = arith.constant 0 : index
    %20 = vector.load %arg7[%c0_9, %c0_10] : memref<8x128xf32, #tpu.memory_space<vmem>>, vector<8x128xf32>
    %21 = vector.extract_strided_slice %0 {offsets = [4, 0], sizes = [1, 128], strides = [1, 1]} : vector<21x128xf32> to vector<1x128xf32>
    %22 = vector.broadcast %21 : vector<1x128xf32> to vector<8x128xf32>
    %23 = arith.mulf %20, %22 : vector<8x128xf32>
    %24 = arith.addf %19, %23 : vector<8x128xf32>
    %c0_11 = arith.constant 0 : index
    %c0_12 = arith.constant 0 : index
    %25 = vector.load %arg8[%c0_11, %c0_12] : memref<8x128xf32, #tpu.memory_space<vmem>>, vector<8x128xf32>
    %26 = vector.extract_strided_slice %0 {offsets = [5, 0], sizes = [1, 128], strides = [1, 1]} : vector<21x128xf32> to vector<1x128xf32>
    %27 = vector.broadcast %26 : vector<1x128xf32> to vector<8x128xf32>
    %28 = arith.mulf %25, %27 : vector<8x128xf32>
    %29 = arith.addf %24, %28 : vector<8x128xf32>
    %c0_13 = arith.constant 0 : index
    %c0_14 = arith.constant 0 : index
    %30 = vector.load %arg9[%c0_13, %c0_14] : memref<8x128xf32, #tpu.memory_space<vmem>>, vector<8x128xf32>
    %31 = vector.extract_strided_slice %0 {offsets = [6, 0], sizes = [1, 128], strides = [1, 1]} : vector<21x128xf32> to vector<1x128xf32>
    %32 = vector.broadcast %31 : vector<1x128xf32> to vector<8x128xf32>
    %33 = arith.mulf %30, %32 : vector<8x128xf32>
    %34 = arith.addf %29, %33 : vector<8x128xf32>
    %c0_15 = arith.constant 0 : index
    %c0_16 = arith.constant 0 : index
    %35 = vector.load %arg10[%c0_15, %c0_16] : memref<8x128xf32, #tpu.memory_space<vmem>>, vector<8x128xf32>
    %36 = vector.extract_strided_slice %0 {offsets = [7, 0], sizes = [1, 128], strides = [1, 1]} : vector<21x128xf32> to vector<1x128xf32>
    %37 = vector.broadcast %36 : vector<1x128xf32> to vector<8x128xf32>
    %38 = arith.mulf %35, %37 : vector<8x128xf32>
    %39 = arith.addf %34, %38 : vector<8x128xf32>
    %c0_17 = arith.constant 0 : index
    %c0_18 = arith.constant 0 : index
    %40 = vector.load %arg11[%c0_17, %c0_18] : memref<8x128xf32, #tpu.memory_space<vmem>>, vector<8x128xf32>
    %41 = vector.extract_strided_slice %0 {offsets = [8, 0], sizes = [1, 128], strides = [1, 1]} : vector<21x128xf32> to vector<1x128xf32>
    %42 = vector.broadcast %41 : vector<1x128xf32> to vector<8x128xf32>
    %43 = arith.mulf %40, %42 : vector<8x128xf32>
    %44 = arith.addf %39, %43 : vector<8x128xf32>
    %c0_19 = arith.constant 0 : index
    %c0_20 = arith.constant 0 : index
    %45 = vector.load %arg12[%c0_19, %c0_20] : memref<8x128xf32, #tpu.memory_space<vmem>>, vector<8x128xf32>
    %46 = vector.extract_strided_slice %0 {offsets = [9, 0], sizes = [1, 128], strides = [1, 1]} : vector<21x128xf32> to vector<1x128xf32>
    %47 = vector.broadcast %46 : vector<1x128xf32> to vector<8x128xf32>
    %48 = arith.mulf %45, %47 : vector<8x128xf32>
    %49 = arith.addf %44, %48 : vector<8x128xf32>
    %c0_21 = arith.constant 0 : index
    %c0_22 = arith.constant 0 : index
    %50 = vector.load %arg13[%c0_21, %c0_22] : memref<8x128xf32, #tpu.memory_space<vmem>>, vector<8x128xf32>
    %51 = vector.extract_strided_slice %0 {offsets = [10, 0], sizes = [1, 128], strides = [1, 1]} : vector<21x128xf32> to vector<1x128xf32>
    %52 = vector.broadcast %51 : vector<1x128xf32> to vector<8x128xf32>
    %53 = arith.mulf %50, %52 : vector<8x128xf32>
    %54 = arith.addf %49, %53 : vector<8x128xf32>
    %c0_23 = arith.constant 0 : index
    %c0_24 = arith.constant 0 : index
    %55 = vector.load %arg14[%c0_23, %c0_24] : memref<8x128xf32, #tpu.memory_space<vmem>>, vector<8x128xf32>
    %56 = vector.extract_strided_slice %0 {offsets = [11, 0], sizes = [1, 128], strides = [1, 1]} : vector<21x128xf32> to vector<1x128xf32>
    %57 = vector.broadcast %56 : vector<1x128xf32> to vector<8x128xf32>
    %58 = arith.mulf %55, %57 : vector<8x128xf32>
    %59 = arith.addf %54, %58 : vector<8x128xf32>
    %c0_25 = arith.constant 0 : index
    %c0_26 = arith.constant 0 : index
    %60 = vector.load %arg15[%c0_25, %c0_26] : memref<8x128xf32, #tpu.memory_space<vmem>>, vector<8x128xf32>
    %61 = vector.extract_strided_slice %0 {offsets = [12, 0], sizes = [1, 128], strides = [1, 1]} : vector<21x128xf32> to vector<1x128xf32>
    %62 = vector.broadcast %61 : vector<1x128xf32> to vector<8x128xf32>
    %63 = arith.mulf %60, %62 : vector<8x128xf32>
    %64 = arith.addf %59, %63 : vector<8x128xf32>
    %c0_27 = arith.constant 0 : index
    %c0_28 = arith.constant 0 : index
    %65 = vector.load %arg16[%c0_27, %c0_28] : memref<8x128xf32, #tpu.memory_space<vmem>>, vector<8x128xf32>
    %66 = vector.extract_strided_slice %0 {offsets = [13, 0], sizes = [1, 128], strides = [1, 1]} : vector<21x128xf32> to vector<1x128xf32>
    %67 = vector.broadcast %66 : vector<1x128xf32> to vector<8x128xf32>
    %68 = arith.mulf %65, %67 : vector<8x128xf32>
    %69 = arith.addf %64, %68 : vector<8x128xf32>
    %c0_29 = arith.constant 0 : index
    %c0_30 = arith.constant 0 : index
    %70 = vector.load %arg17[%c0_29, %c0_30] : memref<8x128xf32, #tpu.memory_space<vmem>>, vector<8x128xf32>
    %71 = vector.extract_strided_slice %0 {offsets = [14, 0], sizes = [1, 128], strides = [1, 1]} : vector<21x128xf32> to vector<1x128xf32>
    %72 = vector.broadcast %71 : vector<1x128xf32> to vector<8x128xf32>
    %73 = arith.mulf %70, %72 : vector<8x128xf32>
    %74 = arith.addf %69, %73 : vector<8x128xf32>
    %c0_31 = arith.constant 0 : index
    %c0_32 = arith.constant 0 : index
    %75 = vector.load %arg18[%c0_31, %c0_32] : memref<8x128xf32, #tpu.memory_space<vmem>>, vector<8x128xf32>
    %76 = vector.extract_strided_slice %0 {offsets = [15, 0], sizes = [1, 128], strides = [1, 1]} : vector<21x128xf32> to vector<1x128xf32>
    %77 = vector.broadcast %76 : vector<1x128xf32> to vector<8x128xf32>
    %78 = arith.mulf %75, %77 : vector<8x128xf32>
    %79 = arith.addf %74, %78 : vector<8x128xf32>
    %c0_33 = arith.constant 0 : index
    %c0_34 = arith.constant 0 : index
    %80 = vector.load %arg19[%c0_33, %c0_34] : memref<8x128xf32, #tpu.memory_space<vmem>>, vector<8x128xf32>
    %81 = vector.extract_strided_slice %0 {offsets = [16, 0], sizes = [1, 128], strides = [1, 1]} : vector<21x128xf32> to vector<1x128xf32>
    %82 = vector.broadcast %81 : vector<1x128xf32> to vector<8x128xf32>
    %83 = arith.mulf %80, %82 : vector<8x128xf32>
    %84 = arith.addf %79, %83 : vector<8x128xf32>
    %c0_35 = arith.constant 0 : index
    %c0_36 = arith.constant 0 : index
    %85 = vector.load %arg20[%c0_35, %c0_36] : memref<8x128xf32, #tpu.memory_space<vmem>>, vector<8x128xf32>
    %86 = vector.extract_strided_slice %0 {offsets = [17, 0], sizes = [1, 128], strides = [1, 1]} : vector<21x128xf32> to vector<1x128xf32>
    %87 = vector.broadcast %86 : vector<1x128xf32> to vector<8x128xf32>
    %88 = arith.mulf %85, %87 : vector<8x128xf32>
    %89 = arith.addf %84, %88 : vector<8x128xf32>
    %c0_37 = arith.constant 0 : index
    %c0_38 = arith.constant 0 : index
    %90 = vector.load %arg21[%c0_37, %c0_38] : memref<8x128xf32, #tpu.memory_space<vmem>>, vector<8x128xf32>
    %91 = vector.extract_strided_slice %0 {offsets = [18, 0], sizes = [1, 128], strides = [1, 1]} : vector<21x128xf32> to vector<1x128xf32>
    %92 = vector.broadcast %91 : vector<1x128xf32> to vector<8x128xf32>
    %93 = arith.mulf %90, %92 : vector<8x128xf32>
    %94 = arith.addf %89, %93 : vector<8x128xf32>
    %c0_39 = arith.constant 0 : index
    %c0_40 = arith.constant 0 : index
    %95 = vector.load %arg22[%c0_39, %c0_40] : memref<8x128xf32, #tpu.memory_space<vmem>>, vector<8x128xf32>
    %96 = vector.extract_strided_slice %0 {offsets = [19, 0], sizes = [1, 128], strides = [1, 1]} : vector<21x128xf32> to vector<1x128xf32>
    %97 = vector.broadcast %96 : vector<1x128xf32> to vector<8x128xf32>
    %98 = arith.mulf %95, %97 : vector<8x128xf32>
    %99 = arith.addf %94, %98 : vector<8x128xf32>
    %c0_41 = arith.constant 0 : index
    %c0_42 = arith.constant 0 : index
    %100 = vector.load %arg23[%c0_41, %c0_42] : memref<8x128xf32, #tpu.memory_space<vmem>>, vector<8x128xf32>
    %101 = vector.extract_strided_slice %0 {offsets = [20, 0], sizes = [1, 128], strides = [1, 1]} : vector<21x128xf32> to vector<1x128xf32>
    %102 = vector.broadcast %101 : vector<1x128xf32> to vector<8x128xf32>
    %103 = arith.mulf %100, %102 : vector<8x128xf32>
    %104 = arith.addf %99, %103 : vector<8x128xf32>
    %c0_43 = arith.constant 0 : index
    %c0_44 = arith.constant 0 : index
    %105 = vector.load %arg2[%c0_43, %c0_44] : memref<1x128xf32, #tpu.memory_space<vmem>>, vector<1x128xf32>
    %106 = vector.broadcast %105 : vector<1x128xf32> to vector<8x128xf32>
    %107 = arith.addf %104, %106 : vector<8x128xf32>
    %c0_45 = arith.constant 0 : index
    %c0_46 = arith.constant 0 : index
    %108 = vector.load %arg24[%c0_45, %c0_46] : memref<8x128xf32, #tpu.memory_space<vmem>>, vector<8x128xf32>
    tpu.vector_store %arg24[%c0_45, %c0_46], %107 {strides = array<i32>} : memref<8x128xf32, #tpu.memory_space<vmem>>, vector<8x128xf32>,
    return
  }
  func.func @transform_0(%arg0: i32) -> (i32, i32) {
    %c0_i32 = arith.constant 0 : i32
    %c0_i32_0 = arith.constant 0 : i32
    %c0_i32_1 = arith.constant 0 : i32
    return %c0_i32, %c0_i32_0 : i32, i32
  }
  func.func @transform_1(%arg0: i32) -> (i32, i32) {
    %c0_i32 = arith.constant 0 : i32
    %c0_i32_0 = arith.constant 0 : i32
    %c0_i32_1 = arith.constant 0 : i32
    return %c0_i32, %c0_i32_0 : i32, i32
  }
  func.func @transform_2(%arg0: i32) -> (i32, i32) {
    %c0_i32 = arith.constant 0 : i32
    %c0_i32_0 = arith.constant 0 : i32
    return %arg0, %c0_i32 : i32, i32
  }
  func.func @transform_3(%arg0: i32) -> (i32, i32) {
    %c0_i32 = arith.constant 0 : i32
    %c0_i32_0 = arith.constant 0 : i32
    return %arg0, %c0_i32 : i32, i32
  }
  func.func @transform_4(%arg0: i32) -> (i32, i32) {
    %c0_i32 = arith.constant 0 : i32
    %c0_i32_0 = arith.constant 0 : i32
    return %arg0, %c0_i32 : i32, i32
  }
  func.func @transform_5(%arg0: i32) -> (i32, i32) {
    %c0_i32 = arith.constant 0 : i32
    %c0_i32_0 = arith.constant 0 : i32
    return %arg0, %c0_i32 : i32, i32
  }
  func.func @transform_6(%arg0: i32) -> (i32, i32) {
    %c0_i32 = arith.constant 0 : i32
    %c0_i32_0 = arith.constant 0 : i32
    return %arg0, %c0_i32 : i32, i32
  }
  func.func @transform_7(%arg0: i32) -> (i32, i32) {
    %c0_i32 = arith.constant 0 : i32
    %c0_i32_0 = arith.constant 0 : i32
    return %arg0, %c0_i32 : i32, i32
  }
  func.func @transform_8(%arg0: i32) -> (i32, i32) {
    %c0_i32 = arith.constant 0 : i32
    %c0_i32_0 = arith.constant 0 : i32
    return %arg0, %c0_i32 : i32, i32
  }
  func.func @transform_9(%arg0: i32) -> (i32, i32) {
    %c0_i32 = arith.constant 0 : i32
    %c0_i32_0 = arith.constant 0 : i32
    return %arg0, %c0_i32 : i32, i32
  }
  func.func @transform_10(%arg0: i32) -> (i32, i32) {
    %c0_i32 = arith.constant 0 : i32
    %c0_i32_0 = arith.constant 0 : i32
    return %arg0, %c0_i32 : i32, i32
  }
  func.func @transform_11(%arg0: i32) -> (i32, i32) {
    %c0_i32 = arith.constant 0 : i32
    %c0_i32_0 = arith.constant 0 : i32
    return %arg0, %c0_i32 : i32, i32
  }
  func.func @transform_12(%arg0: i32) -> (i32, i32) {
    %c0_i32 = arith.constant 0 : i32
    %c0_i32_0 = arith.constant 0 : i32
    return %arg0, %c0_i32 : i32, i32
  }
  func.func @transform_13(%arg0: i32) -> (i32, i32) {
    %c0_i32 = arith.constant 0 : i32
    %c0_i32_0 = arith.constant 0 : i32
    return %arg0, %c0_i32 : i32, i32
  }
  func.func @transform_14(%arg0: i32) -> (i32, i32) {
    %c0_i32 = arith.constant 0 : i32
    %c0_i32_0 = arith.constant 0 : i32
    return %arg0, %c0_i32 : i32, i32
  }
  func.func @transform_15(%arg0: i32) -> (i32, i32) {
    %c0_i32 = arith.constant 0 : i32
    %c0_i32_0 = arith.constant 0 : i32
    return %arg0, %c0_i32 : i32, i32
  }
  func.func @transform_16(%arg0: i32) -> (i32, i32) {
    %c0_i32 = arith.constant 0 : i32
    %c0_i32_0 = arith.constant 0 : i32
    return %arg0, %c0_i32 : i32, i32
  }
  func.func @transform_17(%arg0: i32) -> (i32, i32) {
    %c0_i32 = arith.constant 0 : i32
    %c0_i32_0 = arith.constant 0 : i32
    return %arg0, %c0_i32 : i32, i32
  }
  func.func @transform_18(%arg0: i32) -> (i32, i32) {
    %c0_i32 = arith.constant 0 : i32
    %c0_i32_0 = arith.constant 0 : i32
    return %arg0, %c0_i32 : i32, i32
  }
  func.func @transform_19(%arg0: i32) -> (i32, i32) {
    %c0_i32 = arith.constant 0 : i32
    %c0_i32_0 = arith.constant 0 : i32
    return %arg0, %c0_i32 : i32, i32
  }
  func.func @transform_20(%arg0: i32) -> (i32, i32) {
    %c0_i32 = arith.constant 0 : i32
    %c0_i32_0 = arith.constant 0 : i32
    return %arg0, %c0_i32 : i32, i32
  }
  func.func @transform_21(%arg0: i32) -> (i32, i32) {
    %c0_i32 = arith.constant 0 : i32
    %c0_i32_0 = arith.constant 0 : i32
    return %arg0, %c0_i32 : i32, i32
  }
  func.func @transform_22(%arg0: i32) -> (i32, i32) {
    %c0_i32 = arith.constant 0 : i32
    %c0_i32_0 = arith.constant 0 : i32
    return %arg0, %c0_i32 : i32, i32
  }
  func.func @transform_23(%arg0: i32) -> (i32, i32) {
    %c0_i32 = arith.constant 0 : i32
    %c0_i32_0 = arith.constant 0 : i32
    return %arg0, %c0_i32 : i32, i32
  }
}

module attributes {stable_mosaic.version = 11 : i64} {
  func.func @_mm_kernel(%arg0: i32, %arg1: memref<64x16xf32, #tpu.memory_space<vmem>>, %arg2: memref<16x16xf32, #tpu.memory_space<vmem>>, %arg3: memref<64x16xf32, #tpu.memory_space<vmem>>, %arg4: memref<1x2x16xf32, #tpu.memory_space<vmem>>) attributes {dimension_semantics = [#tpu.dimension_semantics<parallel>], iteration_bounds = array<i64: 2>, scalar_prefetch = 0 : i64, scratch_operands = 0 : i64, tpu.core_type = #tpu.core_type<tc>, window_params = [{transform_indices = @transform_0, window_bounds = array<i64: 64, 16>}, {pipeline_mode = #tpu.pipeline_mode<synchronous>, transform_indices = @transform_1, window_bounds = array<i64: 16, 16>}, {transform_indices = @transform_2, window_bounds = array<i64: 64, 16>}, {transform_indices = @transform_3, window_bounds = array<i64: 1, 2, 16>}]} {
    %c0 = arith.constant 0 : index
    %c0_0 = arith.constant 0 : index
    %0 = vector.load %arg1[%c0, %c0_0] : memref<64x16xf32, #tpu.memory_space<vmem>>, vector<64x16xf32>
    %cst = arith.constant 0.000000e+00 : f32
    %1 = vector.broadcast %cst : f32 to vector<64x16xf32>
    %2 = arith.maximumf %0, %1 : vector<64x16xf32>
    %3 = arith.truncf %2 : vector<64x16xf32> to vector<64x16xbf16>
    %c0_1 = arith.constant 0 : index
    %c0_2 = arith.constant 0 : index
    %4 = vector.load %arg2[%c0_1, %c0_2] : memref<16x16xf32, #tpu.memory_space<vmem>>, vector<16x16xf32>
    %5 = arith.truncf %4 : vector<16x16xf32> to vector<16x16xbf16>
    %cst_3 = arith.constant dense<0.000000e+00> : vector<64x16xf32>
    %6 = tpu.matmul %3, %5, %cst_3 {dimension_numbers = #tpu.dot_dimension_numbers<[1], [0], [0], [1], [0, 0, 1, 1], [], []>} : vector<64x16xbf16>, vector<16x16xbf16>, vector<64x16xf32> -> vector<64x16xf32>
    %c0_4 = arith.constant 0 : index
    %c0_5 = arith.constant 0 : index
    %7 = vector.load %arg3[%c0_4, %c0_5] : memref<64x16xf32, #tpu.memory_space<vmem>>, vector<64x16xf32>
    tpu.vector_store %arg3[%c0_4, %c0_5], %6 {strides = array<i32>} : memref<64x16xf32, #tpu.memory_space<vmem>>, vector<64x16xf32>,
    %cst_6 = arith.constant dense<0.000000e+00> : vector<16xf32>
    %8 = vector.multi_reduction <add>, %6, %cst_6 [0] : vector<64x16xf32> to vector<16xf32>
    %9 = vector.shape_cast %8 : vector<16xf32> to vector<1x16xf32>
    %10 = arith.mulf %6, %6 : vector<64x16xf32>
    %cst_7 = arith.constant dense<0.000000e+00> : vector<16xf32>
    %11 = vector.multi_reduction <add>, %10, %cst_7 [0] : vector<64x16xf32> to vector<16xf32>
    %12 = vector.shape_cast %11 : vector<16xf32> to vector<1x16xf32>
    %13 = tpu.concatenate %9, %12 in 0 : vector<1x16xf32>, vector<1x16xf32> -> vector<2x16xf32>
    %14 = vector.shape_cast %13 : vector<2x16xf32> to vector<1x2x16xf32>
    %c0_8 = arith.constant 0 : index
    %c0_9 = arith.constant 0 : index
    %c0_10 = arith.constant 0 : index
    %15 = vector.load %arg4[%c0_8, %c0_9, %c0_10] : memref<1x2x16xf32, #tpu.memory_space<vmem>>, vector<1x2x16xf32>
    tpu.vector_store %arg4[%c0_8, %c0_9, %c0_10], %14 {strides = array<i32>} : memref<1x2x16xf32, #tpu.memory_space<vmem>>, vector<1x2x16xf32>,
    return
  }
  func.func @transform_0(%arg0: i32) -> (i32, i32) {
    %c0_i32 = arith.constant 0 : i32
    %c0_i32_0 = arith.constant 0 : i32
    return %arg0, %c0_i32 : i32, i32
  }
  func.func @transform_1(%arg0: i32) -> (i32, i32) {
    %c0_i32 = arith.constant 0 : i32
    %c0_i32_0 = arith.constant 0 : i32
    %c0_i32_1 = arith.constant 0 : i32
    return %c0_i32, %c0_i32_0 : i32, i32
  }
  func.func @transform_2(%arg0: i32) -> (i32, i32) {
    %c0_i32 = arith.constant 0 : i32
    %c0_i32_0 = arith.constant 0 : i32
    return %arg0, %c0_i32 : i32, i32
  }
  func.func @transform_3(%arg0: i32) -> (i32, i32, i32) {
    %c0_i32 = arith.constant 0 : i32
    %c0_i32_0 = arith.constant 0 : i32
    %c0_i32_1 = arith.constant 0 : i32
    return %arg0, %c0_i32, %c0_i32_0 : i32, i32, i32
  }
}

module attributes {stable_mosaic.version = 11 : i64} {
  func.func @_affine_kernel(%arg0: i32, %arg1: memref<8x128xf32, #tpu.memory_space<vmem>>, %arg2: memref<1x128xf32, #tpu.memory_space<vmem>>, %arg3: memref<1x128xf32, #tpu.memory_space<vmem>>, %arg4: memref<8x128xf32, #tpu.memory_space<vmem>>) attributes {dimension_semantics = [#tpu.dimension_semantics<parallel>], iteration_bounds = array<i64: 2>, scalar_prefetch = 0 : i64, scratch_operands = 0 : i64, tpu.core_type = #tpu.core_type<tc>, window_params = [{transform_indices = @transform_0, window_bounds = array<i64: 8, 128>}, {pipeline_mode = #tpu.pipeline_mode<synchronous>, transform_indices = @transform_1, window_bounds = array<i64: 1, 128>}, {pipeline_mode = #tpu.pipeline_mode<synchronous>, transform_indices = @transform_2, window_bounds = array<i64: 1, 128>}, {transform_indices = @transform_3, window_bounds = array<i64: 8, 128>}]} {
    %c0 = arith.constant 0 : index
    %c0_0 = arith.constant 0 : index
    %0 = vector.load %arg1[%c0, %c0_0] : memref<8x128xf32, #tpu.memory_space<vmem>>, vector<8x128xf32>
    %c0_1 = arith.constant 0 : index
    %c0_2 = arith.constant 0 : index
    %1 = vector.load %arg2[%c0_1, %c0_2] : memref<1x128xf32, #tpu.memory_space<vmem>>, vector<1x128xf32>
    %2 = vector.broadcast %1 : vector<1x128xf32> to vector<8x128xf32>
    %3 = arith.mulf %0, %2 : vector<8x128xf32>
    %c0_3 = arith.constant 0 : index
    %c0_4 = arith.constant 0 : index
    %4 = vector.load %arg3[%c0_3, %c0_4] : memref<1x128xf32, #tpu.memory_space<vmem>>, vector<1x128xf32>
    %5 = vector.broadcast %4 : vector<1x128xf32> to vector<8x128xf32>
    %6 = arith.addf %3, %5 : vector<8x128xf32>
    %c0_5 = arith.constant 0 : index
    %c0_6 = arith.constant 0 : index
    %7 = vector.load %arg4[%c0_5, %c0_6] : memref<8x128xf32, #tpu.memory_space<vmem>>, vector<8x128xf32>
    tpu.vector_store %arg4[%c0_5, %c0_6], %6 {strides = array<i32>} : memref<8x128xf32, #tpu.memory_space<vmem>>, vector<8x128xf32>,
    return
  }
  func.func @transform_0(%arg0: i32) -> (i32, i32) {
    %c0_i32 = arith.constant 0 : i32
    %c0_i32_0 = arith.constant 0 : i32
    return %arg0, %c0_i32 : i32, i32
  }
  func.func @transform_1(%arg0: i32) -> (i32, i32) {
    %c0_i32 = arith.constant 0 : i32
    %c0_i32_0 = arith.constant 0 : i32
    %c0_i32_1 = arith.constant 0 : i32
    return %c0_i32, %c0_i32_0 : i32, i32
  }
  func.func @transform_2(%arg0: i32) -> (i32, i32) {
    %c0_i32 = arith.constant 0 : i32
    %c0_i32_0 = arith.constant 0 : i32
    %c0_i32_1 = arith.constant 0 : i32
    return %c0_i32, %c0_i32_0 : i32, i32
  }
  func.func @transform_3(%arg0: i32) -> (i32, i32) {
    %c0_i32 = arith.constant 0 : i32
    %c0_i32_0 = arith.constant 0 : i32
    return %arg0, %c0_i32 : i32, i32
  }
}

module attributes {stable_mosaic.version = 11 : i64} {
  func.func @_mm_kernel(%arg0: i32, %arg1: memref<16x16xf32, #tpu.memory_space<vmem>>, %arg2: memref<16x8xf32, #tpu.memory_space<vmem>>, %arg3: memref<16x8xf32, #tpu.memory_space<vmem>>, %arg4: memref<1x2x8xf32, #tpu.memory_space<vmem>>) attributes {dimension_semantics = [#tpu.dimension_semantics<parallel>], iteration_bounds = array<i64: 2>, scalar_prefetch = 0 : i64, scratch_operands = 0 : i64, tpu.core_type = #tpu.core_type<tc>, window_params = [{transform_indices = @transform_0, window_bounds = array<i64: 16, 16>}, {pipeline_mode = #tpu.pipeline_mode<synchronous>, transform_indices = @transform_1, window_bounds = array<i64: 16, 8>}, {transform_indices = @transform_2, window_bounds = array<i64: 16, 8>}, {transform_indices = @transform_3, window_bounds = array<i64: 1, 2, 8>}]} {
    %c0 = arith.constant 0 : index
    %c0_0 = arith.constant 0 : index
    %0 = vector.load %arg1[%c0, %c0_0] : memref<16x16xf32, #tpu.memory_space<vmem>>, vector<16x16xf32>
    %cst = arith.constant 0.000000e+00 : f32
    %1 = vector.broadcast %cst : f32 to vector<16x16xf32>
    %2 = arith.maximumf %0, %1 : vector<16x16xf32>
    %3 = arith.truncf %2 : vector<16x16xf32> to vector<16x16xbf16>
    %c0_1 = arith.constant 0 : index
    %c0_2 = arith.constant 0 : index
    %4 = vector.load %arg2[%c0_1, %c0_2] : memref<16x8xf32, #tpu.memory_space<vmem>>, vector<16x8xf32>
    %5 = arith.truncf %4 : vector<16x8xf32> to vector<16x8xbf16>
    %cst_3 = arith.constant dense<0.000000e+00> : vector<16x8xf32>
    %6 = tpu.matmul %3, %5, %cst_3 {dimension_numbers = #tpu.dot_dimension_numbers<[1], [0], [0], [1], [0, 0, 1, 1], [], []>} : vector<16x16xbf16>, vector<16x8xbf16>, vector<16x8xf32> -> vector<16x8xf32>
    %c0_4 = arith.constant 0 : index
    %c0_5 = arith.constant 0 : index
    %7 = vector.load %arg3[%c0_4, %c0_5] : memref<16x8xf32, #tpu.memory_space<vmem>>, vector<16x8xf32>
    tpu.vector_store %arg3[%c0_4, %c0_5], %6 {strides = array<i32>} : memref<16x8xf32, #tpu.memory_space<vmem>>, vector<16x8xf32>,
    %cst_6 = arith.constant dense<0.000000e+00> : vector<8xf32>
    %8 = vector.multi_reduction <add>, %6, %cst_6 [0] : vector<16x8xf32> to vector<8xf32>
    %9 = vector.shape_cast %8 : vector<8xf32> to vector<1x8xf32>
    %10 = arith.mulf %6, %6 : vector<16x8xf32>
    %cst_7 = arith.constant dense<0.000000e+00> : vector<8xf32>
    %11 = vector.multi_reduction <add>, %10, %cst_7 [0] : vector<16x8xf32> to vector<8xf32>
    %12 = vector.shape_cast %11 : vector<8xf32> to vector<1x8xf32>
    %13 = tpu.concatenate %9, %12 in 0 : vector<1x8xf32>, vector<1x8xf32> -> vector<2x8xf32>
    %14 = vector.shape_cast %13 : vector<2x8xf32> to vector<1x2x8xf32>
    %c0_8 = arith.constant 0 : index
    %c0_9 = arith.constant 0 : index
    %c0_10 = arith.constant 0 : index
    %15 = vector.load %arg4[%c0_8, %c0_9, %c0_10] : memref<1x2x8xf32, #tpu.memory_space<vmem>>, vector<1x2x8xf32>
    tpu.vector_store %arg4[%c0_8, %c0_9, %c0_10], %14 {strides = array<i32>} : memref<1x2x8xf32, #tpu.memory_space<vmem>>, vector<1x2x8xf32>,
    return
  }
  func.func @transform_0(%arg0: i32) -> (i32, i32) {
    %c0_i32 = arith.constant 0 : i32
    %c0_i32_0 = arith.constant 0 : i32
    return %arg0, %c0_i32 : i32, i32
  }
  func.func @transform_1(%arg0: i32) -> (i32, i32) {
    %c0_i32 = arith.constant 0 : i32
    %c0_i32_0 = arith.constant 0 : i32
    %c0_i32_1 = arith.constant 0 : i32
    return %c0_i32, %c0_i32_0 : i32, i32
  }
  func.func @transform_2(%arg0: i32) -> (i32, i32) {
    %c0_i32 = arith.constant 0 : i32
    %c0_i32_0 = arith.constant 0 : i32
    return %arg0, %c0_i32 : i32, i32
  }
  func.func @transform_3(%arg0: i32) -> (i32, i32, i32) {
    %c0_i32 = arith.constant 0 : i32
    %c0_i32_0 = arith.constant 0 : i32
    %c0_i32_1 = arith.constant 0 : i32
    return %arg0, %c0_i32, %c0_i32_0 : i32, i32, i32
  }
}

module attributes {stable_mosaic.version = 11 : i64} {
  func.func @_tap_avg_kernel(%arg0: i32, %arg1: memref<9x4x128xf32, #tpu.memory_space<vmem>>, %arg2: memref<4x128xf32, #tpu.memory_space<vmem>>, %arg3: memref<4x128xf32, #tpu.memory_space<vmem>>, %arg4: memref<1x2x128xf32, #tpu.memory_space<vmem>>) attributes {dimension_semantics = [#tpu.dimension_semantics<parallel>], iteration_bounds = array<i64: 1>, scalar_prefetch = 0 : i64, scratch_operands = 0 : i64, tpu.core_type = #tpu.core_type<tc>, window_params = [{transform_indices = @transform_0, window_bounds = array<i64: 9, 4, 128>}, {transform_indices = @transform_1, window_bounds = array<i64: 4, 128>}, {transform_indices = @transform_2, window_bounds = array<i64: 4, 128>}, {transform_indices = @transform_3, window_bounds = array<i64: 1, 2, 128>}]} {
    %c0 = arith.constant 0 : index
    %c0_0 = arith.constant 0 : index
    %c0_1 = arith.constant 0 : index
    %0 = vector.load %arg1[%c0, %c0_0, %c0_1] : memref<9x4x128xf32, #tpu.memory_space<vmem>>, vector<9x4x128xf32>
    %cst = arith.constant dense<0.000000e+00> : vector<4x128xf32>
    %1 = vector.multi_reduction <add>, %0, %cst [0] : vector<9x4x128xf32> to vector<4x128xf32>
    %c0_2 = arith.constant 0 : index
    %c0_3 = arith.constant 0 : index
    %2 = vector.load %arg2[%c0_2, %c0_3] : memref<4x128xf32, #tpu.memory_space<vmem>>, vector<4x128xf32>
    %3 = arith.mulf %1, %2 : vector<4x128xf32>
    %c0_4 = arith.constant 0 : index
    %c0_5 = arith.constant 0 : index
    %4 = vector.load %arg3[%c0_4, %c0_5] : memref<4x128xf32, #tpu.memory_space<vmem>>, vector<4x128xf32>
    tpu.vector_store %arg3[%c0_4, %c0_5], %3 {strides = array<i32>} : memref<4x128xf32, #tpu.memory_space<vmem>>, vector<4x128xf32>,
    %cst_6 = arith.constant dense<0.000000e+00> : vector<128xf32>
    %5 = vector.multi_reduction <add>, %3, %cst_6 [0] : vector<4x128xf32> to vector<128xf32>
    %6 = vector.shape_cast %5 : vector<128xf32> to vector<1x128xf32>
    %7 = arith.mulf %3, %3 : vector<4x128xf32>
    %cst_7 = arith.constant dense<0.000000e+00> : vector<128xf32>
    %8 = vector.multi_reduction <add>, %7, %cst_7 [0] : vector<4x128xf32> to vector<128xf32>
    %9 = vector.shape_cast %8 : vector<128xf32> to vector<1x128xf32>
    %10 = tpu.concatenate %6, %9 in 0 : vector<1x128xf32>, vector<1x128xf32> -> vector<2x128xf32>
    %11 = vector.shape_cast %10 : vector<2x128xf32> to vector<1x2x128xf32>
    %c0_8 = arith.constant 0 : index
    %c0_9 = arith.constant 0 : index
    %c0_10 = arith.constant 0 : index
    %12 = vector.load %arg4[%c0_8, %c0_9, %c0_10] : memref<1x2x128xf32, #tpu.memory_space<vmem>>, vector<1x2x128xf32>
    tpu.vector_store %arg4[%c0_8, %c0_9, %c0_10], %11 {strides = array<i32>} : memref<1x2x128xf32, #tpu.memory_space<vmem>>, vector<1x2x128xf32>,
    return
  }
  func.func @transform_0(%arg0: i32) -> (i32, i32, i32) {
    %c0_i32 = arith.constant 0 : i32
    %c0_i32_0 = arith.constant 0 : i32
    %c0_i32_1 = arith.constant 0 : i32
    return %c0_i32, %arg0, %c0_i32_0 : i32, i32, i32
  }
  func.func @transform_1(%arg0: i32) -> (i32, i32) {
    %c0_i32 = arith.constant 0 : i32
    %c0_i32_0 = arith.constant 0 : i32
    return %arg0, %c0_i32 : i32, i32
  }
  func.func @transform_2(%arg0: i32) -> (i32, i32) {
    %c0_i32 = arith.constant 0 : i32
    %c0_i32_0 = arith.constant 0 : i32
    return %arg0, %c0_i32 : i32, i32
  }
  func.func @transform_3(%arg0: i32) -> (i32, i32, i32) {
    %c0_i32 = arith.constant 0 : i32
    %c0_i32_0 = arith.constant 0 : i32
    %c0_i32_1 = arith.constant 0 : i32
    return %arg0, %c0_i32, %c0_i32_0 : i32, i32, i32
  }
}

module attributes {stable_mosaic.version = 11 : i64} {
  func.func @_tap_max_kernel(%arg0: i32, %arg1: memref<9x4x128xf32, #tpu.memory_space<vmem>>, %arg2: memref<4x128xf32, #tpu.memory_space<vmem>>, %arg3: memref<1x2x128xf32, #tpu.memory_space<vmem>>) attributes {dimension_semantics = [#tpu.dimension_semantics<parallel>], iteration_bounds = array<i64: 1>, scalar_prefetch = 0 : i64, scratch_operands = 0 : i64, tpu.core_type = #tpu.core_type<tc>, window_params = [{transform_indices = @transform_0, window_bounds = array<i64: 9, 4, 128>}, {transform_indices = @transform_1, window_bounds = array<i64: 4, 128>}, {transform_indices = @transform_2, window_bounds = array<i64: 1, 2, 128>}]} {
    %c0 = arith.constant 0 : index
    %c0_0 = arith.constant 0 : index
    %c0_1 = arith.constant 0 : index
    %0 = vector.load %arg1[%c0, %c0_0, %c0_1] : memref<9x4x128xf32, #tpu.memory_space<vmem>>, vector<9x4x128xf32>
    %cst = arith.constant dense<0xFF800000> : vector<4x128xf32>
    %1 = vector.multi_reduction <maximumf>, %0, %cst [0] : vector<9x4x128xf32> to vector<4x128xf32>
    %c0_2 = arith.constant 0 : index
    %c0_3 = arith.constant 0 : index
    %2 = vector.load %arg2[%c0_2, %c0_3] : memref<4x128xf32, #tpu.memory_space<vmem>>, vector<4x128xf32>
    tpu.vector_store %arg2[%c0_2, %c0_3], %1 {strides = array<i32>} : memref<4x128xf32, #tpu.memory_space<vmem>>, vector<4x128xf32>,
    %cst_4 = arith.constant dense<0.000000e+00> : vector<128xf32>
    %3 = vector.multi_reduction <add>, %1, %cst_4 [0] : vector<4x128xf32> to vector<128xf32>
    %4 = vector.shape_cast %3 : vector<128xf32> to vector<1x128xf32>
    %5 = arith.mulf %1, %1 : vector<4x128xf32>
    %cst_5 = arith.constant dense<0.000000e+00> : vector<128xf32>
    %6 = vector.multi_reduction <add>, %5, %cst_5 [0] : vector<4x128xf32> to vector<128xf32>
    %7 = vector.shape_cast %6 : vector<128xf32> to vector<1x128xf32>
    %8 = tpu.concatenate %4, %7 in 0 : vector<1x128xf32>, vector<1x128xf32> -> vector<2x128xf32>
    %9 = vector.shape_cast %8 : vector<2x128xf32> to vector<1x2x128xf32>
    %c0_6 = arith.constant 0 : index
    %c0_7 = arith.constant 0 : index
    %c0_8 = arith.constant 0 : index
    %10 = vector.load %arg3[%c0_6, %c0_7, %c0_8] : memref<1x2x128xf32, #tpu.memory_space<vmem>>, vector<1x2x128xf32>
    tpu.vector_store %arg3[%c0_6, %c0_7, %c0_8], %9 {strides = array<i32>} : memref<1x2x128xf32, #tpu.memory_space<vmem>>, vector<1x2x128xf32>,
    return
  }
  func.func @transform_0(%arg0: i32) -> (i32, i32, i32) {
    %c0_i32 = arith.constant 0 : i32
    %c0_i32_0 = arith.constant 0 : i32
    %c0_i32_1 = arith.constant 0 : i32
    return %c0_i32, %arg0, %c0_i32_0 : i32, i32, i32
  }
  func.func @transform_1(%arg0: i32) -> (i32, i32) {
    %c0_i32 = arith.constant 0 : i32
    %c0_i32_0 = arith.constant 0 : i32
    return %arg0, %c0_i32 : i32, i32
  }
  func.func @transform_2(%arg0: i32) -> (i32, i32, i32) {
    %c0_i32 = arith.constant 0 : i32
    %c0_i32_0 = arith.constant 0 : i32
    %c0_i32_1 = arith.constant 0 : i32
    return %arg0, %c0_i32, %c0_i32_0 : i32, i32, i32
  }
}

module attributes {stable_mosaic.version = 11 : i64} {
  func.func @_mm_kernel(%arg0: i32, %arg1: memref<64x12xf32, #tpu.memory_space<vmem>>, %arg2: memref<12x8xf32, #tpu.memory_space<vmem>>, %arg3: memref<64x8xf32, #tpu.memory_space<vmem>>, %arg4: memref<1x2x8xf32, #tpu.memory_space<vmem>>) attributes {dimension_semantics = [#tpu.dimension_semantics<parallel>], iteration_bounds = array<i64: 2>, scalar_prefetch = 0 : i64, scratch_operands = 0 : i64, tpu.core_type = #tpu.core_type<tc>, window_params = [{transform_indices = @transform_0, window_bounds = array<i64: 64, 12>}, {pipeline_mode = #tpu.pipeline_mode<synchronous>, transform_indices = @transform_1, window_bounds = array<i64: 12, 8>}, {transform_indices = @transform_2, window_bounds = array<i64: 64, 8>}, {transform_indices = @transform_3, window_bounds = array<i64: 1, 2, 8>}]} {
    %c0 = arith.constant 0 : index
    %c0_0 = arith.constant 0 : index
    %0 = vector.load %arg1[%c0, %c0_0] : memref<64x12xf32, #tpu.memory_space<vmem>>, vector<64x12xf32>
    %cst = arith.constant 0.000000e+00 : f32
    %1 = vector.broadcast %cst : f32 to vector<64x12xf32>
    %2 = arith.maximumf %0, %1 : vector<64x12xf32>
    %3 = arith.truncf %2 : vector<64x12xf32> to vector<64x12xbf16>
    %c0_1 = arith.constant 0 : index
    %c0_2 = arith.constant 0 : index
    %4 = vector.load %arg2[%c0_1, %c0_2] : memref<12x8xf32, #tpu.memory_space<vmem>>, vector<12x8xf32>
    %5 = arith.truncf %4 : vector<12x8xf32> to vector<12x8xbf16>
    %cst_3 = arith.constant dense<0.000000e+00> : vector<64x8xf32>
    %6 = tpu.matmul %3, %5, %cst_3 {dimension_numbers = #tpu.dot_dimension_numbers<[1], [0], [0], [1], [0, 0, 1, 1], [], []>} : vector<64x12xbf16>, vector<12x8xbf16>, vector<64x8xf32> -> vector<64x8xf32>
    %c0_4 = arith.constant 0 : index
    %c0_5 = arith.constant 0 : index
    %7 = vector.load %arg3[%c0_4, %c0_5] : memref<64x8xf32, #tpu.memory_space<vmem>>, vector<64x8xf32>
    tpu.vector_store %arg3[%c0_4, %c0_5], %6 {strides = array<i32>} : memref<64x8xf32, #tpu.memory_space<vmem>>, vector<64x8xf32>,
    %cst_6 = arith.constant dense<0.000000e+00> : vector<8xf32>
    %8 = vector.multi_reduction <add>, %6, %cst_6 [0] : vector<64x8xf32> to vector<8xf32>
    %9 = vector.shape_cast %8 : vector<8xf32> to vector<1x8xf32>
    %10 = arith.mulf %6, %6 : vector<64x8xf32>
    %cst_7 = arith.constant dense<0.000000e+00> : vector<8xf32>
    %11 = vector.multi_reduction <add>, %10, %cst_7 [0] : vector<64x8xf32> to vector<8xf32>
    %12 = vector.shape_cast %11 : vector<8xf32> to vector<1x8xf32>
    %13 = tpu.concatenate %9, %12 in 0 : vector<1x8xf32>, vector<1x8xf32> -> vector<2x8xf32>
    %14 = vector.shape_cast %13 : vector<2x8xf32> to vector<1x2x8xf32>
    %c0_8 = arith.constant 0 : index
    %c0_9 = arith.constant 0 : index
    %c0_10 = arith.constant 0 : index
    %15 = vector.load %arg4[%c0_8, %c0_9, %c0_10] : memref<1x2x8xf32, #tpu.memory_space<vmem>>, vector<1x2x8xf32>
    tpu.vector_store %arg4[%c0_8, %c0_9, %c0_10], %14 {strides = array<i32>} : memref<1x2x8xf32, #tpu.memory_space<vmem>>, vector<1x2x8xf32>,
    return
  }
  func.func @transform_0(%arg0: i32) -> (i32, i32) {
    %c0_i32 = arith.constant 0 : i32
    %c0_i32_0 = arith.constant 0 : i32
    return %arg0, %c0_i32 : i32, i32
  }
  func.func @transform_1(%arg0: i32) -> (i32, i32) {
    %c0_i32 = arith.constant 0 : i32
    %c0_i32_0 = arith.constant 0 : i32
    %c0_i32_1 = arith.constant 0 : i32
    return %c0_i32, %c0_i32_0 : i32, i32
  }
  func.func @transform_2(%arg0: i32) -> (i32, i32) {
    %c0_i32 = arith.constant 0 : i32
    %c0_i32_0 = arith.constant 0 : i32
    return %arg0, %c0_i32 : i32, i32
  }
  func.func @transform_3(%arg0: i32) -> (i32, i32, i32) {
    %c0_i32 = arith.constant 0 : i32
    %c0_i32_0 = arith.constant 0 : i32
    %c0_i32_1 = arith.constant 0 : i32
    return %arg0, %c0_i32, %c0_i32_0 : i32, i32, i32
  }
}

module attributes {stable_mosaic.version = 11 : i64} {
  func.func @_mm_kernel(%arg0: i32, %arg1: memref<16x400xbf16, #tpu.memory_space<vmem>>, %arg2: memref<400x16xf32, #tpu.memory_space<vmem>>, %arg3: memref<16x16xf32, #tpu.memory_space<vmem>>, %arg4: memref<1x2x16xf32, #tpu.memory_space<vmem>>) attributes {dimension_semantics = [#tpu.dimension_semantics<parallel>], iteration_bounds = array<i64: 2>, scalar_prefetch = 0 : i64, scratch_operands = 0 : i64, tpu.core_type = #tpu.core_type<tc>, window_params = [{transform_indices = @transform_0, window_bounds = array<i64: 16, 400>}, {pipeline_mode = #tpu.pipeline_mode<synchronous>, transform_indices = @transform_1, window_bounds = array<i64: 400, 16>}, {transform_indices = @transform_2, window_bounds = array<i64: 16, 16>}, {transform_indices = @transform_3, window_bounds = array<i64: 1, 2, 16>}]} {
    %c0 = arith.constant 0 : index
    %c0_0 = arith.constant 0 : index
    %0 = vector.load %arg1[%c0, %c0_0] : memref<16x400xbf16, #tpu.memory_space<vmem>>, vector<16x400xbf16>
    %c0_1 = arith.constant 0 : index
    %c0_2 = arith.constant 0 : index
    %1 = vector.load %arg2[%c0_1, %c0_2] : memref<400x16xf32, #tpu.memory_space<vmem>>, vector<400x16xf32>
    %2 = arith.truncf %1 : vector<400x16xf32> to vector<400x16xbf16>
    %cst = arith.constant dense<0.000000e+00> : vector<16x16xf32>
    %3 = tpu.matmul %0, %2, %cst {dimension_numbers = #tpu.dot_dimension_numbers<[1], [0], [0], [1], [0, 0, 1, 1], [], []>} : vector<16x400xbf16>, vector<400x16xbf16>, vector<16x16xf32> -> vector<16x16xf32>
    %c0_3 = arith.constant 0 : index
    %c0_4 = arith.constant 0 : index
    %4 = vector.load %arg3[%c0_3, %c0_4] : memref<16x16xf32, #tpu.memory_space<vmem>>, vector<16x16xf32>
    tpu.vector_store %arg3[%c0_3, %c0_4], %3 {strides = array<i32>} : memref<16x16xf32, #tpu.memory_space<vmem>>, vector<16x16xf32>,
    %cst_5 = arith.constant dense<0.000000e+00> : vector<16xf32>
    %5 = vector.multi_reduction <add>, %3, %cst_5 [0] : vector<16x16xf32> to vector<16xf32>
    %6 = vector.shape_cast %5 : vector<16xf32> to vector<1x16xf32>
    %7 = arith.mulf %3, %3 : vector<16x16xf32>
    %cst_6 = arith.constant dense<0.000000e+00> : vector<16xf32>
    %8 = vector.multi_reduction <add>, %7, %cst_6 [0] : vector<16x16xf32> to vector<16xf32>
    %9 = vector.shape_cast %8 : vector<16xf32> to vector<1x16xf32>
    %10 = tpu.concatenate %6, %9 in 0 : vector<1x16xf32>, vector<1x16xf32> -> vector<2x16xf32>
    %11 = vector.shape_cast %10 : vector<2x16xf32> to vector<1x2x16xf32>
    %c0_7 = arith.constant 0 : index
    %c0_8 = arith.constant 0 : index
    %c0_9 = arith.constant 0 : index
    %12 = vector.load %arg4[%c0_7, %c0_8, %c0_9] : memref<1x2x16xf32, #tpu.memory_space<vmem>>, vector<1x2x16xf32>
    tpu.vector_store %arg4[%c0_7, %c0_8, %c0_9], %11 {strides = array<i32>} : memref<1x2x16xf32, #tpu.memory_space<vmem>>, vector<1x2x16xf32>,
    return
  }
  func.func @transform_0(%arg0: i32) -> (i32, i32) {
    %c0_i32 = arith.constant 0 : i32
    %c0_i32_0 = arith.constant 0 : i32
    return %arg0, %c0_i32 : i32, i32
  }
  func.func @transform_1(%arg0: i32) -> (i32, i32) {
    %c0_i32 = arith.constant 0 : i32
    %c0_i32_0 = arith.constant 0 : i32
    %c0_i32_1 = arith.constant 0 : i32
    return %c0_i32, %c0_i32_0 : i32, i32
  }
  func.func @transform_2(%arg0: i32) -> (i32, i32) {
    %c0_i32 = arith.constant 0 : i32
    %c0_i32_0 = arith.constant 0 : i32
    return %arg0, %c0_i32 : i32, i32
  }
  func.func @transform_3(%arg0: i32) -> (i32, i32, i32) {
    %c0_i32 = arith.constant 0 : i32
    %c0_i32_0 = arith.constant 0 : i32
    %c0_i32_1 = arith.constant 0 : i32
    return %arg0, %c0_i32, %c0_i32_0 : i32, i32, i32
  }
}

module attributes {stable_mosaic.version = 11 : i64} {
  func.func @_mm_kernel(%arg0: i32, %arg1: memref<16x144xbf16, #tpu.memory_space<vmem>>, %arg2: memref<144x16xf32, #tpu.memory_space<vmem>>, %arg3: memref<16x16xf32, #tpu.memory_space<vmem>>, %arg4: memref<1x2x16xf32, #tpu.memory_space<vmem>>) attributes {dimension_semantics = [#tpu.dimension_semantics<parallel>], iteration_bounds = array<i64: 2>, scalar_prefetch = 0 : i64, scratch_operands = 0 : i64, tpu.core_type = #tpu.core_type<tc>, window_params = [{transform_indices = @transform_0, window_bounds = array<i64: 16, 144>}, {pipeline_mode = #tpu.pipeline_mode<synchronous>, transform_indices = @transform_1, window_bounds = array<i64: 144, 16>}, {transform_indices = @transform_2, window_bounds = array<i64: 16, 16>}, {transform_indices = @transform_3, window_bounds = array<i64: 1, 2, 16>}]} {
    %c0 = arith.constant 0 : index
    %c0_0 = arith.constant 0 : index
    %0 = vector.load %arg1[%c0, %c0_0] : memref<16x144xbf16, #tpu.memory_space<vmem>>, vector<16x144xbf16>
    %c0_1 = arith.constant 0 : index
    %c0_2 = arith.constant 0 : index
    %1 = vector.load %arg2[%c0_1, %c0_2] : memref<144x16xf32, #tpu.memory_space<vmem>>, vector<144x16xf32>
    %2 = arith.truncf %1 : vector<144x16xf32> to vector<144x16xbf16>
    %cst = arith.constant dense<0.000000e+00> : vector<16x16xf32>
    %3 = tpu.matmul %0, %2, %cst {dimension_numbers = #tpu.dot_dimension_numbers<[1], [0], [0], [1], [0, 0, 1, 1], [], []>} : vector<16x144xbf16>, vector<144x16xbf16>, vector<16x16xf32> -> vector<16x16xf32>
    %c0_3 = arith.constant 0 : index
    %c0_4 = arith.constant 0 : index
    %4 = vector.load %arg3[%c0_3, %c0_4] : memref<16x16xf32, #tpu.memory_space<vmem>>, vector<16x16xf32>
    tpu.vector_store %arg3[%c0_3, %c0_4], %3 {strides = array<i32>} : memref<16x16xf32, #tpu.memory_space<vmem>>, vector<16x16xf32>,
    %cst_5 = arith.constant dense<0.000000e+00> : vector<16xf32>
    %5 = vector.multi_reduction <add>, %3, %cst_5 [0] : vector<16x16xf32> to vector<16xf32>
    %6 = vector.shape_cast %5 : vector<16xf32> to vector<1x16xf32>
    %7 = arith.mulf %3, %3 : vector<16x16xf32>
    %cst_6 = arith.constant dense<0.000000e+00> : vector<16xf32>
    %8 = vector.multi_reduction <add>, %7, %cst_6 [0] : vector<16x16xf32> to vector<16xf32>
    %9 = vector.shape_cast %8 : vector<16xf32> to vector<1x16xf32>
    %10 = tpu.concatenate %6, %9 in 0 : vector<1x16xf32>, vector<1x16xf32> -> vector<2x16xf32>
    %11 = vector.shape_cast %10 : vector<2x16xf32> to vector<1x2x16xf32>
    %c0_7 = arith.constant 0 : index
    %c0_8 = arith.constant 0 : index
    %c0_9 = arith.constant 0 : index
    %12 = vector.load %arg4[%c0_7, %c0_8, %c0_9] : memref<1x2x16xf32, #tpu.memory_space<vmem>>, vector<1x2x16xf32>
    tpu.vector_store %arg4[%c0_7, %c0_8, %c0_9], %11 {strides = array<i32>} : memref<1x2x16xf32, #tpu.memory_space<vmem>>, vector<1x2x16xf32>,
    return
  }
  func.func @transform_0(%arg0: i32) -> (i32, i32) {
    %c0_i32 = arith.constant 0 : i32
    %c0_i32_0 = arith.constant 0 : i32
    return %arg0, %c0_i32 : i32, i32
  }
  func.func @transform_1(%arg0: i32) -> (i32, i32) {
    %c0_i32 = arith.constant 0 : i32
    %c0_i32_0 = arith.constant 0 : i32
    %c0_i32_1 = arith.constant 0 : i32
    return %c0_i32, %c0_i32_0 : i32, i32
  }
  func.func @transform_2(%arg0: i32) -> (i32, i32) {
    %c0_i32 = arith.constant 0 : i32
    %c0_i32_0 = arith.constant 0 : i32
    return %arg0, %c0_i32 : i32, i32
  }
  func.func @transform_3(%arg0: i32) -> (i32, i32, i32) {
    %c0_i32 = arith.constant 0 : i32
    %c0_i32_0 = arith.constant 0 : i32
    %c0_i32_1 = arith.constant 0 : i32
    return %arg0, %c0_i32, %c0_i32_0 : i32, i32, i32
  }
}

module attributes {stable_mosaic.version = 11 : i64} {
  func.func @_affine_kernel(%arg0: i32, %arg1: memref<4x128xf32, #tpu.memory_space<vmem>>, %arg2: memref<1x128xf32, #tpu.memory_space<vmem>>, %arg3: memref<1x128xf32, #tpu.memory_space<vmem>>, %arg4: memref<4x128xf32, #tpu.memory_space<vmem>>) attributes {dimension_semantics = [#tpu.dimension_semantics<parallel>], iteration_bounds = array<i64: 1>, scalar_prefetch = 0 : i64, scratch_operands = 0 : i64, tpu.core_type = #tpu.core_type<tc>, window_params = [{transform_indices = @transform_0, window_bounds = array<i64: 4, 128>}, {pipeline_mode = #tpu.pipeline_mode<synchronous>, transform_indices = @transform_1, window_bounds = array<i64: 1, 128>}, {pipeline_mode = #tpu.pipeline_mode<synchronous>, transform_indices = @transform_2, window_bounds = array<i64: 1, 128>}, {transform_indices = @transform_3, window_bounds = array<i64: 4, 128>}]} {
    %c0 = arith.constant 0 : index
    %c0_0 = arith.constant 0 : index
    %0 = vector.load %arg1[%c0, %c0_0] : memref<4x128xf32, #tpu.memory_space<vmem>>, vector<4x128xf32>
    %c0_1 = arith.constant 0 : index
    %c0_2 = arith.constant 0 : index
    %1 = vector.load %arg2[%c0_1, %c0_2] : memref<1x128xf32, #tpu.memory_space<vmem>>, vector<1x128xf32>
    %2 = vector.broadcast %1 : vector<1x128xf32> to vector<4x128xf32>
    %3 = arith.mulf %0, %2 : vector<4x128xf32>
    %c0_3 = arith.constant 0 : index
    %c0_4 = arith.constant 0 : index
    %4 = vector.load %arg3[%c0_3, %c0_4] : memref<1x128xf32, #tpu.memory_space<vmem>>, vector<1x128xf32>
    %5 = vector.broadcast %4 : vector<1x128xf32> to vector<4x128xf32>
    %6 = arith.addf %3, %5 : vector<4x128xf32>
    %c0_5 = arith.constant 0 : index
    %c0_6 = arith.constant 0 : index
    %7 = vector.load %arg4[%c0_5, %c0_6] : memref<4x128xf32, #tpu.memory_space<vmem>>, vector<4x128xf32>
    tpu.vector_store %arg4[%c0_5, %c0_6], %6 {strides = array<i32>} : memref<4x128xf32, #tpu.memory_space<vmem>>, vector<4x128xf32>,
    return
  }
  func.func @transform_0(%arg0: i32) -> (i32, i32) {
    %c0_i32 = arith.constant 0 : i32
    %c0_i32_0 = arith.constant 0 : i32
    return %arg0, %c0_i32 : i32, i32
  }
  func.func @transform_1(%arg0: i32) -> (i32, i32) {
    %c0_i32 = arith.constant 0 : i32
    %c0_i32_0 = arith.constant 0 : i32
    %c0_i32_1 = arith.constant 0 : i32
    return %c0_i32, %c0_i32_0 : i32, i32
  }
  func.func @transform_2(%arg0: i32) -> (i32, i32) {
    %c0_i32 = arith.constant 0 : i32
    %c0_i32_0 = arith.constant 0 : i32
    %c0_i32_1 = arith.constant 0 : i32
    return %c0_i32, %c0_i32_0 : i32, i32
  }
  func.func @transform_3(%arg0: i32) -> (i32, i32) {
    %c0_i32 = arith.constant 0 : i32
    %c0_i32_0 = arith.constant 0 : i32
    return %arg0, %c0_i32 : i32, i32
  }
}

module attributes {stable_mosaic.version = 11 : i64} {
  func.func @_edge_sum_kernel(%arg0: i32, %arg1: memref<14x128xf32, #tpu.memory_space<vmem>>, %arg2: memref<1x128xf32, #tpu.memory_space<vmem>>, %arg3: memref<4x128xf32, #tpu.memory_space<vmem>>, %arg4: memref<4x128xf32, #tpu.memory_space<vmem>>, %arg5: memref<4x128xf32, #tpu.memory_space<vmem>>, %arg6: memref<4x128xf32, #tpu.memory_space<vmem>>, %arg7: memref<4x128xf32, #tpu.memory_space<vmem>>, %arg8: memref<4x128xf32, #tpu.memory_space<vmem>>, %arg9: memref<4x128xf32, #tpu.memory_space<vmem>>, %arg10: memref<4x128xf32, #tpu.memory_space<vmem>>, %arg11: memref<4x128xf32, #tpu.memory_space<vmem>>, %arg12: memref<4x128xf32, #tpu.memory_space<vmem>>, %arg13: memref<4x128xf32, #tpu.memory_space<vmem>>, %arg14: memref<4x128xf32, #tpu.memory_space<vmem>>, %arg15: memref<4x128xf32, #tpu.memory_space<vmem>>, %arg16: memref<4x128xf32, #tpu.memory_space<vmem>>, %arg17: memref<4x128xf32, #tpu.memory_space<vmem>>) attributes {dimension_semantics = [#tpu.dimension_semantics<parallel>], iteration_bounds = array<i64: 1>, scalar_prefetch = 0 : i64, scratch_operands = 0 : i64, tpu.core_type = #tpu.core_type<tc>, window_params = [{pipeline_mode = #tpu.pipeline_mode<synchronous>, transform_indices = @transform_0, window_bounds = array<i64: 14, 128>}, {pipeline_mode = #tpu.pipeline_mode<synchronous>, transform_indices = @transform_1, window_bounds = array<i64: 1, 128>}, {transform_indices = @transform_2, window_bounds = array<i64: 4, 128>}, {transform_indices = @transform_3, window_bounds = array<i64: 4, 128>}, {transform_indices = @transform_4, window_bounds = array<i64: 4, 128>}, {transform_indices = @transform_5, window_bounds = array<i64: 4, 128>}, {transform_indices = @transform_6, window_bounds = array<i64: 4, 128>}, {transform_indices = @transform_7, window_bounds = array<i64: 4, 128>}, {transform_indices = @transform_8, window_bounds = array<i64: 4, 128>}, {transform_indices = @transform_9, window_bounds = array<i64: 4, 128>}, {transform_indices = @transform_10, window_bounds = array<i64: 4, 128>}, {transform_indices = @transform_11, window_bounds = array<i64: 4, 128>}, {transform_indices = @transform_12, window_bounds = array<i64: 4, 128>}, {transform_indices = @transform_13, window_bounds = array<i64: 4, 128>}, {transform_indices = @transform_14, window_bounds = array<i64: 4, 128>}, {transform_indices = @transform_15, window_bounds = array<i64: 4, 128>}, {transform_indices = @transform_16, window_bounds = array<i64: 4, 128>}]} {
    %c0 = arith.constant 0 : index
    %c0_0 = arith.constant 0 : index
    %0 = vector.load %arg1[%c0, %c0_0] : memref<14x128xf32, #tpu.memory_space<vmem>>, vector<14x128xf32>
    %c0_1 = arith.constant 0 : index
    %c0_2 = arith.constant 0 : index
    %1 = vector.load %arg3[%c0_1, %c0_2] : memref<4x128xf32, #tpu.memory_space<vmem>>, vector<4x128xf32>
    %2 = vector.extract_strided_slice %0 {offsets = [0, 0], sizes = [1, 128], strides = [1, 1]} : vector<14x128xf32> to vector<1x128xf32>
    %3 = vector.broadcast %2 : vector<1x128xf32> to vector<4x128xf32>
    %4 = arith.mulf %1, %3 : vector<4x128xf32>
    %c0_3 = arith.constant 0 : index
    %c0_4 = arith.constant 0 : index
    %5 = vector.load %arg4[%c0_3, %c0_4] : memref<4x128xf32, #tpu.memory_space<vmem>>, vector<4x128xf32>
    %6 = vector.extract_strided_slice %0 {offsets = [1, 0], sizes = [1, 128], strides = [1, 1]} : vector<14x128xf32> to vector<1x128xf32>
    %7 = vector.broadcast %6 : vector<1x128xf32> to vector<4x128xf32>
    %8 = arith.mulf %5, %7 : vector<4x128xf32>
    %9 = arith.addf %4, %8 : vector<4x128xf32>
    %c0_5 = arith.constant 0 : index
    %c0_6 = arith.constant 0 : index
    %10 = vector.load %arg5[%c0_5, %c0_6] : memref<4x128xf32, #tpu.memory_space<vmem>>, vector<4x128xf32>
    %11 = vector.extract_strided_slice %0 {offsets = [2, 0], sizes = [1, 128], strides = [1, 1]} : vector<14x128xf32> to vector<1x128xf32>
    %12 = vector.broadcast %11 : vector<1x128xf32> to vector<4x128xf32>
    %13 = arith.mulf %10, %12 : vector<4x128xf32>
    %14 = arith.addf %9, %13 : vector<4x128xf32>
    %c0_7 = arith.constant 0 : index
    %c0_8 = arith.constant 0 : index
    %15 = vector.load %arg6[%c0_7, %c0_8] : memref<4x128xf32, #tpu.memory_space<vmem>>, vector<4x128xf32>
    %16 = vector.extract_strided_slice %0 {offsets = [3, 0], sizes = [1, 128], strides = [1, 1]} : vector<14x128xf32> to vector<1x128xf32>
    %17 = vector.broadcast %16 : vector<1x128xf32> to vector<4x128xf32>
    %18 = arith.mulf %15, %17 : vector<4x128xf32>
    %19 = arith.addf %14, %18 : vector<4x128xf32>
    %c0_9 = arith.constant 0 : index
    %c0_10 = arith.constant 0 : index
    %20 = vector.load %arg7[%c0_9, %c0_10] : memref<4x128xf32, #tpu.memory_space<vmem>>, vector<4x128xf32>
    %21 = vector.extract_strided_slice %0 {offsets = [4, 0], sizes = [1, 128], strides = [1, 1]} : vector<14x128xf32> to vector<1x128xf32>
    %22 = vector.broadcast %21 : vector<1x128xf32> to vector<4x128xf32>
    %23 = arith.mulf %20, %22 : vector<4x128xf32>
    %24 = arith.addf %19, %23 : vector<4x128xf32>
    %c0_11 = arith.constant 0 : index
    %c0_12 = arith.constant 0 : index
    %25 = vector.load %arg8[%c0_11, %c0_12] : memref<4x128xf32, #tpu.memory_space<vmem>>, vector<4x128xf32>
    %26 = vector.extract_strided_slice %0 {offsets = [5, 0], sizes = [1, 128], strides = [1, 1]} : vector<14x128xf32> to vector<1x128xf32>
    %27 = vector.broadcast %26 : vector<1x128xf32> to vector<4x128xf32>
    %28 = arith.mulf %25, %27 : vector<4x128xf32>
    %29 = arith.addf %24, %28 : vector<4x128xf32>
    %c0_13 = arith.constant 0 : index
    %c0_14 = arith.constant 0 : index
    %30 = vector.load %arg9[%c0_13, %c0_14] : memref<4x128xf32, #tpu.memory_space<vmem>>, vector<4x128xf32>
    %31 = vector.extract_strided_slice %0 {offsets = [6, 0], sizes = [1, 128], strides = [1, 1]} : vector<14x128xf32> to vector<1x128xf32>
    %32 = vector.broadcast %31 : vector<1x128xf32> to vector<4x128xf32>
    %33 = arith.mulf %30, %32 : vector<4x128xf32>
    %34 = arith.addf %29, %33 : vector<4x128xf32>
    %c0_15 = arith.constant 0 : index
    %c0_16 = arith.constant 0 : index
    %35 = vector.load %arg10[%c0_15, %c0_16] : memref<4x128xf32, #tpu.memory_space<vmem>>, vector<4x128xf32>
    %36 = vector.extract_strided_slice %0 {offsets = [7, 0], sizes = [1, 128], strides = [1, 1]} : vector<14x128xf32> to vector<1x128xf32>
    %37 = vector.broadcast %36 : vector<1x128xf32> to vector<4x128xf32>
    %38 = arith.mulf %35, %37 : vector<4x128xf32>
    %39 = arith.addf %34, %38 : vector<4x128xf32>
    %c0_17 = arith.constant 0 : index
    %c0_18 = arith.constant 0 : index
    %40 = vector.load %arg11[%c0_17, %c0_18] : memref<4x128xf32, #tpu.memory_space<vmem>>, vector<4x128xf32>
    %41 = vector.extract_strided_slice %0 {offsets = [8, 0], sizes = [1, 128], strides = [1, 1]} : vector<14x128xf32> to vector<1x128xf32>
    %42 = vector.broadcast %41 : vector<1x128xf32> to vector<4x128xf32>
    %43 = arith.mulf %40, %42 : vector<4x128xf32>
    %44 = arith.addf %39, %43 : vector<4x128xf32>
    %c0_19 = arith.constant 0 : index
    %c0_20 = arith.constant 0 : index
    %45 = vector.load %arg12[%c0_19, %c0_20] : memref<4x128xf32, #tpu.memory_space<vmem>>, vector<4x128xf32>
    %46 = vector.extract_strided_slice %0 {offsets = [9, 0], sizes = [1, 128], strides = [1, 1]} : vector<14x128xf32> to vector<1x128xf32>
    %47 = vector.broadcast %46 : vector<1x128xf32> to vector<4x128xf32>
    %48 = arith.mulf %45, %47 : vector<4x128xf32>
    %49 = arith.addf %44, %48 : vector<4x128xf32>
    %c0_21 = arith.constant 0 : index
    %c0_22 = arith.constant 0 : index
    %50 = vector.load %arg13[%c0_21, %c0_22] : memref<4x128xf32, #tpu.memory_space<vmem>>, vector<4x128xf32>
    %51 = vector.extract_strided_slice %0 {offsets = [10, 0], sizes = [1, 128], strides = [1, 1]} : vector<14x128xf32> to vector<1x128xf32>
    %52 = vector.broadcast %51 : vector<1x128xf32> to vector<4x128xf32>
    %53 = arith.mulf %50, %52 : vector<4x128xf32>
    %54 = arith.addf %49, %53 : vector<4x128xf32>
    %c0_23 = arith.constant 0 : index
    %c0_24 = arith.constant 0 : index
    %55 = vector.load %arg14[%c0_23, %c0_24] : memref<4x128xf32, #tpu.memory_space<vmem>>, vector<4x128xf32>
    %56 = vector.extract_strided_slice %0 {offsets = [11, 0], sizes = [1, 128], strides = [1, 1]} : vector<14x128xf32> to vector<1x128xf32>
    %57 = vector.broadcast %56 : vector<1x128xf32> to vector<4x128xf32>
    %58 = arith.mulf %55, %57 : vector<4x128xf32>
    %59 = arith.addf %54, %58 : vector<4x128xf32>
    %c0_25 = arith.constant 0 : index
    %c0_26 = arith.constant 0 : index
    %60 = vector.load %arg15[%c0_25, %c0_26] : memref<4x128xf32, #tpu.memory_space<vmem>>, vector<4x128xf32>
    %61 = vector.extract_strided_slice %0 {offsets = [12, 0], sizes = [1, 128], strides = [1, 1]} : vector<14x128xf32> to vector<1x128xf32>
    %62 = vector.broadcast %61 : vector<1x128xf32> to vector<4x128xf32>
    %63 = arith.mulf %60, %62 : vector<4x128xf32>
    %64 = arith.addf %59, %63 : vector<4x128xf32>
    %c0_27 = arith.constant 0 : index
    %c0_28 = arith.constant 0 : index
    %65 = vector.load %arg16[%c0_27, %c0_28] : memref<4x128xf32, #tpu.memory_space<vmem>>, vector<4x128xf32>
    %66 = vector.extract_strided_slice %0 {offsets = [13, 0], sizes = [1, 128], strides = [1, 1]} : vector<14x128xf32> to vector<1x128xf32>
    %67 = vector.broadcast %66 : vector<1x128xf32> to vector<4x128xf32>
    %68 = arith.mulf %65, %67 : vector<4x128xf32>
    %69 = arith.addf %64, %68 : vector<4x128xf32>
    %c0_29 = arith.constant 0 : index
    %c0_30 = arith.constant 0 : index
    %70 = vector.load %arg2[%c0_29, %c0_30] : memref<1x128xf32, #tpu.memory_space<vmem>>, vector<1x128xf32>
    %71 = vector.broadcast %70 : vector<1x128xf32> to vector<4x128xf32>
    %72 = arith.addf %69, %71 : vector<4x128xf32>
    %c0_31 = arith.constant 0 : index
    %c0_32 = arith.constant 0 : index
    %73 = vector.load %arg17[%c0_31, %c0_32] : memref<4x128xf32, #tpu.memory_space<vmem>>, vector<4x128xf32>
    tpu.vector_store %arg17[%c0_31, %c0_32], %72 {strides = array<i32>} : memref<4x128xf32, #tpu.memory_space<vmem>>, vector<4x128xf32>,
    return
  }
  func.func @transform_0(%arg0: i32) -> (i32, i32) {
    %c0_i32 = arith.constant 0 : i32
    %c0_i32_0 = arith.constant 0 : i32
    %c0_i32_1 = arith.constant 0 : i32
    return %c0_i32, %c0_i32_0 : i32, i32
  }
  func.func @transform_1(%arg0: i32) -> (i32, i32) {
    %c0_i32 = arith.constant 0 : i32
    %c0_i32_0 = arith.constant 0 : i32
    %c0_i32_1 = arith.constant 0 : i32
    return %c0_i32, %c0_i32_0 : i32, i32
  }
  func.func @transform_2(%arg0: i32) -> (i32, i32) {
    %c0_i32 = arith.constant 0 : i32
    %c0_i32_0 = arith.constant 0 : i32
    return %arg0, %c0_i32 : i32, i32
  }
  func.func @transform_3(%arg0: i32) -> (i32, i32) {
    %c0_i32 = arith.constant 0 : i32
    %c0_i32_0 = arith.constant 0 : i32
    return %arg0, %c0_i32 : i32, i32
  }
  func.func @transform_4(%arg0: i32) -> (i32, i32) {
    %c0_i32 = arith.constant 0 : i32
    %c0_i32_0 = arith.constant 0 : i32
    return %arg0, %c0_i32 : i32, i32
  }
  func.func @transform_5(%arg0: i32) -> (i32, i32) {
    %c0_i32 = arith.constant 0 : i32
    %c0_i32_0 = arith.constant 0 : i32
    return %arg0, %c0_i32 : i32, i32
  }
  func.func @transform_6(%arg0: i32) -> (i32, i32) {
    %c0_i32 = arith.constant 0 : i32
    %c0_i32_0 = arith.constant 0 : i32
    return %arg0, %c0_i32 : i32, i32
  }
  func.func @transform_7(%arg0: i32) -> (i32, i32) {
    %c0_i32 = arith.constant 0 : i32
    %c0_i32_0 = arith.constant 0 : i32
    return %arg0, %c0_i32 : i32, i32
  }
  func.func @transform_8(%arg0: i32) -> (i32, i32) {
    %c0_i32 = arith.constant 0 : i32
    %c0_i32_0 = arith.constant 0 : i32
    return %arg0, %c0_i32 : i32, i32
  }
  func.func @transform_9(%arg0: i32) -> (i32, i32) {
    %c0_i32 = arith.constant 0 : i32
    %c0_i32_0 = arith.constant 0 : i32
    return %arg0, %c0_i32 : i32, i32
  }
  func.func @transform_10(%arg0: i32) -> (i32, i32) {
    %c0_i32 = arith.constant 0 : i32
    %c0_i32_0 = arith.constant 0 : i32
    return %arg0, %c0_i32 : i32, i32
  }
  func.func @transform_11(%arg0: i32) -> (i32, i32) {
    %c0_i32 = arith.constant 0 : i32
    %c0_i32_0 = arith.constant 0 : i32
    return %arg0, %c0_i32 : i32, i32
  }
  func.func @transform_12(%arg0: i32) -> (i32, i32) {
    %c0_i32 = arith.constant 0 : i32
    %c0_i32_0 = arith.constant 0 : i32
    return %arg0, %c0_i32 : i32, i32
  }
  func.func @transform_13(%arg0: i32) -> (i32, i32) {
    %c0_i32 = arith.constant 0 : i32
    %c0_i32_0 = arith.constant 0 : i32
    return %arg0, %c0_i32 : i32, i32
  }
  func.func @transform_14(%arg0: i32) -> (i32, i32) {
    %c0_i32 = arith.constant 0 : i32
    %c0_i32_0 = arith.constant 0 : i32
    return %arg0, %c0_i32 : i32, i32
  }
  func.func @transform_15(%arg0: i32) -> (i32, i32) {
    %c0_i32 = arith.constant 0 : i32
    %c0_i32_0 = arith.constant 0 : i32
    return %arg0, %c0_i32 : i32, i32
  }
  func.func @transform_16(%arg0: i32) -> (i32, i32) {
    %c0_i32 = arith.constant 0 : i32
    %c0_i32_0 = arith.constant 0 : i32
    return %arg0, %c0_i32 : i32, i32
  }
}

module attributes {stable_mosaic.version = 11 : i64} {
  func.func @_edge_sum_kernel(%arg0: i32, %arg1: memref<21x128xf32, #tpu.memory_space<vmem>>, %arg2: memref<1x128xf32, #tpu.memory_space<vmem>>, %arg3: memref<4x128xf32, #tpu.memory_space<vmem>>, %arg4: memref<4x128xf32, #tpu.memory_space<vmem>>, %arg5: memref<4x128xf32, #tpu.memory_space<vmem>>, %arg6: memref<4x128xf32, #tpu.memory_space<vmem>>, %arg7: memref<4x128xf32, #tpu.memory_space<vmem>>, %arg8: memref<4x128xf32, #tpu.memory_space<vmem>>, %arg9: memref<4x128xf32, #tpu.memory_space<vmem>>, %arg10: memref<4x128xf32, #tpu.memory_space<vmem>>, %arg11: memref<4x128xf32, #tpu.memory_space<vmem>>, %arg12: memref<4x128xf32, #tpu.memory_space<vmem>>, %arg13: memref<4x128xf32, #tpu.memory_space<vmem>>, %arg14: memref<4x128xf32, #tpu.memory_space<vmem>>, %arg15: memref<4x128xf32, #tpu.memory_space<vmem>>, %arg16: memref<4x128xf32, #tpu.memory_space<vmem>>, %arg17: memref<4x128xf32, #tpu.memory_space<vmem>>, %arg18: memref<4x128xf32, #tpu.memory_space<vmem>>, %arg19: memref<4x128xf32, #tpu.memory_space<vmem>>, %arg20: memref<4x128xf32, #tpu.memory_space<vmem>>, %arg21: memref<4x128xf32, #tpu.memory_space<vmem>>, %arg22: memref<4x128xf32, #tpu.memory_space<vmem>>, %arg23: memref<4x128xf32, #tpu.memory_space<vmem>>, %arg24: memref<4x128xf32, #tpu.memory_space<vmem>>) attributes {dimension_semantics = [#tpu.dimension_semantics<parallel>], iteration_bounds = array<i64: 1>, scalar_prefetch = 0 : i64, scratch_operands = 0 : i64, tpu.core_type = #tpu.core_type<tc>, window_params = [{pipeline_mode = #tpu.pipeline_mode<synchronous>, transform_indices = @transform_0, window_bounds = array<i64: 21, 128>}, {pipeline_mode = #tpu.pipeline_mode<synchronous>, transform_indices = @transform_1, window_bounds = array<i64: 1, 128>}, {transform_indices = @transform_2, window_bounds = array<i64: 4, 128>}, {transform_indices = @transform_3, window_bounds = array<i64: 4, 128>}, {transform_indices = @transform_4, window_bounds = array<i64: 4, 128>}, {transform_indices = @transform_5, window_bounds = array<i64: 4, 128>}, {transform_indices = @transform_6, window_bounds = array<i64: 4, 128>}, {transform_indices = @transform_7, window_bounds = array<i64: 4, 128>}, {transform_indices = @transform_8, window_bounds = array<i64: 4, 128>}, {transform_indices = @transform_9, window_bounds = array<i64: 4, 128>}, {transform_indices = @transform_10, window_bounds = array<i64: 4, 128>}, {transform_indices = @transform_11, window_bounds = array<i64: 4, 128>}, {transform_indices = @transform_12, window_bounds = array<i64: 4, 128>}, {transform_indices = @transform_13, window_bounds = array<i64: 4, 128>}, {transform_indices = @transform_14, window_bounds = array<i64: 4, 128>}, {transform_indices = @transform_15, window_bounds = array<i64: 4, 128>}, {transform_indices = @transform_16, window_bounds = array<i64: 4, 128>}, {transform_indices = @transform_17, window_bounds = array<i64: 4, 128>}, {transform_indices = @transform_18, window_bounds = array<i64: 4, 128>}, {transform_indices = @transform_19, window_bounds = array<i64: 4, 128>}, {transform_indices = @transform_20, window_bounds = array<i64: 4, 128>}, {transform_indices = @transform_21, window_bounds = array<i64: 4, 128>}, {transform_indices = @transform_22, window_bounds = array<i64: 4, 128>}, {transform_indices = @transform_23, window_bounds = array<i64: 4, 128>}]} {
    %c0 = arith.constant 0 : index
    %c0_0 = arith.constant 0 : index
    %0 = vector.load %arg1[%c0, %c0_0] : memref<21x128xf32, #tpu.memory_space<vmem>>, vector<21x128xf32>
    %c0_1 = arith.constant 0 : index
    %c0_2 = arith.constant 0 : index
    %1 = vector.load %arg3[%c0_1, %c0_2] : memref<4x128xf32, #tpu.memory_space<vmem>>, vector<4x128xf32>
    %2 = vector.extract_strided_slice %0 {offsets = [0, 0], sizes = [1, 128], strides = [1, 1]} : vector<21x128xf32> to vector<1x128xf32>
    %3 = vector.broadcast %2 : vector<1x128xf32> to vector<4x128xf32>
    %4 = arith.mulf %1, %3 : vector<4x128xf32>
    %c0_3 = arith.constant 0 : index
    %c0_4 = arith.constant 0 : index
    %5 = vector.load %arg4[%c0_3, %c0_4] : memref<4x128xf32, #tpu.memory_space<vmem>>, vector<4x128xf32>
    %6 = vector.extract_strided_slice %0 {offsets = [1, 0], sizes = [1, 128], strides = [1, 1]} : vector<21x128xf32> to vector<1x128xf32>
    %7 = vector.broadcast %6 : vector<1x128xf32> to vector<4x128xf32>
    %8 = arith.mulf %5, %7 : vector<4x128xf32>
    %9 = arith.addf %4, %8 : vector<4x128xf32>
    %c0_5 = arith.constant 0 : index
    %c0_6 = arith.constant 0 : index
    %10 = vector.load %arg5[%c0_5, %c0_6] : memref<4x128xf32, #tpu.memory_space<vmem>>, vector<4x128xf32>
    %11 = vector.extract_strided_slice %0 {offsets = [2, 0], sizes = [1, 128], strides = [1, 1]} : vector<21x128xf32> to vector<1x128xf32>
    %12 = vector.broadcast %11 : vector<1x128xf32> to vector<4x128xf32>
    %13 = arith.mulf %10, %12 : vector<4x128xf32>
    %14 = arith.addf %9, %13 : vector<4x128xf32>
    %c0_7 = arith.constant 0 : index
    %c0_8 = arith.constant 0 : index
    %15 = vector.load %arg6[%c0_7, %c0_8] : memref<4x128xf32, #tpu.memory_space<vmem>>, vector<4x128xf32>
    %16 = vector.extract_strided_slice %0 {offsets = [3, 0], sizes = [1, 128], strides = [1, 1]} : vector<21x128xf32> to vector<1x128xf32>
    %17 = vector.broadcast %16 : vector<1x128xf32> to vector<4x128xf32>
    %18 = arith.mulf %15, %17 : vector<4x128xf32>
    %19 = arith.addf %14, %18 : vector<4x128xf32>
    %c0_9 = arith.constant 0 : index
    %c0_10 = arith.constant 0 : index
    %20 = vector.load %arg7[%c0_9, %c0_10] : memref<4x128xf32, #tpu.memory_space<vmem>>, vector<4x128xf32>
    %21 = vector.extract_strided_slice %0 {offsets = [4, 0], sizes = [1, 128], strides = [1, 1]} : vector<21x128xf32> to vector<1x128xf32>
    %22 = vector.broadcast %21 : vector<1x128xf32> to vector<4x128xf32>
    %23 = arith.mulf %20, %22 : vector<4x128xf32>
    %24 = arith.addf %19, %23 : vector<4x128xf32>
    %c0_11 = arith.constant 0 : index
    %c0_12 = arith.constant 0 : index
    %25 = vector.load %arg8[%c0_11, %c0_12] : memref<4x128xf32, #tpu.memory_space<vmem>>, vector<4x128xf32>
    %26 = vector.extract_strided_slice %0 {offsets = [5, 0], sizes = [1, 128], strides = [1, 1]} : vector<21x128xf32> to vector<1x128xf32>
    %27 = vector.broadcast %26 : vector<1x128xf32> to vector<4x128xf32>
    %28 = arith.mulf %25, %27 : vector<4x128xf32>
    %29 = arith.addf %24, %28 : vector<4x128xf32>
    %c0_13 = arith.constant 0 : index
    %c0_14 = arith.constant 0 : index
    %30 = vector.load %arg9[%c0_13, %c0_14] : memref<4x128xf32, #tpu.memory_space<vmem>>, vector<4x128xf32>
    %31 = vector.extract_strided_slice %0 {offsets = [6, 0], sizes = [1, 128], strides = [1, 1]} : vector<21x128xf32> to vector<1x128xf32>
    %32 = vector.broadcast %31 : vector<1x128xf32> to vector<4x128xf32>
    %33 = arith.mulf %30, %32 : vector<4x128xf32>
    %34 = arith.addf %29, %33 : vector<4x128xf32>
    %c0_15 = arith.constant 0 : index
    %c0_16 = arith.constant 0 : index
    %35 = vector.load %arg10[%c0_15, %c0_16] : memref<4x128xf32, #tpu.memory_space<vmem>>, vector<4x128xf32>
    %36 = vector.extract_strided_slice %0 {offsets = [7, 0], sizes = [1, 128], strides = [1, 1]} : vector<21x128xf32> to vector<1x128xf32>
    %37 = vector.broadcast %36 : vector<1x128xf32> to vector<4x128xf32>
    %38 = arith.mulf %35, %37 : vector<4x128xf32>
    %39 = arith.addf %34, %38 : vector<4x128xf32>
    %c0_17 = arith.constant 0 : index
    %c0_18 = arith.constant 0 : index
    %40 = vector.load %arg11[%c0_17, %c0_18] : memref<4x128xf32, #tpu.memory_space<vmem>>, vector<4x128xf32>
    %41 = vector.extract_strided_slice %0 {offsets = [8, 0], sizes = [1, 128], strides = [1, 1]} : vector<21x128xf32> to vector<1x128xf32>
    %42 = vector.broadcast %41 : vector<1x128xf32> to vector<4x128xf32>
    %43 = arith.mulf %40, %42 : vector<4x128xf32>
    %44 = arith.addf %39, %43 : vector<4x128xf32>
    %c0_19 = arith.constant 0 : index
    %c0_20 = arith.constant 0 : index
    %45 = vector.load %arg12[%c0_19, %c0_20] : memref<4x128xf32, #tpu.memory_space<vmem>>, vector<4x128xf32>
    %46 = vector.extract_strided_slice %0 {offsets = [9, 0], sizes = [1, 128], strides = [1, 1]} : vector<21x128xf32> to vector<1x128xf32>
    %47 = vector.broadcast %46 : vector<1x128xf32> to vector<4x128xf32>
    %48 = arith.mulf %45, %47 : vector<4x128xf32>
    %49 = arith.addf %44, %48 : vector<4x128xf32>
    %c0_21 = arith.constant 0 : index
    %c0_22 = arith.constant 0 : index
    %50 = vector.load %arg13[%c0_21, %c0_22] : memref<4x128xf32, #tpu.memory_space<vmem>>, vector<4x128xf32>
    %51 = vector.extract_strided_slice %0 {offsets = [10, 0], sizes = [1, 128], strides = [1, 1]} : vector<21x128xf32> to vector<1x128xf32>
    %52 = vector.broadcast %51 : vector<1x128xf32> to vector<4x128xf32>
    %53 = arith.mulf %50, %52 : vector<4x128xf32>
    %54 = arith.addf %49, %53 : vector<4x128xf32>
    %c0_23 = arith.constant 0 : index
    %c0_24 = arith.constant 0 : index
    %55 = vector.load %arg14[%c0_23, %c0_24] : memref<4x128xf32, #tpu.memory_space<vmem>>, vector<4x128xf32>
    %56 = vector.extract_strided_slice %0 {offsets = [11, 0], sizes = [1, 128], strides = [1, 1]} : vector<21x128xf32> to vector<1x128xf32>
    %57 = vector.broadcast %56 : vector<1x128xf32> to vector<4x128xf32>
    %58 = arith.mulf %55, %57 : vector<4x128xf32>
    %59 = arith.addf %54, %58 : vector<4x128xf32>
    %c0_25 = arith.constant 0 : index
    %c0_26 = arith.constant 0 : index
    %60 = vector.load %arg15[%c0_25, %c0_26] : memref<4x128xf32, #tpu.memory_space<vmem>>, vector<4x128xf32>
    %61 = vector.extract_strided_slice %0 {offsets = [12, 0], sizes = [1, 128], strides = [1, 1]} : vector<21x128xf32> to vector<1x128xf32>
    %62 = vector.broadcast %61 : vector<1x128xf32> to vector<4x128xf32>
    %63 = arith.mulf %60, %62 : vector<4x128xf32>
    %64 = arith.addf %59, %63 : vector<4x128xf32>
    %c0_27 = arith.constant 0 : index
    %c0_28 = arith.constant 0 : index
    %65 = vector.load %arg16[%c0_27, %c0_28] : memref<4x128xf32, #tpu.memory_space<vmem>>, vector<4x128xf32>
    %66 = vector.extract_strided_slice %0 {offsets = [13, 0], sizes = [1, 128], strides = [1, 1]} : vector<21x128xf32> to vector<1x128xf32>
    %67 = vector.broadcast %66 : vector<1x128xf32> to vector<4x128xf32>
    %68 = arith.mulf %65, %67 : vector<4x128xf32>
    %69 = arith.addf %64, %68 : vector<4x128xf32>
    %c0_29 = arith.constant 0 : index
    %c0_30 = arith.constant 0 : index
    %70 = vector.load %arg17[%c0_29, %c0_30] : memref<4x128xf32, #tpu.memory_space<vmem>>, vector<4x128xf32>
    %71 = vector.extract_strided_slice %0 {offsets = [14, 0], sizes = [1, 128], strides = [1, 1]} : vector<21x128xf32> to vector<1x128xf32>
    %72 = vector.broadcast %71 : vector<1x128xf32> to vector<4x128xf32>
    %73 = arith.mulf %70, %72 : vector<4x128xf32>
    %74 = arith.addf %69, %73 : vector<4x128xf32>
    %c0_31 = arith.constant 0 : index
    %c0_32 = arith.constant 0 : index
    %75 = vector.load %arg18[%c0_31, %c0_32] : memref<4x128xf32, #tpu.memory_space<vmem>>, vector<4x128xf32>
    %76 = vector.extract_strided_slice %0 {offsets = [15, 0], sizes = [1, 128], strides = [1, 1]} : vector<21x128xf32> to vector<1x128xf32>
    %77 = vector.broadcast %76 : vector<1x128xf32> to vector<4x128xf32>
    %78 = arith.mulf %75, %77 : vector<4x128xf32>
    %79 = arith.addf %74, %78 : vector<4x128xf32>
    %c0_33 = arith.constant 0 : index
    %c0_34 = arith.constant 0 : index
    %80 = vector.load %arg19[%c0_33, %c0_34] : memref<4x128xf32, #tpu.memory_space<vmem>>, vector<4x128xf32>
    %81 = vector.extract_strided_slice %0 {offsets = [16, 0], sizes = [1, 128], strides = [1, 1]} : vector<21x128xf32> to vector<1x128xf32>
    %82 = vector.broadcast %81 : vector<1x128xf32> to vector<4x128xf32>
    %83 = arith.mulf %80, %82 : vector<4x128xf32>
    %84 = arith.addf %79, %83 : vector<4x128xf32>
    %c0_35 = arith.constant 0 : index
    %c0_36 = arith.constant 0 : index
    %85 = vector.load %arg20[%c0_35, %c0_36] : memref<4x128xf32, #tpu.memory_space<vmem>>, vector<4x128xf32>
    %86 = vector.extract_strided_slice %0 {offsets = [17, 0], sizes = [1, 128], strides = [1, 1]} : vector<21x128xf32> to vector<1x128xf32>
    %87 = vector.broadcast %86 : vector<1x128xf32> to vector<4x128xf32>
    %88 = arith.mulf %85, %87 : vector<4x128xf32>
    %89 = arith.addf %84, %88 : vector<4x128xf32>
    %c0_37 = arith.constant 0 : index
    %c0_38 = arith.constant 0 : index
    %90 = vector.load %arg21[%c0_37, %c0_38] : memref<4x128xf32, #tpu.memory_space<vmem>>, vector<4x128xf32>
    %91 = vector.extract_strided_slice %0 {offsets = [18, 0], sizes = [1, 128], strides = [1, 1]} : vector<21x128xf32> to vector<1x128xf32>
    %92 = vector.broadcast %91 : vector<1x128xf32> to vector<4x128xf32>
    %93 = arith.mulf %90, %92 : vector<4x128xf32>
    %94 = arith.addf %89, %93 : vector<4x128xf32>
    %c0_39 = arith.constant 0 : index
    %c0_40 = arith.constant 0 : index
    %95 = vector.load %arg22[%c0_39, %c0_40] : memref<4x128xf32, #tpu.memory_space<vmem>>, vector<4x128xf32>
    %96 = vector.extract_strided_slice %0 {offsets = [19, 0], sizes = [1, 128], strides = [1, 1]} : vector<21x128xf32> to vector<1x128xf32>
    %97 = vector.broadcast %96 : vector<1x128xf32> to vector<4x128xf32>
    %98 = arith.mulf %95, %97 : vector<4x128xf32>
    %99 = arith.addf %94, %98 : vector<4x128xf32>
    %c0_41 = arith.constant 0 : index
    %c0_42 = arith.constant 0 : index
    %100 = vector.load %arg23[%c0_41, %c0_42] : memref<4x128xf32, #tpu.memory_space<vmem>>, vector<4x128xf32>
    %101 = vector.extract_strided_slice %0 {offsets = [20, 0], sizes = [1, 128], strides = [1, 1]} : vector<21x128xf32> to vector<1x128xf32>
    %102 = vector.broadcast %101 : vector<1x128xf32> to vector<4x128xf32>
    %103 = arith.mulf %100, %102 : vector<4x128xf32>
    %104 = arith.addf %99, %103 : vector<4x128xf32>
    %c0_43 = arith.constant 0 : index
    %c0_44 = arith.constant 0 : index
    %105 = vector.load %arg2[%c0_43, %c0_44] : memref<1x128xf32, #tpu.memory_space<vmem>>, vector<1x128xf32>
    %106 = vector.broadcast %105 : vector<1x128xf32> to vector<4x128xf32>
    %107 = arith.addf %104, %106 : vector<4x128xf32>
    %c0_45 = arith.constant 0 : index
    %c0_46 = arith.constant 0 : index
    %108 = vector.load %arg24[%c0_45, %c0_46] : memref<4x128xf32, #tpu.memory_space<vmem>>, vector<4x128xf32>
    tpu.vector_store %arg24[%c0_45, %c0_46], %107 {strides = array<i32>} : memref<4x128xf32, #tpu.memory_space<vmem>>, vector<4x128xf32>,
    return
  }
  func.func @transform_0(%arg0: i32) -> (i32, i32) {
    %c0_i32 = arith.constant 0 : i32
    %c0_i32_0 = arith.constant 0 : i32
    %c0_i32_1 = arith.constant 0 : i32
    return %c0_i32, %c0_i32_0 : i32, i32
  }
  func.func @transform_1(%arg0: i32) -> (i32, i32) {
    %c0_i32 = arith.constant 0 : i32
    %c0_i32_0 = arith.constant 0 : i32
    %c0_i32_1 = arith.constant 0 : i32
    return %c0_i32, %c0_i32_0 : i32, i32
  }
  func.func @transform_2(%arg0: i32) -> (i32, i32) {
    %c0_i32 = arith.constant 0 : i32
    %c0_i32_0 = arith.constant 0 : i32
    return %arg0, %c0_i32 : i32, i32
  }
  func.func @transform_3(%arg0: i32) -> (i32, i32) {
    %c0_i32 = arith.constant 0 : i32
    %c0_i32_0 = arith.constant 0 : i32
    return %arg0, %c0_i32 : i32, i32
  }
  func.func @transform_4(%arg0: i32) -> (i32, i32) {
    %c0_i32 = arith.constant 0 : i32
    %c0_i32_0 = arith.constant 0 : i32
    return %arg0, %c0_i32 : i32, i32
  }
  func.func @transform_5(%arg0: i32) -> (i32, i32) {
    %c0_i32 = arith.constant 0 : i32
    %c0_i32_0 = arith.constant 0 : i32
    return %arg0, %c0_i32 : i32, i32
  }
  func.func @transform_6(%arg0: i32) -> (i32, i32) {
    %c0_i32 = arith.constant 0 : i32
    %c0_i32_0 = arith.constant 0 : i32
    return %arg0, %c0_i32 : i32, i32
  }
  func.func @transform_7(%arg0: i32) -> (i32, i32) {
    %c0_i32 = arith.constant 0 : i32
    %c0_i32_0 = arith.constant 0 : i32
    return %arg0, %c0_i32 : i32, i32
  }
  func.func @transform_8(%arg0: i32) -> (i32, i32) {
    %c0_i32 = arith.constant 0 : i32
    %c0_i32_0 = arith.constant 0 : i32
    return %arg0, %c0_i32 : i32, i32
  }
  func.func @transform_9(%arg0: i32) -> (i32, i32) {
    %c0_i32 = arith.constant 0 : i32
    %c0_i32_0 = arith.constant 0 : i32
    return %arg0, %c0_i32 : i32, i32
  }
  func.func @transform_10(%arg0: i32) -> (i32, i32) {
    %c0_i32 = arith.constant 0 : i32
    %c0_i32_0 = arith.constant 0 : i32
    return %arg0, %c0_i32 : i32, i32
  }
  func.func @transform_11(%arg0: i32) -> (i32, i32) {
    %c0_i32 = arith.constant 0 : i32
    %c0_i32_0 = arith.constant 0 : i32
    return %arg0, %c0_i32 : i32, i32
  }
  func.func @transform_12(%arg0: i32) -> (i32, i32) {
    %c0_i32 = arith.constant 0 : i32
    %c0_i32_0 = arith.constant 0 : i32
    return %arg0, %c0_i32 : i32, i32
  }
  func.func @transform_13(%arg0: i32) -> (i32, i32) {
    %c0_i32 = arith.constant 0 : i32
    %c0_i32_0 = arith.constant 0 : i32
    return %arg0, %c0_i32 : i32, i32
  }
  func.func @transform_14(%arg0: i32) -> (i32, i32) {
    %c0_i32 = arith.constant 0 : i32
    %c0_i32_0 = arith.constant 0 : i32
    return %arg0, %c0_i32 : i32, i32
  }
  func.func @transform_15(%arg0: i32) -> (i32, i32) {
    %c0_i32 = arith.constant 0 : i32
    %c0_i32_0 = arith.constant 0 : i32
    return %arg0, %c0_i32 : i32, i32
  }
  func.func @transform_16(%arg0: i32) -> (i32, i32) {
    %c0_i32 = arith.constant 0 : i32
    %c0_i32_0 = arith.constant 0 : i32
    return %arg0, %c0_i32 : i32, i32
  }
  func.func @transform_17(%arg0: i32) -> (i32, i32) {
    %c0_i32 = arith.constant 0 : i32
    %c0_i32_0 = arith.constant 0 : i32
    return %arg0, %c0_i32 : i32, i32
  }
  func.func @transform_18(%arg0: i32) -> (i32, i32) {
    %c0_i32 = arith.constant 0 : i32
    %c0_i32_0 = arith.constant 0 : i32
    return %arg0, %c0_i32 : i32, i32
  }
  func.func @transform_19(%arg0: i32) -> (i32, i32) {
    %c0_i32 = arith.constant 0 : i32
    %c0_i32_0 = arith.constant 0 : i32
    return %arg0, %c0_i32 : i32, i32
  }
  func.func @transform_20(%arg0: i32) -> (i32, i32) {
    %c0_i32 = arith.constant 0 : i32
    %c0_i32_0 = arith.constant 0 : i32
    return %arg0, %c0_i32 : i32, i32
  }
  func.func @transform_21(%arg0: i32) -> (i32, i32) {
    %c0_i32 = arith.constant 0 : i32
    %c0_i32_0 = arith.constant 0 : i32
    return %arg0, %c0_i32 : i32, i32
  }
  func.func @transform_22(%arg0: i32) -> (i32, i32) {
    %c0_i32 = arith.constant 0 : i32
    %c0_i32_0 = arith.constant 0 : i32
    return %arg0, %c0_i32 : i32, i32
  }
  func.func @transform_23(%arg0: i32) -> (i32, i32) {
    %c0_i32 = arith.constant 0 : i32
    %c0_i32_0 = arith.constant 0 : i32
    return %arg0, %c0_i32 : i32, i32
  }
}

module attributes {stable_mosaic.version = 11 : i64} {
  func.func @_pool_sum_kernel(%arg0: i32, %arg1: memref<2x8x32xf32, #tpu.memory_space<vmem>>, %arg2: memref<1x2x32xf32, #tpu.memory_space<vmem>>) attributes {dimension_semantics = [#tpu.dimension_semantics<parallel>], iteration_bounds = array<i64: 2>, scalar_prefetch = 0 : i64, scratch_operands = 0 : i64, tpu.core_type = #tpu.core_type<tc>, window_params = [{transform_indices = @transform_0, window_bounds = array<i64: 2, 8, 32>}, {transform_indices = @transform_1, window_bounds = array<i64: 1, 2, 32>}]} {
    %c0 = arith.constant 0 : index
    %c0_0 = arith.constant 0 : index
    %c0_1 = arith.constant 0 : index
    %0 = vector.load %arg1[%c0, %c0_0, %c0_1] : memref<2x8x32xf32, #tpu.memory_space<vmem>>, vector<2x8x32xf32>
    %cst = arith.constant dense<0.000000e+00> : vector<2x32xf32>
    %1 = vector.multi_reduction <add>, %0, %cst [1] : vector<2x8x32xf32> to vector<2x32xf32>
    %2 = vector.shape_cast %1 : vector<2x32xf32> to vector<1x2x32xf32>
    %c0_2 = arith.constant 0 : index
    %c0_3 = arith.constant 0 : index
    %c0_4 = arith.constant 0 : index
    %3 = vector.load %arg2[%c0_2, %c0_3, %c0_4] : memref<1x2x32xf32, #tpu.memory_space<vmem>>, vector<1x2x32xf32>
    tpu.vector_store %arg2[%c0_2, %c0_3, %c0_4], %2 {strides = array<i32>} : memref<1x2x32xf32, #tpu.memory_space<vmem>>, vector<1x2x32xf32>,
    return
  }
  func.func @transform_0(%arg0: i32) -> (i32, i32, i32) {
    %c0_i32 = arith.constant 0 : i32
    %c0_i32_0 = arith.constant 0 : i32
    %c0_i32_1 = arith.constant 0 : i32
    return %c0_i32, %arg0, %c0_i32_0 : i32, i32, i32
  }
  func.func @transform_1(%arg0: i32) -> (i32, i32, i32) {
    %c0_i32 = arith.constant 0 : i32
    %c0_i32_0 = arith.constant 0 : i32
    %c0_i32_1 = arith.constant 0 : i32
    return %arg0, %c0_i32, %c0_i32_0 : i32, i32, i32
  }
}

module attributes {stable_mosaic.version = 11 : i64} {
  func.func @_mm_kernel(%arg0: i32, %arg1: memref<2x32xf32, #tpu.memory_space<vmem>>, %arg2: memref<32x10xf32, #tpu.memory_space<vmem>>, %arg3: memref<1x10xf32, #tpu.memory_space<vmem>>, %arg4: memref<2x10xf32, #tpu.memory_space<vmem>>) attributes {dimension_semantics = [#tpu.dimension_semantics<parallel>], iteration_bounds = array<i64: 1>, scalar_prefetch = 0 : i64, scratch_operands = 0 : i64, tpu.core_type = #tpu.core_type<tc>, window_params = [{transform_indices = @transform_0, window_bounds = array<i64: 2, 32>}, {pipeline_mode = #tpu.pipeline_mode<synchronous>, transform_indices = @transform_1, window_bounds = array<i64: 32, 10>}, {pipeline_mode = #tpu.pipeline_mode<synchronous>, transform_indices = @transform_2, window_bounds = array<i64: 1, 10>}, {transform_indices = @transform_3, window_bounds = array<i64: 2, 10>}]} {
    %c0 = arith.constant 0 : index
    %c0_0 = arith.constant 0 : index
    %0 = vector.load %arg1[%c0, %c0_0] : memref<2x32xf32, #tpu.memory_space<vmem>>, vector<2x32xf32>
    %1 = arith.truncf %0 : vector<2x32xf32> to vector<2x32xbf16>
    %c0_1 = arith.constant 0 : index
    %c0_2 = arith.constant 0 : index
    %2 = vector.load %arg2[%c0_1, %c0_2] : memref<32x10xf32, #tpu.memory_space<vmem>>, vector<32x10xf32>
    %3 = arith.truncf %2 : vector<32x10xf32> to vector<32x10xbf16>
    %cst = arith.constant dense<0.000000e+00> : vector<2x10xf32>
    %4 = tpu.matmul %1, %3, %cst {dimension_numbers = #tpu.dot_dimension_numbers<[1], [0], [0], [1], [0, 0, 1, 1], [], []>} : vector<2x32xbf16>, vector<32x10xbf16>, vector<2x10xf32> -> vector<2x10xf32>
    %c0_3 = arith.constant 0 : index
    %c0_4 = arith.constant 0 : index
    %5 = vector.load %arg3[%c0_3, %c0_4] : memref<1x10xf32, #tpu.memory_space<vmem>>, vector<1x10xf32>
    %6 = vector.broadcast %5 : vector<1x10xf32> to vector<2x10xf32>
    %7 = arith.addf %4, %6 : vector<2x10xf32>
    %c0_5 = arith.constant 0 : index
    %c0_6 = arith.constant 0 : index
    %8 = vector.load %arg4[%c0_5, %c0_6] : memref<2x10xf32, #tpu.memory_space<vmem>>, vector<2x10xf32>
    tpu.vector_store %arg4[%c0_5, %c0_6], %7 {strides = array<i32>} : memref<2x10xf32, #tpu.memory_space<vmem>>, vector<2x10xf32>,
    return
  }
  func.func @transform_0(%arg0: i32) -> (i32, i32) {
    %c0_i32 = arith.constant 0 : i32
    %c0_i32_0 = arith.constant 0 : i32
    return %arg0, %c0_i32 : i32, i32
  }
  func.func @transform_1(%arg0: i32) -> (i32, i32) {
    %c0_i32 = arith.constant 0 : i32
    %c0_i32_0 = arith.constant 0 : i32
    %c0_i32_1 = arith.constant 0 : i32
    return %c0_i32, %c0_i32_0 : i32, i32
  }
  func.func @transform_2(%arg0: i32) -> (i32, i32) {
    %c0_i32 = arith.constant 0 : i32
    %c0_i32_0 = arith.constant 0 : i32
    %c0_i32_1 = arith.constant 0 : i32
    return %c0_i32, %c0_i32_0 : i32, i32
  }
  func.func @transform_3(%arg0: i32) -> (i32, i32) {
    %c0_i32 = arith.constant 0 : i32
    %c0_i32_0 = arith.constant 0 : i32
    return %arg0, %c0_i32 : i32, i32
  }
}

</mosaic_0001>

<bundles_post_ra>
// kernel: tile.623
= control target key start
LH: loop header
LB: loop body
LE: loop exit
PB: predicated region body
PF: predicated region fallthrough
CT: control target
= control target key end

     0   :  { %s28_s0 = inlined_call_operand.vmem [shape: f32[8], index: 0, kind: input, shape index: {}]   ;;  %s29_s1 = inlined_call_operand.vmem [shape: f32[16,8], index: 1, kind: output, shape index: {}]  }
   0x1   :  { %v4_v0 = vld [vmem:[%s28_s0] ss:$0 sm:$0xff] }
   0x2   :  { %5 = vst [vmem:[%s29_s1] sm:$0xff] %v4_v0  ;;  %8 = vst [vmem:[%s29_s1 + $0x8] sm:$0xff] %v4_v0 }

// kernel: network_forward.134
= control target key start
LH: loop header
LB: loop body
LE: loop exit
PB: predicated region body
PF: predicated region fallthrough
CT: control target
= control target key end

     0   :  { %s422_s12 = smov 0   ;;  %s613_s0 = inlined_call_operand.vmem [shape: f32[512,12], index: 0, kind: input, shape index: {}]   ;;  %s614_s1 = inlined_call_operand.vmem [shape: f32[1,12], index: 1, kind: input, shape index: {}]   ;;  %s615_s2 = inlined_call_operand.vmem [shape: f32[1,12], index: 2, kind: input, shape index: {}]   ;;  %s616_s3 = inlined_call_operand.vmem [shape: f32[512,12], index: 3, kind: output, shape index: {}]  }
   0x1 LB: > { %s373_s13 = sadd.s32 4294967295, %s400_s12   ;;  %p377_p0 = scmp.ge.s32.totalorder %s400_s12, 1  ;;  %s400_s12 = sphi %s422_s12, %s13_s12  }
   0x2   : > { %p138_p1 = scmp.lt.s32.totalorder %s400_s12, 3 }
   0x4   : > { %p139_p2 = pnand %p377_p0, %p138_p1 }
   0x5   : > { %s378_s14 = sshll.u32 (!%p139_p2), %s373_s13, 5  ;;  %v433_v0 = vld [vmem:[%s614_s1] ss:$0 sm:$0xff] (!%p139_p2)  ;;  %vm284_vm0 = vcmask (!%p139_p2), 97280  }
   0x6   : > { %142 = sbr.rel (%p139_p2) target bundleno = 40 (0x28), region = 32  ;;  %p163_p3 = scmp.lt.s32.totalorder (!%p139_p2), %s378_s14, 63  ;;  %v443_v1 = vld [vmem:[%s615_s2] ss:$0 sm:$0xff] (!%p139_p2) }
   0xd   : > { %s618_s14 = smov (!%p163_p3, %s378_s14), 63 }
   0xe   : > { %s379_s15 = sshll.u32 %s618_s14, 3 }
   0xf   : > { %s438_s20 = scalar_lea.vmem %s613_s0, %s379_s15  ;;  %s457_s25 = scalar_lea.vmem %s616_s3, %s379_s15 }
  0x10   : > { %v174_v2 = vld [vmem:[%s438_s20] sm:$0xff]  ;;  %v175_v3 = vld [vmem:[%s438_s20 + $0x8] sm:$0xff]  ;;  %v176_v4 = vld [vmem:[%s438_s20 + $0x10] sm:$0xff] }
  0x11   : > { %v213_v5 = vmul.f32 %v433_v0, %v174_v2  ;;  %v214_v6 = vmul.f32 %v433_v0, %v175_v3  ;;  %v215_v7 = vmul.f32 %v433_v0, %v176_v4  ;;  %v177_v8 = vld [vmem:[%s438_s20 + $0x18] sm:$0xff]  ;;  %v178_v9 = vld [vmem:[%s438_s20 + $0x20] sm:$0xff]  ;;  %v179_v10 = vld [vmem:[%s438_s20 + $0x28] sm:$0xff] }
  0x12   : > { %v216_v11 = vmul.f32 %v433_v0, %v177_v8  ;;  %v217_v12 = vmul.f32 %v433_v0, %v178_v9  ;;  %v218_v13 = vmul.f32 %v433_v0, %v179_v10  ;;  %v180_v14 = vld [vmem:[%s438_s20 + $0x30] sm:$0xff]  ;;  %v181_v15 = vld [vmem:[%s438_s20 + $0x38] sm:$0xff]  ;;  %v182_v16 = vld [vmem:[%s438_s20 + $0x40] sm:$0xff] }
  0x13   : > { %v252_v17 = vadd.f32 %v443_v1, %v213_v5  ;;  %v253_v18 = vadd.f32 %v443_v1, %v214_v6  ;;  %v254_v19 = vadd.f32 %v443_v1, %v215_v7  ;;  %v219_v20 = vmul.f32 %v433_v0, %v180_v14  ;;  %v183_v21 = vld [vmem:[%s438_s20 + $0x48] sm:$0xff]  ;;  %v184_v22 = vld [vmem:[%s438_s20 + $0x50] sm:$0xff]  ;;  %v185_v23 = vld [vmem:[%s438_s20 + $0x58] sm:$0xff] }
  0x14   : > { %v255_v24 = vadd.f32 %v443_v1, %v216_v11  ;;  %v256_v25 = vadd.f32 %v443_v1, %v217_v12  ;;  %v257_v26 = vadd.f32 %v443_v1, %v218_v13  ;;  %v220_v27 = vmul.f32 %v433_v0, %v181_v15  ;;  %v186_v28 = vld [vmem:[%s438_s20 + $0x60] sm:$0xff]  ;;  %v187_v29 = vld [vmem:[%s438_s20 + $0x68] sm:$0xff]  ;;  %v188_v30 = vld [vmem:[%s438_s20 + $0x70] sm:$0xff] }
  0x15   : > { %285 = vst.msk [vmem:[%s457_s25] sm:$0xff] %vm284_vm0, %v252_v17  ;;  %286 = vst.msk [vmem:[%s457_s25 + $0x8] sm:$0xff] %vm284_vm0, %v253_v18  ;;  %v258_v31 = vadd.f32 %v443_v1, %v219_v20  ;;  %v221_v32 = vmul.f32 %v433_v0, %v182_v16  ;;  %v222_v33 = vmul.f32 %v433_v0, %v183_v21  ;;  %v189_v35 = vld [vmem:[%s438_s20 + $0x78] sm:$0xff]  ;;  %v190_v40 = vld [vmem:[%s438_s20 + $0x80] sm:$0xff] }
  0x16   : > { %287 = vst.msk [vmem:[%s457_s25 + $0x10] sm:$0xff] %vm284_vm0, %v254_v19  ;;  %v223_v34 = vmul.f32 %v433_v0, %v184_v22  ;;  %288 = vst.msk [vmem:[%s457_s25 + $0x18] sm:$0xff] %vm284_vm0, %v255_v24  ;;  %v259_v36 = vadd.f32 %v443_v1, %v220_v27  ;;  %v224_v37 = vmul.f32 %v433_v0, %v185_v23  ;;  %v191_v41 = vld [vmem:[%s438_s20 + $0x88] sm:$0xff]  ;;  %v192_v42 = vld [vmem:[%s438_s20 + $0x90] sm:$0xff] }
  0x17   : > { %289 = vst.msk [vmem:[%s457_s25 + $0x20] sm:$0xff] %vm284_vm0, %v256_v25  ;;  %290 = vst.msk [vmem:[%s457_s25 + $0x28] sm:$0xff] %vm284_vm0, %v257_v26  ;;  %v225_v38 = vmul.f32 %v433_v0, %v186_v28  ;;  %v226_v39 = vmul.f32 %v433_v0, %v187_v29  ;;  %v260_v43 = vadd.f32 %v443_v1, %v221_v32  ;;  %v193_v47 = vld [vmem:[%s438_s20 + $0x98] sm:$0xff]  ;;  %v194_v48 = vld [vmem:[%s438_s20 + $0xa0] sm:$0xff] }
  0x18   : > { %291 = vst.msk [vmem:[%s457_s25 + $0x30] sm:$0xff] %vm284_vm0, %v258_v31  ;;  %v261_v44 = vadd.f32 %v443_v1, %v222_v33  ;;  %v262_v45 = vadd.f32 %v443_v1, %v223_v34  ;;  %v227_v46 = vmul.f32 %v433_v0, %v188_v30  ;;  %v195_v49 = vld [vmem:[%s438_s20 + $0xa8] sm:$0xff]  ;;  %292 = vst.msk [vmem:[%s457_s25 + $0x38] sm:$0xff] %vm284_vm0, %v259_v36  ;;  %v196_v54 = vld [vmem:[%s438_s20 + $0xb0] sm:$0xff] }
  0x19   : > { %v263_v50 = vadd.f32 %v443_v1, %v224_v37  ;;  %v264_v51 = vadd.f32 %v443_v1, %v225_v38  ;;  %v265_v52 = vadd.f32 %v443_v1, %v226_v39  ;;  %v228_v53 = vmul.f32 %v433_v0, %v189_v35  ;;  %293 = vst.msk [vmem:[%s457_s25 + $0x40] sm:$0xff] %vm284_vm0, %v260_v43  ;;  %v197_v59 = vld [vmem:[%s438_s20 + $0xb8] sm:$0xff]  ;;  %v198_v2 = vld [vmem:[%s438_s20 + $0xc0] sm:$0xff]  ;;  %v199_v3 = vld [vmem:[%s438_s20 + $0xc8] sm:$0xff] }
  0x1a   : > { %294 = vst.msk [vmem:[%s457_s25 + $0x48] sm:$0xff] %vm284_vm0, %v261_v44  ;;  %295 = vst.msk [vmem:[%s457_s25 + $0x50] sm:$0xff] %vm284_vm0, %v262_v45  ;;  %v266_v55 = vadd.f32 %v443_v1, %v227_v46  ;;  %v229_v56 = vmul.f32 %v433_v0, %v190_v40  ;;  %v230_v57 = vmul.f32 %v433_v0, %v191_v41  ;;  %v200_v4 = vld [vmem:[%s438_s20 + $0xd0] sm:$0xff]  ;;  %v201_v9 = vld [vmem:[%s438_s20 + $0xd8] sm:$0xff] }
  0x1b   : > { %v231_v58 = vmul.f32 %v433_v0, %v192_v42  ;;  %296 = vst.msk [vmem:[%s457_s25 + $0x58] sm:$0xff] %vm284_vm0, %v263_v50  ;;  %297 = vst.msk [vmem:[%s457_s25 + $0x60] sm:$0xff] %vm284_vm0, %v264_v51  ;;  %v267_v60 = vadd.f32 %v443_v1, %v228_v53  ;;  %v232_v61 = vmul.f32 %v433_v0, %v193_v47  ;;  %v202_v10 = vld [vmem:[%s438_s20 + $0xe0] sm:$0xff]  ;;  %v203_v11 = vld [vmem:[%s438_s20 + $0xe8] sm:$0xff] }
  0x1c   : > { %298 = vst.msk [vmem:[%s457_s25 + $0x68] sm:$0xff] %vm284_vm0, %v265_v52  ;;  %v233_v62 = vmul.f32 %v433_v0, %v194_v48  ;;  %v234_v63 = vmul.f32 %v433_v0, %v195_v49  ;;  %299 = vst.msk [vmem:[%s457_s25 + $0x70] sm:$0xff] %vm284_vm0, %v266_v55  ;;  %v268_v5 = vadd.f32 %v443_v1, %v229_v56  ;;  %v204_v16 = vld [vmem:[%s438_s20 + $0xf0] sm:$0xff]  ;;  %v205_v21 = vld [vmem:[%s438_s20 + $0xf8] sm:$0xff] }
  0x1d   : > { %v269_v6 = vadd.f32 %v443_v1, %v230_v57  ;;  %v270_v7 = vadd.f32 %v443_v1, %v231_v58  ;;  %v235_v8 = vmul.f32 %v433_v0, %v196_v54  ;;  %300 = vst.msk [vmem:[%s457_s25 + $0x78] sm:$0xff] %vm284_vm0, %v267_v60  ;;  %v271_v12 = vadd.f32 %v443_v1, %v232_v61 }
  0x1e   : > { %v272_v13 = vadd.f32 %v443_v1, %v233_v62  ;;  %v273_v14 = vadd.f32 %v443_v1, %v234_v63  ;;  %v236_v15 = vmul.f32 %v433_v0, %v197_v59  ;;  %301 = vst.msk [vmem:[%s457_s25 + $0x80] sm:$0xff] %vm284_vm0, %v268_v5  ;;  %v237_v18 = vmul.f32 %v433_v0, %v198_v2 }
  0x1f   : > { %302 = vst.msk [vmem:[%s457_s25 + $0x88] sm:$0xff] %vm284_vm0, %v269_v6  ;;  %303 = vst.msk [vmem:[%s457_s25 + $0x90] sm:$0xff] %vm284_vm0, %v270_v7  ;;  %v274_v17 = vadd.f32 %v443_v1, %v235_v8  ;;  %v238_v19 = vmul.f32 %v433_v0, %v199_v3  ;;  %v239_v20 = vmul.f32 %v433_v0, %v200_v4 }
  0x20   : > { %304 = vst.msk [vmem:[%s457_s25 + $0x98] sm:$0xff] %vm284_vm0, %v271_v12  ;;  %305 = vst.msk [vmem:[%s457_s25 + $0xa0] sm:$0xff] %vm284_vm0, %v272_v13  ;;  %v275_v22 = vadd.f32 %v443_v1, %v236_v15  ;;  %v240_v23 = vmul.f32 %v433_v0, %v201_v9  ;;  %v241_v24 = vmul.f32 %v433_v0, %v202_v10 }
  0x21   : > { %306 = vst.msk [vmem:[%s457_s25 + $0xa8] sm:$0xff] %vm284_vm0, %v273_v14  ;;  %v242_v25 = vmul.f32 %v433_v0, %v203_v11  ;;  %307 = vst.msk [vmem:[%s457_s25 + $0xb0] sm:$0xff] %vm284_vm0, %v274_v17  ;;  %v276_v26 = vadd.f32 %v443_v1, %v237_v18  ;;  %v277_v27 = vadd.f32 %v443_v1, %v238_v19 }
  0x22   : > { %v278_v28 = vadd.f32 %v443_v1, %v239_v20  ;;  %v243_v29 = vmul.f32 %v433_v0, %v204_v16  ;;  %308 = vst.msk [vmem:[%s457_s25 + $0xb8] sm:$0xff] %vm284_vm0, %v275_v22  ;;  %v279_v30 = vadd.f32 %v443_v1, %v240_v23  ;;  %v280_v31 = vadd.f32 %v443_v1, %v241_v24 }
  0x23   : > { %v281_v32 = vadd.f32 %v443_v1, %v242_v25  ;;  %v244_v33 = vmul.f32 %v433_v0, %v205_v21  ;;  %309 = vst.msk [vmem:[%s457_s25 + $0xc0] sm:$0xff] %vm284_vm0, %v276_v26  ;;  %310 = vst.msk [vmem:[%s457_s25 + $0xc8] sm:$0xff] %vm284_vm0, %v277_v27 }
  0x24   : > { %311 = vst.msk [vmem:[%s457_s25 + $0xd0] sm:$0xff] %vm284_vm0, %v278_v28  ;;  %v282_v34 = vadd.f32 %v443_v1, %v243_v29  ;;  %312 = vst.msk [vmem:[%s457_s25 + $0xd8] sm:$0xff] %vm284_vm0, %v279_v30 }
  0x25   : > { %313 = vst.msk [vmem:[%s457_s25 + $0xe0] sm:$0xff] %vm284_vm0, %v280_v31  ;;  %314 = vst.msk [vmem:[%s457_s25 + $0xe8] sm:$0xff] %vm284_vm0, %v281_v32  ;;  %v283_v35 = vadd.f32 %v443_v1, %v244_v33 }
  0x26   : > { %315 = vst.msk [vmem:[%s457_s25 + $0xf0] sm:$0xff] %vm284_vm0, %v282_v34 }
  0x27   : > { %316 = vst.msk [vmem:[%s457_s25 + $0xf8] sm:$0xff] %vm284_vm0, %v283_v35 }
  0x28 PF: > { %s13_s12 = sadd.s32 1, %s400_s12  }
  0x29   : > { %p10_p4 = scmp.ge.s32.totalorder %s13_s12, 4  }
  0x2b   :  { %12 = sbr.rel (!%p10_p4) target bundleno = 1 (0x1), region = 62 }

// kernel: tile.624
= control target key start
LH: loop header
LB: loop body
LE: loop exit
PB: predicated region body
PF: predicated region fallthrough
CT: control target
= control target key end

     0   :  { %s131_s10 = smov 120   ;;  %s132_s11 = smov 104   ;;  %vm3_vm0 = vcmask 64512   ;;  %vm9_vm1 = vcmask 1048512   ;;  %vm15_vm2 = vcmask 982912   ;;  %vm21_vm3 = vcmask 917312   ;;  %s207_s0 = inlined_call_operand.vmem [shape: f32[16,8], index: 0, kind: input, shape index: {}]   ;;  %s208_s1 = inlined_call_operand.vmem [shape: f32[1,128], index: 1, kind: output, shape index: {}]  }
   0x1   :  { %v101_v0 = vld [vmem:[%s207_s0 + $0xf] sm:$0x1]   ;;  %v103_v1 = vld [vmem:[%s207_s0 + $0xd] sm:$0x1]   ;;  %v102_v2 = vld [vmem:[%s207_s0 + $0xe] sm:$0x1]  }
   0x2   :  { %7 = vrot.lane.b32.xlu0 %v101_v0, %s131_s10  ;;  %19 = vrot.lane.b32.xlu1 %v103_v1, %s132_s11  ;;  %v104_v3 = vld [vmem:[%s207_s0 + $0xc] sm:$0x1]   ;;  %s133_s16 = smov 112   ;;  %s134_s17 = smov 96   ;;  %v105_v4 = vld [vmem:[%s207_s0 + $0xb] sm:$0x1]  }
   0x3   :  { %v106_v5 = vld [vmem:[%s207_s0 + $0xa] sm:$0x1]   ;;  %v2_v6 = vld [vmem:[%s207_s0] sm:$0x1]   ;;  %s135_s24 = smov 88   ;;  %s136_s25 = smov 80  }
   0x4   :  { %4 = vst.msk [vmem:[#allocation0] sm:$0x1] %vm3_vm0, %v2_v6   ;;  %v107_v7 = vld [vmem:[%s207_s0 + $0x9] sm:$0x1]   ;;  %v108_v8 = vld [vmem:[%s207_s0 + $0x8] sm:$0x1]  }
   0x5   :  { %s137_s30 = smov 72   ;;  %s138_s2 = smov 64   ;;  %v109_v9 = vld [vmem:[%s207_s0 + $0x7] sm:$0x1]   ;;  %v110_v10 = vld [vmem:[%s207_s0 + $0x6] sm:$0x1]  }
   0x6   :  { %13 = vrot.lane.b32.xlu0 %v102_v2, %s133_s16  ;;  %25 = vrot.lane.b32.xlu1 %v104_v3, %s134_s17  ;;  %s139_s7 = smov 56   ;;  %s140_s8 = smov 48   ;;  %v111_v11 = vld [vmem:[%s207_s0 + $0x5] sm:$0x1]   ;;  %v112_v12 = vld [vmem:[%s207_s0 + $0x4] sm:$0x1]  }
   0x7   :  { %s141_s13 = smov 40   ;;  %s142_s14 = smov 32   ;;  %v113_v13 = vld [vmem:[%s207_s0 + $0x3] sm:$0x1]   ;;  %v114_v14 = vld [vmem:[%s207_s0 + $0x2] sm:$0x1]  }
   0x8   :  { %s143_s19 = smov 24   ;;  %s144_s20 = smov 16   ;;  %v115_v15 = vld [vmem:[%s207_s0 + $0x1] sm:$0x1]   ;;  %vm27_vm4 = vcmask 851712   ;;  %vm33_vm5 = vcmask 786112  }
   0x9   :  { %s145_s0 = smov 8   ;;  %vm39_vm6 = vcmask 720512   ;;  %vm45_vm7 = vcmask 654912   ;;  %vm51_vm8 = vcmask 589312   ;;  %vm57_vm9 = vcmask 523712  }
   0xa   :  { %31 = vrot.lane.b32.xlu0 %v105_v4, %s135_s24  ;;  %37 = vrot.lane.b32.xlu1 %v106_v5, %s136_s25  ;;  %vm63_vm10 = vcmask 458112   ;;  %vm69_vm11 = vcmask 392512   ;;  %vm75_vm12 = vcmask 326912   ;;  %vm81_vm13 = vcmask 261312  }
   0xb   :  { %vm87_vm14 = vcmask 195712   ;;  %vm93_vm15 = vcmask 130112  }
   0xe   :  { %43 = vrot.lane.b32.xlu0 %v107_v7, %s137_s30  ;;  %49 = vrot.lane.b32.xlu1 %v108_v8, %s138_s2 }
  0x12   :  { %55 = vrot.lane.b32.xlu0 %v109_v9, %s139_s7  ;;  %61 = vrot.lane.b32.xlu1 %v110_v10, %s140_s8 }
  0x16   :  { %67 = vrot.lane.b32.xlu0 %v111_v11, %s141_s13  ;;  %73 = vrot.lane.b32.xlu1 %v112_v12, %s142_s14 }
  0x1a   :  { %79 = vrot.lane.b32.xlu0 %v113_v13, %s143_s19  ;;  %85 = vrot.lane.b32.xlu1 %v114_v14, %s144_s20 }
  0x1e   :  { %91 = vrot.lane.b32.xlu0 %v115_v15, %s145_s0 }
  0x74   :  { %v8_v16 = vpop.permute.xlu0 %7   ;;  %v20_v17 = vpop.permute.xlu1 %19  }
  0x75   :  { %10 = vst.msk [vmem:[#allocation0] sm:$0x1] %vm9_vm1, %v8_v16  }
  0x78   :  { %v14_v18 = vpop.permute.xlu0 %13   ;;  %v26_v19 = vpop.permute.xlu1 %25  }
  0x79   :  { %16 = vst.msk [vmem:[#allocation0] sm:$0x1] %vm15_vm2, %v14_v18  }
  0x7a   :  { %22 = vst.msk [vmem:[#allocation0] sm:$0x1] %vm21_vm3, %v20_v17  }
  0x7b   :  { %28 = vst.msk [vmem:[#allocation0] sm:$0x1] %vm27_vm4, %v26_v19  }
  0x7c   :  { %v32_v20 = vpop.permute.xlu0 %31   ;;  %v38_v21 = vpop.permute.xlu1 %37  }
  0x7d   :  { %34 = vst.msk [vmem:[#allocation0] sm:$0x1] %vm33_vm5, %v32_v20  }
  0x7e   :  { %40 = vst.msk [vmem:[#allocation0] sm:$0x1] %vm39_vm6, %v38_v21  }
  0x80   :  { %v44_v22 = vpop.permute.xlu0 %43   ;;  %v50_v23 = vpop.permute.xlu1 %49  }
  0x81   :  { %46 = vst.msk [vmem:[#allocation0] sm:$0x1] %vm45_vm7, %v44_v22  }
  0x82   :  { %52 = vst.msk [vmem:[#allocation0] sm:$0x1] %vm51_vm8, %v50_v23  }
  0x84   :  { %v56_v24 = vpop.permute.xlu0 %55   ;;  %v62_v25 = vpop.permute.xlu1 %61  }
  0x85   :  { %58 = vst.msk [vmem:[#allocation0] sm:$0x1] %vm57_vm9, %v56_v24  }
  0x86   :  { %64 = vst.msk [vmem:[#allocation0] sm:$0x1] %vm63_vm10, %v62_v25  }
  0x88   :  { %v68_v26 = vpop.permute.xlu0 %67   ;;  %v74_v27 = vpop.permute.xlu1 %73  }
  0x89   :  { %70 = vst.msk [vmem:[#allocation0] sm:$0x1] %vm69_vm11, %v68_v26  }
  0x8a   :  { %76 = vst.msk [vmem:[#allocation0] sm:$0x1] %vm75_vm12, %v74_v27  }
  0x8c   :  { %v80_v28 = vpop.permute.xlu0 %79   ;;  %v86_v29 = vpop.permute.xlu1 %85  }
  0x8d   :  { %82 = vst.msk [vmem:[#allocation0] sm:$0x1] %vm81_vm13, %v80_v28  }
  0x8e   :  { %88 = vst.msk [vmem:[#allocation0] sm:$0x1] %vm87_vm14, %v86_v29  }
  0x90   :  { %v92_v30 = vpop.permute.xlu0 %91  }
  0x91   :  { %94 = vst.msk [vmem:[#allocation0] sm:$0x1] %vm93_vm15, %v92_v30  }
  0x98   :  { %v98_v31 = vld [vmem:[#allocation0] sm:$0x1] }
  0x99   :  { %100 = vst [vmem:[%s208_s1] sm:$0x1] %v98_v31 }

// kernel: network_forward.133
= control target key start
LH: loop header
LB: loop body
LE: loop exit
PB: predicated region body
PF: predicated region fallthrough
CT: control target
= control target key end

     0   :  { %s971_s12 = smov 0   ;;  %s1272_s0 = inlined_call_operand.vmem [shape: bf16[512,27], index: 0, kind: input, shape index: {}]   ;;  %s1273_s1 = inlined_call_operand.vmem [shape: f32[27,12], index: 1, kind: input, shape index: {}]   ;;  %s1274_s2 = inlined_call_operand.vmem [shape: f32[512,12], index: 2, kind: output, shape index: {0}]   ;;  %s1275_s3 = inlined_call_operand.vmem [shape: f32[2,2,12], index: 3, kind: output, shape index: {1}]  }
   0x1 LB: > { %s977_s13 = sadd.s32 4294967295, %s948_s12   ;;  %p819_p0 = scmp.ge.s32.totalorder %s948_s12, 1  ;;  %s948_s12 = sphi %s971_s12, %s14_s12  }
   0x2   : > { %p141_p1 = scmp.lt.s32.totalorder %s948_s12, 3 }
   0x4   : > { %p142_p2 = pnand %p819_p0, %p141_p1 }
   0x5   : > { %v218_v0 = vld [vmem:[%s1273_s1] sm:$0xff] (!%p142_p2)  ;;  %v219_v1 = vld [vmem:[%s1273_s1 + $0x8] sm:$0xff] (!%p142_p2)  ;;  %v220_v2 = vld [vmem:[%s1273_s1 + $0x10] sm:$0xff] (!%p142_p2)  ;;  %vm353_vm0 = vcmask (!%p142_p2), 1044480   ;;  %vm354_vm1 = vcmask (!%p142_p2), 1045504   ;;  %v950_v5 = vmov (!%p142_p2), 65535  }
   0x6   : > { %145 = sbr.rel (%p142_p2) target bundleno = 312 (0x138), region = 28  ;;  %v222_v3 = vpack.c.bf16 (!%p142_p2), %v219_v1, %v218_v0  ;;  %v221_v4 = vld [vmem:[%s1273_s1 + $0x18] sm:$0x7] (!%p142_p2)  ;;  %v355_v6 = vsel (!%p142_p2), %vm353_vm0, 4294967295, %v950_v5  ;;  %s820_s22 = sshll.u32 (!%p142_p2), %s977_s13, 5  ;;  %vm304_vm2 = vcmask (!%p142_p2), 220160  }
   0x7   : > { %v223_v7 = vpack.c.bf16 (!%p142_p2), %v221_v4, %v220_v2  ;;  %v356_v8 = vsel (!%p142_p2), %vm354_vm1, %v355_v6, 0  ;;  %p170_p3 = scmp.lt.s32.totalorder (!%p142_p2), %s820_s22, 63  ;;  %vm521_vm3 = vcmask (!%p142_p2), 97280   ;;  %p181_p4 = scmp.lt.s32.totalorder (!%p142_p2), %s977_s13, 1  ;;  %vm724_vm4 = vcmask (!%p142_p2), 1040384  }
   0x8   : > { %877 = vmatprep.subr.bf16.mxu0 (!%p142_p2), %v222_v3  ;;  %913 = vmatprep.subr.bf16.mxu1 (!%p142_p2), %v222_v3  ;;  %vm726_vm5 = vcmask (!%p142_p2), 91136  }
   0x9   : > { %878 = vmatpush3.bf16.msra.mxu0 (!%p142_p2), %v222_v3  ;;  %v358_v9 = vand.u32 (!%p142_p2), %v356_v8, %v223_v7  ;;  %915 = vmatpush3.bf16.msra.mxu1 (!%p142_p2), %v222_v3 }
   0xb   : > { %879 = vmatprep.subr.bf16.mxu0 (!%p142_p2), %v358_v9  ;;  %914 = vmatprep.subr.bf16.mxu1 (!%p142_p2), %v358_v9 }
   0xd   : > { %s1277_s22 = smov (!%p170_p3, %s820_s22), 63  ;;  %880 = vmatpush3.bf16.msra.mxu0 %v358_v9  ;;  %916 = vmatpush3.bf16.msra.mxu1 %v358_v9  ;;  %s1279_s13 = smov (!%p181_p4, %s977_s13), 1 }
   0xe   : > { %s821_s23 = sshll.u32 %s1277_s22, 2  ;;  %s823_s27 = sshll.u32 %s1277_s22, 3 }
   0xf   : > { %s1000_s26 = scalar_lea.vmem %s1272_s0, %s821_s23  ;;  %s1038_s30 = scalar_lea.vmem %s1274_s2, %s823_s27 }
  0x10   : > { %v926_v10 = vld [vmem:[%s1000_s26] sm:$0xff]   ;;  %v927_v11 = vld [vmem:[%s1000_s26 + $0x8] sm:$0xff]   ;;  %v928_v12 = vld [vmem:[%s1000_s26 + $0x10] sm:$0xff]   ;;  %s824_s4 = sshll.u32 %s1279_s13, 1 }
  0x11   : > { %881 = vmatprep.mubr.msk.bf16.mxu0 %vm304_vm2, %v926_v10  ;;  %v929_v13 = vld [vmem:[%s1000_s26 + $0x18] sm:$0xff]   ;;  %v930_v14 = vld [vmem:[%s1000_s26 + $0x20] sm:$0xff]   ;;  %v935_v16 = vld [vmem:[%s1000_s26 + $0x48] sm:$0xff]   ;;  %s184_s7 = scalar_lea.vmem %s1275_s3, %s824_s4 }
  0x12   : > { %882 = vmatmul.mubr.msk.bf16.vlgmr.msra.gmra.mrb[0].mxu0 %vm304_vm2, %v927_v11  ;;  %v934_v15 = vld [vmem:[%s1000_s26 + $0x40] sm:$0xff]   ;;  %v936_v17 = vld [vmem:[%s1000_s26 + $0x50] sm:$0xff]   ;;  %v931_v18 = vld [vmem:[%s1000_s26 + $0x28] sm:$0xff]  }
  0x13   : > { %885 = vmatprep.mubr.msk.bf16.mxu0 %vm304_vm2, %v928_v12  ;;  %897 = vmatprep.mubr.msk.bf16.mxu1 %vm304_vm2, %v934_v15  ;;  %v937_v19 = vld [vmem:[%s1000_s26 + $0x58] sm:$0xff]   ;;  %v932_v20 = vld [vmem:[%s1000_s26 + $0x30] sm:$0xff]   ;;  %v938_v21 = vld [vmem:[%s1000_s26 + $0x60] sm:$0xff]  }
  0x14   : > { %898 = vmatmul.mubr.msk.bf16.vlgmr.msra.gmra.mrb[0].mxu1 %vm304_vm2, %v935_v16  ;;  %v933_v22 = vld [vmem:[%s1000_s26 + $0x38] sm:$0xff]   ;;  %v939_v23 = vld [vmem:[%s1000_s26 + $0x68] sm:$0xff]   ;;  %v940_v24 = vld [vmem:[%s1000_s26 + $0x70] sm:$0xff]  }
  0x15   : > { %901 = vmatprep.mubr.msk.bf16.mxu1 %vm304_vm2, %v936_v17  ;;  %v941_v25 = vld [vmem:[%s1000_s26 + $0x78] sm:$0xff]  }
  0x1a   : > { %886 = vmatmul.mubr.msk.bf16.gmra.mrb[4].mxu0 %vm304_vm2, %v929_v13 }
  0x1b   : > { %889 = vmatprep.mubr.msk.bf16.mxu0 %vm304_vm2, %v930_v14 }
  0x1c   : > { %902 = vmatmul.mubr.msk.bf16.gmra.mrb[4].mxu1 %vm304_vm2, %v937_v19 }
  0x1d   : > { %905 = vmatprep.mubr.msk.bf16.mxu1 %vm304_vm2, %v938_v21 }
  0x22   : > { %890 = vmatmul.mubr.msk.bf16.gmra.mrb[8].mxu0 %vm304_vm2, %v931_v18 }
  0x23   : > { %893 = vmatprep.mubr.msk.bf16.mxu0 %vm304_vm2, %v932_v20 }
  0x24   : > { %906 = vmatmul.mubr.msk.bf16.gmra.mrb[8].mxu1 %vm304_vm2, %v939_v23 }
  0x25   : > { %909 = vmatprep.mubr.msk.bf16.mxu1 %vm304_vm2, %v940_v24 }
  0x2a   : > { %894 = vmatmul.mubr.msk.bf16.gmra.mrb[12].mxu0 %vm304_vm2, %v933_v22 }
  0x2c   : > { %910 = vmatmul.mubr.msk.bf16.gmra.mrb[12].mxu1 %vm304_vm2, %v941_v25 }
  0xe5   : > { %v883_v26 = vpop.f32.mrb[0].mxu0 }
  0xe6   : > { %524 = vst.msk [vmem:[%s1038_s30 + $0x10] sm:$0xff] %vm521_vm3, %v883_v26  ;;  %v394_v27 = vpop.f32.mrb[1].mxu0  ;;  %v625_v31 = vmul.f32 %v883_v26, %v883_v26  ;;  %v557_v36 = vsel %vm521_vm3, %v883_v26, 0.0 }
  0xe7   : > { %522 = vst.msk [vmem:[%s1038_s30] sm:$0xff] %vm521_vm3, %v394_v27  ;;  %v623_v28 = vmul.f32 %v394_v27, %v394_v27  ;;  %v884_v29 = vpop.f32.mrb[2].mxu0  ;;  %v554_v32 = vsel %vm521_vm3, %v394_v27, 0.0  ;;  %v1055_v45 = vpop.f32.mrb[0].mxu1 }
  0xe8   : > { %525 = vst.msk [vmem:[%s1038_s30 + $0x18] sm:$0xff] %vm521_vm3, %v884_v29  ;;  %v397_v30 = vpop.f32.mrb[3].mxu0  ;;  %v626_v38 = vmul.f32 %v884_v29, %v884_v29  ;;  %v658_v42 = vsel %vm521_vm3, %v625_v31, 0.0  ;;  %v559_v43 = vsel %vm521_vm3, %v884_v29, 0.0  ;;  %540 = vst.msk [vmem:[%s1038_s30 + $0x90] sm:$0xff] %vm521_vm3, %v1055_v45  ;;  %v1062_v49 = vpop.f32.mrb[1].mxu1 }
  0xe9   : > { %523 = vst.msk [vmem:[%s1038_s30 + $0x8] sm:$0xff] %vm521_vm3, %v397_v30  ;;  %v555_v33 = vsel %vm521_vm3, %v397_v30, 0.0  ;;  %v624_v34 = vmul.f32 %v397_v30, %v397_v30  ;;  %v655_v37 = vsel %vm521_vm3, %v623_v28, 0.0  ;;  %538 = vst.msk [vmem:[%s1038_s30 + $0x80] sm:$0xff] %vm521_vm3, %v1062_v49  ;;  %v1071_v54 = vpop.f32.mrb[2].mxu1 }
  0xea   : > { %v556_v35 = vadd.f32 %v555_v33, %v554_v32  ;;  %v660_v50 = vsel %vm521_vm3, %v626_v38, 0.0  ;;  %541 = vst.msk [vmem:[%s1038_s30 + $0x98] sm:$0xff] %vm521_vm3, %v1071_v54  ;;  %v1078_v58 = vpop.f32.mrb[3].mxu1 }
  0xeb   : > { %v656_v39 = vsel %vm521_vm3, %v624_v34, 0.0  ;;  %539 = vst.msk [vmem:[%s1038_s30 + $0x88] sm:$0xff] %vm521_vm3, %v1078_v58 }
  0xec   : > { %v558_v40 = vadd.f32 %v557_v36, %v556_v35  ;;  %v657_v41 = vadd.f32 %v656_v39, %v655_v37 }
  0xed   : > { %v887_v44 = vpop.f32.mrb[4].mxu0 }
  0xee   : > { %v659_v46 = vadd.f32 %v658_v42, %v657_v41  ;;  %528 = vst.msk [vmem:[%s1038_s30 + $0x30] sm:$0xff] %vm521_vm3, %v887_v44  ;;  %v410_v47 = vpop.f32.mrb[5].mxu0  ;;  %v560_v48 = vadd.f32 %v559_v43, %v558_v40  ;;  %v629_v59 = vmul.f32 %v887_v44, %v887_v44  ;;  %v565_v1 = vsel %vm521_vm3, %v887_v44, 0.0 }
  0xef   : > { %526 = vst.msk [vmem:[%s1038_s30 + $0x20] sm:$0xff] %vm521_vm3, %v410_v47  ;;  %v561_v51 = vsel %vm521_vm3, %v410_v47, 0.0  ;;  %v627_v52 = vmul.f32 %v410_v47, %v410_v47  ;;  %v888_v53 = vpop.f32.mrb[6].mxu0  ;;  %v1091_v9 = vpop.f32.mrb[4].mxu1 }
  0xf0   : > { %v562_v55 = vadd.f32 %v561_v51, %v560_v48  ;;  %v661_v56 = vadd.f32 %v660_v50, %v659_v46  ;;  %529 = vst.msk [vmem:[%s1038_s30 + $0x38] sm:$0xff] %vm521_vm3, %v888_v53  ;;  %v413_v57 = vpop.f32.mrb[7].mxu0  ;;  %v630_v2 = vmul.f32 %v888_v53, %v888_v53  ;;  %v666_v6 = vsel %vm521_vm3, %v629_v59, 0.0  ;;  %544 = vst.msk [vmem:[%s1038_s30 + $0xb0] sm:$0xff] %vm521_vm3, %v1091_v9  ;;  %v1098_v13 = vpop.f32.mrb[5].mxu1 }
  0xf1   : > { %v662_v60 = vsel %vm521_vm3, %v627_v52, 0.0  ;;  %527 = vst.msk [vmem:[%s1038_s30 + $0x28] sm:$0xff] %vm521_vm3, %v413_v57  ;;  %v563_v61 = vsel %vm521_vm3, %v413_v57, 0.0  ;;  %v628_v62 = vmul.f32 %v413_v57, %v413_v57  ;;  %v567_v7 = vsel %vm521_vm3, %v888_v53, 0.0  ;;  %542 = vst.msk [vmem:[%s1038_s30 + $0xa0] sm:$0xff] %vm521_vm3, %v1098_v13  ;;  %v1107_v18 = vpop.f32.mrb[6].mxu1 }
  0xf2   : > { %v663_v63 = vadd.f32 %v662_v60, %v661_v56  ;;  %v564_v0 = vadd.f32 %v563_v61, %v562_v55  ;;  %v668_v14 = vsel %vm521_vm3, %v630_v2, 0.0  ;;  %545 = vst.msk [vmem:[%s1038_s30 + $0xb8] sm:$0xff] %vm521_vm3, %v1107_v18  ;;  %v1114_v22 = vpop.f32.mrb[7].mxu1 }
  0xf3   : > { %v664_v3 = vsel %vm521_vm3, %v628_v62, 0.0  ;;  %543 = vst.msk [vmem:[%s1038_s30 + $0xa8] sm:$0xff] %vm521_vm3, %v1114_v22 }
  0xf4   : > { %v566_v4 = vadd.f32 %v565_v1, %v564_v0  ;;  %v665_v5 = vadd.f32 %v664_v3, %v663_v63  ;;  %v639_v0 = vmul.f32 %v1062_v49, %v1062_v49 }
  0xf5   : > { %v891_v8 = vpop.f32.mrb[8].mxu0 }
  0xf6   : > { %v667_v10 = vadd.f32 %v666_v6, %v665_v5  ;;  %532 = vst.msk [vmem:[%s1038_s30 + $0x50] sm:$0xff] %vm521_vm3, %v891_v8  ;;  %v426_v11 = vpop.f32.mrb[9].mxu0  ;;  %v568_v12 = vadd.f32 %v567_v7, %v566_v4  ;;  %v633_v23 = vmul.f32 %v891_v8, %v891_v8  ;;  %v573_v29 = vsel %vm521_vm3, %v891_v8, 0.0 }
  0xf7   : > { %530 = vst.msk [vmem:[%s1038_s30 + $0x40] sm:$0xff] %vm521_vm3, %v426_v11  ;;  %v569_v15 = vsel %vm521_vm3, %v426_v11, 0.0  ;;  %v631_v16 = vmul.f32 %v426_v11, %v426_v11  ;;  %v892_v17 = vpop.f32.mrb[10].mxu0  ;;  %v1127_v37 = vpop.f32.mrb[8].mxu1  ;;  %v585_v5 = vsel %vm521_vm3, %v1062_v49, 0.0 }
  0xf8   : > { %v570_v19 = vadd.f32 %v569_v15, %v568_v12  ;;  %v669_v20 = vadd.f32 %v668_v14, %v667_v10  ;;  %533 = vst.msk [vmem:[%s1038_s30 + $0x58] sm:$0xff] %vm521_vm3, %v892_v17  ;;  %v429_v21 = vpop.f32.mrb[11].mxu0  ;;  %v634_v30 = vmul.f32 %v892_v17, %v892_v17  ;;  %v674_v34 = vsel %vm521_vm3, %v633_v23, 0.0  ;;  %548 = vst.msk [vmem:[%s1038_s30 + $0xd0] sm:$0xff] %vm521_vm3, %v1127_v37  ;;  %v1134_v41 = vpop.f32.mrb[9].mxu1 }
  0xf9   : > { %v670_v24 = vsel %vm521_vm3, %v631_v16, 0.0  ;;  %531 = vst.msk [vmem:[%s1038_s30 + $0x48] sm:$0xff] %vm521_vm3, %v429_v21  ;;  %v571_v25 = vsel %vm521_vm3, %v429_v21, 0.0  ;;  %v632_v26 = vmul.f32 %v429_v21, %v429_v21  ;;  %v575_v35 = vsel %vm521_vm3, %v892_v17, 0.0  ;;  %546 = vst.msk [vmem:[%s1038_s30 + $0xc0] sm:$0xff] %vm521_vm3, %v1134_v41  ;;  %v1143_v47 = vpop.f32.mrb[10].mxu1 }
  0xfa   : > { %v671_v27 = vadd.f32 %v670_v24, %v669_v20  ;;  %v572_v28 = vadd.f32 %v571_v25, %v570_v19  ;;  %v676_v42 = vsel %vm521_vm3, %v634_v30, 0.0  ;;  %549 = vst.msk [vmem:[%s1038_s30 + $0xd8] sm:$0xff] %vm521_vm3, %v1143_v47  ;;  %v1150_v52 = vpop.f32.mrb[11].mxu1  ;;  %v686_v12 = vsel %vm521_vm3, %v639_v0, 0.0 }
  0xfb   : > { %v672_v31 = vsel %vm521_vm3, %v632_v26, 0.0  ;;  %547 = vst.msk [vmem:[%s1038_s30 + $0xc8] sm:$0xff] %vm521_vm3, %v1150_v52  ;;  %v640_v14 = vmul.f32 %v1078_v58, %v1078_v58  ;;  %v641_v20 = vmul.f32 %v1055_v45, %v1055_v45  ;;  %v587_v21 = vsel %vm521_vm3, %v1078_v58, 0.0 }
  0xfc   : > { %v574_v32 = vadd.f32 %v573_v29, %v572_v28  ;;  %v673_v33 = vadd.f32 %v672_v31, %v671_v27  ;;  %v589_v24 = vsel %vm521_vm3, %v1055_v45, 0.0  ;;  %v642_v27 = vmul.f32 %v1071_v54, %v1071_v54 }
  0xfd   : > { %v895_v36 = vpop.f32.mrb[12].mxu0  ;;  %v688_v28 = vsel %vm521_vm3, %v640_v14, 0.0  ;;  %v643_v29 = vmul.f32 %v1098_v13, %v1098_v13  ;;  %v591_v45 = vsel %vm521_vm3, %v1071_v54, 0.0  ;;  %v595_v54 = vsel %vm521_vm3, %v1114_v22, 0.0 }
  0xfe   : > { %v675_v38 = vadd.f32 %v674_v34, %v673_v33  ;;  %536 = vst.msk [vmem:[%s1038_s30 + $0x70] sm:$0xff] %vm521_vm3, %v895_v36  ;;  %v442_v39 = vpop.f32.mrb[13].mxu0  ;;  %v576_v40 = vadd.f32 %v575_v35, %v574_v32  ;;  %v637_v53 = vmul.f32 %v895_v36, %v895_v36  ;;  %v581_v61 = vsel %vm521_vm3, %v895_v36, 0.0 }
  0xff   : > { %534 = vst.msk [vmem:[%s1038_s30 + $0x60] sm:$0xff] %vm521_vm3, %v442_v39  ;;  %v577_v43 = vsel %vm521_vm3, %v442_v39, 0.0  ;;  %v635_v44 = vmul.f32 %v442_v39, %v442_v39  ;;  %v896_v46 = vpop.f32.mrb[14].mxu0  ;;  %v1167_v6 = vpop.f32.mrb[12].mxu1  ;;  %v690_v32 = vsel %vm521_vm3, %v641_v20, 0.0  ;;  %v593_v33 = vsel %vm521_vm3, %v1098_v13, 0.0 }
 0x100   : > { %v578_v48 = vadd.f32 %v577_v43, %v576_v40  ;;  %v677_v50 = vadd.f32 %v676_v42, %v675_v38  ;;  %537 = vst.msk [vmem:[%s1038_s30 + $0x78] sm:$0xff] %vm521_vm3, %v896_v46  ;;  %v445_v51 = vpop.f32.mrb[15].mxu0  ;;  %v638_v62 = vmul.f32 %v896_v46, %v896_v46  ;;  %v682_v3 = vsel %vm521_vm3, %v637_v53, 0.0  ;;  %552 = vst.msk [vmem:[%s1038_s30 + $0xf0] sm:$0xff] %vm521_vm3, %v1167_v6  ;;  %v1172_v10 = vpop.f32.mrb[13].mxu1 }
 0x101   : > { %v678_v55 = vsel %vm521_vm3, %v635_v44, 0.0  ;;  %535 = vst.msk [vmem:[%s1038_s30 + $0x68] sm:$0xff] %vm521_vm3, %v445_v51  ;;  %v579_v56 = vsel %vm521_vm3, %v445_v51, 0.0  ;;  %v636_v57 = vmul.f32 %v445_v51, %v445_v51  ;;  %v583_v4 = vsel %vm521_vm3, %v896_v46, 0.0  ;;  %550 = vst.msk [vmem:[%s1038_s30 + $0xe0] sm:$0xff] %vm521_vm3, %v1172_v10  ;;  %v912_v49 = vpop.f32.mrb[14].mxu1 }
 0x102   : > { %v679_v59 = vadd.f32 %v678_v55, %v677_v50  ;;  %v580_v60 = vadd.f32 %v579_v56, %v578_v48  ;;  %v684_v11 = vsel %vm521_vm3, %v638_v62, 0.0  ;;  %553 = vst.msk [vmem:[%s1038_s30 + $0xf8] sm:$0xff] %vm521_vm3, %v912_v49  ;;  %v1184_v17 = vsel %vm521_vm3, %v912_v49, 0.0  ;;  %v1186_v19 = vpop.f32.mrb[15].mxu1 }
 0x103   : > { %v680_v63 = vsel %vm521_vm3, %v636_v57, 0.0  ;;  %v654_v23 = vmul.f32 %v912_v49, %v912_v49  ;;  %551 = vst.msk [vmem:[%s1038_s30 + $0xe8] sm:$0xff] %vm521_vm3, %v1186_v19  ;;  %v692_v36 = vsel %vm521_vm3, %v642_v27, 0.0  ;;  %v694_v38 = vsel %vm521_vm3, %v643_v29, 0.0 }
 0x104   : > { %v582_v1 = vadd.f32 %v581_v61, %v580_v60  ;;  %v681_v2 = vadd.f32 %v680_v63, %v679_v59  ;;  %v644_v39 = vmul.f32 %v1114_v22, %v1114_v22  ;;  %v645_v43 = vmul.f32 %v1091_v9, %v1091_v9 }
 0x105   : > { %v1203_v30 = vsel %vm521_vm3, %v654_v23, 0.0  ;;  %v597_v13 = vsel %vm521_vm3, %v1091_v9, 0.0  ;;  %v646_v48 = vmul.f32 %v1107_v18, %v1107_v18  ;;  %v647_v51 = vmul.f32 %v1134_v41, %v1134_v41 }
 0x106   : > { %v683_v7 = vadd.f32 %v682_v3, %v681_v2  ;;  %v584_v8 = vadd.f32 %v583_v4, %v582_v1  ;;  %v696_v50 = vsel %vm521_vm3, %v644_v39, 0.0  ;;  %v698_v56 = vsel %vm521_vm3, %v645_v43, 0.0 }
 0x107   : > { %v599_v22 = vsel %vm521_vm3, %v1107_v18, 0.0  ;;  %v601_v57 = vsel %vm521_vm3, %v1134_v41, 0.0  ;;  %v700_v60 = vsel %vm521_vm3, %v646_v48, 0.0  ;;  %v702_v61 = vsel %vm521_vm3, %v647_v51, 0.0 }
 0x108   : > { %v586_v15 = vadd.f32 %v585_v5, %v584_v8  ;;  %v685_v16 = vadd.f32 %v684_v11, %v683_v7  ;;  %v648_v62 = vmul.f32 %v1150_v52, %v1150_v52  ;;  %v649_v1 = vmul.f32 %v1127_v37, %v1127_v37 }
 0x109   : > { %v603_v18 = vsel %vm521_vm3, %v1150_v52, 0.0  ;;  %v605_v41 = vsel %vm521_vm3, %v1127_v37, 0.0  ;;  %v650_v4 = vmul.f32 %v1143_v47, %v1143_v47  ;;  %v651_v7 = vmul.f32 %v1172_v10, %v1172_v10 }
 0x10a   : > { %v687_v25 = vadd.f32 %v686_v12, %v685_v16  ;;  %v588_v26 = vadd.f32 %v587_v21, %v586_v15  ;;  %v704_v5 = vsel %vm521_vm3, %v648_v62, 0.0  ;;  %v706_v12 = vsel %vm521_vm3, %v649_v1, 0.0 }
 0x10b   : > { %v607_v52 = vsel %vm521_vm3, %v1143_v47, 0.0  ;;  %v609_v14 = vsel %vm521_vm3, %v1172_v10, 0.0  ;;  %v708_v15 = vsel %vm521_vm3, %v650_v4, 0.0  ;;  %v710_v16 = vsel %vm521_vm3, %v651_v7, 0.0 }
 0x10c   : > { %v590_v58 = vadd.f32 %v589_v24, %v588_v26  ;;  %v689_v31 = vadd.f32 %v688_v28, %v687_v25  ;;  %v652_v20 = vmul.f32 %v1186_v19, %v1186_v19  ;;  %v653_v24 = vmul.f32 %v1167_v6, %v1167_v6 }
 0x10d   : > { %v611_v47 = vsel %vm521_vm3, %v1186_v19, 0.0  ;;  %v613_v26 = vsel %vm521_vm3, %v1167_v6, 0.0 }
 0x10e   : > { %v691_v34 = vadd.f32 %v690_v32, %v689_v31  ;;  %v592_v35 = vadd.f32 %v591_v45, %v590_v58  ;;  %v712_v27 = vsel %vm521_vm3, %v652_v20, 0.0  ;;  %v714_v58 = vsel %vm521_vm3, %v653_v24, 0.0 }
 0x110   : > { %v594_v40 = vadd.f32 %v593_v33, %v592_v35  ;;  %v693_v42 = vadd.f32 %v692_v36, %v691_v34 }
 0x112   : > { %v695_v44 = vadd.f32 %v694_v38, %v693_v42  ;;  %v596_v46 = vadd.f32 %v595_v54, %v594_v40 }
 0x114   : > { %v598_v53 = vadd.f32 %v597_v13, %v596_v46  ;;  %v697_v55 = vadd.f32 %v696_v50, %v695_v44 }
 0x116   : > { %v699_v59 = vadd.f32 %v698_v56, %v697_v55  ;;  %v600_v9 = vadd.f32 %v599_v22, %v598_v53 }
 0x118   : > { %v602_v63 = vadd.f32 %v601_v57, %v600_v9  ;;  %v701_v0 = vadd.f32 %v700_v60, %v699_v59 }
 0x11a   : > { %v703_v2 = vadd.f32 %v702_v61, %v701_v0  ;;  %v604_v3 = vadd.f32 %v603_v18, %v602_v63 }
 0x11c   : > { %v606_v8 = vadd.f32 %v605_v41, %v604_v3  ;;  %v705_v11 = vadd.f32 %v704_v5, %v703_v2 }
 0x11e   : > { %v707_v49 = vadd.f32 %v706_v12, %v705_v11  ;;  %v608_v37 = vadd.f32 %v607_v52, %v606_v8 }
 0x120   : > { %v610_v21 = vadd.f32 %v609_v14, %v608_v37  ;;  %v709_v23 = vadd.f32 %v708_v15, %v707_v49 }
 0x122   : > { %v711_v25 = vadd.f32 %v710_v16, %v709_v23  ;;  %v612_v10 = vadd.f32 %v611_v47, %v610_v21 }
 0x124   : > { %v614_v28 = vadd.f32 %v613_v26, %v612_v10  ;;  %v713_v29 = vadd.f32 %v712_v27, %v711_v25 }
 0x126   : > { %v616_v31 = vadd.f32 %v1184_v17, %v614_v28  ;;  %v715_v32 = vadd.f32 %v714_v58, %v713_v29 }
 0x128   : > { %v617_v45 = vrot.slane %v616_v31, 4  ;;  %v717_v33 = vadd.f32 %v1203_v30, %v715_v32 }
 0x12a   : > { %v618_v19 = vadd.f32 %v617_v45, %v616_v31  ;;  %v718_v34 = vrot.slane %v717_v33, 4 }
 0x12c   : > { %v619_v35 = vrot.slane %v618_v19, 2  ;;  %v719_v36 = vadd.f32 %v718_v34, %v717_v33 }
 0x12e   : > { %v620_v38 = vadd.f32 %v619_v35, %v618_v19  ;;  %v720_v6 = vrot.slane %v719_v36, 2 }
 0x130   : > { %v621_v39 = vrot.slane %v620_v38, 1  ;;  %v721_v40 = vadd.f32 %v720_v6, %v719_v36 }
 0x132   : > { %v722_v42 = vrot.slane %v721_v40, 1  ;;  %v622_v17 = vadd.f32 %v621_v39, %v620_v38 }
 0x134   : > { %v723_v43 = vadd.f32 %v722_v42, %v721_v40 }
 0x136   : > { %v725_v30 = vsel %vm724_vm4, %v622_v17, %v723_v43 }
 0x137   : > { %727 = vst.msk [vmem:[%s184_s7] sm:$0x3] %vm726_vm5, %v725_v30 }
 0x138 PF: > { %s14_s12 = sadd.s32 1, %s948_s12  }
 0x139   : > { %p11_p5 = scmp.ge.s32.totalorder %s14_s12, 4  }
 0x13b   :  { %13 = sbr.rel (!%p11_p5) target bundleno = 1 (0x1), region = 70 }

// kernel: network_forward.137
= control target key start
LH: loop header
LB: loop body
LE: loop exit
PB: predicated region body
PF: predicated region fallthrough
CT: control target
= control target key end

     0   :  { %s896_s12 = smov 0   ;;  %s1210_s0 = inlined_call_operand.vmem [shape: f32[512,12], index: 0, kind: input, shape index: {}]   ;;  %s1211_s1 = inlined_call_operand.vmem [shape: f32[12,8], index: 1, kind: input, shape index: {}]   ;;  %s1212_s2 = inlined_call_operand.vmem [shape: f32[512,8], index: 2, kind: output, shape index: {0}]   ;;  %s1213_s3 = inlined_call_operand.vmem [shape: f32[2,2,8], index: 3, kind: output, shape index: {1}]  }
   0x1 LB: > { %s902_s13 = sadd.s32 4294967295, %s874_s12   ;;  %p781_p0 = scmp.ge.s32.totalorder %s874_s12, 1  ;;  %s874_s12 = sphi %s896_s12, %s14_s12  }
   0x2   : > { %p141_p1 = scmp.lt.s32.totalorder %s874_s12, 3 }
   0x4   : > { %p142_p2 = pnand %p781_p0, %p141_p1 }
   0x5   : > { %v266_v0 = vld [vmem:[%s1211_s1] sm:$0xff] (!%p142_p2)  ;;  %v267_v1 = vld [vmem:[%s1211_s1 + $0x8] sm:$0xf] (!%p142_p2)  ;;  %vm318_vm0 = vcmask (!%p142_p2), 1045504   ;;  %s782_s18 = sshll.u32 (!%p142_p2), %s902_s13, 5  ;;  %vm269_vm1 = vcmask (!%p142_p2), 97280  }
   0x6   : > { %145 = sbr.rel (%p142_p2) target bundleno = 316 (0x13c), region = 28  ;;  %v268_v2 = vpack.c.bf16 (!%p142_p2), %v267_v1, %v266_v0  ;;  %p170_p3 = scmp.lt.s32.totalorder (!%p142_p2), %s782_s18, 63  ;;  %vm483_vm2 = vcmask (!%p142_p2), 64512   ;;  %vm686_vm3 = vcmask (!%p142_p2), 1040384   ;;  %vm688_vm4 = vcmask (!%p142_p2), 58368  }
   0x7   : > { %p181_p4 = scmp.lt.s32.totalorder (!%p142_p2), %s902_s13, 1 }
   0x8   : > { %858 = vmatprep.subr.msk.bf16.mxu0 (!%p142_p2), %vm318_vm0, %v268_v2  ;;  %v320_v3 = vsel (!%p142_p2), %vm318_vm0, %v268_v2, 0  ;;  %859 = vmatprep.subr.msk.bf16.mxu1 (!%p142_p2), %vm318_vm0, %v268_v2 }
   0x9   : > { %823 = vmatpush3.bf16.msra.mxu0 (!%p142_p2), %v320_v3  ;;  %857 = vmatpush3.bf16.msra.mxu1 (!%p142_p2), %v320_v3 }
   0xd   : > { %s1215_s18 = smov (!%p170_p3, %s782_s18), 63  ;;  %s1217_s13 = smov (!%p181_p4, %s902_s13), 1 }
   0xe   : > { %s783_s19 = sshll.u32 %s1215_s18, 3  ;;  %s786_s26 = sshll.u32 %s1217_s13, 1 }
   0xf   : > { %s921_s22 = scalar_lea.vmem %s1210_s0, %s783_s19  ;;  %s976_s25 = scalar_lea.vmem %s1212_s2, %s783_s19 }
  0x10   : > { %v186_v4 = vld [vmem:[%s921_s22] sm:$0xff]  ;;  %v187_v5 = vld [vmem:[%s921_s22 + $0x8] sm:$0xff]  ;;  %v188_v6 = vld [vmem:[%s921_s22 + $0x10] sm:$0xff]  ;;  %s184_s29 = scalar_lea.vmem %s1213_s3, %s786_s26 }
  0x11   : > { %v218_v7 = vmax.f32 %v186_v4, 0.0  ;;  %v219_v8 = vmax.f32 %v187_v5, 0.0  ;;  %v189_v9 = vld [vmem:[%s921_s22 + $0x18] sm:$0xff]  ;;  %v220_v10 = vmax.f32 %v188_v6, 0.0  ;;  %v190_v11 = vld [vmem:[%s921_s22 + $0x20] sm:$0xff]  ;;  %v191_v12 = vld [vmem:[%s921_s22 + $0x28] sm:$0xff] }
  0x12   : > { %v221_v13 = vmax.f32 %v189_v9, 0.0  ;;  %v222_v14 = vmax.f32 %v190_v11, 0.0  ;;  %v223_v15 = vmax.f32 %v191_v12, 0.0  ;;  %v192_v17 = vld [vmem:[%s921_s22 + $0x30] sm:$0xff]  ;;  %v193_v18 = vld [vmem:[%s921_s22 + $0x38] sm:$0xff]  ;;  %v194_v21 = vld [vmem:[%s921_s22 + $0x40] sm:$0xff] }
  0x13   : > { %v250_v16 = vpack.c.bf16 %v219_v8, %v218_v7  ;;  %v195_v22 = vld [vmem:[%s921_s22 + $0x48] sm:$0xff]  ;;  %v202_v23 = vld [vmem:[%s921_s22 + $0x80] sm:$0xff]  ;;  %v224_v25 = vmax.f32 %v192_v17, 0.0  ;;  %v225_v26 = vmax.f32 %v193_v18, 0.0  ;;  %v204_v28 = vld [vmem:[%s921_s22 + $0x90] sm:$0xff]  ;;  %v226_v31 = vmax.f32 %v194_v21, 0.0 }
  0x14   : > { %v251_v19 = vpack.c.bf16 %v221_v13, %v220_v10  ;;  %v252_v20 = vpack.c.bf16 %v223_v15, %v222_v14  ;;  %v203_v24 = vld [vmem:[%s921_s22 + $0x88] sm:$0xff]  ;;  %v234_v27 = vmax.f32 %v202_v23, 0.0  ;;  %v205_v29 = vld [vmem:[%s921_s22 + $0x98] sm:$0xff]  ;;  %v206_v30 = vld [vmem:[%s921_s22 + $0xa0] sm:$0xff]  ;;  %v227_v32 = vmax.f32 %v195_v22, 0.0 }
  0x15   : > { %824 = vmatprep.mubr.msk.bf16.mxu0 %vm269_vm1, %v250_v16  ;;  %v235_v33 = vmax.f32 %v203_v24, 0.0  ;;  %v236_v34 = vmax.f32 %v204_v28, 0.0  ;;  %v207_v35 = vld [vmem:[%s921_s22 + $0xa8] sm:$0xff]  ;;  %v237_v36 = vmax.f32 %v205_v29, 0.0  ;;  %v238_v37 = vmax.f32 %v206_v30, 0.0  ;;  %v208_v40 = vld [vmem:[%s921_s22 + $0xb0] sm:$0xff] }
  0x16   : > { %825 = vmatmul.mubr.msk.bf16.vlgmr.msra.gmra.mrb[0].mxu0 %vm269_vm1, %v251_v19  ;;  %v239_v38 = vmax.f32 %v207_v35, 0.0  ;;  %v209_v41 = vld [vmem:[%s921_s22 + $0xb8] sm:$0xff]  ;;  %v253_v42 = vpack.c.bf16 %v225_v26, %v224_v25  ;;  %v210_v45 = vld [vmem:[%s921_s22 + $0xc0] sm:$0xff]  ;;  %v211_v46 = vld [vmem:[%s921_s22 + $0xc8] sm:$0xff]  ;;  %v254_v47 = vpack.c.bf16 %v227_v32, %v226_v31  ;;  %v240_v52 = vmax.f32 %v208_v40, 0.0 }
  0x17   : > { %828 = vmatprep.mubr.msk.bf16.mxu0 %vm269_vm1, %v252_v20  ;;  %v258_v39 = vpack.c.bf16 %v235_v33, %v234_v27  ;;  %v259_v43 = vpack.c.bf16 %v237_v36, %v236_v34  ;;  %v196_v48 = vld [vmem:[%s921_s22 + $0x50] sm:$0xff]  ;;  %v197_v49 = vld [vmem:[%s921_s22 + $0x58] sm:$0xff]  ;;  %v198_v50 = vld [vmem:[%s921_s22 + $0x60] sm:$0xff]  ;;  %v241_v53 = vmax.f32 %v209_v41, 0.0  ;;  %v242_v54 = vmax.f32 %v210_v45, 0.0 }
  0x18   : > { %v260_v44 = vpack.c.bf16 %v239_v38, %v238_v37  ;;  %v199_v51 = vld [vmem:[%s921_s22 + $0x68] sm:$0xff]  ;;  %v243_v55 = vmax.f32 %v211_v46, 0.0  ;;  %v228_v56 = vmax.f32 %v196_v48, 0.0  ;;  %v229_v57 = vmax.f32 %v197_v49, 0.0  ;;  %v212_v62 = vld [vmem:[%s921_s22 + $0xd0] sm:$0xff]  ;;  %v213_v63 = vld [vmem:[%s921_s22 + $0xd8] sm:$0xff] }
  0x19   : > { %840 = vmatprep.mubr.msk.bf16.mxu1 %vm269_vm1, %v258_v39  ;;  %v230_v58 = vmax.f32 %v198_v50, 0.0  ;;  %v231_v59 = vmax.f32 %v199_v51, 0.0  ;;  %v261_v60 = vpack.c.bf16 %v241_v53, %v240_v52  ;;  %v214_v1 = vld [vmem:[%s921_s22 + $0xe0] sm:$0xff]  ;;  %v215_v2 = vld [vmem:[%s921_s22 + $0xe8] sm:$0xff]  ;;  %v200_v4 = vld [vmem:[%s921_s22 + $0x70] sm:$0xff]  ;;  %v244_v6 = vmax.f32 %v212_v62, 0.0 }
  0x1a   : > { %841 = vmatmul.mubr.msk.bf16.vlgmr.msra.gmra.mrb[0].mxu1 %vm269_vm1, %v259_v43  ;;  %v262_v61 = vpack.c.bf16 %v243_v55, %v242_v54  ;;  %v255_v0 = vpack.c.bf16 %v229_v57, %v228_v56  ;;  %v201_v5 = vld [vmem:[%s921_s22 + $0x78] sm:$0xff]  ;;  %v245_v7 = vmax.f32 %v213_v63, 0.0  ;;  %v246_v8 = vmax.f32 %v214_v1, 0.0  ;;  %v216_v14 = vld [vmem:[%s921_s22 + $0xf0] sm:$0xff] }
  0x1b   : > { %844 = vmatprep.mubr.msk.bf16.mxu1 %vm269_vm1, %v260_v44  ;;  %v256_v3 = vpack.c.bf16 %v231_v59, %v230_v58  ;;  %v247_v9 = vmax.f32 %v215_v2, 0.0  ;;  %v232_v10 = vmax.f32 %v200_v4, 0.0  ;;  %v233_v11 = vmax.f32 %v201_v5, 0.0  ;;  %v217_v15 = vld [vmem:[%s921_s22 + $0xf8] sm:$0xff] }
  0x1c   : > { %v263_v12 = vpack.c.bf16 %v245_v7, %v244_v6  ;;  %v248_v17 = vmax.f32 %v216_v14, 0.0  ;;  %v249_v18 = vmax.f32 %v217_v15, 0.0 }
  0x1d   : > { %v264_v13 = vpack.c.bf16 %v247_v9, %v246_v8  ;;  %v257_v16 = vpack.c.bf16 %v233_v11, %v232_v10 }
  0x1e   : > { %829 = vmatmul.mubr.msk.bf16.gmra.mrb[4].mxu0 %vm269_vm1, %v253_v42  ;;  %v265_v19 = vpack.c.bf16 %v249_v18, %v248_v17 }
  0x1f   : > { %832 = vmatprep.mubr.msk.bf16.mxu0 %vm269_vm1, %v254_v47 }
  0x22   : > { %845 = vmatmul.mubr.msk.bf16.gmra.mrb[4].mxu1 %vm269_vm1, %v261_v60 }
  0x23   : > { %848 = vmatprep.mubr.msk.bf16.mxu1 %vm269_vm1, %v262_v61 }
  0x26   : > { %833 = vmatmul.mubr.msk.bf16.gmra.mrb[8].mxu0 %vm269_vm1, %v255_v0 }
  0x27   : > { %836 = vmatprep.mubr.msk.bf16.mxu0 %vm269_vm1, %v256_v3 }
  0x2a   : > { %849 = vmatmul.mubr.msk.bf16.gmra.mrb[8].mxu1 %vm269_vm1, %v263_v12 }
  0x2b   : > { %852 = vmatprep.mubr.msk.bf16.mxu1 %vm269_vm1, %v264_v13 }
  0x2e   : > { %837 = vmatmul.mubr.msk.bf16.gmra.mrb[12].mxu0 %vm269_vm1, %v257_v16 }
  0x32   : > { %853 = vmatmul.mubr.msk.bf16.gmra.mrb[12].mxu1 %vm269_vm1, %v265_v19 }
  0xe9   : > { %v826_v20 = vpop.f32.mrb[0].mxu0 }
  0xea   : > { %486 = vst.msk [vmem:[%s976_s25 + $0x10] sm:$0xff] %vm483_vm2, %v826_v20  ;;  %v356_v21 = vpop.f32.mrb[1].mxu0  ;;  %v587_v25 = vmul.f32 %v826_v20, %v826_v20  ;;  %v519_v30 = vsel %vm483_vm2, %v826_v20, 0.0 }
  0xeb   : > { %484 = vst.msk [vmem:[%s976_s25] sm:$0xff] %vm483_vm2, %v356_v21  ;;  %v585_v22 = vmul.f32 %v356_v21, %v356_v21  ;;  %v827_v23 = vpop.f32.mrb[2].mxu0  ;;  %v516_v26 = vsel %vm483_vm2, %v356_v21, 0.0 }
  0xec   : > { %487 = vst.msk [vmem:[%s976_s25 + $0x18] sm:$0xff] %vm483_vm2, %v827_v23  ;;  %v359_v24 = vpop.f32.mrb[3].mxu0  ;;  %v588_v32 = vmul.f32 %v827_v23, %v827_v23  ;;  %v620_v38 = vsel %vm483_vm2, %v587_v25, 0.0  ;;  %v521_v39 = vsel %vm483_vm2, %v827_v23, 0.0 }
  0xed   : > { %485 = vst.msk [vmem:[%s976_s25 + $0x8] sm:$0xff] %vm483_vm2, %v359_v24  ;;  %v517_v27 = vsel %vm483_vm2, %v359_v24, 0.0  ;;  %v586_v28 = vmul.f32 %v359_v24, %v359_v24  ;;  %v617_v31 = vsel %vm483_vm2, %v585_v22, 0.0  ;;  %v991_v34 = vpop.f32.mrb[0].mxu1 }
  0xee   : > { %v518_v29 = vadd.f32 %v517_v27, %v516_v26  ;;  %502 = vst.msk [vmem:[%s976_s25 + $0x90] sm:$0xff] %vm483_vm2, %v991_v34  ;;  %v996_v37 = vpop.f32.mrb[1].mxu1  ;;  %v622_v46 = vsel %vm483_vm2, %v588_v32, 0.0 }
  0xef   : > { %v618_v33 = vsel %vm483_vm2, %v586_v28, 0.0  ;;  %500 = vst.msk [vmem:[%s976_s25 + $0x80] sm:$0xff] %vm483_vm2, %v996_v37  ;;  %v1003_v41 = vpop.f32.mrb[2].mxu1 }
  0xf0   : > { %v520_v35 = vadd.f32 %v519_v30, %v518_v29  ;;  %v619_v36 = vadd.f32 %v618_v33, %v617_v31  ;;  %503 = vst.msk [vmem:[%s976_s25 + $0x98] sm:$0xff] %vm483_vm2, %v1003_v41  ;;  %v1010_v45 = vpop.f32.mrb[3].mxu1 }
  0xf1   : > { %v830_v40 = vpop.f32.mrb[4].mxu0  ;;  %501 = vst.msk [vmem:[%s976_s25 + $0x88] sm:$0xff] %vm483_vm2, %v1010_v45 }
  0xf2   : > { %v621_v42 = vadd.f32 %v620_v38, %v619_v36  ;;  %490 = vst.msk [vmem:[%s976_s25 + $0x30] sm:$0xff] %vm483_vm2, %v830_v40  ;;  %v372_v43 = vpop.f32.mrb[5].mxu0  ;;  %v522_v44 = vadd.f32 %v521_v39, %v520_v35  ;;  %v591_v53 = vmul.f32 %v830_v40, %v830_v40  ;;  %v527_v59 = vsel %vm483_vm2, %v830_v40, 0.0 }
  0xf3   : > { %488 = vst.msk [vmem:[%s976_s25 + $0x20] sm:$0xff] %vm483_vm2, %v372_v43  ;;  %v523_v47 = vsel %vm483_vm2, %v372_v43, 0.0  ;;  %v589_v48 = vmul.f32 %v372_v43, %v372_v43  ;;  %v831_v49 = vpop.f32.mrb[6].mxu0 }
  0xf4   : > { %v524_v50 = vadd.f32 %v523_v47, %v522_v44  ;;  %v623_v51 = vadd.f32 %v622_v46, %v621_v42  ;;  %491 = vst.msk [vmem:[%s976_s25 + $0x38] sm:$0xff] %vm483_vm2, %v831_v49  ;;  %v375_v52 = vpop.f32.mrb[7].mxu0  ;;  %v592_v60 = vmul.f32 %v831_v49, %v831_v49  ;;  %v628_v2 = vsel %vm483_vm2, %v591_v53, 0.0 }
  0xf5   : > { %v624_v54 = vsel %vm483_vm2, %v589_v48, 0.0  ;;  %489 = vst.msk [vmem:[%s976_s25 + $0x28] sm:$0xff] %vm483_vm2, %v375_v52  ;;  %v525_v55 = vsel %vm483_vm2, %v375_v52, 0.0  ;;  %v590_v56 = vmul.f32 %v375_v52, %v375_v52  ;;  %v1027_v62 = vpop.f32.mrb[4].mxu1  ;;  %v529_v3 = vsel %vm483_vm2, %v831_v49, 0.0 }
  0xf6   : > { %v625_v57 = vadd.f32 %v624_v54, %v623_v51  ;;  %v526_v58 = vadd.f32 %v525_v55, %v524_v50  ;;  %506 = vst.msk [vmem:[%s976_s25 + $0xb0] sm:$0xff] %vm483_vm2, %v1027_v62  ;;  %v1032_v1 = vpop.f32.mrb[5].mxu1  ;;  %v630_v10 = vsel %vm483_vm2, %v592_v60, 0.0 }
  0xf7   : > { %v626_v61 = vsel %vm483_vm2, %v590_v56, 0.0  ;;  %504 = vst.msk [vmem:[%s976_s25 + $0xa0] sm:$0xff] %vm483_vm2, %v1032_v1  ;;  %v1039_v5 = vpop.f32.mrb[6].mxu1 }
  0xf8   : > { %v528_v63 = vadd.f32 %v527_v59, %v526_v58  ;;  %v627_v0 = vadd.f32 %v626_v61, %v625_v57  ;;  %507 = vst.msk [vmem:[%s976_s25 + $0xb8] sm:$0xff] %vm483_vm2, %v1039_v5  ;;  %v1046_v9 = vpop.f32.mrb[7].mxu1  ;;  %v601_v58 = vmul.f32 %v996_v37, %v996_v37 }
  0xf9   : > { %v834_v4 = vpop.f32.mrb[8].mxu0  ;;  %505 = vst.msk [vmem:[%s976_s25 + $0xa8] sm:$0xff] %vm483_vm2, %v1046_v9 }
  0xfa   : > { %v629_v6 = vadd.f32 %v628_v2, %v627_v0  ;;  %494 = vst.msk [vmem:[%s976_s25 + $0x50] sm:$0xff] %vm483_vm2, %v834_v4  ;;  %v388_v7 = vpop.f32.mrb[9].mxu0  ;;  %v530_v8 = vadd.f32 %v529_v3, %v528_v63  ;;  %v595_v17 = vmul.f32 %v834_v4, %v834_v4  ;;  %v535_v23 = vsel %vm483_vm2, %v834_v4, 0.0 }
  0xfb   : > { %492 = vst.msk [vmem:[%s976_s25 + $0x40] sm:$0xff] %vm483_vm2, %v388_v7  ;;  %v531_v11 = vsel %vm483_vm2, %v388_v7, 0.0  ;;  %v593_v12 = vmul.f32 %v388_v7, %v388_v7  ;;  %v835_v13 = vpop.f32.mrb[10].mxu0  ;;  %v547_v3 = vsel %vm483_vm2, %v996_v37, 0.0  ;;  %v602_v37 = vmul.f32 %v1010_v45, %v1010_v45 }
  0xfc   : > { %v532_v14 = vadd.f32 %v531_v11, %v530_v8  ;;  %v631_v15 = vadd.f32 %v630_v10, %v629_v6  ;;  %495 = vst.msk [vmem:[%s976_s25 + $0x58] sm:$0xff] %vm483_vm2, %v835_v13  ;;  %v391_v16 = vpop.f32.mrb[11].mxu0  ;;  %v596_v24 = vmul.f32 %v835_v13, %v835_v13  ;;  %v636_v30 = vsel %vm483_vm2, %v595_v17, 0.0 }
  0xfd   : > { %v632_v18 = vsel %vm483_vm2, %v593_v12, 0.0  ;;  %493 = vst.msk [vmem:[%s976_s25 + $0x48] sm:$0xff] %vm483_vm2, %v391_v16  ;;  %v533_v19 = vsel %vm483_vm2, %v391_v16, 0.0  ;;  %v594_v20 = vmul.f32 %v391_v16, %v391_v16  ;;  %v1063_v26 = vpop.f32.mrb[8].mxu1  ;;  %v537_v31 = vsel %vm483_vm2, %v835_v13, 0.0 }
  0xfe   : > { %v633_v21 = vadd.f32 %v632_v18, %v631_v15  ;;  %v534_v22 = vadd.f32 %v533_v19, %v532_v14  ;;  %510 = vst.msk [vmem:[%s976_s25 + $0xd0] sm:$0xff] %vm483_vm2, %v1063_v26  ;;  %v1068_v29 = vpop.f32.mrb[9].mxu1  ;;  %v638_v40 = vsel %vm483_vm2, %v596_v24, 0.0  ;;  %v648_v13 = vsel %vm483_vm2, %v601_v58, 0.0 }
  0xff   : > { %v634_v25 = vsel %vm483_vm2, %v594_v20, 0.0  ;;  %508 = vst.msk [vmem:[%s976_s25 + $0xc0] sm:$0xff] %vm483_vm2, %v1068_v29  ;;  %v1075_v33 = vpop.f32.mrb[10].mxu1  ;;  %v603_v17 = vmul.f32 %v991_v34, %v991_v34  ;;  %v549_v18 = vsel %vm483_vm2, %v1010_v45, 0.0  ;;  %v605_v24 = vmul.f32 %v1032_v1, %v1032_v1 }
 0x100   : > { %v536_v27 = vadd.f32 %v535_v23, %v534_v22  ;;  %v635_v28 = vadd.f32 %v634_v25, %v633_v21  ;;  %511 = vst.msk [vmem:[%s976_s25 + $0xd8] sm:$0xff] %vm483_vm2, %v1075_v33  ;;  %v1082_v39 = vpop.f32.mrb[11].mxu1  ;;  %v551_v21 = vsel %vm483_vm2, %v991_v34, 0.0  ;;  %v604_v22 = vmul.f32 %v1003_v41, %v1003_v41 }
 0x101   : > { %v838_v32 = vpop.f32.mrb[12].mxu0  ;;  %509 = vst.msk [vmem:[%s976_s25 + $0xc8] sm:$0xff] %vm483_vm2, %v1082_v39  ;;  %v650_v23 = vsel %vm483_vm2, %v602_v37, 0.0  ;;  %v553_v45 = vsel %vm483_vm2, %v1003_v41, 0.0  ;;  %v557_v41 = vsel %vm483_vm2, %v1046_v9, 0.0 }
 0x102   : > { %v637_v35 = vadd.f32 %v636_v30, %v635_v28  ;;  %498 = vst.msk [vmem:[%s976_s25 + $0x70] sm:$0xff] %vm483_vm2, %v838_v32  ;;  %v404_v36 = vpop.f32.mrb[13].mxu0  ;;  %v538_v38 = vadd.f32 %v537_v31, %v536_v27  ;;  %v599_v49 = vmul.f32 %v838_v32, %v838_v32  ;;  %v543_v55 = vsel %vm483_vm2, %v838_v32, 0.0 }
 0x103   : > { %496 = vst.msk [vmem:[%s976_s25 + $0x60] sm:$0xff] %vm483_vm2, %v404_v36  ;;  %v539_v42 = vsel %vm483_vm2, %v404_v36, 0.0  ;;  %v597_v43 = vmul.f32 %v404_v36, %v404_v36  ;;  %v839_v44 = vpop.f32.mrb[14].mxu0  ;;  %v652_v28 = vsel %vm483_vm2, %v603_v17, 0.0  ;;  %v555_v30 = vsel %vm483_vm2, %v1032_v1, 0.0 }
 0x104   : > { %v540_v46 = vadd.f32 %v539_v42, %v538_v38  ;;  %v639_v47 = vadd.f32 %v638_v40, %v637_v35  ;;  %499 = vst.msk [vmem:[%s976_s25 + $0x78] sm:$0xff] %vm483_vm2, %v839_v44  ;;  %v407_v48 = vpop.f32.mrb[15].mxu0  ;;  %v600_v56 = vmul.f32 %v839_v44, %v839_v44  ;;  %v644_v0 = vsel %vm483_vm2, %v599_v49, 0.0 }
 0x105   : > { %v640_v50 = vsel %vm483_vm2, %v597_v43, 0.0  ;;  %497 = vst.msk [vmem:[%s976_s25 + $0x68] sm:$0xff] %vm483_vm2, %v407_v48  ;;  %v541_v51 = vsel %vm483_vm2, %v407_v48, 0.0  ;;  %v598_v52 = vmul.f32 %v407_v48, %v407_v48  ;;  %v1101_v59 = vpop.f32.mrb[12].mxu1  ;;  %v545_v2 = vsel %vm483_vm2, %v839_v44, 0.0 }
 0x106   : > { %v641_v53 = vadd.f32 %v640_v50, %v639_v47  ;;  %v542_v54 = vadd.f32 %v541_v51, %v540_v46  ;;  %514 = vst.msk [vmem:[%s976_s25 + $0xf0] sm:$0xff] %vm483_vm2, %v1101_v59  ;;  %v1106_v63 = vpop.f32.mrb[13].mxu1  ;;  %v646_v12 = vsel %vm483_vm2, %v600_v56, 0.0  ;;  %v654_v32 = vsel %vm483_vm2, %v604_v22, 0.0 }
 0x107   : > { %v642_v57 = vsel %vm483_vm2, %v598_v52, 0.0  ;;  %512 = vst.msk [vmem:[%s976_s25 + $0xe0] sm:$0xff] %vm483_vm2, %v1106_v63  ;;  %v855_v4 = vpop.f32.mrb[14].mxu1  ;;  %v656_v35 = vsel %vm483_vm2, %v605_v24, 0.0  ;;  %v606_v36 = vmul.f32 %v1046_v9, %v1046_v9  ;;  %v607_v42 = vmul.f32 %v1027_v62, %v1027_v62 }
 0x108   : > { %v544_v60 = vadd.f32 %v543_v55, %v542_v54  ;;  %v643_v61 = vadd.f32 %v642_v57, %v641_v53  ;;  %515 = vst.msk [vmem:[%s976_s25 + $0xf8] sm:$0xff] %vm483_vm2, %v855_v4  ;;  %v1118_v8 = vsel %vm483_vm2, %v855_v4, 0.0  ;;  %v616_v10 = vmul.f32 %v855_v4, %v855_v4  ;;  %v1120_v11 = vpop.f32.mrb[15].mxu1 }
 0x109   : > { %513 = vst.msk [vmem:[%s976_s25 + $0xe8] sm:$0xff] %vm483_vm2, %v1120_v11  ;;  %v559_v1 = vsel %vm483_vm2, %v1027_v62, 0.0  ;;  %v608_v46 = vmul.f32 %v1039_v5, %v1039_v5  ;;  %v658_v47 = vsel %vm483_vm2, %v606_v36, 0.0  ;;  %v609_v48 = vmul.f32 %v1068_v29, %v1068_v29 }
 0x10a   : > { %v645_v6 = vadd.f32 %v644_v0, %v643_v61  ;;  %v546_v7 = vadd.f32 %v545_v2, %v544_v60  ;;  %v1130_v16 = vsel %vm483_vm2, %v616_v10, 0.0  ;;  %v660_v51 = vsel %vm483_vm2, %v607_v42, 0.0 }
 0x10b   : > { %v561_v9 = vsel %vm483_vm2, %v1039_v5, 0.0  ;;  %v563_v52 = vsel %vm483_vm2, %v1068_v29, 0.0  ;;  %v662_v54 = vsel %vm483_vm2, %v608_v46, 0.0  ;;  %v664_v55 = vsel %vm483_vm2, %v609_v48, 0.0 }
 0x10c   : > { %v548_v14 = vadd.f32 %v547_v3, %v546_v7  ;;  %v647_v15 = vadd.f32 %v646_v12, %v645_v6  ;;  %v610_v56 = vmul.f32 %v1082_v39, %v1082_v39  ;;  %v611_v60 = vmul.f32 %v1063_v26, %v1063_v26 }
 0x10d   : > { %v565_v5 = vsel %vm483_vm2, %v1082_v39, 0.0  ;;  %v567_v29 = vsel %vm483_vm2, %v1063_v26, 0.0  ;;  %v612_v2 = vmul.f32 %v1075_v33, %v1075_v33  ;;  %v613_v4 = vmul.f32 %v1106_v63, %v1106_v63 }
 0x10e   : > { %v649_v19 = vadd.f32 %v648_v13, %v647_v15  ;;  %v550_v20 = vadd.f32 %v549_v18, %v548_v14  ;;  %v666_v3 = vsel %vm483_vm2, %v610_v56, 0.0  ;;  %v668_v10 = vsel %vm483_vm2, %v611_v60, 0.0 }
 0x10f   : > { %v569_v39 = vsel %vm483_vm2, %v1075_v33, 0.0  ;;  %v571_v12 = vsel %vm483_vm2, %v1106_v63, 0.0  ;;  %v670_v37 = vsel %vm483_vm2, %v612_v2, 0.0  ;;  %v672_v14 = vsel %vm483_vm2, %v613_v4, 0.0 }
 0x110   : > { %v552_v25 = vadd.f32 %v551_v21, %v550_v20  ;;  %v651_v27 = vadd.f32 %v650_v23, %v649_v19  ;;  %v614_v15 = vmul.f32 %v1120_v11, %v1120_v11  ;;  %v615_v19 = vmul.f32 %v1101_v59, %v1101_v59 }
 0x111   : > { %v573_v33 = vsel %vm483_vm2, %v1120_v11, 0.0  ;;  %v575_v21 = vsel %vm483_vm2, %v1101_v59, 0.0 }
 0x112   : > { %v653_v31 = vadd.f32 %v652_v28, %v651_v27  ;;  %v554_v34 = vadd.f32 %v553_v45, %v552_v25  ;;  %v674_v22 = vsel %vm483_vm2, %v614_v15, 0.0  ;;  %v676_v25 = vsel %vm483_vm2, %v615_v19, 0.0 }
 0x114   : > { %v556_v38 = vadd.f32 %v555_v30, %v554_v34  ;;  %v655_v40 = vadd.f32 %v654_v32, %v653_v31 }
 0x116   : > { %v657_v43 = vadd.f32 %v656_v35, %v655_v40  ;;  %v558_v44 = vadd.f32 %v557_v41, %v556_v38 }
 0x118   : > { %v560_v49 = vadd.f32 %v559_v1, %v558_v44  ;;  %v659_v50 = vadd.f32 %v658_v47, %v657_v43 }
 0x11a   : > { %v661_v53 = vadd.f32 %v660_v51, %v659_v50  ;;  %v562_v62 = vadd.f32 %v561_v9, %v560_v49 }
 0x11c   : > { %v564_v57 = vadd.f32 %v563_v52, %v562_v62  ;;  %v663_v58 = vadd.f32 %v662_v54, %v661_v53 }
 0x11e   : > { %v665_v61 = vadd.f32 %v664_v55, %v663_v58  ;;  %v566_v0 = vadd.f32 %v565_v5, %v564_v57 }
 0x120   : > { %v568_v6 = vadd.f32 %v567_v29, %v566_v0  ;;  %v667_v7 = vadd.f32 %v666_v3, %v665_v61 }
 0x122   : > { %v669_v13 = vadd.f32 %v668_v10, %v667_v7  ;;  %v570_v26 = vadd.f32 %v569_v39, %v568_v6 }
 0x124   : > { %v572_v17 = vadd.f32 %v571_v12, %v570_v26  ;;  %v671_v18 = vadd.f32 %v670_v37, %v669_v13 }
 0x126   : > { %v673_v20 = vadd.f32 %v672_v14, %v671_v18  ;;  %v574_v63 = vadd.f32 %v573_v33, %v572_v17 }
 0x128   : > { %v576_v23 = vadd.f32 %v575_v21, %v574_v63  ;;  %v675_v24 = vadd.f32 %v674_v22, %v673_v20 }
 0x12a   : > { %v578_v27 = vadd.f32 %v1118_v8, %v576_v23  ;;  %v677_v28 = vadd.f32 %v676_v25, %v675_v24 }
 0x12c   : > { %v579_v45 = vrot.slane %v578_v27, 4  ;;  %v679_v30 = vadd.f32 %v1130_v16, %v677_v28 }
 0x12e   : > { %v580_v11 = vadd.f32 %v579_v45, %v578_v27  ;;  %v680_v31 = vrot.slane %v679_v30, 4 }
 0x130   : > { %v581_v34 = vrot.slane %v580_v11, 2  ;;  %v681_v32 = vadd.f32 %v680_v31, %v679_v30 }
 0x132   : > { %v582_v35 = vadd.f32 %v581_v34, %v580_v11  ;;  %v682_v59 = vrot.slane %v681_v32, 2 }
 0x134   : > { %v583_v36 = vrot.slane %v582_v35, 1  ;;  %v683_v38 = vadd.f32 %v682_v59, %v681_v32 }
 0x136   : > { %v684_v40 = vrot.slane %v683_v38, 1  ;;  %v584_v8 = vadd.f32 %v583_v36, %v582_v35 }
 0x138   : > { %v685_v42 = vadd.f32 %v684_v40, %v683_v38 }
 0x13a   : > { %v687_v16 = vsel %vm686_vm3, %v584_v8, %v685_v42 }
 0x13b   : > { %689 = vst.msk [vmem:[%s184_s29] sm:$0x3] %vm688_vm4, %v687_v16 }
 0x13c PF: > { %s14_s12 = sadd.s32 1, %s874_s12  }
 0x13d   : > { %p11_p5 = scmp.ge.s32.totalorder %s14_s12, 4  }
 0x13f   :  { %13 = sbr.rel (!%p11_p5) target bundleno = 1 (0x1), region = 70 }

// kernel: network_forward.138
= control target key start
LH: loop header
LB: loop body
LE: loop exit
PB: predicated region body
PF: predicated region fallthrough
CT: control target
= control target key end

     0   :  { %s277_s12 = smov 0   ;;  %s313_s0 = inlined_call_operand.vmem [shape: f32[32,128], index: 0, kind: input, shape index: {}]   ;;  %s314_s1 = inlined_call_operand.vmem [shape: f32[1,128], index: 1, kind: input, shape index: {}]   ;;  %s315_s2 = inlined_call_operand.vmem [shape: f32[1,128], index: 2, kind: input, shape index: {}]   ;;  %s316_s3 = inlined_call_operand.vmem [shape: f32[32,128], index: 3, kind: output, shape index: {}]  }
   0x1 LB: > { %s252_s13 = sadd.s32 4294967295, %s279_s12   ;;  %p256_p0 = scmp.ge.s32.totalorder %s279_s12, 1  ;;  %s279_s12 = sphi %s277_s12, %s13_s12  }
   0x2   : > { %p138_p1 = scmp.lt.s32.totalorder %s279_s12, 3 }
   0x4   : > { %p139_p2 = pnand %p256_p0, %p138_p1 }
   0x5   : > { %s257_s14 = sshll.u32 (!%p139_p2), %s252_s13, 1  ;;  %v261_v0 = vld [vmem:[%s314_s1] ss:$0 sm:$0xff] (!%p139_p2) }
   0x6   : > { %142 = sbr.rel (%p139_p2) target bundleno = 22 (0x16), region = 32  ;;  %p163_p3 = scmp.lt.s32.totalorder (!%p139_p2), %s257_s14, 3  ;;  %v262_v3 = vld [vmem:[%s315_s2] ss:$0 sm:$0xff] (!%p139_p2) }
   0xd   : > { %s318_s14 = smov (!%p163_p3, %s257_s14), 3 }
   0xe   : > { %s258_s15 = sshll.u32 %s318_s14, 3 }
   0xf   : > { %s166_s20 = scalar_lea.vmem %s313_s0, %s258_s15  ;;  %s172_s25 = scalar_lea.vmem %s316_s3, %s258_s15 }
  0x10   : > { %v174_v1 = vld [vmem:[%s166_s20] sm:$0xff]  ;;  %v175_v2 = vld [vmem:[%s166_s20 + $0x8] sm:$0xff] }
  0x11   : > { %v183_v4 = vmul.f32 %v261_v0, %v174_v1  ;;  %v184_v5 = vmul.f32 %v261_v0, %v175_v2 }
  0x13   : > { %v192_v6 = vadd.f32 %v262_v3, %v183_v4  ;;  %v193_v7 = vadd.f32 %v262_v3, %v184_v5 }
  0x15   : > { %194 = vst [vmem:[%s172_s25] sm:$0xff] %v192_v6  ;;  %195 = vst [vmem:[%s172_s25 + $0x8] sm:$0xff] %v193_v7 }
  0x16 PF: > { %s13_s12 = sadd.s32 1, %s279_s12  }
  0x17   : > { %p10_p4 = scmp.ge.s32.totalorder %s13_s12, 4  }
  0x19   :  { %12 = sbr.rel (!%p10_p4) target bundleno = 1 (0x1), region = 62 }

// kernel: network_forward.162
= control target key start
LH: loop header
LB: loop body
LE: loop exit
PB: predicated region body
PF: predicated region fallthrough
CT: control target
= control target key end

     0   :  { %s605_s12 = smov 0   ;;  %s786_s0 = inlined_call_operand.vmem [shape: bf16[128,200], index: 0, kind: input, shape index: {}]   ;;  %s787_s1 = inlined_call_operand.vmem [shape: f32[200,8], index: 1, kind: input, shape index: {}]   ;;  %s788_s2 = inlined_call_operand.vmem [shape: f32[128,8], index: 2, kind: output, shape index: {0}]   ;;  %s789_s3 = inlined_call_operand.vmem [shape: f32[2,2,8], index: 3, kind: output, shape index: {1}]  }
   0x1 LB: > { %s611_s13 = sadd.s32 4294967295, %s582_s12   ;;  %p507_p0 = scmp.ge.s32.totalorder %s582_s12, 1  ;;  %s582_s12 = sphi %s605_s12, %s14_s12  }
   0x2   : > { %p142_p1 = scmp.lt.s32.totalorder %s582_s12, 3 }
   0x4   : > { %p143_p2 = pnand %p507_p0, %p142_p1 }
   0x5   : > { %v197_v0 = vld [vmem:[%s787_s1] sm:$0xff] (!%p143_p2)  ;;  %v198_v1 = vld [vmem:[%s787_s1 + $0x8] sm:$0xff] (!%p143_p2)  ;;  %v199_v2 = vld [vmem:[%s787_s1 + $0x10] sm:$0xff] (!%p143_p2)  ;;  %s508_s20 = sshll.u32 (!%p143_p2), %s611_s13, 3  ;;  %v584_v3 = vmov (!%p143_p2), 0   ;;  %vm271_vm0 = vcmask (!%p143_p2), 588800  }
   0x6   : > { %146 = sbr.rel (%p143_p2) target bundleno = 308 (0x134), region = 28  ;;  %288 = vmatprep.subr.bf16.mxu0 (!%p143_p2), %v584_v3  ;;  %v222_v4 = vpack.c.bf16 (!%p143_p2), %v198_v1, %v197_v0  ;;  %529 = vmatprep.subr.bf16.mxu1 (!%p143_p2), %v584_v3  ;;  %v200_v5 = vld [vmem:[%s787_s1 + $0x18] sm:$0xff] (!%p143_p2)  ;;  %p172_p3 = scmp.lt.s32.totalorder (!%p143_p2), %s508_s20, 15  ;;  %v201_v7 = vld [vmem:[%s787_s1 + $0x20] sm:$0xff] (!%p143_p2)  ;;  %v202_v8 = vld [vmem:[%s787_s1 + $0x28] sm:$0xff] (!%p143_p2)  ;;  %vm284_vm1 = vcmask (!%p143_p2), 1043456  }
   0x7   : > { %v223_v6 = vpack.c.bf16 (!%p143_p2), %v200_v5, %v199_v2  ;;  %v224_v9 = vpack.c.bf16 (!%p143_p2), %v202_v8, %v201_v7  ;;  %v203_v10 = vld [vmem:[%s787_s1 + $0x30] sm:$0xff] (!%p143_p2)  ;;  %v204_v11 = vld [vmem:[%s787_s1 + $0x38] sm:$0xff] (!%p143_p2)  ;;  %v205_v15 = vld [vmem:[%s787_s1 + $0x40] sm:$0xff] (!%p143_p2)  ;;  %vm353_vm2 = vcmask (!%p143_p2), 64512   ;;  %p184_p4 = scmp.lt.s32.totalorder (!%p143_p2), %s611_s13, 1  ;;  %vm412_vm3 = vcmask (!%p143_p2), 1040384  }
   0x8   : > { %289 = vmatpush1.bf16.msra.mxu0 (!%p143_p2), %v222_v4  ;;  %542 = vmatpush1.bf16.msra.mxu1 (!%p143_p2), %v222_v4  ;;  %v225_v14 = vpack.c.bf16 (!%p143_p2), %v204_v11, %v203_v10  ;;  %v206_v16 = vld [vmem:[%s787_s1 + $0x48] sm:$0xff] (!%p143_p2)  ;;  %v207_v18 = vld [vmem:[%s787_s1 + $0x50] sm:$0xff] (!%p143_p2)  ;;  %v208_v19 = vld [vmem:[%s787_s1 + $0x58] sm:$0xff] (!%p143_p2)  ;;  %vm414_vm4 = vcmask (!%p143_p2), 58368  }
   0x9   : > { %290 = vmatprep.subr.bf16.mxu0 (!%p143_p2), %v584_v3  ;;  %530 = vmatprep.subr.bf16.mxu1 (!%p143_p2), %v584_v3  ;;  %v226_v17 = vpack.c.bf16 (!%p143_p2), %v206_v16, %v205_v15  ;;  %v227_v20 = vpack.c.bf16 (!%p143_p2), %v208_v19, %v207_v18  ;;  %v209_v21 = vld [vmem:[%s787_s1 + $0x60] sm:$0xff] (!%p143_p2)  ;;  %v210_v22 = vld [vmem:[%s787_s1 + $0x68] sm:$0xff] (!%p143_p2)  ;;  %v211_v24 = vld [vmem:[%s787_s1 + $0x70] sm:$0xff] (!%p143_p2) }
   0xa   : > { %v228_v23 = vpack.c.bf16 (!%p143_p2), %v210_v22, %v209_v21  ;;  %v212_v25 = vld [vmem:[%s787_s1 + $0x78] sm:$0xff] (!%p143_p2)  ;;  %v213_v27 = vld [vmem:[%s787_s1 + $0x80] sm:$0xff] (!%p143_p2)  ;;  %v214_v28 = vld [vmem:[%s787_s1 + $0x88] sm:$0xff] (!%p143_p2) }
   0xb   : > { %v229_v26 = vpack.c.bf16 (!%p143_p2), %v212_v25, %v211_v24  ;;  %v230_v29 = vpack.c.bf16 (!%p143_p2), %v214_v28, %v213_v27  ;;  %v215_v30 = vld [vmem:[%s787_s1 + $0x90] sm:$0xff] (!%p143_p2)  ;;  %v216_v31 = vld [vmem:[%s787_s1 + $0x98] sm:$0xff] (!%p143_p2)  ;;  %v217_v33 = vld [vmem:[%s787_s1 + $0xa0] sm:$0xff] (!%p143_p2) }
   0xc   : > { %291 = vmatpush1.bf16.msra.mxu0 (!%p143_p2), %v223_v6  ;;  %543 = vmatpush1.bf16.msra.mxu1 (!%p143_p2), %v223_v6  ;;  %v231_v32 = vpack.c.bf16 (!%p143_p2), %v216_v31, %v215_v30  ;;  %v218_v34 = vld [vmem:[%s787_s1 + $0xa8] sm:$0xff] (!%p143_p2)  ;;  %v219_v36 = vld [vmem:[%s787_s1 + $0xb0] sm:$0xff] (!%p143_p2)  ;;  %v220_v37 = vld [vmem:[%s787_s1 + $0xb8] sm:$0xff] (!%p143_p2) }
   0xd   : > { %s791_s20 = smov (!%p172_p3, %s508_s20), 15  ;;  %292 = vmatprep.subr.bf16.mxu0 %v584_v3  ;;  %531 = vmatprep.subr.bf16.mxu1 %v584_v3  ;;  %v232_v35 = vpack.c.bf16 %v218_v34, %v217_v33  ;;  %v221_v38 = vld [vmem:[%s787_s1 + $0xc0] sm:$0xff]  ;;  %v233_v39 = vpack.c.bf16 %v220_v37, %v219_v36  ;;  %s793_s13 = smov (!%p184_p4, %s611_s13), 1 }
   0xe   : > { %s528_s27 = sshll.u32 %s791_s20, 3  ;;  %v234_v40 = vpack.c.bf16 %v221_v38, %v221_v38  ;;  %s513_s20 = sshll.u32 %s793_s13, 1 }
   0xf   : > { %s646_s30 = scalar_lea.vmem %s786_s0, %s528_s27  ;;  %s744_s25 = scalar_lea.vmem %s788_s2, %s528_s27 }
  0x10   : > { %v566_v12 = vld [vmem:[%s646_s30 + $0x4] ss:$8 sps:$4 sm:$0xff]   ;;  %293 = vmatpush1.bf16.msra.mxu0 %v224_v9  ;;  %544 = vmatpush1.bf16.msra.mxu1 %v224_v9  ;;  %v286_v41 = vsel %vm284_vm1, %v234_v40, 0  ;;  %v564_v42 = vld [vmem:[%s646_s30] ss:$8 sps:$4 sm:$0xff]   ;;  %s187_s26 = scalar_lea.vmem %s789_s3, %s513_s20 }
  0x11   : > { %v569_v13 = vld [vmem:[%s646_s30 + $0x24] ss:$8 sps:$4 sm:$0xff]   ;;  %294 = vmatprep.subr.bf16.mxu0 %v584_v3  ;;  %532 = vmatprep.subr.bf16.mxu1 %v584_v3  ;;  %v567_v43 = vld [vmem:[%s646_s30 + $0x20] ss:$8 sps:$4 sm:$0xff]   ;;  %v570_v44 = vld [vmem:[%s646_s30 + $0x14] ss:$8 sps:$4 sm:$0xff]  }
  0x12   : > { %522 = vmatprep.mubr.msk.bf16.mxu0 %vm271_vm0, %v566_v12  ;;  %524 = vmatprep.mubr.msk.bf16.mxu1 %vm271_vm0, %v569_v13  ;;  %v573_v45 = vld [vmem:[%s646_s30 + $0x34] ss:$8 sps:$4 sm:$0xff]   ;;  %v572_v46 = vld [vmem:[%s646_s30 + $0x10] ss:$8 sps:$4 sm:$0xff]  }
  0x13   : > { %v575_v47 = vld [vmem:[%s646_s30 + $0x30] ss:$8 sps:$4 sm:$0xff]  }
  0x14   : > { %295 = vmatpush1.bf16.msra.mxu0 %v225_v14  ;;  %545 = vmatpush1.bf16.msra.mxu1 %v225_v14 }
  0x15   : > { %296 = vmatprep.subr.bf16.mxu0 %v584_v3  ;;  %533 = vmatprep.subr.bf16.mxu1 %v584_v3 }
  0x18   : > { %297 = vmatpush1.bf16.msra.mxu0 %v226_v17  ;;  %546 = vmatpush1.bf16.msra.mxu1 %v226_v17 }
  0x19   : > { %298 = vmatprep.subr.bf16.mxu0 %v584_v3  ;;  %534 = vmatprep.subr.bf16.mxu1 %v584_v3 }
  0x1c   : > { %299 = vmatpush1.bf16.msra.mxu0 %v227_v20  ;;  %547 = vmatpush1.bf16.msra.mxu1 %v227_v20 }
  0x1d   : > { %300 = vmatprep.subr.bf16.mxu0 %v584_v3  ;;  %535 = vmatprep.subr.bf16.mxu1 %v584_v3 }
  0x20   : > { %301 = vmatpush1.bf16.msra.mxu0 %v228_v23  ;;  %548 = vmatpush1.bf16.msra.mxu1 %v228_v23 }
  0x21   : > { %302 = vmatprep.subr.bf16.mxu0 %v584_v3  ;;  %536 = vmatprep.subr.bf16.mxu1 %v584_v3 }
  0x24   : > { %303 = vmatpush1.bf16.msra.mxu0 %v229_v26  ;;  %549 = vmatpush1.bf16.msra.mxu1 %v229_v26 }
  0x25   : > { %304 = vmatprep.subr.bf16.mxu0 %v584_v3  ;;  %537 = vmatprep.subr.bf16.mxu1 %v584_v3 }
  0x28   : > { %305 = vmatpush1.bf16.msra.mxu0 %v230_v29  ;;  %550 = vmatpush1.bf16.msra.mxu1 %v230_v29 }
  0x29   : > { %306 = vmatprep.subr.bf16.mxu0 %v584_v3  ;;  %538 = vmatprep.subr.bf16.mxu1 %v584_v3 }
  0x2c   : > { %307 = vmatpush1.bf16.msra.mxu0 %v231_v32  ;;  %551 = vmatpush1.bf16.msra.mxu1 %v231_v32 }
  0x2d   : > { %308 = vmatprep.subr.bf16.mxu0 %v584_v3  ;;  %539 = vmatprep.subr.bf16.mxu1 %v584_v3 }
  0x30   : > { %309 = vmatpush1.bf16.msra.mxu0 %v232_v35  ;;  %552 = vmatpush1.bf16.msra.mxu1 %v232_v35 }
  0x31   : > { %310 = vmatprep.subr.bf16.mxu0 %v584_v3  ;;  %540 = vmatprep.subr.bf16.mxu1 %v584_v3 }
  0x34   : > { %311 = vmatpush1.bf16.msra.mxu0 %v233_v39  ;;  %553 = vmatpush1.bf16.msra.mxu1 %v233_v39 }
  0x35   : > { %312 = vmatprep.subr.bf16.mxu0 %v584_v3  ;;  %541 = vmatprep.subr.bf16.mxu1 %v584_v3 }
  0x38   : > { %313 = vmatpush1.bf16.msra.mxu0 %v286_v41  ;;  %554 = vmatpush1.bf16.msra.mxu1 %v286_v41 }
  0x3b   : > { %321 = vmatmul.mubr.bf16.vlgmr.msra.gmra.mrb[0].mxu0 %v564_v42  ;;  %337 = vmatmul.mubr.bf16.vlgmr.msra.gmra.mrb[0].mxu1 %v567_v43 }
  0x3c   : > { %523 = vmatprep.mubr.msk.bf16.mxu0 %vm271_vm0, %v570_v44  ;;  %525 = vmatprep.mubr.msk.bf16.mxu1 %vm271_vm0, %v573_v45 }
  0x43   : > { %329 = vmatmul.mubr.bf16.gmra.mrb[4].mxu0 %v572_v46  ;;  %345 = vmatmul.mubr.bf16.gmra.mrb[4].mxu1 %v575_v47 }
 0x10e   : > { %v322_v48 = vpop.f32.mrb[0].mxu0  ;;  %v338_v49 = vpop.f32.mrb[0].mxu1 }
 0x10f   : > { %354 = vst.msk [vmem:[%s744_s25] sm:$0xff] %vm353_vm2, %v322_v48  ;;  %v383_v50 = vmul.f32 %v322_v48, %v322_v48  ;;  %v324_v51 = vpop.f32.mrb[1].mxu0  ;;  %358 = vst.msk [vmem:[%s744_s25 + $0x20] sm:$0xff] %vm353_vm2, %v338_v49  ;;  %v340_v52 = vpop.f32.mrb[1].mxu1  ;;  %v362_v55 = vsel %vm353_vm2, %v322_v48, 0.0  ;;  %v387_v9 = vmul.f32 %v338_v49, %v338_v49  ;;  %v369_v17 = vsel %vm353_vm2, %v338_v49, 0.0 }
 0x110   : > { %v325_v53 = vpop.f32.mrb[2].mxu0  ;;  %v341_v54 = vpop.f32.mrb[2].mxu1 }
 0x111   : > { %355 = vst.msk [vmem:[%s744_s25 + $0x8] sm:$0xff] %vm353_vm2, %v325_v53  ;;  %v363_v56 = vsel %vm353_vm2, %v325_v53, 0.0  ;;  %v384_v57 = vmul.f32 %v325_v53, %v325_v53  ;;  %v327_v58 = vpop.f32.mrb[3].mxu0  ;;  %359 = vst.msk [vmem:[%s744_s25 + $0x28] sm:$0xff] %vm353_vm2, %v341_v54  ;;  %v343_v59 = vpop.f32.mrb[3].mxu1  ;;  %v391_v61 = vsel %vm353_vm2, %v383_v50, 0.0  ;;  %v388_v18 = vmul.f32 %v341_v54, %v341_v54 }
 0x112   : > { %v364_v60 = vadd.f32 %v363_v56, %v362_v55  ;;  %v398_v23 = vsel %vm353_vm2, %v387_v9, 0.0  ;;  %v371_v24 = vsel %vm353_vm2, %v341_v54, 0.0 }
 0x113   : > { %v392_v62 = vsel %vm353_vm2, %v384_v57, 0.0  ;;  %v400_v28 = vsel %vm353_vm2, %v388_v18, 0.0 }
 0x114   : > { %v393_v63 = vadd.f32 %v392_v62, %v391_v61 }
 0x116   : > { %v330_v0 = vpop.f32.mrb[4].mxu0  ;;  %v346_v1 = vpop.f32.mrb[4].mxu1 }
 0x117   : > { %356 = vst.msk [vmem:[%s744_s25 + $0x10] sm:$0xff] %vm353_vm2, %v330_v0  ;;  %v365_v2 = vsel %vm353_vm2, %v330_v0, 0.0  ;;  %v385_v3 = vmul.f32 %v330_v0, %v330_v0  ;;  %v332_v4 = vpop.f32.mrb[5].mxu0  ;;  %360 = vst.msk [vmem:[%s744_s25 + $0x30] sm:$0xff] %vm353_vm2, %v346_v1  ;;  %v348_v5 = vpop.f32.mrb[5].mxu1  ;;  %v389_v20 = vmul.f32 %v346_v1, %v346_v1  ;;  %v373_v25 = vsel %vm353_vm2, %v346_v1, 0.0 }
 0x118   : > { %v366_v6 = vadd.f32 %v365_v2, %v364_v60  ;;  %v333_v7 = vpop.f32.mrb[6].mxu0  ;;  %v349_v8 = vpop.f32.mrb[6].mxu1 }
 0x119   : > { %v394_v10 = vsel %vm353_vm2, %v385_v3, 0.0  ;;  %357 = vst.msk [vmem:[%s744_s25 + $0x18] sm:$0xff] %vm353_vm2, %v333_v7  ;;  %v367_v11 = vsel %vm353_vm2, %v333_v7, 0.0  ;;  %v386_v12 = vmul.f32 %v333_v7, %v333_v7  ;;  %v335_v13 = vpop.f32.mrb[7].mxu0  ;;  %361 = vst.msk [vmem:[%s744_s25 + $0x38] sm:$0xff] %vm353_vm2, %v349_v8  ;;  %v351_v14 = vpop.f32.mrb[7].mxu1  ;;  %v390_v30 = vmul.f32 %v349_v8, %v349_v8 }
 0x11a   : > { %v395_v15 = vadd.f32 %v394_v10, %v393_v63  ;;  %v368_v16 = vadd.f32 %v367_v11, %v366_v6  ;;  %v402_v29 = vsel %vm353_vm2, %v389_v20, 0.0  ;;  %v375_v33 = vsel %vm353_vm2, %v349_v8, 0.0 }
 0x11b   : > { %v396_v19 = vsel %vm353_vm2, %v386_v12, 0.0  ;;  %v404_v36 = vsel %vm353_vm2, %v390_v30, 0.0 }
 0x11c   : > { %v370_v21 = vadd.f32 %v369_v17, %v368_v16  ;;  %v397_v22 = vadd.f32 %v396_v19, %v395_v15 }
 0x11e   : > { %v399_v26 = vadd.f32 %v398_v23, %v397_v22  ;;  %v372_v27 = vadd.f32 %v371_v24, %v370_v21 }
 0x120   : > { %v374_v31 = vadd.f32 %v373_v25, %v372_v27  ;;  %v401_v32 = vadd.f32 %v400_v28, %v399_v26 }
 0x122   : > { %v403_v34 = vadd.f32 %v402_v29, %v401_v32  ;;  %v376_v35 = vadd.f32 %v375_v33, %v374_v31 }
 0x124   : > { %v377_v37 = vrot.slane %v376_v35, 4  ;;  %v405_v38 = vadd.f32 %v404_v36, %v403_v34 }
 0x126   : > { %v378_v39 = vadd.f32 %v377_v37, %v376_v35  ;;  %v406_v40 = vrot.slane %v405_v38, 4 }
 0x128   : > { %v379_v41 = vrot.slane %v378_v39, 2  ;;  %v407_v42 = vadd.f32 %v406_v40, %v405_v38 }
 0x12a   : > { %v380_v43 = vadd.f32 %v379_v41, %v378_v39  ;;  %v408_v44 = vrot.slane %v407_v42, 2 }
 0x12c   : > { %v381_v45 = vrot.slane %v380_v43, 1  ;;  %v409_v46 = vadd.f32 %v408_v44, %v407_v42 }
 0x12e   : > { %v410_v47 = vrot.slane %v409_v46, 1  ;;  %v382_v48 = vadd.f32 %v381_v45, %v380_v43 }
 0x130   : > { %v411_v49 = vadd.f32 %v410_v47, %v409_v46 }
 0x132   : > { %v413_v50 = vsel %vm412_vm3, %v382_v48, %v411_v49 }
 0x133   : > { %415 = vst.msk [vmem:[%s187_s26] sm:$0x3] %vm414_vm4, %v413_v50 }
 0x134 PF: > { %s14_s12 = sadd.s32 1, %s582_s12  }
 0x135   : > { %p11_p5 = scmp.ge.s32.totalorder %s14_s12, 4  }
 0x137   :  { %13 = sbr.rel (!%p11_p5) target bundleno = 1 (0x1), region = 70 }

// kernel: network_forward.159
= control target key start
LH: loop header
LB: loop body
LE: loop exit
PB: predicated region body
PF: predicated region fallthrough
CT: control target
= control target key end

     0   :  { %s70_s0 = inlined_call_operand.vmem [shape: f32[8,128], index: 0, kind: input, shape index: {}]   ;;  %s71_s1 = inlined_call_operand.vmem [shape: f32[1,128], index: 1, kind: input, shape index: {}]   ;;  %s72_s2 = inlined_call_operand.vmem [shape: f32[1,128], index: 2, kind: input, shape index: {}]   ;;  %s73_s3 = inlined_call_operand.vmem [shape: f32[8,128], index: 3, kind: output, shape index: {}]  }
   0x1   :  { %v14_v0 = vld [vmem:[%s70_s0] sm:$0xff] }
   0x2   :  { %v36_v1 = vld [vmem:[%s71_s1] ss:$0 sm:$0xff] }
   0x3   :  { %v37_v2 = vld [vmem:[%s72_s2] ss:$0 sm:$0xff]  ;;  %v22_v3 = vmul.f32 %v36_v1, %v14_v0 }
   0x5   :  { %v30_v4 = vadd.f32 %v37_v2, %v22_v3 }
   0x7   :  { %31 = vst [vmem:[%s73_s3] sm:$0xff] %v30_v4 }

// kernel: network_forward.140
= control target key start
LH: loop header
LB: loop body
LE: loop exit
PB: predicated region body
PF: predicated region fallthrough
CT: control target
= control target key end

     0   :  { %vm46_vm0 = vcmask 1040384   ;;  %s113_s0 = inlined_call_operand.vmem [shape: f32[9,8,128], index: 0, kind: input, shape index: {}]   ;;  %s114_s1 = inlined_call_operand.vmem [shape: f32[8,128], index: 1, kind: input, shape index: {}]   ;;  %s115_s2 = inlined_call_operand.vmem [shape: f32[8,128], index: 2, kind: output, shape index: {0}]   ;;  %s116_s3 = inlined_call_operand.vmem [shape: f32[1,2,128], index: 3, kind: output, shape index: {1}]  }
   0x1   :  { %v13_v0 = vld [vmem:[%s113_s0] sm:$0xff]  ;;  %v14_v1 = vld [vmem:[%s113_s0 + $0x8] sm:$0xff]  ;;  %v15_v2 = vld [vmem:[%s113_s0 + $0x10] sm:$0xff] }
   0x2   :  { %v22_v3 = vadd.f32 %v14_v1, %v13_v0  ;;  %v16_v4 = vld [vmem:[%s113_s0 + $0x18] sm:$0xff]  ;;  %v17_v6 = vld [vmem:[%s113_s0 + $0x20] sm:$0xff]  ;;  %v18_v8 = vld [vmem:[%s113_s0 + $0x28] sm:$0xff] }
   0x3   :  { %v19_v10 = vld [vmem:[%s113_s0 + $0x30] sm:$0xff]  ;;  %v20_v12 = vld [vmem:[%s113_s0 + $0x38] sm:$0xff]  ;;  %v21_v14 = vld [vmem:[%s113_s0 + $0x40] sm:$0xff] }
   0x4   :  { %v23_v5 = vadd.f32 %v22_v3, %v15_v2  ;;  %v30_v16 = vld [vmem:[%s114_s1] sm:$0xff] }
   0x6   :  { %v24_v7 = vadd.f32 %v23_v5, %v16_v4 }
   0x8   :  { %v25_v9 = vadd.f32 %v24_v7, %v17_v6 }
   0xa   :  { %v26_v11 = vadd.f32 %v25_v9, %v18_v8 }
   0xc   :  { %v27_v13 = vadd.f32 %v26_v11, %v19_v10 }
   0xe   :  { %v28_v15 = vadd.f32 %v27_v13, %v20_v12 }
  0x10   :  { %v29_v17 = vadd.f32 %v28_v15, %v21_v14 }
  0x12   :  { %v31_v18 = vmul.f32 %v30_v16, %v29_v17 }
  0x14   :  { %32 = vst [vmem:[%s115_s2] sm:$0xff] %v31_v18  ;;  %v33_v19 = vrot.slane %v31_v18, 4  ;;  %v39_v20 = vmul.f32 %v31_v18, %v31_v18 }
  0x16   :  { %v34_v21 = vadd.f32 %v33_v19, %v31_v18  ;;  %v40_v22 = vrot.slane %v39_v20, 4 }
  0x18   :  { %v35_v23 = vrot.slane %v34_v21, 2  ;;  %v41_v24 = vadd.f32 %v40_v22, %v39_v20 }
  0x1a   :  { %v36_v25 = vadd.f32 %v35_v23, %v34_v21  ;;  %v42_v26 = vrot.slane %v41_v24, 2 }
  0x1c   :  { %v37_v27 = vrot.slane %v36_v25, 1  ;;  %v43_v28 = vadd.f32 %v42_v26, %v41_v24 }
  0x1e   :  { %v38_v29 = vadd.f32 %v37_v27, %v36_v25  ;;  %v44_v30 = vrot.slane %v43_v28, 1 }
  0x20   :  { %v45_v31 = vadd.f32 %v44_v30, %v43_v28 }
  0x22   :  { %v47_v32 = vsel %vm46_vm0, %v38_v29, %v45_v31 }
  0x23   :  { %48 = vst [vmem:[%s116_s3] sm:$0x3] %v47_v32 }

// kernel: network_forward.139
= control target key start
LH: loop header
LB: loop body
LE: loop exit
PB: predicated region body
PF: predicated region fallthrough
CT: control target
= control target key end

     0   :  { %vm41_vm0 = vcmask 1040384   ;;  %s100_s0 = inlined_call_operand.vmem [shape: f32[9,8,128], index: 0, kind: input, shape index: {}]   ;;  %s101_s1 = inlined_call_operand.vmem [shape: f32[8,128], index: 1, kind: output, shape index: {0}]   ;;  %s102_s2 = inlined_call_operand.vmem [shape: f32[1,2,128], index: 2, kind: output, shape index: {1}]  }
   0x1   :  { %v10_v0 = vld [vmem:[%s100_s0] sm:$0xff]  ;;  %v11_v1 = vld [vmem:[%s100_s0 + $0x8] sm:$0xff]  ;;  %v12_v2 = vld [vmem:[%s100_s0 + $0x10] sm:$0xff] }
   0x2   :  { %v13_v3 = vld [vmem:[%s100_s0 + $0x18] sm:$0xff]  ;;  %v14_v4 = vld [vmem:[%s100_s0 + $0x20] sm:$0xff]  ;;  %v15_v5 = vld [vmem:[%s100_s0 + $0x28] sm:$0xff] }
   0x3   :  { %v16_v6 = vld [vmem:[%s100_s0 + $0x30] sm:$0xff]  ;;  %v17_v7 = vld [vmem:[%s100_s0 + $0x38] sm:$0xff]  ;;  %v18_v8 = vld [vmem:[%s100_s0 + $0x40] sm:$0xff]  ;;  %v19_v9 = vmax.f32 %v10_v0, %v14_v4  ;;  %v20_v10 = vmax.f32 %v11_v1, %v15_v5 }
   0x4   :  { %v21_v11 = vmax.f32 %v12_v2, %v16_v6  ;;  %v22_v12 = vmax.f32 %v13_v3, %v17_v7 }
   0x5   :  { %v23_v13 = vmax.f32 %v19_v9, %v18_v8 }
   0x6   :  { %v25_v14 = vmax.f32 %v21_v11, %v22_v12 }
   0x7   :  { %v24_v15 = vmax.f32 %v23_v13, %v20_v10 }
   0x9   :  { %v26_v16 = vmax.f32 %v24_v15, %v25_v14 }
   0xb   :  { %27 = vst [vmem:[%s101_s1] sm:$0xff] %v26_v16  ;;  %v28_v17 = vrot.slane %v26_v16, 4  ;;  %v34_v18 = vmul.f32 %v26_v16, %v26_v16 }
   0xd   :  { %v29_v19 = vadd.f32 %v28_v17, %v26_v16  ;;  %v35_v20 = vrot.slane %v34_v18, 4 }
   0xf   :  { %v30_v21 = vrot.slane %v29_v19, 2  ;;  %v36_v22 = vadd.f32 %v35_v20, %v34_v18 }
  0x11   :  { %v31_v23 = vadd.f32 %v30_v21, %v29_v19  ;;  %v37_v24 = vrot.slane %v36_v22, 2 }
  0x13   :  { %v32_v25 = vrot.slane %v31_v23, 1  ;;  %v38_v26 = vadd.f32 %v37_v24, %v36_v22 }
  0x15   :  { %v33_v27 = vadd.f32 %v32_v25, %v31_v23  ;;  %v39_v28 = vrot.slane %v38_v26, 1 }
  0x17   :  { %v40_v29 = vadd.f32 %v39_v28, %v38_v26 }
  0x19   :  { %v42_v30 = vsel %vm41_vm0, %v33_v27, %v40_v29 }
  0x1a   :  { %43 = vst [vmem:[%s102_s2] sm:$0x3] %v42_v30 }

// kernel: network_forward.155
= control target key start
LH: loop header
LB: loop body
LE: loop exit
PB: predicated region body
PF: predicated region fallthrough
CT: control target
= control target key end

     0   :  { %s559_s12 = smov 0   ;;  %s643_s0 = inlined_call_operand.vmem [shape: bf16[128,72], index: 0, kind: input, shape index: {}]   ;;  %s644_s1 = inlined_call_operand.vmem [shape: f32[72,8], index: 1, kind: input, shape index: {}]   ;;  %s645_s2 = inlined_call_operand.vmem [shape: f32[128,8], index: 2, kind: output, shape index: {0}]   ;;  %s646_s3 = inlined_call_operand.vmem [shape: f32[2,2,8], index: 3, kind: output, shape index: {1}]  }
   0x1 LB: > { %s565_s13 = sadd.s32 4294967295, %s537_s12   ;;  %p464_p0 = scmp.ge.s32.totalorder %s537_s12, 1  ;;  %s537_s12 = sphi %s559_s12, %s14_s12  }
   0x2   : > { %p141_p1 = scmp.lt.s32.totalorder %s537_s12, 3 }
   0x4   : > { %p142_p2 = pnand %p464_p0, %p141_p1 }
   0x5   : > { %v194_v0 = vld [vmem:[%s644_s1] sm:$0xff] (!%p142_p2)  ;;  %v195_v1 = vld [vmem:[%s644_s1 + $0x8] sm:$0xff] (!%p142_p2)  ;;  %v196_v2 = vld [vmem:[%s644_s1 + $0x10] sm:$0xff] (!%p142_p2)  ;;  %s465_s20 = sshll.u32 (!%p142_p2), %s565_s13, 3  ;;  %vm228_vm0 = vcmask (!%p142_p2), 588800   ;;  %vm241_vm1 = vcmask (!%p142_p2), 1043456  }
   0x6   : > { %145 = sbr.rel (%p142_p2) target bundleno = 275 (0x113), region = 28  ;;  %v203_v3 = vpack.c.bf16 (!%p142_p2), %v195_v1, %v194_v0  ;;  %v197_v4 = vld [vmem:[%s644_s1 + $0x18] sm:$0xff] (!%p142_p2)  ;;  %p170_p3 = scmp.lt.s32.totalorder (!%p142_p2), %s465_s20, 15  ;;  %v198_v6 = vld [vmem:[%s644_s1 + $0x20] sm:$0xff] (!%p142_p2)  ;;  %v199_v7 = vld [vmem:[%s644_s1 + $0x28] sm:$0xff] (!%p142_p2)  ;;  %vm310_vm2 = vcmask (!%p142_p2), 64512  }
   0x7   : > { %v204_v5 = vpack.c.bf16 (!%p142_p2), %v197_v4, %v196_v2  ;;  %v205_v8 = vpack.c.bf16 (!%p142_p2), %v199_v7, %v198_v6  ;;  %v200_v9 = vld [vmem:[%s644_s1 + $0x30] sm:$0xff] (!%p142_p2)  ;;  %v201_v10 = vld [vmem:[%s644_s1 + $0x38] sm:$0xff] (!%p142_p2)  ;;  %v202_v14 = vld [vmem:[%s644_s1 + $0x40] sm:$0xff] (!%p142_p2)  ;;  %p181_p4 = scmp.lt.s32.totalorder (!%p142_p2), %s565_s13, 1  ;;  %vm369_vm3 = vcmask (!%p142_p2), 1040384   ;;  %vm371_vm4 = vcmask (!%p142_p2), 58368  }
   0x8   : > { %489 = vmatprep.subr.bf16.mxu0 (!%p142_p2), %v203_v3  ;;  %507 = vmatprep.subr.bf16.mxu1 (!%p142_p2), %v203_v3  ;;  %v206_v12 = vpack.c.bf16 (!%p142_p2), %v201_v10, %v200_v9  ;;  %v207_v15 = vpack.c.bf16 (!%p142_p2), %v202_v14, %v202_v14 }
   0x9   : > { %490 = vmatpush3.bf16.msra.mxu0 (!%p142_p2), %v203_v3  ;;  %512 = vmatpush3.bf16.msra.mxu1 (!%p142_p2), %v203_v3 }
   0xa   : > { %491 = vmatprep.subr.bf16.mxu0 (!%p142_p2), %v204_v5  ;;  %508 = vmatprep.subr.bf16.mxu1 (!%p142_p2), %v204_v5  ;;  %v243_v16 = vsel (!%p142_p2), %vm241_vm1, %v207_v15, 0 }
   0xd   : > { %s648_s20 = smov (!%p170_p3, %s465_s20), 15  ;;  %492 = vmatpush3.bf16.msra.mxu0 %v204_v5  ;;  %513 = vmatpush3.bf16.msra.mxu1 %v204_v5  ;;  %s650_s13 = smov (!%p181_p4, %s565_s13), 1 }
   0xe   : > { %s466_s27 = sshll.u32 %s648_s20, 2  ;;  %493 = vmatprep.subr.bf16.mxu0 %v205_v8  ;;  %509 = vmatprep.subr.bf16.mxu1 %v205_v8  ;;  %s468_s10 = sshll.u32 %s648_s20, 3 }
   0xf   : > { %s173_s7 = scalar_lea.vmem %s643_s0, %s466_s27  ;;  %s179_s15 = scalar_lea.vmem %s645_s2, %s468_s10 }
  0x10   : > { %v527_v11 = vld [vmem:[%s173_s7] sm:$0xff]   ;;  %v529_v13 = vld [vmem:[%s173_s7 + $0x10] sm:$0xff]   ;;  %v528_v17 = vld [vmem:[%s173_s7 + $0x8] sm:$0xff]   ;;  %s469_s16 = sshll.u32 %s650_s13, 1 }
  0x11   : > { %499 = vmatprep.mubr.msk.bf16.mxu0 %vm228_vm0, %v527_v11  ;;  %503 = vmatprep.mubr.msk.bf16.mxu1 %vm228_vm0, %v529_v13  ;;  %v530_v18 = vld [vmem:[%s173_s7 + $0x18] sm:$0xff]   ;;  %s184_s19 = scalar_lea.vmem %s646_s3, %s469_s16 }
  0x12   : > { %494 = vmatpush3.bf16.msra.mxu0 %v205_v8  ;;  %514 = vmatpush3.bf16.msra.mxu1 %v205_v8 }
  0x13   : > { %495 = vmatprep.subr.bf16.mxu0 %v206_v12  ;;  %510 = vmatprep.subr.bf16.mxu1 %v206_v12 }
  0x16   : > { %496 = vmatpush3.bf16.msra.mxu0 %v206_v12  ;;  %515 = vmatpush3.bf16.msra.mxu1 %v206_v12 }
  0x17   : > { %517 = vmatprep.subr.msk.bf16.mxu0 %vm241_vm1, %v207_v15  ;;  %518 = vmatprep.subr.msk.bf16.mxu1 %vm241_vm1, %v207_v15 }
  0x1a   : > { %498 = vmatpush3.bf16.msra.mxu0 %v243_v16  ;;  %516 = vmatpush3.bf16.msra.mxu1 %v243_v16 }
  0x1d   : > { %500 = vmatmul.mubr.msk.bf16.vlgmr.msra.gmra.mrb[0].mxu0 %vm228_vm0, %v528_v17  ;;  %504 = vmatmul.mubr.msk.bf16.vlgmr.msra.gmra.mrb[0].mxu1 %vm228_vm0, %v530_v18 }
  0xf0   : > { %v501_v19 = vpop.f32.mrb[0].mxu0  ;;  %v505_v20 = vpop.f32.mrb[0].mxu1 }
  0xf1   : > { %313 = vst.msk [vmem:[%s179_s15 + $0x10] sm:$0xff] %vm310_vm2, %v501_v19  ;;  %v279_v21 = vpop.f32.mrb[1].mxu0  ;;  %317 = vst.msk [vmem:[%s179_s15 + $0x30] sm:$0xff] %vm310_vm2, %v505_v20  ;;  %v295_v22 = vpop.f32.mrb[1].mxu1  ;;  %v342_v28 = vmul.f32 %v501_v19, %v501_v19  ;;  %v322_v32 = vsel %vm310_vm2, %v501_v19, 0.0  ;;  %v346_v50 = vmul.f32 %v505_v20, %v505_v20  ;;  %v330_v54 = vsel %vm310_vm2, %v505_v20, 0.0 }
  0xf2   : > { %311 = vst.msk [vmem:[%s179_s15] sm:$0xff] %vm310_vm2, %v279_v21  ;;  %v340_v23 = vmul.f32 %v279_v21, %v279_v21  ;;  %v502_v24 = vpop.f32.mrb[2].mxu0  ;;  %315 = vst.msk [vmem:[%s179_s15 + $0x20] sm:$0xff] %vm310_vm2, %v295_v22  ;;  %v506_v25 = vpop.f32.mrb[2].mxu1  ;;  %v319_v29 = vsel %vm310_vm2, %v279_v21, 0.0  ;;  %v344_v37 = vmul.f32 %v295_v22, %v295_v22  ;;  %v326_v42 = vsel %vm310_vm2, %v295_v22, 0.0 }
  0xf3   : > { %314 = vst.msk [vmem:[%s179_s15 + $0x18] sm:$0xff] %vm310_vm2, %v502_v24  ;;  %v282_v26 = vpop.f32.mrb[3].mxu0  ;;  %318 = vst.msk [vmem:[%s179_s15 + $0x38] sm:$0xff] %vm310_vm2, %v506_v25  ;;  %v298_v27 = vpop.f32.mrb[3].mxu1  ;;  %v343_v35 = vmul.f32 %v502_v24, %v502_v24  ;;  %v351_v40 = vsel %vm310_vm2, %v342_v28, 0.0  ;;  %v324_v41 = vsel %vm310_vm2, %v502_v24, 0.0  ;;  %v347_v55 = vmul.f32 %v506_v25, %v506_v25 }
  0xf4   : > { %312 = vst.msk [vmem:[%s179_s15 + $0x8] sm:$0xff] %vm310_vm2, %v282_v26  ;;  %v320_v30 = vsel %vm310_vm2, %v282_v26, 0.0  ;;  %v341_v31 = vmul.f32 %v282_v26, %v282_v26  ;;  %316 = vst.msk [vmem:[%s179_s15 + $0x28] sm:$0xff] %vm310_vm2, %v298_v27  ;;  %v348_v34 = vsel %vm310_vm2, %v340_v23, 0.0  ;;  %v355_v46 = vsel %vm310_vm2, %v344_v37, 0.0 }
  0xf5   : > { %v321_v33 = vadd.f32 %v320_v30, %v319_v29  ;;  %v353_v45 = vsel %vm310_vm2, %v343_v35, 0.0  ;;  %v345_v47 = vmul.f32 %v298_v27, %v298_v27  ;;  %v328_v51 = vsel %vm310_vm2, %v298_v27, 0.0 }
  0xf6   : > { %v349_v36 = vsel %vm310_vm2, %v341_v31, 0.0  ;;  %v359_v59 = vsel %vm310_vm2, %v346_v50, 0.0  ;;  %v332_v60 = vsel %vm310_vm2, %v506_v25, 0.0  ;;  %v361_v63 = vsel %vm310_vm2, %v347_v55, 0.0 }
  0xf7   : > { %v323_v38 = vadd.f32 %v322_v32, %v321_v33  ;;  %v350_v39 = vadd.f32 %v349_v36, %v348_v34  ;;  %v357_v56 = vsel %vm310_vm2, %v345_v47, 0.0 }
  0xf9   : > { %v352_v43 = vadd.f32 %v351_v40, %v350_v39  ;;  %v325_v44 = vadd.f32 %v324_v41, %v323_v38 }
  0xfb   : > { %v327_v48 = vadd.f32 %v326_v42, %v325_v44  ;;  %v354_v49 = vadd.f32 %v353_v45, %v352_v43 }
  0xfd   : > { %v356_v52 = vadd.f32 %v355_v46, %v354_v49  ;;  %v329_v53 = vadd.f32 %v328_v51, %v327_v48 }
  0xff   : > { %v331_v57 = vadd.f32 %v330_v54, %v329_v53  ;;  %v358_v58 = vadd.f32 %v357_v56, %v356_v52 }
 0x101   : > { %v333_v61 = vadd.f32 %v332_v60, %v331_v57  ;;  %v360_v62 = vadd.f32 %v359_v59, %v358_v58 }
 0x103   : > { %v334_v0 = vrot.slane %v333_v61, 4  ;;  %v362_v1 = vadd.f32 %v361_v63, %v360_v62 }
 0x105   : > { %v335_v2 = vadd.f32 %v334_v0, %v333_v61  ;;  %v363_v3 = vrot.slane %v362_v1, 4 }
 0x107   : > { %v336_v4 = vrot.slane %v335_v2, 2  ;;  %v364_v5 = vadd.f32 %v363_v3, %v362_v1 }
 0x109   : > { %v337_v6 = vadd.f32 %v336_v4, %v335_v2  ;;  %v365_v7 = vrot.slane %v364_v5, 2 }
 0x10b   : > { %v338_v8 = vrot.slane %v337_v6, 1  ;;  %v366_v9 = vadd.f32 %v365_v7, %v364_v5 }
 0x10d   : > { %v367_v10 = vrot.slane %v366_v9, 1  ;;  %v339_v11 = vadd.f32 %v338_v8, %v337_v6 }
 0x10f   : > { %v368_v12 = vadd.f32 %v367_v10, %v366_v9 }
 0x111   : > { %v370_v13 = vsel %vm369_vm3, %v339_v11, %v368_v12 }
 0x112   : > { %372 = vst.msk [vmem:[%s184_s19] sm:$0x3] %vm371_vm4, %v370_v13 }
 0x113 PF: > { %s14_s12 = sadd.s32 1, %s537_s12  }
 0x114   : > { %p11_p5 = scmp.ge.s32.totalorder %s14_s12, 4  }
 0x116   :  { %13 = sbr.rel (!%p11_p5) target bundleno = 1 (0x1), region = 70 }

// kernel: network_forward.141
= control target key start
LH: loop header
LB: loop body
LE: loop exit
PB: predicated region body
PF: predicated region fallthrough
CT: control target
= control target key end

     0   :  { %s511_s12 = smov 0   ;;  %s566_s0 = inlined_call_operand.vmem [shape: f32[128,8], index: 0, kind: input, shape index: {}]   ;;  %s567_s1 = inlined_call_operand.vmem [shape: f32[8,4], index: 1, kind: input, shape index: {}]   ;;  %s568_s2 = inlined_call_operand.vmem [shape: f32[128,4], index: 2, kind: output, shape index: {0}]   ;;  %s569_s3 = inlined_call_operand.vmem [shape: f32[2,2,4], index: 3, kind: output, shape index: {1}]  }
   0x1 LB: > { %s517_s13 = sadd.s32 4294967295, %s489_s12   ;;  %p444_p0 = scmp.ge.s32.totalorder %s489_s12, 1  ;;  %s489_s12 = sphi %s511_s12, %s14_s12  }
   0x2   : > { %p141_p1 = scmp.lt.s32.totalorder %s489_s12, 3 }
   0x4   : > { %p142_p2 = pnand %p444_p0, %p141_p1 }
   0x5   : > { %v206_v0 = vld [vmem:[%s567_s1] sm:$0xff] (!%p142_p2)  ;;  %vm221_vm0 = vcmask (!%p142_p2), 1043456   ;;  %s445_s16 = sshll.u32 (!%p142_p2), %s517_s13, 3  ;;  %vm208_vm1 = vcmask (!%p142_p2), 64512   ;;  %vm290_vm2 = vcmask (!%p142_p2), 31744   ;;  %p181_p4 = scmp.lt.s32.totalorder (!%p142_p2), %s517_s13, 1 }
   0x6   : > { %145 = sbr.rel (%p142_p2) target bundleno = 268 (0x10c), region = 28  ;;  %v207_v1 = vpack.c.bf16 (!%p142_p2), %v206_v0, %v206_v0  ;;  %p170_p3 = scmp.lt.s32.totalorder (!%p142_p2), %s445_s16, 15  ;;  %vm349_vm3 = vcmask (!%p142_p2), 1040384   ;;  %vm351_vm4 = vcmask (!%p142_p2), 25600  }
   0x8   : > { %473 = vmatprep.subr.msk.bf16.mxu0 (!%p142_p2), %vm221_vm0, %v207_v1  ;;  %v223_v2 = vsel (!%p142_p2), %vm221_vm0, %v207_v1, 0  ;;  %474 = vmatprep.subr.msk.bf16.mxu1 (!%p142_p2), %vm221_vm0, %v207_v1 }
   0x9   : > { %462 = vmatpush3.bf16.msra.mxu0 (!%p142_p2), %v223_v2  ;;  %472 = vmatpush3.bf16.msra.mxu1 (!%p142_p2), %v223_v2 }
   0xd   : > { %s571_s16 = smov (!%p170_p3, %s445_s16), 15  ;;  %s573_s13 = smov (!%p181_p4, %s517_s13), 1 }
   0xe   : > { %s446_s17 = sshll.u32 %s571_s16, 3  ;;  %s449_s24 = sshll.u32 %s573_s13, 1 }
   0xf   : > { %s173_s20 = scalar_lea.vmem %s566_s0, %s446_s17  ;;  %s179_s23 = scalar_lea.vmem %s568_s2, %s446_s17 }
  0x10   : > { %v186_v3 = vld [vmem:[%s173_s20] sm:$0xff]  ;;  %v187_v4 = vld [vmem:[%s173_s20 + $0x8] sm:$0xff]  ;;  %v188_v5 = vld [vmem:[%s173_s20 + $0x10] sm:$0xff]  ;;  %s184_s27 = scalar_lea.vmem %s569_s3, %s449_s24 }
  0x11   : > { %v194_v6 = vmax.f32 %v186_v3, 0.0  ;;  %v195_v7 = vmax.f32 %v187_v4, 0.0  ;;  %v189_v8 = vld [vmem:[%s173_s20 + $0x18] sm:$0xff]  ;;  %v196_v9 = vmax.f32 %v188_v5, 0.0  ;;  %v190_v10 = vld [vmem:[%s173_s20 + $0x20] sm:$0xff]  ;;  %v191_v11 = vld [vmem:[%s173_s20 + $0x28] sm:$0xff] }
  0x12   : > { %v197_v12 = vmax.f32 %v189_v8, 0.0  ;;  %v198_v13 = vmax.f32 %v190_v10, 0.0  ;;  %v199_v14 = vmax.f32 %v191_v11, 0.0  ;;  %v192_v15 = vld [vmem:[%s173_s20 + $0x30] sm:$0xff]  ;;  %v193_v16 = vld [vmem:[%s173_s20 + $0x38] sm:$0xff] }
  0x13   : > { %v202_v17 = vpack.c.bf16 %v195_v7, %v194_v6  ;;  %v200_v18 = vmax.f32 %v192_v15, 0.0  ;;  %v201_v19 = vmax.f32 %v193_v16, 0.0 }
  0x14   : > { %v203_v20 = vpack.c.bf16 %v197_v12, %v196_v9  ;;  %v204_v21 = vpack.c.bf16 %v199_v14, %v198_v13 }
  0x15   : > { %463 = vmatprep.mubr.msk.bf16.mxu0 %vm208_vm1, %v202_v17  ;;  %v205_v22 = vpack.c.bf16 %v201_v19, %v200_v18 }
  0x16   : > { %464 = vmatmul.mubr.msk.bf16.vlgmr.msra.gmra.mrb[0].mxu0 %vm208_vm1, %v203_v20  ;;  %467 = vmatprep.mubr.msk.bf16.mxu1 %vm208_vm1, %v204_v21 }
  0x17   : > { %468 = vmatmul.mubr.msk.bf16.vlgmr.msra.gmra.mrb[0].mxu1 %vm208_vm1, %v205_v22 }
  0xe9   : > { %v465_v23 = vpop.f32.mrb[0].mxu0 }
  0xea   : > { %293 = vst.msk [vmem:[%s179_s23 + $0x10] sm:$0xff] %vm290_vm2, %v465_v23  ;;  %v259_v24 = vpop.f32.mrb[1].mxu0  ;;  %v469_v25 = vpop.f32.mrb[0].mxu1  ;;  %v322_v31 = vmul.f32 %v465_v23, %v465_v23  ;;  %v302_v36 = vsel %vm290_vm2, %v465_v23, 0.0 }
  0xeb   : > { %291 = vst.msk [vmem:[%s179_s23] sm:$0xff] %vm290_vm2, %v259_v24  ;;  %v320_v26 = vmul.f32 %v259_v24, %v259_v24  ;;  %v466_v27 = vpop.f32.mrb[2].mxu0  ;;  %297 = vst.msk [vmem:[%s179_s23 + $0x30] sm:$0xff] %vm290_vm2, %v469_v25  ;;  %v275_v28 = vpop.f32.mrb[1].mxu1  ;;  %v299_v32 = vsel %vm290_vm2, %v259_v24, 0.0  ;;  %v326_v54 = vmul.f32 %v469_v25, %v469_v25  ;;  %v310_v58 = vsel %vm290_vm2, %v469_v25, 0.0 }
  0xec   : > { %294 = vst.msk [vmem:[%s179_s23 + $0x18] sm:$0xff] %vm290_vm2, %v466_v27  ;;  %v262_v29 = vpop.f32.mrb[3].mxu0  ;;  %295 = vst.msk [vmem:[%s179_s23 + $0x20] sm:$0xff] %vm290_vm2, %v275_v28  ;;  %v470_v30 = vpop.f32.mrb[2].mxu1  ;;  %v323_v39 = vmul.f32 %v466_v27, %v466_v27  ;;  %v324_v41 = vmul.f32 %v275_v28, %v275_v28  ;;  %v331_v44 = vsel %vm290_vm2, %v322_v31, 0.0  ;;  %v304_v45 = vsel %vm290_vm2, %v466_v27, 0.0 }
  0xed   : > { %292 = vst.msk [vmem:[%s179_s23 + $0x8] sm:$0xff] %vm290_vm2, %v262_v29  ;;  %v300_v33 = vsel %vm290_vm2, %v262_v29, 0.0  ;;  %v321_v34 = vmul.f32 %v262_v29, %v262_v29  ;;  %298 = vst.msk [vmem:[%s179_s23 + $0x38] sm:$0xff] %vm290_vm2, %v470_v30  ;;  %v278_v35 = vpop.f32.mrb[3].mxu1  ;;  %v328_v38 = vsel %vm290_vm2, %v320_v26, 0.0  ;;  %v306_v46 = vsel %vm290_vm2, %v275_v28, 0.0 }
  0xee   : > { %v301_v37 = vadd.f32 %v300_v33, %v299_v32  ;;  %296 = vst.msk [vmem:[%s179_s23 + $0x28] sm:$0xff] %vm290_vm2, %v278_v35  ;;  %v333_v49 = vsel %vm290_vm2, %v323_v39, 0.0  ;;  %v335_v50 = vsel %vm290_vm2, %v324_v41, 0.0  ;;  %v325_v51 = vmul.f32 %v278_v35, %v278_v35 }
  0xef   : > { %v329_v40 = vsel %vm290_vm2, %v321_v34, 0.0  ;;  %v308_v55 = vsel %vm290_vm2, %v278_v35, 0.0  ;;  %v327_v59 = vmul.f32 %v470_v30, %v470_v30  ;;  %v339_v63 = vsel %vm290_vm2, %v326_v54, 0.0 }
  0xf0   : > { %v303_v42 = vadd.f32 %v302_v36, %v301_v37  ;;  %v330_v43 = vadd.f32 %v329_v40, %v328_v38  ;;  %v337_v60 = vsel %vm290_vm2, %v325_v51, 0.0  ;;  %v312_v0 = vsel %vm290_vm2, %v470_v30, 0.0 }
  0xf1   : > { %v341_v3 = vsel %vm290_vm2, %v327_v59, 0.0 }
  0xf2   : > { %v332_v47 = vadd.f32 %v331_v44, %v330_v43  ;;  %v305_v48 = vadd.f32 %v304_v45, %v303_v42 }
  0xf4   : > { %v307_v52 = vadd.f32 %v306_v46, %v305_v48  ;;  %v334_v53 = vadd.f32 %v333_v49, %v332_v47 }
  0xf6   : > { %v336_v56 = vadd.f32 %v335_v50, %v334_v53  ;;  %v309_v57 = vadd.f32 %v308_v55, %v307_v52 }
  0xf8   : > { %v311_v61 = vadd.f32 %v310_v58, %v309_v57  ;;  %v338_v62 = vadd.f32 %v337_v60, %v336_v56 }
  0xfa   : > { %v313_v1 = vadd.f32 %v312_v0, %v311_v61  ;;  %v340_v2 = vadd.f32 %v339_v63, %v338_v62 }
  0xfc   : > { %v314_v4 = vrot.slane %v313_v1, 4  ;;  %v342_v5 = vadd.f32 %v341_v3, %v340_v2 }
  0xfe   : > { %v315_v6 = vadd.f32 %v314_v4, %v313_v1  ;;  %v343_v7 = vrot.slane %v342_v5, 4 }
 0x100   : > { %v316_v8 = vrot.slane %v315_v6, 2  ;;  %v344_v9 = vadd.f32 %v343_v7, %v342_v5 }
 0x102   : > { %v317_v10 = vadd.f32 %v316_v8, %v315_v6  ;;  %v345_v11 = vrot.slane %v344_v9, 2 }
 0x104   : > { %v318_v12 = vrot.slane %v317_v10, 1  ;;  %v346_v13 = vadd.f32 %v345_v11, %v344_v9 }
 0x106   : > { %v347_v14 = vrot.slane %v346_v13, 1  ;;  %v319_v15 = vadd.f32 %v318_v12, %v317_v10 }
 0x108   : > { %v348_v16 = vadd.f32 %v347_v14, %v346_v13 }
 0x10a   : > { %v350_v17 = vsel %vm349_vm3, %v319_v15, %v348_v16 }
 0x10b   : > { %352 = vst.msk [vmem:[%s184_s27] sm:$0x3] %vm351_vm4, %v350_v17 }
 0x10c PF: > { %s14_s12 = sadd.s32 1, %s489_s12  }
 0x10d   : > { %p11_p5 = scmp.ge.s32.totalorder %s14_s12, 4  }
 0x10f   :  { %13 = sbr.rel (!%p11_p5) target bundleno = 1 (0x1), region = 70 }

// kernel: network_forward.163
= control target key start
LH: loop header
LB: loop body
LE: loop exit
PB: predicated region body
PF: predicated region fallthrough
CT: control target
= control target key end

     0   :  { %v56_v0 = vlaneseq  ;;  %s315_s0 = inlined_call_operand.vmem [shape: f32[14,128], index: 0, kind: input, shape index: {}]   ;;  %s316_s2 = inlined_call_operand.vmem [shape: f32[8,128], index: 2, kind: input, shape index: {}]   ;;  %s317_s3 = inlined_call_operand.vmem [shape: f32[8,128], index: 3, kind: input, shape index: {}]   ;;  %s318_s4 = inlined_call_operand.vmem [shape: f32[8,128], index: 4, kind: input, shape index: {}]   ;;  %s319_s5 = inlined_call_operand.vmem [shape: f32[8,128], index: 5, kind: input, shape index: {}]   ;;  %s320_s6 = inlined_call_operand.vmem [shape: f32[8,128], index: 6, kind: input, shape index: {}]   ;;  %s321_s7 = inlined_call_operand.vmem [shape: f32[8,128], index: 7, kind: input, shape index: {}]   ;;  %s322_s8 = inlined_call_operand.vmem [shape: f32[8,128], index: 8, kind: input, shape index: {}]   ;;  %s323_s9 = inlined_call_operand.vmem [shape: f32[8,128], index: 9, kind: input, shape index: {}]   ;;  %s324_s10 = inlined_call_operand.vmem [shape: f32[8,128], index: 10, kind: input, shape index: {}]   ;;  %s325_s11 = inlined_call_operand.vmem [shape: f32[8,128], index: 11, kind: input, shape index: {}]   ;;  %s326_s12 = inlined_call_operand.vmem [shape: f32[8,128], index: 12, kind: input, shape index: {}]   ;;  %s327_s13 = inlined_call_operand.vmem [shape: f32[8,128], index: 13, kind: input, shape index: {}]   ;;  %s328_s14 = inlined_call_operand.vmem [shape: f32[8,128], index: 14, kind: input, shape index: {}]   ;;  %s329_s15 = inlined_call_operand.vmem [shape: f32[8,128], index: 15, kind: input, shape index: {}]   ;;  %s330_s1 = inlined_call_operand.vmem [shape: f32[1,128], index: 1, kind: input, shape index: {}]   ;;  %s331_s16 = inlined_call_operand.vmem [shape: f32[8,128], index: 16, kind: output, shape index: {}]  }
   0x1   :  { %333 = sst [smem:[#allocation2_spill]] %s315_s0  ;;  %v55_v7 = vld [vmem:[%s316_s2] sm:$0xff] }
   0x2   :  { %v251_v1 = vshrl.u32 %v56_v0, 7  ;;  %s334_s23 = sld [smem:[#allocation2_spill]]  ;;  %v61_v8 = vld [vmem:[%s317_s3] sm:$0xff] }
   0x3   :  { %v68_v9 = vld [vmem:[%s318_s4] sm:$0xff] }
   0x4   :  { %v58_v3 = vsub.s32 0, %v251_v1  ;;  %v64_v4 = vsub.s32 1, %v251_v1  ;;  %v71_v5 = vsub.s32 2, %v251_v1  ;;  %v78_v6 = vsub.s32 3, %v251_v1  ;;  %v75_v16 = vld [vmem:[%s319_s5] sm:$0xff] }
   0x5   :  { %v85_v10 = vsub.s32 4, %v251_v1  ;;  %v92_v11 = vsub.s32 5, %v251_v1  ;;  %v99_v17 = vsub.s32 6, %v251_v1  ;;  %v82_v22 = vld [vmem:[%s320_s6] sm:$0xff]  ;;  %v106_v26 = vsub.s32 7, %v251_v1 }
   0x6   :  { %v89_v27 = vld [vmem:[%s321_s7] sm:$0xff] }
   0x7   :  { %v96_v32 = vld [vmem:[%s322_s8] sm:$0xff] }
   0x8   :  { %v53_v2 = vld [vmem:[%s334_s23] sm:$0xff]  ;;  %v54_v31 = vld [vmem:[%s334_s23 + $0x8] sm:$0x3f] }
   0x9   :  { %v59_v12 = vrot.slane %v53_v2, %v58_v3  ;;  %v65_v13 = vrot.slane %v53_v2, %v64_v4  ;;  %v72_v14 = vrot.slane %v53_v2, %v71_v5  ;;  %v79_v15 = vrot.slane %v53_v2, %v78_v6  ;;  %v103_v36 = vld [vmem:[%s323_s9] sm:$0xff] }
   0xa   :  { %v86_v21 = vrot.slane %v53_v2, %v85_v10  ;;  %v93_v25 = vrot.slane %v53_v2, %v92_v11  ;;  %v100_v30 = vrot.slane %v53_v2, %v99_v17  ;;  %v107_v35 = vrot.slane %v53_v2, %v106_v26  ;;  %v110_v40 = vld [vmem:[%s324_s10] sm:$0xff] }
   0xb   :  { %v60_v18 = vmul.f32 %v59_v12, %v55_v7  ;;  %v66_v19 = vmul.f32 %v65_v13, %v61_v8  ;;  %v73_v20 = vmul.f32 %v72_v14, %v68_v9  ;;  %v80_v24 = vmul.f32 %v79_v15, %v75_v16  ;;  %v117_v44 = vld [vmem:[%s325_s11] sm:$0xff] }
   0xc   :  { %v87_v29 = vmul.f32 %v86_v21, %v82_v22  ;;  %v94_v34 = vmul.f32 %v93_v25, %v89_v27  ;;  %v101_v38 = vmul.f32 %v100_v30, %v96_v32  ;;  %v114_v39 = vrot.slane %v54_v31, %v58_v3  ;;  %v124_v48 = vld [vmem:[%s326_s12] sm:$0xff] }
   0xd   :  { %v67_v23 = vadd.f32 %v66_v19, %v60_v18  ;;  %v108_v42 = vmul.f32 %v107_v35, %v103_v36  ;;  %v121_v43 = vrot.slane %v54_v31, %v64_v4  ;;  %v128_v47 = vrot.slane %v54_v31, %v71_v5  ;;  %v131_v52 = vld [vmem:[%s327_s13] sm:$0xff] }
   0xe   :  { %v115_v46 = vmul.f32 %v114_v39, %v110_v40  ;;  %v135_v51 = vrot.slane %v54_v31, %v78_v6  ;;  %v142_v55 = vrot.slane %v54_v31, %v85_v10  ;;  %v138_v56 = vld [vmem:[%s328_s14] sm:$0xff]  ;;  %v149_v59 = vrot.slane %v54_v31, %v92_v11 }
   0xf   :  { %v74_v28 = vadd.f32 %v73_v20, %v67_v23  ;;  %v122_v50 = vmul.f32 %v121_v43, %v117_v44  ;;  %v129_v54 = vmul.f32 %v128_v47, %v124_v48  ;;  %v145_v60 = vld [vmem:[%s329_s15] sm:$0xff] }
  0x10   :  { %v136_v58 = vmul.f32 %v135_v51, %v131_v52  ;;  %v143_v62 = vmul.f32 %v142_v55, %v138_v56  ;;  %v150_v0 = vmul.f32 %v149_v59, %v145_v60  ;;  %v165_v2 = vld [vmem:[%s330_s1] ss:$0 sm:$0xff] }
  0x11   :  { %v81_v33 = vadd.f32 %v80_v24, %v74_v28 }
  0x13   :  { %v88_v37 = vadd.f32 %v87_v29, %v81_v33 }
  0x15   :  { %v95_v41 = vadd.f32 %v94_v34, %v88_v37 }
  0x17   :  { %v102_v45 = vadd.f32 %v101_v38, %v95_v41 }
  0x19   :  { %v109_v49 = vadd.f32 %v108_v42, %v102_v45 }
  0x1b   :  { %v116_v53 = vadd.f32 %v115_v46, %v109_v49 }
  0x1d   :  { %v123_v57 = vadd.f32 %v122_v50, %v116_v53 }
  0x1f   :  { %v130_v61 = vadd.f32 %v129_v54, %v123_v57 }
  0x21   :  { %v137_v63 = vadd.f32 %v136_v58, %v130_v61 }
  0x23   :  { %v144_v1 = vadd.f32 %v143_v62, %v137_v63 }
  0x25   :  { %v151_v3 = vadd.f32 %v150_v0, %v144_v1 }
  0x27   :  { %v159_v4 = vadd.f32 %v165_v2, %v151_v3 }
  0x29   :  { %160 = vst [vmem:[%s331_s16] sm:$0xff] %v159_v4 }

// kernel: tile.928
= control target key start
LH: loop header
LB: loop body
LE: loop exit
PB: predicated region body
PF: predicated region fallthrough
CT: control target
= control target key end

     0   :  { %s22_s0 = inlined_call_operand.vmem [shape: f32[16], index: 0, kind: input, shape index: {}]   ;;  %s23_s1 = inlined_call_operand.vmem [shape: f32[8,16], index: 1, kind: output, shape index: {}]  }
   0x1   :  { %v4_v0 = vld [vmem:[%s22_s0] ss:$0 sm:$0xff] }
   0x2   :  { %5 = vst [vmem:[%s23_s1] sm:$0xff] %v4_v0 }

// kernel: tile.929
= control target key start
LH: loop header
LB: loop body
LE: loop exit
PB: predicated region body
PF: predicated region fallthrough
CT: control target
= control target key end

     0   :  { %s67_s10 = smov 112   ;;  %s68_s11 = smov 80   ;;  %vm3_vm0 = vcmask 130048   ;;  %vm9_vm1 = vcmask 1048448   ;;  %vm15_vm2 = vcmask 917248   ;;  %vm21_vm3 = vcmask 786048   ;;  %s111_s0 = inlined_call_operand.vmem [shape: f32[8,16], index: 0, kind: input, shape index: {}]   ;;  %s112_s1 = inlined_call_operand.vmem [shape: f32[1,128], index: 1, kind: output, shape index: {}]  }
   0x1   :  { %v53_v0 = vld [vmem:[%s111_s0 + $0x7] sm:$0x1]   ;;  %v55_v1 = vld [vmem:[%s111_s0 + $0x5] sm:$0x1]   ;;  %v54_v2 = vld [vmem:[%s111_s0 + $0x6] sm:$0x1]  }
   0x2   :  { %7 = vrot.lane.b32.xlu0 %v53_v0, %s67_s10  ;;  %19 = vrot.lane.b32.xlu1 %v55_v1, %s68_s11  ;;  %v56_v3 = vld [vmem:[%s111_s0 + $0x4] sm:$0x1]   ;;  %v2_v4 = vld [vmem:[%s111_s0] sm:$0x1]   ;;  %s69_s18 = smov 96   ;;  %s70_s19 = smov 64  }
   0x3   :  { %4 = vst.msk [vmem:[#allocation0] sm:$0x1] %vm3_vm0, %v2_v4   ;;  %v57_v5 = vld [vmem:[%s111_s0 + $0x3] sm:$0x1]   ;;  %v58_v6 = vld [vmem:[%s111_s0 + $0x2] sm:$0x1]  }
   0x4   :  { %s71_s24 = smov 48   ;;  %s72_s25 = smov 32   ;;  %v59_v7 = vld [vmem:[%s111_s0 + $0x1] sm:$0x1]   ;;  %vm27_vm4 = vcmask 654848   ;;  %vm33_vm5 = vcmask 523648  }
   0x5   :  { %s73_s0 = smov 16   ;;  %vm39_vm6 = vcmask 392448   ;;  %vm45_vm7 = vcmask 261248  }
   0x6   :  { %13 = vrot.lane.b32.xlu0 %v54_v2, %s69_s18  ;;  %25 = vrot.lane.b32.xlu1 %v56_v3, %s70_s19 }
   0xa   :  { %31 = vrot.lane.b32.xlu0 %v57_v5, %s71_s24  ;;  %37 = vrot.lane.b32.xlu1 %v58_v6, %s72_s25 }
   0xe   :  { %43 = vrot.lane.b32.xlu0 %v59_v7, %s73_s0 }
  0x74   :  { %v8_v8 = vpop.permute.xlu0 %7   ;;  %v20_v9 = vpop.permute.xlu1 %19  }
  0x75   :  { %10 = vst.msk [vmem:[#allocation0] sm:$0x1] %vm9_vm1, %v8_v8  }
  0x78   :  { %v14_v10 = vpop.permute.xlu0 %13   ;;  %v26_v11 = vpop.permute.xlu1 %25  }
  0x79   :  { %16 = vst.msk [vmem:[#allocation0] sm:$0x1] %vm15_vm2, %v14_v10  }
  0x7a   :  { %22 = vst.msk [vmem:[#allocation0] sm:$0x1] %vm21_vm3, %v20_v9  }
  0x7b   :  { %28 = vst.msk [vmem:[#allocation0] sm:$0x1] %vm27_vm4, %v26_v11  }
  0x7c   :  { %v32_v12 = vpop.permute.xlu0 %31   ;;  %v38_v13 = vpop.permute.xlu1 %37  }
  0x7d   :  { %34 = vst.msk [vmem:[#allocation0] sm:$0x1] %vm33_vm5, %v32_v12  }
  0x7e   :  { %40 = vst.msk [vmem:[#allocation0] sm:$0x1] %vm39_vm6, %v38_v13  }
  0x80   :  { %v44_v14 = vpop.permute.xlu0 %43  }
  0x81   :  { %46 = vst.msk [vmem:[#allocation0] sm:$0x1] %vm45_vm7, %v44_v14  }
  0x88   :  { %v50_v15 = vld [vmem:[#allocation0] sm:$0x1] }
  0x89   :  { %52 = vst [vmem:[%s112_s1] sm:$0x1] %v50_v15 }

// kernel: network_forward.198
= control target key start
LH: loop header
LB: loop body
LE: loop exit
PB: predicated region body
PF: predicated region fallthrough
CT: control target
= control target key end

     0   :  { %s505_s12 = smov 0   ;;  %s567_s0 = inlined_call_operand.vmem [shape: f32[128,16], index: 0, kind: input, shape index: {}]   ;;  %s568_s1 = inlined_call_operand.vmem [shape: f32[16,16], index: 1, kind: input, shape index: {}]   ;;  %s569_s2 = inlined_call_operand.vmem [shape: f32[128,16], index: 2, kind: output, shape index: {0}]   ;;  %s570_s3 = inlined_call_operand.vmem [shape: f32[2,2,16], index: 3, kind: output, shape index: {1}]  }
   0x1 LB: > { %s511_s13 = sadd.s32 4294967295, %s483_s12   ;;  %p440_p0 = scmp.ge.s32.totalorder %s483_s12, 1  ;;  %s483_s12 = sphi %s505_s12, %s14_s12  }
   0x2   : > { %p141_p1 = scmp.lt.s32.totalorder %s483_s12, 3 }
   0x4   : > { %p142_p2 = pnand %p440_p0, %p141_p1 }
   0x5   : > { %v206_v0 = vld [vmem:[%s568_s1] sm:$0xff] (!%p142_p2)  ;;  %v207_v1 = vld [vmem:[%s568_s1 + $0x8] sm:$0xff] (!%p142_p2)  ;;  %s441_s18 = sshll.u32 (!%p142_p2), %s511_s13, 3  ;;  %vm209_vm0 = vcmask (!%p142_p2), 130048   ;;  %p181_p4 = scmp.lt.s32.totalorder (!%p142_p2), %s511_s13, 1  ;;  %vm345_vm1 = vcmask (!%p142_p2), 1040384  }
   0x6   : > { %145 = sbr.rel (%p142_p2) target bundleno = 268 (0x10c), region = 28  ;;  %v208_v2 = vpack.c.bf16 (!%p142_p2), %v207_v1, %v206_v0  ;;  %p170_p3 = scmp.lt.s32.totalorder (!%p142_p2), %s441_s18, 15  ;;  %vm347_vm2 = vcmask (!%p142_p2), 123904  }
   0x8   : > { %457 = vmatprep.subr.bf16.mxu0 (!%p142_p2), %v208_v2  ;;  %467 = vmatprep.subr.bf16.mxu1 (!%p142_p2), %v208_v2 }
   0x9   : > { %458 = vmatpush3.bf16.msra.mxu0 (!%p142_p2), %v208_v2  ;;  %468 = vmatpush3.bf16.msra.mxu1 (!%p142_p2), %v208_v2 }
   0xd   : > { %s572_s18 = smov (!%p170_p3, %s441_s18), 15  ;;  %s574_s13 = smov (!%p181_p4, %s511_s13), 1 }
   0xe   : > { %s442_s19 = sshll.u32 %s572_s18, 3  ;;  %s445_s26 = sshll.u32 %s574_s13, 1 }
   0xf   : > { %s173_s22 = scalar_lea.vmem %s567_s0, %s442_s19  ;;  %s179_s25 = scalar_lea.vmem %s569_s2, %s442_s19 }
  0x10   : > { %v186_v3 = vld [vmem:[%s173_s22] sm:$0xff]  ;;  %v187_v4 = vld [vmem:[%s173_s22 + $0x8] sm:$0xff]  ;;  %v188_v5 = vld [vmem:[%s173_s22 + $0x10] sm:$0xff]  ;;  %s184_s29 = scalar_lea.vmem %s570_s3, %s445_s26 }
  0x11   : > { %v194_v6 = vmax.f32 %v186_v3, 0.0  ;;  %v195_v7 = vmax.f32 %v187_v4, 0.0  ;;  %v189_v8 = vld [vmem:[%s173_s22 + $0x18] sm:$0xff]  ;;  %v196_v9 = vmax.f32 %v188_v5, 0.0  ;;  %v190_v10 = vld [vmem:[%s173_s22 + $0x20] sm:$0xff]  ;;  %v191_v11 = vld [vmem:[%s173_s22 + $0x28] sm:$0xff] }
  0x12   : > { %v197_v12 = vmax.f32 %v189_v8, 0.0  ;;  %v198_v13 = vmax.f32 %v190_v10, 0.0  ;;  %v199_v14 = vmax.f32 %v191_v11, 0.0  ;;  %v192_v15 = vld [vmem:[%s173_s22 + $0x30] sm:$0xff]  ;;  %v193_v16 = vld [vmem:[%s173_s22 + $0x38] sm:$0xff] }
  0x13   : > { %v202_v17 = vpack.c.bf16 %v195_v7, %v194_v6  ;;  %v200_v18 = vmax.f32 %v192_v15, 0.0  ;;  %v201_v19 = vmax.f32 %v193_v16, 0.0 }
  0x14   : > { %v203_v20 = vpack.c.bf16 %v197_v12, %v196_v9  ;;  %v204_v21 = vpack.c.bf16 %v199_v14, %v198_v13 }
  0x15   : > { %459 = vmatprep.mubr.msk.bf16.mxu0 %vm209_vm0, %v202_v17  ;;  %v205_v22 = vpack.c.bf16 %v201_v19, %v200_v18 }
  0x16   : > { %460 = vmatmul.mubr.msk.bf16.vlgmr.msra.gmra.mrb[0].mxu0 %vm209_vm0, %v203_v20  ;;  %463 = vmatprep.mubr.msk.bf16.mxu1 %vm209_vm0, %v204_v21 }
  0x17   : > { %464 = vmatmul.mubr.msk.bf16.vlgmr.msra.gmra.mrb[0].mxu1 %vm209_vm0, %v205_v22 }
  0xe9   : > { %v461_v23 = vpop.f32.mrb[0].mxu0 }
  0xea   : > { %289 = vst.msk [vmem:[%s179_s25 + $0x10] sm:$0xff] %vm209_vm0, %v461_v23  ;;  %v256_v24 = vpop.f32.mrb[1].mxu0  ;;  %v465_v25 = vpop.f32.mrb[0].mxu1  ;;  %v318_v31 = vmul.f32 %v461_v23, %v461_v23  ;;  %v298_v36 = vsel %vm209_vm0, %v461_v23, 0.0 }
  0xeb   : > { %287 = vst.msk [vmem:[%s179_s25] sm:$0xff] %vm209_vm0, %v256_v24  ;;  %v316_v26 = vmul.f32 %v256_v24, %v256_v24  ;;  %v462_v27 = vpop.f32.mrb[2].mxu0  ;;  %293 = vst.msk [vmem:[%s179_s25 + $0x30] sm:$0xff] %vm209_vm0, %v465_v25  ;;  %v272_v28 = vpop.f32.mrb[1].mxu1  ;;  %v295_v32 = vsel %vm209_vm0, %v256_v24, 0.0  ;;  %v322_v54 = vmul.f32 %v465_v25, %v465_v25  ;;  %v306_v58 = vsel %vm209_vm0, %v465_v25, 0.0 }
  0xec   : > { %290 = vst.msk [vmem:[%s179_s25 + $0x18] sm:$0xff] %vm209_vm0, %v462_v27  ;;  %v259_v29 = vpop.f32.mrb[3].mxu0  ;;  %291 = vst.msk [vmem:[%s179_s25 + $0x20] sm:$0xff] %vm209_vm0, %v272_v28  ;;  %v466_v30 = vpop.f32.mrb[2].mxu1  ;;  %v319_v39 = vmul.f32 %v462_v27, %v462_v27  ;;  %v320_v41 = vmul.f32 %v272_v28, %v272_v28  ;;  %v327_v44 = vsel %vm209_vm0, %v318_v31, 0.0  ;;  %v300_v45 = vsel %vm209_vm0, %v462_v27, 0.0 }
  0xed   : > { %288 = vst.msk [vmem:[%s179_s25 + $0x8] sm:$0xff] %vm209_vm0, %v259_v29  ;;  %v296_v33 = vsel %vm209_vm0, %v259_v29, 0.0  ;;  %v317_v34 = vmul.f32 %v259_v29, %v259_v29  ;;  %294 = vst.msk [vmem:[%s179_s25 + $0x38] sm:$0xff] %vm209_vm0, %v466_v30  ;;  %v275_v35 = vpop.f32.mrb[3].mxu1  ;;  %v324_v38 = vsel %vm209_vm0, %v316_v26, 0.0  ;;  %v302_v46 = vsel %vm209_vm0, %v272_v28, 0.0 }
  0xee   : > { %v297_v37 = vadd.f32 %v296_v33, %v295_v32  ;;  %292 = vst.msk [vmem:[%s179_s25 + $0x28] sm:$0xff] %vm209_vm0, %v275_v35  ;;  %v329_v49 = vsel %vm209_vm0, %v319_v39, 0.0  ;;  %v331_v50 = vsel %vm209_vm0, %v320_v41, 0.0  ;;  %v321_v51 = vmul.f32 %v275_v35, %v275_v35 }
  0xef   : > { %v325_v40 = vsel %vm209_vm0, %v317_v34, 0.0  ;;  %v304_v55 = vsel %vm209_vm0, %v275_v35, 0.0  ;;  %v323_v59 = vmul.f32 %v466_v30, %v466_v30  ;;  %v335_v63 = vsel %vm209_vm0, %v322_v54, 0.0 }
  0xf0   : > { %v299_v42 = vadd.f32 %v298_v36, %v297_v37  ;;  %v326_v43 = vadd.f32 %v325_v40, %v324_v38  ;;  %v333_v60 = vsel %vm209_vm0, %v321_v51, 0.0  ;;  %v308_v0 = vsel %vm209_vm0, %v466_v30, 0.0 }
  0xf1   : > { %v337_v3 = vsel %vm209_vm0, %v323_v59, 0.0 }
  0xf2   : > { %v328_v47 = vadd.f32 %v327_v44, %v326_v43  ;;  %v301_v48 = vadd.f32 %v300_v45, %v299_v42 }
  0xf4   : > { %v303_v52 = vadd.f32 %v302_v46, %v301_v48  ;;  %v330_v53 = vadd.f32 %v329_v49, %v328_v47 }
  0xf6   : > { %v332_v56 = vadd.f32 %v331_v50, %v330_v53  ;;  %v305_v57 = vadd.f32 %v304_v55, %v303_v52 }
  0xf8   : > { %v307_v61 = vadd.f32 %v306_v58, %v305_v57  ;;  %v334_v62 = vadd.f32 %v333_v60, %v332_v56 }
  0xfa   : > { %v309_v1 = vadd.f32 %v308_v0, %v307_v61  ;;  %v336_v2 = vadd.f32 %v335_v63, %v334_v62 }
  0xfc   : > { %v310_v4 = vrot.slane %v309_v1, 4  ;;  %v338_v5 = vadd.f32 %v337_v3, %v336_v2 }
  0xfe   : > { %v311_v6 = vadd.f32 %v310_v4, %v309_v1  ;;  %v339_v7 = vrot.slane %v338_v5, 4 }
 0x100   : > { %v312_v8 = vrot.slane %v311_v6, 2  ;;  %v340_v9 = vadd.f32 %v339_v7, %v338_v5 }
 0x102   : > { %v313_v10 = vadd.f32 %v312_v8, %v311_v6  ;;  %v341_v11 = vrot.slane %v340_v9, 2 }
 0x104   : > { %v314_v12 = vrot.slane %v313_v10, 1  ;;  %v342_v13 = vadd.f32 %v341_v11, %v340_v9 }
 0x106   : > { %v343_v14 = vrot.slane %v342_v13, 1  ;;  %v315_v15 = vadd.f32 %v314_v12, %v313_v10 }
 0x108   : > { %v344_v16 = vadd.f32 %v343_v14, %v342_v13 }
 0x10a   : > { %v346_v17 = vsel %vm345_vm1, %v315_v15, %v344_v16 }
 0x10b   : > { %348 = vst.msk [vmem:[%s184_s29] sm:$0x3] %vm347_vm2, %v346_v17 }
 0x10c PF: > { %s14_s12 = sadd.s32 1, %s483_s12  }
 0x10d   : > { %p11_p5 = scmp.ge.s32.totalorder %s14_s12, 4  }
 0x10f   :  { %13 = sbr.rel (!%p11_p5) target bundleno = 1 (0x1), region = 70 }

// kernel: network_forward.194
= control target key start
LH: loop header
LB: loop body
LE: loop exit
PB: predicated region body
PF: predicated region fallthrough
CT: control target
= control target key end

     0   :  { %v78_v0 = vlaneseq  ;;  %s470_s0 = inlined_call_operand.vmem [shape: f32[21,128], index: 0, kind: input, shape index: {}]   ;;  %s471_s2 = inlined_call_operand.vmem [shape: f32[8,128], index: 2, kind: input, shape index: {}]   ;;  %s472_s3 = inlined_call_operand.vmem [shape: f32[8,128], index: 3, kind: input, shape index: {}]   ;;  %s473_s4 = inlined_call_operand.vmem [shape: f32[8,128], index: 4, kind: input, shape index: {}]   ;;  %s474_s5 = inlined_call_operand.vmem [shape: f32[8,128], index: 5, kind: input, shape index: {}]   ;;  %s475_s6 = inlined_call_operand.vmem [shape: f32[8,128], index: 6, kind: input, shape index: {}]   ;;  %s476_s7 = inlined_call_operand.vmem [shape: f32[8,128], index: 7, kind: input, shape index: {}]   ;;  %s477_s8 = inlined_call_operand.vmem [shape: f32[8,128], index: 8, kind: input, shape index: {}]   ;;  %s478_s9 = inlined_call_operand.vmem [shape: f32[8,128], index: 9, kind: input, shape index: {}]   ;;  %s479_s10 = inlined_call_operand.vmem [shape: f32[8,128], index: 10, kind: input, shape index: {}]   ;;  %s480_s11 = inlined_call_operand.vmem [shape: f32[8,128], index: 11, kind: input, shape index: {}]   ;;  %s481_s12 = inlined_call_operand.vmem [shape: f32[8,128], index: 12, kind: input, shape index: {}]   ;;  %s482_s13 = inlined_call_operand.vmem [shape: f32[8,128], index: 13, kind: input, shape index: {}]   ;;  %s483_s14 = inlined_call_operand.vmem [shape: f32[8,128], index: 14, kind: input, shape index: {}]   ;;  %s484_s15 = inlined_call_operand.vmem [shape: f32[8,128], index: 15, kind: input, shape index: {}]   ;;  %s485_s16 = inlined_call_operand.vmem [shape: f32[8,128], index: 16, kind: input, shape index: {}]   ;;  %s486_s17 = inlined_call_operand.vmem [shape: f32[8,128], index: 17, kind: input, shape index: {}]   ;;  %s487_s18 = inlined_call_operand.vmem [shape: f32[8,128], index: 18, kind: input, shape index: {}]   ;;  %s488_s19 = inlined_call_operand.vmem [shape: f32[8,128], index: 19, kind: input, shape index: {}]   ;;  %s489_s20 = inlined_call_operand.vmem [shape: f32[8,128], index: 20, kind: input, shape index: {}]   ;;  %s490_s21 = inlined_call_operand.vmem [shape: f32[8,128], index: 21, kind: input, shape index: {}]   ;;  %s491_s22 = inlined_call_operand.vmem [shape: f32[8,128], index: 22, kind: input, shape index: {}]   ;;  %s492_s1 = inlined_call_operand.vmem [shape: f32[1,128], index: 1, kind: input, shape index: {}]   ;;  %s493_s23 = inlined_call_operand.vmem [shape: f32[8,128], index: 23, kind: output, shape index: {}]  }
   0x1   :  { %495 = sst [smem:[#allocation2_spill]] %s470_s0  ;;  %v125_v36 = vld [vmem:[%s478_s9] sm:$0xff] }
   0x2   :  { %496 = sst [smem:[#allocation3_spill]] %s471_s2  ;;  %v357_v1 = vshrl.u32 %v78_v0, 7  ;;  %s503_s24 = sld [smem:[#allocation2_spill]]  ;;  %v132_v40 = vld [vmem:[%s479_s10] sm:$0xff] }
   0x3   :  { %497 = sst [smem:[#allocation4_spill]] %s472_s3  ;;  %s504_s2 = sld [smem:[#allocation3_spill]]  ;;  %v139_v44 = vld [vmem:[%s480_s11] sm:$0xff] }
   0x4   :  { %498 = sst [smem:[#allocation5_spill]] %s473_s4  ;;  %v363_v3 = vsub.s32 0, %v357_v1  ;;  %v366_v4 = vsub.s32 1, %v357_v1  ;;  %v369_v5 = vsub.s32 2, %v357_v1  ;;  %v372_v6 = vsub.s32 3, %v357_v1  ;;  %v146_v48 = vld [vmem:[%s481_s12] sm:$0xff] }
   0x5   :  { %499 = sst [smem:[#allocation6_spill]] %s474_s5  ;;  %s506_s28 = sld [smem:[#allocation5_spill]]  ;;  %v384_v10 = vsub.s32 4, %v357_v1  ;;  %v114_v11 = vsub.s32 5, %v357_v1  ;;  %v121_v17 = vsub.s32 6, %v357_v1  ;;  %v128_v26 = vsub.s32 7, %v357_v1 }
   0x6   :  { %500 = sst [smem:[#allocation7_spill]] %s475_s6  ;;  %s507_s0 = sld [smem:[#allocation6_spill]]  ;;  %v153_v52 = vld [vmem:[%s482_s13] sm:$0xff] }
   0x7   :  { %501 = sst [smem:[#allocation8_spill]] %s476_s7  ;;  %s505_s7 = sld [smem:[#allocation4_spill]]  ;;  %v160_v56 = vld [vmem:[%s483_s14] sm:$0xff] }
   0x8   :  { %502 = sst [smem:[#allocation9_spill]] %s477_s8  ;;  %v74_v2 = vld [vmem:[%s503_s24] sm:$0xff]  ;;  %s508_s25 = sld [smem:[#allocation7_spill]]  ;;  %v75_v31 = vld [vmem:[%s503_s24 + $0x8] sm:$0xff]  ;;  %v76_v0 = vld [vmem:[%s503_s24 + $0x10] sm:$0x1f] }
   0x9   :  { %v77_v7 = vld [vmem:[%s504_s2] sm:$0xff]  ;;  %v81_v12 = vrot.slane %v74_v2, %v363_v3  ;;  %v87_v13 = vrot.slane %v74_v2, %v366_v4  ;;  %v94_v14 = vrot.slane %v74_v2, %v369_v5  ;;  %v101_v15 = vrot.slane %v74_v2, %v372_v6  ;;  %s509_s26 = sld [smem:[#allocation8_spill]] }
   0xa   :  { %v108_v21 = vrot.slane %v74_v2, %v384_v10  ;;  %v115_v25 = vrot.slane %v74_v2, %v114_v11  ;;  %v122_v30 = vrot.slane %v74_v2, %v121_v17  ;;  %v129_v35 = vrot.slane %v74_v2, %v128_v26  ;;  %v167_v60 = vld [vmem:[%s484_s15] sm:$0xff] }
   0xb   :  { %v90_v9 = vld [vmem:[%s506_s28] sm:$0xff]  ;;  %v82_v18 = vmul.f32 %v81_v12, %v77_v7  ;;  %s510_s28 = sld [smem:[#allocation9_spill]]  ;;  %v136_v39 = vrot.slane %v75_v31, %v363_v3  ;;  %v143_v43 = vrot.slane %v75_v31, %v366_v4  ;;  %v150_v47 = vrot.slane %v75_v31, %v369_v5 }
   0xc   :  { %v97_v16 = vld [vmem:[%s507_s0] sm:$0xff]  ;;  %v95_v20 = vmul.f32 %v94_v14, %v90_v9  ;;  %v130_v42 = vmul.f32 %v129_v35, %v125_v36  ;;  %v157_v51 = vrot.slane %v75_v31, %v372_v6  ;;  %v164_v55 = vrot.slane %v75_v31, %v384_v10 }
   0xd   :  { %v83_v8 = vld [vmem:[%s505_s7] sm:$0xff]  ;;  %v102_v24 = vmul.f32 %v101_v15, %v97_v16  ;;  %v137_v46 = vmul.f32 %v136_v39, %v132_v40  ;;  %v144_v50 = vmul.f32 %v143_v43, %v139_v44  ;;  %v151_v54 = vmul.f32 %v150_v47, %v146_v48 }
   0xe   :  { %v88_v19 = vmul.f32 %v87_v13, %v83_v8  ;;  %v104_v22 = vld [vmem:[%s508_s25] sm:$0xff]  ;;  %v158_v58 = vmul.f32 %v157_v51, %v153_v52  ;;  %v171_v59 = vrot.slane %v75_v31, %v114_v11  ;;  %v165_v62 = vmul.f32 %v164_v55, %v160_v56 }
   0xf   :  { %v111_v27 = vld [vmem:[%s509_s26] sm:$0xff]  ;;  %v109_v29 = vmul.f32 %v108_v21, %v104_v22  ;;  %v178_v63 = vrot.slane %v75_v31, %v121_v17  ;;  %v185_v8 = vrot.slane %v75_v31, %v128_v26  ;;  %v192_v13 = vrot.slane %v76_v0, %v363_v3 }
  0x10   :  { %v89_v23 = vadd.f32 %v88_v19, %v82_v18  ;;  %v116_v34 = vmul.f32 %v115_v25, %v111_v27  ;;  %v174_v1 = vld [vmem:[%s485_s16] sm:$0xff]  ;;  %v172_v7 = vmul.f32 %v171_v59, %v167_v60  ;;  %v199_v17 = vrot.slane %v76_v0, %v366_v4 }
  0x11   :  { %v118_v32 = vld [vmem:[%s510_s28] sm:$0xff]  ;;  %v179_v12 = vmul.f32 %v178_v63, %v174_v1  ;;  %v206_v21 = vrot.slane %v76_v0, %v369_v5  ;;  %v220_v27 = vrot.slane %v76_v0, %v384_v10 }
  0x12   :  { %v96_v28 = vadd.f32 %v95_v20, %v89_v23  ;;  %v123_v38 = vmul.f32 %v122_v30, %v118_v32  ;;  %v181_v9 = vld [vmem:[%s486_s17] sm:$0xff] }
  0x13   :  { %v188_v14 = vld [vmem:[%s487_s18] sm:$0xff]  ;;  %v186_v16 = vmul.f32 %v185_v8, %v181_v9 }
  0x14   :  { %v103_v33 = vadd.f32 %v102_v24, %v96_v28  ;;  %v195_v18 = vld [vmem:[%s488_s19] sm:$0xff]  ;;  %v193_v20 = vmul.f32 %v192_v13, %v188_v14  ;;  %v213_v24 = vrot.slane %v76_v0, %v372_v6 }
  0x15   :  { %v202_v3 = vld [vmem:[%s489_s20] sm:$0xff]  ;;  %v200_v23 = vmul.f32 %v199_v17, %v195_v18 }
  0x16   :  { %v110_v37 = vadd.f32 %v109_v29, %v103_v33  ;;  %v209_v4 = vld [vmem:[%s490_s21] sm:$0xff]  ;;  %v207_v26 = vmul.f32 %v206_v21, %v202_v3 }
  0x17   :  { %v216_v5 = vld [vmem:[%s491_s22] sm:$0xff]  ;;  %v214_v29 = vmul.f32 %v213_v24, %v209_v4 }
  0x18   :  { %v117_v41 = vadd.f32 %v116_v34, %v110_v37  ;;  %v221_v31 = vmul.f32 %v220_v27, %v216_v5  ;;  %v236_v6 = vld [vmem:[%s492_s1] ss:$0 sm:$0xff] }
  0x1a   :  { %v124_v45 = vadd.f32 %v123_v38, %v117_v41 }
  0x1c   :  { %v131_v49 = vadd.f32 %v130_v42, %v124_v45 }
  0x1e   :  { %v138_v53 = vadd.f32 %v137_v46, %v131_v49 }
  0x20   :  { %v145_v57 = vadd.f32 %v144_v50, %v138_v53 }
  0x22   :  { %v152_v61 = vadd.f32 %v151_v54, %v145_v57 }
  0x24   :  { %v159_v2 = vadd.f32 %v158_v58, %v152_v61 }
  0x26   :  { %v166_v11 = vadd.f32 %v165_v62, %v159_v2 }
  0x28   :  { %v173_v15 = vadd.f32 %v172_v7, %v166_v11 }
  0x2a   :  { %v180_v19 = vadd.f32 %v179_v12, %v173_v15 }
  0x2c   :  { %v187_v22 = vadd.f32 %v186_v16, %v180_v19 }
  0x2e   :  { %v194_v25 = vadd.f32 %v193_v20, %v187_v22 }
  0x30   :  { %v201_v28 = vadd.f32 %v200_v23, %v194_v25 }
  0x32   :  { %v208_v30 = vadd.f32 %v207_v26, %v201_v28 }
  0x34   :  { %v215_v32 = vadd.f32 %v214_v29, %v208_v30 }
  0x36   :  { %v222_v33 = vadd.f32 %v221_v31, %v215_v32 }
  0x38   :  { %v230_v34 = vadd.f32 %v236_v6, %v222_v33 }
  0x3a   :  { %231 = vst [vmem:[%s493_s23] sm:$0xff] %v230_v34 }

// kernel: network_forward.199
= control target key start
LH: loop header
LB: loop body
LE: loop exit
PB: predicated region body
PF: predicated region fallthrough
CT: control target
= control target key end

     0   :  { %s260_s12 = smov 0   ;;  %s296_s0 = inlined_call_operand.vmem [shape: f32[16,128], index: 0, kind: input, shape index: {}]   ;;  %s297_s1 = inlined_call_operand.vmem [shape: f32[1,128], index: 1, kind: input, shape index: {}]   ;;  %s298_s2 = inlined_call_operand.vmem [shape: f32[1,128], index: 2, kind: input, shape index: {}]   ;;  %s299_s3 = inlined_call_operand.vmem [shape: f32[16,128], index: 3, kind: output, shape index: {}]  }
   0x1 LB: > { %s237_s13 = sadd.s32 4294967295, %s262_s12   ;;  %p241_p0 = scmp.ge.s32.totalorder %s262_s12, 1  ;;  %s262_s12 = sphi %s260_s12, %s13_s12  }
   0x2   : > { %p136_p1 = scmp.lt.s32.totalorder %s262_s12, 3 }
   0x4   : > { %p137_p2 = pnand %p241_p0, %p136_p1 }
   0x5   : > { %p158_p3 = scmp.lt.s32.totalorder (!%p137_p2), %s237_s13, 1  ;;  %v244_v0 = vld [vmem:[%s297_s1] ss:$0 sm:$0xff] (!%p137_p2) }
   0x6   : > { %140 = sbr.rel (%p137_p2) target bundleno = 22 (0x16), region = 32  ;;  %v245_v2 = vld [vmem:[%s298_s2] ss:$0 sm:$0xff] (!%p137_p2) }
   0xd   : > { %s301_s13 = smov (!%p158_p3, %s237_s13), 1 }
   0xe   : > { %s242_s14 = sshll.u32 %s301_s13, 3 }
   0xf   : > { %s161_s19 = scalar_lea.vmem %s296_s0, %s242_s14  ;;  %s165_s24 = scalar_lea.vmem %s299_s3, %s242_s14 }
  0x10   : > { %v166_v1 = vld [vmem:[%s161_s19] sm:$0xff] }
  0x11   : > { %v174_v3 = vmul.f32 %v244_v0, %v166_v1 }
  0x13   : > { %v182_v4 = vadd.f32 %v245_v2, %v174_v3 }
  0x15   : > { %183 = vst [vmem:[%s165_s24] sm:$0xff] %v182_v4 }
  0x16 PF: > { %s13_s12 = sadd.s32 1, %s262_s12  }
  0x17   : > { %p10_p4 = scmp.ge.s32.totalorder %s13_s12, 4  }
  0x19   :  { %12 = sbr.rel (!%p10_p4) target bundleno = 1 (0x1), region = 62 }

// kernel: network_forward.235
= control target key start
LH: loop header
LB: loop body
LE: loop exit
PB: predicated region body
PF: predicated region fallthrough
CT: control target
= control target key end

     0   :  { %s414_s12 = smov 0   ;;  %s445_s0 = inlined_call_operand.vmem [shape: f32[32,16], index: 0, kind: input, shape index: {}]   ;;  %s446_s1 = inlined_call_operand.vmem [shape: f32[16,8], index: 1, kind: input, shape index: {}]   ;;  %s447_s2 = inlined_call_operand.vmem [shape: f32[32,8], index: 2, kind: output, shape index: {0}]   ;;  %s448_s3 = inlined_call_operand.vmem [shape: f32[2,2,8], index: 3, kind: output, shape index: {1}]  }
   0x1 LB: > { %s420_s13 = sadd.s32 4294967295, %s390_s12   ;;  %p357_p0 = scmp.ge.s32.totalorder %s390_s12, 1  ;;  %s390_s12 = sphi %s414_s12, %s14_s12  }
   0x2   : > { %p141_p1 = scmp.lt.s32.totalorder %s390_s12, 3 }
   0x4   : > { %p142_p2 = pnand %p357_p0, %p141_p1 }
   0x5   : > { %v191_v0 = vld [vmem:[%s446_s1] sm:$0xff] (!%p142_p2)  ;;  %v192_v1 = vld [vmem:[%s446_s1 + $0x8] sm:$0xff] (!%p142_p2)  ;;  %s358_s18 = sshll.u32 (!%p142_p2), %s420_s13, 1  ;;  %v392_v2 = vmov (!%p142_p2), 0.0   ;;  %vm393_vm0 = vmmov (!%p142_p2), 0   ;;  %vm194_vm1 = vcmask (!%p142_p2), 130048  }
   0x6   : > { %145 = sbr.rel (%p142_p2) target bundleno = 254 (0xfe), region = 28  ;;  %368 = vmatprep.subr.bf16.mxu0 (!%p142_p2), %v392_v2  ;;  %v193_v3 = vpack.c.bf16 (!%p142_p2), %v192_v1, %v191_v0  ;;  %370 = vmatprep.mubr.msk.bf16.mxu0 (!%p142_p2), %vm393_vm0, %v392_v2  ;;  %p170_p3 = scmp.lt.s32.totalorder (!%p142_p2), %s358_s18, 3  ;;  %vm239_vm2 = vcmask (!%p142_p2), 64512   ;;  %vm262_vm3 = vcmask (!%p142_p2), 1040384   ;;  %vm264_vm4 = vcmask (!%p142_p2), 58368  }
   0x7   : > { %p181_p4 = scmp.lt.s32.totalorder (!%p142_p2), %s420_s13, 1 }
   0x8   : > { %369 = vmatpush3.bf16.msra.mxu0 (!%p142_p2), %v193_v3 }
   0xd   : > { %s450_s18 = smov (!%p170_p3, %s358_s18), 3  ;;  %s452_s13 = smov (!%p181_p4, %s420_s13), 1 }
   0xe   : > { %s359_s19 = sshll.u32 %s450_s18, 3  ;;  %s362_s26 = sshll.u32 %s452_s13, 1 }
   0xf   : > { %s173_s22 = scalar_lea.vmem %s445_s0, %s359_s19  ;;  %s179_s25 = scalar_lea.vmem %s447_s2, %s359_s19 }
  0x10   : > { %v186_v4 = vld [vmem:[%s173_s22] sm:$0xff]  ;;  %v187_v5 = vld [vmem:[%s173_s22 + $0x8] sm:$0xff]  ;;  %s184_s29 = scalar_lea.vmem %s448_s3, %s362_s26 }
  0x11   : > { %v188_v6 = vmax.f32 %v186_v4, 0.0  ;;  %v189_v7 = vmax.f32 %v187_v5, 0.0 }
  0x13   : > { %v190_v8 = vpack.c.bf16 %v189_v7, %v188_v6 }
  0x15   : > { %371 = vmatmul.mubr.msk.bf16.vlgmr.msra.gmra.mrb[0].mxu0 %vm194_vm1, %v190_v8 }
  0xe8   : > { %v232_v9 = vpop.f32.mrb[0].mxu0 }
  0xe9   : > { %240 = vst.msk [vmem:[%s179_s25] sm:$0xff] %vm239_vm2, %v232_v9  ;;  %v251_v10 = vmul.f32 %v232_v9, %v232_v9  ;;  %v372_v11 = vpop.f32.mrb[1].mxu0  ;;  %v242_v13 = vsel %vm239_vm2, %v232_v9, 0.0 }
  0xea   : > { %v235_v12 = vpop.f32.mrb[2].mxu0 }
  0xeb   : > { %241 = vst.msk [vmem:[%s179_s25 + $0x8] sm:$0xff] %vm239_vm2, %v235_v12  ;;  %v243_v14 = vsel %vm239_vm2, %v235_v12, 0.0  ;;  %v252_v15 = vmul.f32 %v235_v12, %v235_v12  ;;  %v373_v16 = vpop.f32.mrb[3].mxu0  ;;  %v253_v18 = vsel %vm239_vm2, %v251_v10, 0.0 }
  0xec   : > { %v244_v17 = vadd.f32 %v243_v14, %v242_v13 }
  0xed   : > { %v254_v19 = vsel %vm239_vm2, %v252_v15, 0.0 }
  0xee   : > { %v245_v20 = vrot.slane %v244_v17, 4  ;;  %v255_v21 = vadd.f32 %v254_v19, %v253_v18 }
  0xf0   : > { %v246_v22 = vadd.f32 %v245_v20, %v244_v17  ;;  %v256_v23 = vrot.slane %v255_v21, 4 }
  0xf2   : > { %v247_v24 = vrot.slane %v246_v22, 2  ;;  %v257_v25 = vadd.f32 %v256_v23, %v255_v21 }
  0xf4   : > { %v248_v26 = vadd.f32 %v247_v24, %v246_v22  ;;  %v258_v27 = vrot.slane %v257_v25, 2 }
  0xf6   : > { %v249_v28 = vrot.slane %v248_v26, 1  ;;  %v259_v29 = vadd.f32 %v258_v27, %v257_v25 }
  0xf8   : > { %v260_v30 = vrot.slane %v259_v29, 1  ;;  %v250_v31 = vadd.f32 %v249_v28, %v248_v26 }
  0xfa   : > { %v261_v32 = vadd.f32 %v260_v30, %v259_v29 }
  0xfc   : > { %v263_v33 = vsel %vm262_vm3, %v250_v31, %v261_v32 }
  0xfd   : > { %265 = vst.msk [vmem:[%s184_s29] sm:$0x3] %vm264_vm4, %v263_v33 }
  0xfe PF: > { %s14_s12 = sadd.s32 1, %s390_s12  }
  0xff   : > { %p11_p5 = scmp.ge.s32.totalorder %s14_s12, 4  }
 0x101   :  { %13 = sbr.rel (!%p11_p5) target bundleno = 1 (0x1), region = 70 }

// kernel: network_forward.213
= control target key start
LH: loop header
LB: loop body
LE: loop exit
PB: predicated region body
PF: predicated region fallthrough
CT: control target
= control target key end

     0   :  { %vm22_vm0 = vcmask 1043456   ;;  %vm58_vm1 = vcmask 1040384   ;;  %s136_s0 = inlined_call_operand.vmem [shape: f32[9,4,128], index: 0, kind: input, shape index: {}]   ;;  %s137_s1 = inlined_call_operand.vmem [shape: f32[4,128], index: 1, kind: input, shape index: {}]   ;;  %s138_s2 = inlined_call_operand.vmem [shape: f32[4,128], index: 2, kind: output, shape index: {0}]   ;;  %s139_s3 = inlined_call_operand.vmem [shape: f32[1,2,128], index: 3, kind: output, shape index: {1}]  }
   0x1   :  { %v13_v0 = vld [vmem:[%s136_s0] sm:$0xf]  ;;  %v14_v1 = vld [vmem:[%s136_s0 + $0x4] sm:$0xf]  ;;  %v15_v2 = vld [vmem:[%s136_s0 + $0x8] sm:$0xf] }
   0x2   :  { %v16_v3 = vld [vmem:[%s136_s0 + $0xc] sm:$0xf]  ;;  %v23_v4 = vsel %vm22_vm0, %v13_v0, 0.0  ;;  %v24_v5 = vsel %vm22_vm0, %v14_v1, 0.0  ;;  %v26_v6 = vsel %vm22_vm0, %v15_v2, 0.0 }
   0x3   :  { %v17_v7 = vld [vmem:[%s136_s0 + $0x10] sm:$0xf]  ;;  %v25_v8 = vadd.f32 %v24_v5, %v23_v4  ;;  %v28_v9 = vsel %vm22_vm0, %v16_v3, 0.0  ;;  %v18_v10 = vld [vmem:[%s136_s0 + $0x14] sm:$0xf] }
   0x4   :  { %v30_v12 = vsel %vm22_vm0, %v17_v7, 0.0  ;;  %v19_v13 = vld [vmem:[%s136_s0 + $0x18] sm:$0xf]  ;;  %v32_v15 = vsel %vm22_vm0, %v18_v10, 0.0  ;;  %v20_v16 = vld [vmem:[%s136_s0 + $0x1c] sm:$0xf] }
   0x5   :  { %v27_v11 = vadd.f32 %v26_v6, %v25_v8  ;;  %v34_v18 = vsel %vm22_vm0, %v19_v13, 0.0  ;;  %v21_v19 = vld [vmem:[%s136_s0 + $0x20] sm:$0xf]  ;;  %v36_v21 = vsel %vm22_vm0, %v20_v16, 0.0 }
   0x6   :  { %v38_v23 = vsel %vm22_vm0, %v21_v19, 0.0  ;;  %v40_v25 = vld [vmem:[%s137_s1] sm:$0xf] }
   0x7   :  { %v29_v14 = vadd.f32 %v28_v9, %v27_v11 }
   0x9   :  { %v31_v17 = vadd.f32 %v30_v12, %v29_v14 }
   0xb   :  { %v33_v20 = vadd.f32 %v32_v15, %v31_v17 }
   0xd   :  { %v35_v22 = vadd.f32 %v34_v18, %v33_v20 }
   0xf   :  { %v37_v24 = vadd.f32 %v36_v21, %v35_v22 }
  0x11   :  { %v39_v26 = vadd.f32 %v38_v23, %v37_v24 }
  0x13   :  { %v41_v27 = vmul.f32 %v40_v25, %v39_v26 }
  0x15   :  { %42 = vst [vmem:[%s138_s2] sm:$0xf] %v41_v27  ;;  %v43_v28 = vsel %vm22_vm0, %v41_v27, 0.0  ;;  %v50_v29 = vmul.f32 %v41_v27, %v41_v27 }
  0x16   :  { %v44_v30 = vrot.slane %v43_v28, 4 }
  0x17   :  { %v51_v31 = vsel %vm22_vm0, %v50_v29, 0.0 }
  0x18   :  { %v45_v32 = vadd.f32 %v44_v30, %v43_v28  ;;  %v52_v33 = vrot.slane %v51_v31, 4 }
  0x1a   :  { %v46_v34 = vrot.slane %v45_v32, 2  ;;  %v53_v35 = vadd.f32 %v52_v33, %v51_v31 }
  0x1c   :  { %v47_v36 = vadd.f32 %v46_v34, %v45_v32  ;;  %v54_v37 = vrot.slane %v53_v35, 2 }
  0x1e   :  { %v48_v38 = vrot.slane %v47_v36, 1  ;;  %v55_v39 = vadd.f32 %v54_v37, %v53_v35 }
  0x20   :  { %v49_v40 = vadd.f32 %v48_v38, %v47_v36  ;;  %v56_v41 = vrot.slane %v55_v39, 1 }
  0x22   :  { %v57_v42 = vadd.f32 %v56_v41, %v55_v39 }
  0x24   :  { %v59_v43 = vsel %vm58_vm1, %v49_v40, %v57_v42 }
  0x25   :  { %60 = vst [vmem:[%s139_s3] sm:$0x3] %v59_v43 }

// kernel: network_forward.212
= control target key start
LH: loop header
LB: loop body
LE: loop exit
PB: predicated region body
PF: predicated region fallthrough
CT: control target
= control target key end

     0   :  { %vm19_vm0 = vcmask 1043456   ;;  %vm53_vm1 = vcmask 1040384   ;;  %s123_s0 = inlined_call_operand.vmem [shape: f32[9,4,128], index: 0, kind: input, shape index: {}]   ;;  %s124_s1 = inlined_call_operand.vmem [shape: f32[4,128], index: 1, kind: output, shape index: {0}]   ;;  %s125_s2 = inlined_call_operand.vmem [shape: f32[1,2,128], index: 2, kind: output, shape index: {1}]  }
   0x1   :  { %v10_v0 = vld [vmem:[%s123_s0] sm:$0xf]  ;;  %v11_v1 = vld [vmem:[%s123_s0 + $0x4] sm:$0xf]  ;;  %v12_v2 = vld [vmem:[%s123_s0 + $0x8] sm:$0xf] }
   0x2   :  { %v13_v3 = vld [vmem:[%s123_s0 + $0xc] sm:$0xf]  ;;  %v14_v4 = vld [vmem:[%s123_s0 + $0x10] sm:$0xf]  ;;  %v15_v5 = vld [vmem:[%s123_s0 + $0x14] sm:$0xf] }
   0x3   :  { %v16_v6 = vld [vmem:[%s123_s0 + $0x18] sm:$0xf]  ;;  %v17_v7 = vld [vmem:[%s123_s0 + $0x1c] sm:$0xf]  ;;  %v18_v8 = vld [vmem:[%s123_s0 + $0x20] sm:$0xf] }
   0x4   :  { %v20_v9 = vsel %vm19_vm0, %v10_v0, -inf  ;;  %v21_v10 = vsel %vm19_vm0, %v11_v1, -inf  ;;  %v22_v11 = vsel %vm19_vm0, %v12_v2, -inf  ;;  %v23_v12 = vsel %vm19_vm0, %v13_v3, -inf }
   0x5   :  { %v24_v13 = vsel %vm19_vm0, %v14_v4, -inf  ;;  %v26_v14 = vsel %vm19_vm0, %v15_v5, -inf  ;;  %v28_v15 = vsel %vm19_vm0, %v16_v6, -inf  ;;  %v30_v16 = vsel %vm19_vm0, %v17_v7, -inf }
   0x6   :  { %v25_v17 = vmax.f32 %v20_v9, %v24_v13  ;;  %v27_v18 = vmax.f32 %v21_v10, %v26_v14  ;;  %v29_v19 = vmax.f32 %v22_v11, %v28_v15  ;;  %v31_v20 = vmax.f32 %v23_v12, %v30_v16 }
   0x7   :  { %v32_v21 = vsel %vm19_vm0, %v18_v8, -inf }
   0x8   :  { %v33_v22 = vmax.f32 %v25_v17, %v32_v21  ;;  %v35_v23 = vmax.f32 %v29_v19, %v31_v20 }
   0xa   :  { %v34_v24 = vmax.f32 %v33_v22, %v27_v18 }
   0xc   :  { %v36_v25 = vmax.f32 %v34_v24, %v35_v23 }
   0xe   :  { %37 = vst [vmem:[%s124_s1] sm:$0xf] %v36_v25  ;;  %v38_v26 = vsel %vm19_vm0, %v36_v25, 0.0  ;;  %v45_v27 = vmul.f32 %v36_v25, %v36_v25 }
   0xf   :  { %v39_v28 = vrot.slane %v38_v26, 4 }
  0x10   :  { %v46_v29 = vsel %vm19_vm0, %v45_v27, 0.0 }
  0x11   :  { %v40_v30 = vadd.f32 %v39_v28, %v38_v26  ;;  %v47_v31 = vrot.slane %v46_v29, 4 }
  0x13   :  { %v41_v32 = vrot.slane %v40_v30, 2  ;;  %v48_v33 = vadd.f32 %v47_v31, %v46_v29 }
  0x15   :  { %v42_v34 = vadd.f32 %v41_v32, %v40_v30  ;;  %v49_v35 = vrot.slane %v48_v33, 2 }
  0x17   :  { %v43_v36 = vrot.slane %v42_v34, 1  ;;  %v50_v37 = vadd.f32 %v49_v35, %v48_v33 }
  0x19   :  { %v44_v38 = vadd.f32 %v43_v36, %v42_v34  ;;  %v51_v39 = vrot.slane %v50_v37, 1 }
  0x1b   :  { %v52_v40 = vadd.f32 %v51_v39, %v50_v37 }
  0x1d   :  { %v54_v41 = vsel %vm53_vm1, %v44_v38, %v52_v40 }
  0x1e   :  { %55 = vst [vmem:[%s125_s2] sm:$0x3] %v54_v41 }

// kernel: network_forward.195
= control target key start
LH: loop header
LB: loop body
LE: loop exit
PB: predicated region body
PF: predicated region fallthrough
CT: control target
= control target key end

     0   :  { %s512_s12 = smov 0   ;;  %s570_s0 = inlined_call_operand.vmem [shape: f32[128,12], index: 0, kind: input, shape index: {}]   ;;  %s571_s1 = inlined_call_operand.vmem [shape: f32[12,8], index: 1, kind: input, shape index: {}]   ;;  %s572_s2 = inlined_call_operand.vmem [shape: f32[128,8], index: 2, kind: output, shape index: {0}]   ;;  %s573_s3 = inlined_call_operand.vmem [shape: f32[2,2,8], index: 3, kind: output, shape index: {1}]  }
   0x1 LB: > { %s518_s13 = sadd.s32 4294967295, %s490_s12   ;;  %p445_p0 = scmp.ge.s32.totalorder %s490_s12, 1  ;;  %s490_s12 = sphi %s512_s12, %s14_s12  }
   0x2   : > { %p141_p1 = scmp.lt.s32.totalorder %s490_s12, 3 }
   0x4   : > { %p142_p2 = pnand %p445_p0, %p141_p1 }
   0x5   : > { %v206_v0 = vld [vmem:[%s571_s1] sm:$0xff] (!%p142_p2)  ;;  %v207_v1 = vld [vmem:[%s571_s1 + $0x8] sm:$0xf] (!%p142_p2)  ;;  %vm222_vm0 = vcmask (!%p142_p2), 1045504   ;;  %s446_s18 = sshll.u32 (!%p142_p2), %s518_s13, 3  ;;  %vm209_vm1 = vcmask (!%p142_p2), 97280  }
   0x6   : > { %145 = sbr.rel (%p142_p2) target bundleno = 268 (0x10c), region = 28  ;;  %v208_v2 = vpack.c.bf16 (!%p142_p2), %v207_v1, %v206_v0  ;;  %p170_p3 = scmp.lt.s32.totalorder (!%p142_p2), %s446_s18, 15  ;;  %vm291_vm2 = vcmask (!%p142_p2), 64512   ;;  %vm350_vm3 = vcmask (!%p142_p2), 1040384   ;;  %vm352_vm4 = vcmask (!%p142_p2), 58368  }
   0x7   : > { %p181_p4 = scmp.lt.s32.totalorder (!%p142_p2), %s518_s13, 1 }
   0x8   : > { %474 = vmatprep.subr.msk.bf16.mxu0 (!%p142_p2), %vm222_vm0, %v208_v2  ;;  %v224_v3 = vsel (!%p142_p2), %vm222_vm0, %v208_v2, 0  ;;  %475 = vmatprep.subr.msk.bf16.mxu1 (!%p142_p2), %vm222_vm0, %v208_v2 }
   0x9   : > { %463 = vmatpush3.bf16.msra.mxu0 (!%p142_p2), %v224_v3  ;;  %473 = vmatpush3.bf16.msra.mxu1 (!%p142_p2), %v224_v3 }
   0xd   : > { %s575_s18 = smov (!%p170_p3, %s446_s18), 15  ;;  %s577_s13 = smov (!%p181_p4, %s518_s13), 1 }
   0xe   : > { %s447_s19 = sshll.u32 %s575_s18, 3  ;;  %s450_s26 = sshll.u32 %s577_s13, 1 }
   0xf   : > { %s173_s22 = scalar_lea.vmem %s570_s0, %s447_s19  ;;  %s179_s25 = scalar_lea.vmem %s572_s2, %s447_s19 }
  0x10   : > { %v186_v4 = vld [vmem:[%s173_s22] sm:$0xff]  ;;  %v187_v5 = vld [vmem:[%s173_s22 + $0x8] sm:$0xff]  ;;  %v188_v6 = vld [vmem:[%s173_s22 + $0x10] sm:$0xff]  ;;  %s184_s29 = scalar_lea.vmem %s573_s3, %s450_s26 }
  0x11   : > { %v194_v7 = vmax.f32 %v186_v4, 0.0  ;;  %v195_v8 = vmax.f32 %v187_v5, 0.0  ;;  %v189_v9 = vld [vmem:[%s173_s22 + $0x18] sm:$0xff]  ;;  %v196_v10 = vmax.f32 %v188_v6, 0.0  ;;  %v190_v11 = vld [vmem:[%s173_s22 + $0x20] sm:$0xff]  ;;  %v191_v12 = vld [vmem:[%s173_s22 + $0x28] sm:$0xff] }
  0x12   : > { %v197_v13 = vmax.f32 %v189_v9, 0.0  ;;  %v198_v14 = vmax.f32 %v190_v11, 0.0  ;;  %v199_v15 = vmax.f32 %v191_v12, 0.0  ;;  %v192_v16 = vld [vmem:[%s173_s22 + $0x30] sm:$0xff]  ;;  %v193_v17 = vld [vmem:[%s173_s22 + $0x38] sm:$0xff] }
  0x13   : > { %v202_v18 = vpack.c.bf16 %v195_v8, %v194_v7  ;;  %v200_v19 = vmax.f32 %v192_v16, 0.0  ;;  %v201_v20 = vmax.f32 %v193_v17, 0.0 }
  0x14   : > { %v203_v21 = vpack.c.bf16 %v197_v13, %v196_v10  ;;  %v204_v22 = vpack.c.bf16 %v199_v15, %v198_v14 }
  0x15   : > { %464 = vmatprep.mubr.msk.bf16.mxu0 %vm209_vm1, %v202_v18  ;;  %v205_v23 = vpack.c.bf16 %v201_v20, %v200_v19 }
  0x16   : > { %465 = vmatmul.mubr.msk.bf16.vlgmr.msra.gmra.mrb[0].mxu0 %vm209_vm1, %v203_v21  ;;  %468 = vmatprep.mubr.msk.bf16.mxu1 %vm209_vm1, %v204_v22 }
  0x17   : > { %469 = vmatmul.mubr.msk.bf16.vlgmr.msra.gmra.mrb[0].mxu1 %vm209_vm1, %v205_v23 }
  0xe9   : > { %v466_v24 = vpop.f32.mrb[0].mxu0 }
  0xea   : > { %294 = vst.msk [vmem:[%s179_s25 + $0x10] sm:$0xff] %vm291_vm2, %v466_v24  ;;  %v260_v25 = vpop.f32.mrb[1].mxu0  ;;  %v470_v26 = vpop.f32.mrb[0].mxu1  ;;  %v323_v32 = vmul.f32 %v466_v24, %v466_v24  ;;  %v303_v37 = vsel %vm291_vm2, %v466_v24, 0.0 }
  0xeb   : > { %292 = vst.msk [vmem:[%s179_s25] sm:$0xff] %vm291_vm2, %v260_v25  ;;  %v321_v27 = vmul.f32 %v260_v25, %v260_v25  ;;  %v467_v28 = vpop.f32.mrb[2].mxu0  ;;  %298 = vst.msk [vmem:[%s179_s25 + $0x30] sm:$0xff] %vm291_vm2, %v470_v26  ;;  %v276_v29 = vpop.f32.mrb[1].mxu1  ;;  %v300_v33 = vsel %vm291_vm2, %v260_v25, 0.0  ;;  %v327_v55 = vmul.f32 %v470_v26, %v470_v26  ;;  %v311_v59 = vsel %vm291_vm2, %v470_v26, 0.0 }
  0xec   : > { %295 = vst.msk [vmem:[%s179_s25 + $0x18] sm:$0xff] %vm291_vm2, %v467_v28  ;;  %v263_v30 = vpop.f32.mrb[3].mxu0  ;;  %296 = vst.msk [vmem:[%s179_s25 + $0x20] sm:$0xff] %vm291_vm2, %v276_v29  ;;  %v471_v31 = vpop.f32.mrb[2].mxu1  ;;  %v324_v40 = vmul.f32 %v467_v28, %v467_v28  ;;  %v325_v42 = vmul.f32 %v276_v29, %v276_v29  ;;  %v332_v45 = vsel %vm291_vm2, %v323_v32, 0.0  ;;  %v305_v46 = vsel %vm291_vm2, %v467_v28, 0.0 }
  0xed   : > { %293 = vst.msk [vmem:[%s179_s25 + $0x8] sm:$0xff] %vm291_vm2, %v263_v30  ;;  %v301_v34 = vsel %vm291_vm2, %v263_v30, 0.0  ;;  %v322_v35 = vmul.f32 %v263_v30, %v263_v30  ;;  %299 = vst.msk [vmem:[%s179_s25 + $0x38] sm:$0xff] %vm291_vm2, %v471_v31  ;;  %v279_v36 = vpop.f32.mrb[3].mxu1  ;;  %v329_v39 = vsel %vm291_vm2, %v321_v27, 0.0  ;;  %v307_v47 = vsel %vm291_vm2, %v276_v29, 0.0 }
  0xee   : > { %v302_v38 = vadd.f32 %v301_v34, %v300_v33  ;;  %297 = vst.msk [vmem:[%s179_s25 + $0x28] sm:$0xff] %vm291_vm2, %v279_v36  ;;  %v334_v50 = vsel %vm291_vm2, %v324_v40, 0.0  ;;  %v336_v51 = vsel %vm291_vm2, %v325_v42, 0.0  ;;  %v326_v52 = vmul.f32 %v279_v36, %v279_v36 }
  0xef   : > { %v330_v41 = vsel %vm291_vm2, %v322_v35, 0.0  ;;  %v309_v56 = vsel %vm291_vm2, %v279_v36, 0.0  ;;  %v328_v60 = vmul.f32 %v471_v31, %v471_v31  ;;  %v340_v0 = vsel %vm291_vm2, %v327_v55, 0.0 }
  0xf0   : > { %v304_v43 = vadd.f32 %v303_v37, %v302_v38  ;;  %v331_v44 = vadd.f32 %v330_v41, %v329_v39  ;;  %v338_v61 = vsel %vm291_vm2, %v326_v52, 0.0  ;;  %v313_v1 = vsel %vm291_vm2, %v471_v31, 0.0 }
  0xf1   : > { %v342_v4 = vsel %vm291_vm2, %v328_v60, 0.0 }
  0xf2   : > { %v333_v48 = vadd.f32 %v332_v45, %v331_v44  ;;  %v306_v49 = vadd.f32 %v305_v46, %v304_v43 }
  0xf4   : > { %v308_v53 = vadd.f32 %v307_v47, %v306_v49  ;;  %v335_v54 = vadd.f32 %v334_v50, %v333_v48 }
  0xf6   : > { %v337_v57 = vadd.f32 %v336_v51, %v335_v54  ;;  %v310_v58 = vadd.f32 %v309_v56, %v308_v53 }
  0xf8   : > { %v312_v62 = vadd.f32 %v311_v59, %v310_v58  ;;  %v339_v63 = vadd.f32 %v338_v61, %v337_v57 }
  0xfa   : > { %v314_v2 = vadd.f32 %v313_v1, %v312_v62  ;;  %v341_v3 = vadd.f32 %v340_v0, %v339_v63 }
  0xfc   : > { %v315_v5 = vrot.slane %v314_v2, 4  ;;  %v343_v6 = vadd.f32 %v342_v4, %v341_v3 }
  0xfe   : > { %v316_v7 = vadd.f32 %v315_v5, %v314_v2  ;;  %v344_v8 = vrot.slane %v343_v6, 4 }
 0x100   : > { %v317_v9 = vrot.slane %v316_v7, 2  ;;  %v345_v10 = vadd.f32 %v344_v8, %v343_v6 }
 0x102   : > { %v318_v11 = vadd.f32 %v317_v9, %v316_v7  ;;  %v346_v12 = vrot.slane %v345_v10, 2 }
 0x104   : > { %v319_v13 = vrot.slane %v318_v11, 1  ;;  %v347_v14 = vadd.f32 %v346_v12, %v345_v10 }
 0x106   : > { %v348_v15 = vrot.slane %v347_v14, 1  ;;  %v320_v16 = vadd.f32 %v319_v13, %v318_v11 }
 0x108   : > { %v349_v17 = vadd.f32 %v348_v15, %v347_v14 }
 0x10a   : > { %v351_v18 = vsel %vm350_vm3, %v320_v16, %v349_v17 }
 0x10b   : > { %353 = vst.msk [vmem:[%s184_s29] sm:$0x3] %vm352_vm4, %v351_v18 }
 0x10c PF: > { %s14_s12 = sadd.s32 1, %s490_s12  }
 0x10d   : > { %p11_p5 = scmp.ge.s32.totalorder %s14_s12, 4  }
 0x10f   :  { %13 = sbr.rel (!%p11_p5) target bundleno = 1 (0x1), region = 70 }

// kernel: network_forward.223
= control target key start
LH: loop header
LB: loop body
LE: loop exit
PB: predicated region body
PF: predicated region fallthrough
CT: control target
= control target key end

     0   :  { %s571_s12 = smov 0   ;;  %s782_s0 = inlined_call_operand.vmem [shape: bf16[32,400], index: 0, kind: input, shape index: {}]   ;;  %s783_s1 = inlined_call_operand.vmem [shape: f32[400,16], index: 1, kind: input, shape index: {}]   ;;  %s784_s2 = inlined_call_operand.vmem [shape: f32[32,16], index: 2, kind: output, shape index: {0}]   ;;  %s785_s3 = inlined_call_operand.vmem [shape: f32[2,2,16], index: 3, kind: output, shape index: {1}]  }
   0x1 LB: > { %s577_s13 = sadd.s32 4294967295, %s548_s12   ;;  %p490_p0 = scmp.ge.s32.totalorder %s548_s12, 1  ;;  %s548_s12 = sphi %s571_s12, %s14_s12  }
   0x2   : > { %p142_p1 = scmp.lt.s32.totalorder %s548_s12, 3 }
   0x4   : > { %p143_p2 = pnand %p490_p0, %p142_p1 }
   0x5   : > { %v209_v0 = vld [vmem:[%s783_s1 + $0x80] sm:$0xff] (!%p143_p2)  ;;  %v210_v1 = vld [vmem:[%s783_s1 + $0x88] sm:$0xff] (!%p143_p2)  ;;  %s491_s20 = sshll.u32 (!%p143_p2), %s577_s13, 1  ;;  %v550_v3 = vmov (!%p143_p2), 0   ;;  %v211_v10 = vld [vmem:[%s783_s1 + $0x90] sm:$0xff] (!%p143_p2)  ;;  %vm287_vm0 = vcmask (!%p143_p2), 130048  }
   0x6   : > { %146 = sbr.rel (%p143_p2) target bundleno = 279 (0x117), region = 28  ;;  %v225_v2 = vld [vmem:[%s783_s1 + $0x100] sm:$0xff] (!%p143_p2)  ;;  %332 = vmatprep.subr.bf16.mxu1 (!%p143_p2), %v550_v3  ;;  %v251_v4 = vpack.c.bf16 (!%p143_p2), %v210_v1, %v209_v0  ;;  %v226_v5 = vld [vmem:[%s783_s1 + $0x108] sm:$0xff] (!%p143_p2)  ;;  %v212_v11 = vld [vmem:[%s783_s1 + $0x98] sm:$0xff] (!%p143_p2)  ;;  %p621_p3 = scmp.lt.s32.totalorder (!%p143_p2), %s491_s20, 3  ;;  %vm395_vm1 = vcmask (!%p143_p2), 1040384  }
   0x7   : > { %v193_v6 = vld [vmem:[%s783_s1] sm:$0xff] (!%p143_p2)  ;;  %v194_v7 = vld [vmem:[%s783_s1 + $0x8] sm:$0xff] (!%p143_p2)  ;;  %v259_v8 = vpack.c.bf16 (!%p143_p2), %v226_v5, %v225_v2  ;;  %v227_v12 = vld [vmem:[%s783_s1 + $0x110] sm:$0xff] (!%p143_p2)  ;;  %v252_v13 = vpack.c.bf16 (!%p143_p2), %v212_v11, %v211_v10  ;;  %p184_p4 = scmp.lt.s32.totalorder (!%p143_p2), %s577_s13, 1  ;;  %vm397_vm2 = vcmask (!%p143_p2), 123904  }
   0x8   : > { %v243_v9 = vpack.c.bf16 (!%p143_p2), %v194_v7, %v193_v6  ;;  %505 = vmatprep.subr.bf16.mxu0 (!%p143_p2), %v251_v4  ;;  %v228_v14 = vld [vmem:[%s783_s1 + $0x118] sm:$0xff] (!%p143_p2)  ;;  %v195_v15 = vld [vmem:[%s783_s1 + $0x10] sm:$0xff] (!%p143_p2)  ;;  %v213_v19 = vld [vmem:[%s783_s1 + $0xa0] sm:$0xff] (!%p143_p2) }
   0x9   : > { %v196_v16 = vld [vmem:[%s783_s1 + $0x18] sm:$0xff] (!%p143_p2)  ;;  %333 = vmatpush1.bf16.msra.mxu1 (!%p143_p2), %v259_v8  ;;  %v260_v17 = vpack.c.bf16 (!%p143_p2), %v228_v14, %v227_v12  ;;  %v214_v20 = vld [vmem:[%s783_s1 + $0xa8] sm:$0xff] (!%p143_p2)  ;;  %v229_v21 = vld [vmem:[%s783_s1 + $0x120] sm:$0xff] (!%p143_p2) }
   0xa   : > { %506 = vmatpush3.bf16.msra.mxu0 (!%p143_p2), %v243_v9  ;;  %v244_v18 = vpack.c.bf16 (!%p143_p2), %v196_v16, %v195_v15  ;;  %334 = vmatprep.subr.bf16.mxu1 (!%p143_p2), %v550_v3  ;;  %v253_v22 = vpack.c.bf16 (!%p143_p2), %v214_v20, %v213_v19  ;;  %v230_v23 = vld [vmem:[%s783_s1 + $0x128] sm:$0xff] (!%p143_p2)  ;;  %v197_v24 = vld [vmem:[%s783_s1 + $0x20] sm:$0xff] (!%p143_p2)  ;;  %v215_v26 = vld [vmem:[%s783_s1 + $0xb0] sm:$0xff] (!%p143_p2) }
   0xb   : > { %507 = vmatprep.subr.bf16.mxu0 (!%p143_p2), %v252_v13  ;;  %v198_v25 = vld [vmem:[%s783_s1 + $0x28] sm:$0xff] (!%p143_p2)  ;;  %v216_v27 = vld [vmem:[%s783_s1 + $0xb8] sm:$0xff] (!%p143_p2)  ;;  %v261_v28 = vpack.c.bf16 (!%p143_p2), %v230_v23, %v229_v21  ;;  %v231_v30 = vld [vmem:[%s783_s1 + $0x130] sm:$0xff] (!%p143_p2) }
   0xc   : > { %v245_v29 = vpack.c.bf16 (!%p143_p2), %v198_v25, %v197_v24  ;;  %v254_v31 = vpack.c.bf16 (!%p143_p2), %v216_v27, %v215_v26  ;;  %v232_v32 = vld [vmem:[%s783_s1 + $0x138] sm:$0xff] (!%p143_p2)  ;;  %v199_v33 = vld [vmem:[%s783_s1 + $0x30] sm:$0xff] (!%p143_p2)  ;;  %v217_v35 = vld [vmem:[%s783_s1 + $0xc0] sm:$0xff] (!%p143_p2) }
   0xd   : > { %s788_s20 = smov (!%p621_p3, %s491_s20), 3  ;;  %335 = vmatpush1.bf16.msra.mxu1 %v260_v17  ;;  %v200_v34 = vld [vmem:[%s783_s1 + $0x38] sm:$0xff]  ;;  %v218_v36 = vld [vmem:[%s783_s1 + $0xc8] sm:$0xff]  ;;  %v262_v37 = vpack.c.bf16 %v232_v32, %v231_v30  ;;  %v233_v39 = vld [vmem:[%s783_s1 + $0x140] sm:$0xff]  ;;  %s790_s13 = smov (!%p184_p4, %s577_s13), 1 }
   0xe   : > { %508 = vmatpush3.bf16.msra.mxu0 %v244_v18  ;;  %336 = vmatprep.subr.bf16.mxu1 %v550_v3  ;;  %s504_s19 = sshll.u32 %s788_s20, 4  ;;  %v246_v38 = vpack.c.bf16 %v200_v34, %v199_v33  ;;  %v255_v40 = vpack.c.bf16 %v218_v36, %v217_v35  ;;  %v234_v41 = vld [vmem:[%s783_s1 + $0x148] sm:$0xff]  ;;  %v201_v42 = vld [vmem:[%s783_s1 + $0x40] sm:$0xff]  ;;  %v219_v44 = vld [vmem:[%s783_s1 + $0xd0] sm:$0xff]  ;;  %s495_s25 = sshll.u32 %s788_s20, 3 }
   0xf   : > { %509 = vmatprep.subr.bf16.mxu0 %v253_v22  ;;  %v202_v43 = vld [vmem:[%s783_s1 + $0x48] sm:$0xff]  ;;  %v220_v45 = vld [vmem:[%s783_s1 + $0xd8] sm:$0xff]  ;;  %s698_s8 = scalar_lea.vmem %s782_s0, %s504_s19  ;;  %v235_v46 = vld [vmem:[%s783_s1 + $0x150] sm:$0xff]  ;;  %v263_v48 = vpack.c.bf16 %v234_v41, %v233_v39  ;;  %s182_s28 = scalar_lea.vmem %s784_s2, %s495_s25 }
  0x10   : > { %v236_v47 = vld [vmem:[%s783_s1 + $0x158] sm:$0xff]  ;;  %v247_v49 = vpack.c.bf16 %v202_v43, %v201_v42  ;;  %v203_v50 = vld [vmem:[%s783_s1 + $0x50] sm:$0xff]  ;;  %v256_v51 = vpack.c.bf16 %v220_v45, %v219_v44  ;;  %v221_v53 = vld [vmem:[%s783_s1 + $0xe0] sm:$0xff]  ;;  %s496_s20 = sshll.u32 %s790_s13, 1 }
  0x11   : > { %337 = vmatpush1.bf16.msra.mxu1 %v261_v28  ;;  %v204_v52 = vld [vmem:[%s783_s1 + $0x58] sm:$0xff]  ;;  %v538_v54 = vld [vmem:[%s698_s8 + $0x4] ss:$16 sps:$4 sm:$0xff]   ;;  %v222_v55 = vld [vmem:[%s783_s1 + $0xe8] sm:$0xff]  ;;  %v264_v57 = vpack.c.bf16 %v236_v47, %v235_v46  ;;  %s187_s30 = scalar_lea.vmem %s785_s3, %s496_s20 }
  0x12   : > { %510 = vmatpush3.bf16.msra.mxu0 %v245_v29  ;;  %338 = vmatprep.subr.bf16.mxu1 %v550_v3  ;;  %v541_v56 = vld [vmem:[%s698_s8 + $0xc] ss:$16 sps:$4 sm:$0xff]   ;;  %v248_v58 = vpack.c.bf16 %v204_v52, %v203_v50  ;;  %v237_v59 = vld [vmem:[%s783_s1 + $0x160] sm:$0xff]  ;;  %v257_v60 = vpack.c.bf16 %v222_v55, %v221_v53  ;;  %v223_v0 = vld [vmem:[%s783_s1 + $0xf0] sm:$0xff] }
  0x13   : > { %511 = vmatprep.subr.bf16.mxu0 %v254_v31  ;;  %323 = vmatprep.mubr.bf16.mxu0 %v538_v54  ;;  %v238_v61 = vld [vmem:[%s783_s1 + $0x168] sm:$0xff]  ;;  %v205_v62 = vld [vmem:[%s783_s1 + $0x60] sm:$0xff]  ;;  %v224_v1 = vld [vmem:[%s783_s1 + $0xf8] sm:$0xff] }
  0x14   : > { %v206_v63 = vld [vmem:[%s783_s1 + $0x68] sm:$0xff]  ;;  %501 = vmatprep.mubr.msk.bf16.mxu1 %vm287_vm0, %v541_v56  ;;  %v265_v2 = vpack.c.bf16 %v238_v61, %v237_v59  ;;  %v239_v5 = vld [vmem:[%s783_s1 + $0x170] sm:$0xff]  ;;  %v258_v6 = vpack.c.bf16 %v224_v1, %v223_v0  ;;  %v240_v7 = vld [vmem:[%s783_s1 + $0x178] sm:$0xff] }
  0x15   : > { %339 = vmatpush1.bf16.msra.mxu1 %v262_v37  ;;  %v249_v4 = vpack.c.bf16 %v206_v63, %v205_v62  ;;  %v207_v8 = vld [vmem:[%s783_s1 + $0x70] sm:$0xff]  ;;  %v208_v9 = vld [vmem:[%s783_s1 + $0x78] sm:$0xff]  ;;  %v266_v10 = vpack.c.bf16 %v240_v7, %v239_v5  ;;  %v241_v12 = vld [vmem:[%s783_s1 + $0x180] sm:$0xff] }
  0x16   : > { %512 = vmatpush3.bf16.msra.mxu0 %v246_v38  ;;  %340 = vmatprep.subr.bf16.mxu1 %v550_v3  ;;  %v250_v11 = vpack.c.bf16 %v208_v9, %v207_v8  ;;  %v242_v13 = vld [vmem:[%s783_s1 + $0x188] sm:$0xff]  ;;  %v536_v14 = vld [vmem:[%s698_s8] ss:$16 sps:$4 sm:$0xff]  }
  0x17   : > { %513 = vmatprep.subr.bf16.mxu0 %v255_v40  ;;  %v267_v15 = vpack.c.bf16 %v242_v13, %v241_v12  ;;  %v539_v16 = vld [vmem:[%s698_s8 + $0x8] ss:$16 sps:$4 sm:$0xff]  }
  0x19   : > { %341 = vmatpush1.bf16.msra.mxu1 %v263_v48 }
  0x1a   : > { %514 = vmatpush3.bf16.msra.mxu0 %v247_v49  ;;  %342 = vmatprep.subr.bf16.mxu1 %v550_v3 }
  0x1b   : > { %515 = vmatprep.subr.bf16.mxu0 %v256_v51 }
  0x1d   : > { %343 = vmatpush1.bf16.msra.mxu1 %v264_v57 }
  0x1e   : > { %516 = vmatpush3.bf16.msra.mxu0 %v248_v58  ;;  %344 = vmatprep.subr.bf16.mxu1 %v550_v3 }
  0x1f   : > { %517 = vmatprep.subr.bf16.mxu0 %v257_v60 }
  0x21   : > { %345 = vmatpush1.bf16.msra.mxu1 %v265_v2 }
  0x22   : > { %518 = vmatpush3.bf16.msra.mxu0 %v249_v4  ;;  %346 = vmatprep.subr.bf16.mxu1 %v550_v3 }
  0x23   : > { %519 = vmatprep.subr.bf16.mxu0 %v258_v6 }
  0x25   : > { %347 = vmatpush1.bf16.msra.mxu1 %v266_v10 }
  0x26   : > { %520 = vmatpush3.bf16.msra.mxu0 %v250_v11  ;;  %348 = vmatprep.subr.bf16.mxu1 %v550_v3 }
  0x29   : > { %324 = vmatmul.mubr.bf16.vlgmr.msra.gmra.mrb[0].mxu0 %v536_v14  ;;  %349 = vmatpush1.bf16.msra.mxu1 %v267_v15 }
  0x2c   : > { %365 = vmatmul.mubr.bf16.vlgmr.msra.gmra.mrb[0].mxu1 %v539_v16 }
  0xfc   : > { %v521_v17 = vpop.f32.mrb[0].mxu0 }
  0xfd   : > { %v522_v18 = vpop.f32.mrb[1].mxu0 }
  0xfe   : > { %v523_v19 = vadd.f32 %v522_v18, %v521_v17  ;;  %v524_v20 = vpop.f32.mrb[2].mxu0 }
  0xff   : > { %v525_v21 = vpop.f32.mrb[3].mxu0  ;;  %v366_v23 = vpop.f32.mrb[0].mxu1 }
 0x100   : > { %v526_v22 = vadd.f32 %v525_v21, %v524_v20  ;;  %v367_v24 = vadd.f32 %v523_v19, %v366_v23  ;;  %v368_v25 = vpop.f32.mrb[1].mxu1 }
 0x101   : > { %v369_v3 = vpop.f32.mrb[2].mxu1 }
 0x102   : > { %373 = vst.msk [vmem:[%s182_s28] sm:$0xff] %vm287_vm0, %v367_v24  ;;  %v384_v26 = vmul.f32 %v367_v24, %v367_v24  ;;  %v370_v27 = vadd.f32 %v526_v22, %v369_v3  ;;  %v371_v28 = vpop.f32.mrb[3].mxu1  ;;  %v375_v29 = vsel %vm287_vm0, %v367_v24, 0.0 }
 0x104   : > { %374 = vst.msk [vmem:[%s182_s28 + $0x8] sm:$0xff] %vm287_vm0, %v370_v27  ;;  %v376_v30 = vsel %vm287_vm0, %v370_v27, 0.0  ;;  %v385_v31 = vmul.f32 %v370_v27, %v370_v27  ;;  %v386_v33 = vsel %vm287_vm0, %v384_v26, 0.0 }
 0x105   : > { %v377_v32 = vadd.f32 %v376_v30, %v375_v29 }
 0x106   : > { %v387_v34 = vsel %vm287_vm0, %v385_v31, 0.0 }
 0x107   : > { %v378_v35 = vrot.slane %v377_v32, 4  ;;  %v388_v36 = vadd.f32 %v387_v34, %v386_v33 }
 0x109   : > { %v379_v37 = vadd.f32 %v378_v35, %v377_v32  ;;  %v389_v38 = vrot.slane %v388_v36, 4 }
 0x10b   : > { %v380_v39 = vrot.slane %v379_v37, 2  ;;  %v390_v40 = vadd.f32 %v389_v38, %v388_v36 }
 0x10d   : > { %v381_v41 = vadd.f32 %v380_v39, %v379_v37  ;;  %v391_v42 = vrot.slane %v390_v40, 2 }
 0x10f   : > { %v382_v43 = vrot.slane %v381_v41, 1  ;;  %v392_v44 = vadd.f32 %v391_v42, %v390_v40 }
 0x111   : > { %v393_v45 = vrot.slane %v392_v44, 1  ;;  %v383_v46 = vadd.f32 %v382_v43, %v381_v41 }
 0x113   : > { %v394_v47 = vadd.f32 %v393_v45, %v392_v44 }
 0x115   : > { %v396_v48 = vsel %vm395_vm1, %v383_v46, %v394_v47 }
 0x116   : > { %398 = vst.msk [vmem:[%s187_s30] sm:$0x3] %vm397_vm2, %v396_v48 }
 0x117 PF: > { %s14_s12 = sadd.s32 1, %s548_s12  }
 0x118   : > { %p11_p5 = scmp.ge.s32.totalorder %s14_s12, 4  }
 0x11a   :  { %13 = sbr.rel (!%p11_p5) target bundleno = 1 (0x1), region = 70 }

// kernel: network_forward.222
= control target key start
LH: loop header
LB: loop body
LE: loop exit
PB: predicated region body
PF: predicated region fallthrough
CT: control target
= control target key end

     0   :  { %s443_s12 = smov 0   ;;  %s540_s0 = inlined_call_operand.vmem [shape: bf16[32,144], index: 0, kind: input, shape index: {}]   ;;  %s541_s1 = inlined_call_operand.vmem [shape: f32[144,16], index: 1, kind: input, shape index: {}]   ;;  %s542_s2 = inlined_call_operand.vmem [shape: f32[32,16], index: 2, kind: output, shape index: {0}]   ;;  %s543_s3 = inlined_call_operand.vmem [shape: f32[2,2,16], index: 3, kind: output, shape index: {1}]  }
   0x1 LB: > { %s449_s13 = sadd.s32 4294967295, %s420_s12   ;;  %p389_p0 = scmp.ge.s32.totalorder %s420_s12, 1  ;;  %s420_s12 = sphi %s443_s12, %s14_s12  }
   0x2   : > { %p142_p1 = scmp.lt.s32.totalorder %s420_s12, 3 }
   0x4   : > { %p143_p2 = pnand %p389_p0, %p142_p1 }
   0x5   : > { %v191_v0 = vld [vmem:[%s541_s1] sm:$0xff] (!%p143_p2)  ;;  %v192_v1 = vld [vmem:[%s541_s1 + $0x8] sm:$0xff] (!%p143_p2)  ;;  %v193_v2 = vld [vmem:[%s541_s1 + $0x10] sm:$0xff] (!%p143_p2)  ;;  %s390_s20 = sshll.u32 (!%p143_p2), %s449_s13, 1  ;;  %v422_v3 = vmov (!%p143_p2), 0   ;;  %vm227_vm0 = vcmask (!%p143_p2), 130048  }
   0x6   : > { %146 = sbr.rel (%p143_p2) target bundleno = 276 (0x114), region = 28  ;;  %231 = vmatprep.subr.bf16.mxu0 (!%p143_p2), %v422_v3  ;;  %v209_v4 = vpack.c.bf16 (!%p143_p2), %v192_v1, %v191_v0  ;;  %v194_v5 = vld [vmem:[%s541_s1 + $0x18] sm:$0xff] (!%p143_p2)  ;;  %p172_p3 = scmp.lt.s32.totalorder (!%p143_p2), %s390_s20, 3  ;;  %v195_v7 = vld [vmem:[%s541_s1 + $0x20] sm:$0xff] (!%p143_p2)  ;;  %v196_v8 = vld [vmem:[%s541_s1 + $0x28] sm:$0xff] (!%p143_p2)  ;;  %vm294_vm1 = vcmask (!%p143_p2), 1040384  }
   0x7   : > { %v210_v6 = vpack.c.bf16 (!%p143_p2), %v194_v5, %v193_v2  ;;  %v211_v9 = vpack.c.bf16 (!%p143_p2), %v196_v8, %v195_v7  ;;  %v197_v10 = vld [vmem:[%s541_s1 + $0x30] sm:$0xff] (!%p143_p2)  ;;  %v198_v11 = vld [vmem:[%s541_s1 + $0x38] sm:$0xff] (!%p143_p2)  ;;  %v199_v14 = vld [vmem:[%s541_s1 + $0x40] sm:$0xff] (!%p143_p2)  ;;  %p184_p4 = scmp.lt.s32.totalorder (!%p143_p2), %s449_s13, 1  ;;  %vm296_vm2 = vcmask (!%p143_p2), 123904  }
   0x8   : > { %232 = vmatpush1.bf16.msra.mxu0 (!%p143_p2), %v209_v4  ;;  %v212_v13 = vpack.c.bf16 (!%p143_p2), %v198_v11, %v197_v10  ;;  %v200_v15 = vld [vmem:[%s541_s1 + $0x48] sm:$0xff] (!%p143_p2)  ;;  %v201_v17 = vld [vmem:[%s541_s1 + $0x50] sm:$0xff] (!%p143_p2)  ;;  %v202_v18 = vld [vmem:[%s541_s1 + $0x58] sm:$0xff] (!%p143_p2) }
   0x9   : > { %233 = vmatprep.subr.bf16.mxu0 (!%p143_p2), %v422_v3  ;;  %v213_v16 = vpack.c.bf16 (!%p143_p2), %v200_v15, %v199_v14  ;;  %v214_v19 = vpack.c.bf16 (!%p143_p2), %v202_v18, %v201_v17  ;;  %v203_v20 = vld [vmem:[%s541_s1 + $0x60] sm:$0xff] (!%p143_p2)  ;;  %v204_v21 = vld [vmem:[%s541_s1 + $0x68] sm:$0xff] (!%p143_p2)  ;;  %v205_v23 = vld [vmem:[%s541_s1 + $0x70] sm:$0xff] (!%p143_p2) }
   0xa   : > { %v215_v22 = vpack.c.bf16 (!%p143_p2), %v204_v21, %v203_v20  ;;  %v206_v24 = vld [vmem:[%s541_s1 + $0x78] sm:$0xff] (!%p143_p2)  ;;  %v207_v26 = vld [vmem:[%s541_s1 + $0x80] sm:$0xff] (!%p143_p2)  ;;  %v208_v27 = vld [vmem:[%s541_s1 + $0x88] sm:$0xff] (!%p143_p2) }
   0xb   : > { %v216_v25 = vpack.c.bf16 (!%p143_p2), %v206_v24, %v205_v23  ;;  %v217_v28 = vpack.c.bf16 (!%p143_p2), %v208_v27, %v207_v26 }
   0xc   : > { %234 = vmatpush1.bf16.msra.mxu0 (!%p143_p2), %v210_v6 }
   0xd   : > { %s545_s20 = smov (!%p172_p3, %s390_s20), 3  ;;  %235 = vmatprep.subr.bf16.mxu0 %v422_v3  ;;  %s547_s13 = smov (!%p184_p4, %s449_s13), 1 }
   0xe   : > { %s401_s27 = sshll.u32 %s545_s20, 3  ;;  %s395_s20 = sshll.u32 %s547_s13, 1 }
   0xf   : > { %s480_s30 = scalar_lea.vmem %s540_s0, %s401_s27  ;;  %s182_s8 = scalar_lea.vmem %s542_s2, %s401_s27 }
  0x10   : > { %v413_v12 = vld [vmem:[%s480_s30 + $0x4] ss:$8 sps:$4 sm:$0xff]   ;;  %236 = vmatpush1.bf16.msra.mxu0 %v211_v9  ;;  %v411_v29 = vld [vmem:[%s480_s30] ss:$8 sps:$4 sm:$0xff]   ;;  %s187_s9 = scalar_lea.vmem %s543_s3, %s395_s20 }
  0x11   : > { %398 = vmatprep.mubr.msk.bf16.mxu0 %vm227_vm0, %v413_v12  ;;  %237 = vmatprep.subr.bf16.mxu0 %v422_v3 }
  0x14   : > { %238 = vmatpush1.bf16.msra.mxu0 %v212_v13 }
  0x15   : > { %239 = vmatprep.subr.bf16.mxu0 %v422_v3 }
  0x18   : > { %240 = vmatpush1.bf16.msra.mxu0 %v213_v16 }
  0x19   : > { %241 = vmatprep.subr.bf16.mxu0 %v422_v3 }
  0x1c   : > { %242 = vmatpush1.bf16.msra.mxu0 %v214_v19 }
  0x1d   : > { %243 = vmatprep.subr.bf16.mxu0 %v422_v3 }
  0x20   : > { %244 = vmatpush1.bf16.msra.mxu0 %v215_v22 }
  0x21   : > { %245 = vmatprep.subr.bf16.mxu0 %v422_v3 }
  0x24   : > { %246 = vmatpush1.bf16.msra.mxu0 %v216_v25 }
  0x25   : > { %247 = vmatprep.subr.bf16.mxu0 %v422_v3 }
  0x28   : > { %248 = vmatpush1.bf16.msra.mxu0 %v217_v28 }
  0x2b   : > { %264 = vmatmul.mubr.bf16.vlgmr.msra.gmra.mrb[0].mxu0 %v411_v29 }
  0xfe   : > { %v265_v30 = vpop.f32.mrb[0].mxu0 }
  0xff   : > { %272 = vst.msk [vmem:[%s182_s8] sm:$0xff] %vm227_vm0, %v265_v30  ;;  %v283_v31 = vmul.f32 %v265_v30, %v265_v30  ;;  %v267_v32 = vpop.f32.mrb[1].mxu0  ;;  %v274_v34 = vsel %vm227_vm0, %v265_v30, 0.0 }
 0x100   : > { %v268_v33 = vpop.f32.mrb[2].mxu0 }
 0x101   : > { %273 = vst.msk [vmem:[%s182_s8 + $0x8] sm:$0xff] %vm227_vm0, %v268_v33  ;;  %v275_v35 = vsel %vm227_vm0, %v268_v33, 0.0  ;;  %v284_v36 = vmul.f32 %v268_v33, %v268_v33  ;;  %v270_v37 = vpop.f32.mrb[3].mxu0  ;;  %v285_v39 = vsel %vm227_vm0, %v283_v31, 0.0 }
 0x102   : > { %v276_v38 = vadd.f32 %v275_v35, %v274_v34 }
 0x103   : > { %v286_v40 = vsel %vm227_vm0, %v284_v36, 0.0 }
 0x104   : > { %v277_v41 = vrot.slane %v276_v38, 4  ;;  %v287_v42 = vadd.f32 %v286_v40, %v285_v39 }
 0x106   : > { %v278_v43 = vadd.f32 %v277_v41, %v276_v38  ;;  %v288_v44 = vrot.slane %v287_v42, 4 }
 0x108   : > { %v279_v45 = vrot.slane %v278_v43, 2  ;;  %v289_v46 = vadd.f32 %v288_v44, %v287_v42 }
 0x10a   : > { %v280_v47 = vadd.f32 %v279_v45, %v278_v43  ;;  %v290_v48 = vrot.slane %v289_v46, 2 }
 0x10c   : > { %v281_v49 = vrot.slane %v280_v47, 1  ;;  %v291_v50 = vadd.f32 %v290_v48, %v289_v46 }
 0x10e   : > { %v292_v51 = vrot.slane %v291_v50, 1  ;;  %v282_v52 = vadd.f32 %v281_v49, %v280_v47 }
 0x110   : > { %v293_v53 = vadd.f32 %v292_v51, %v291_v50 }
 0x112   : > { %v295_v54 = vsel %vm294_vm1, %v282_v52, %v293_v53 }
 0x113   : > { %297 = vst.msk [vmem:[%s187_s9] sm:$0x3] %vm296_vm2, %v295_v54 }
 0x114 PF: > { %s14_s12 = sadd.s32 1, %s420_s12  }
 0x115   : > { %p11_p5 = scmp.ge.s32.totalorder %s14_s12, 4  }
 0x117   :  { %13 = sbr.rel (!%p11_p5) target bundleno = 1 (0x1), region = 70 }

// kernel: network_forward.220
= control target key start
LH: loop header
LB: loop body
LE: loop exit
PB: predicated region body
PF: predicated region fallthrough
CT: control target
= control target key end

     0   :  { %s70_s0 = inlined_call_operand.vmem [shape: f32[4,128], index: 0, kind: input, shape index: {}]   ;;  %s71_s1 = inlined_call_operand.vmem [shape: f32[1,128], index: 1, kind: input, shape index: {}]   ;;  %s72_s2 = inlined_call_operand.vmem [shape: f32[1,128], index: 2, kind: input, shape index: {}]   ;;  %s73_s3 = inlined_call_operand.vmem [shape: f32[4,128], index: 3, kind: output, shape index: {}]  }
   0x1   :  { %v14_v0 = vld [vmem:[%s70_s0] sm:$0xf] }
   0x2   :  { %v36_v1 = vld [vmem:[%s71_s1] ss:$0 sm:$0xff] }
   0x3   :  { %v37_v2 = vld [vmem:[%s72_s2] ss:$0 sm:$0xff]  ;;  %v22_v3 = vmul.f32 %v36_v1, %v14_v0 }
   0x5   :  { %v30_v4 = vadd.f32 %v37_v2, %v22_v3 }
   0x7   :  { %31 = vst [vmem:[%s73_s3] sm:$0xf] %v30_v4 }

// kernel: network_forward.224
= control target key start
LH: loop header
LB: loop body
LE: loop exit
PB: predicated region body
PF: predicated region fallthrough
CT: control target
= control target key end

     0   :  { %v56_v0 = vlaneseq  ;;  %s315_s0 = inlined_call_operand.vmem [shape: f32[14,128], index: 0, kind: input, shape index: {}]   ;;  %s316_s2 = inlined_call_operand.vmem [shape: f32[4,128], index: 2, kind: input, shape index: {}]   ;;  %s317_s3 = inlined_call_operand.vmem [shape: f32[4,128], index: 3, kind: input, shape index: {}]   ;;  %s318_s4 = inlined_call_operand.vmem [shape: f32[4,128], index: 4, kind: input, shape index: {}]   ;;  %s319_s5 = inlined_call_operand.vmem [shape: f32[4,128], index: 5, kind: input, shape index: {}]   ;;  %s320_s6 = inlined_call_operand.vmem [shape: f32[4,128], index: 6, kind: input, shape index: {}]   ;;  %s321_s7 = inlined_call_operand.vmem [shape: f32[4,128], index: 7, kind: input, shape index: {}]   ;;  %s322_s8 = inlined_call_operand.vmem [shape: f32[4,128], index: 8, kind: input, shape index: {}]   ;;  %s323_s9 = inlined_call_operand.vmem [shape: f32[4,128], index: 9, kind: input, shape index: {}]   ;;  %s324_s10 = inlined_call_operand.vmem [shape: f32[4,128], index: 10, kind: input, shape index: {}]   ;;  %s325_s11 = inlined_call_operand.vmem [shape: f32[4,128], index: 11, kind: input, shape index: {}]   ;;  %s326_s12 = inlined_call_operand.vmem [shape: f32[4,128], index: 12, kind: input, shape index: {}]   ;;  %s327_s13 = inlined_call_operand.vmem [shape: f32[4,128], index: 13, kind: input, shape index: {}]   ;;  %s328_s14 = inlined_call_operand.vmem [shape: f32[4,128], index: 14, kind: input, shape index: {}]   ;;  %s329_s15 = inlined_call_operand.vmem [shape: f32[4,128], index: 15, kind: input, shape index: {}]   ;;  %s330_s1 = inlined_call_operand.vmem [shape: f32[1,128], index: 1, kind: input, shape index: {}]   ;;  %s331_s16 = inlined_call_operand.vmem [shape: f32[4,128], index: 16, kind: output, shape index: {}]  }
   0x1   :  { %333 = sst [smem:[#allocation2_spill]] %s315_s0  ;;  %v55_v3 = vld [vmem:[%s316_s2] sm:$0xf] }
   0x2   :  { %v251_v1 = vshrl.u32 %v56_v0, 7  ;;  %s334_s23 = sld [smem:[#allocation2_spill]]  ;;  %v61_v8 = vld [vmem:[%s317_s3] sm:$0xf] }
   0x3   :  { %v68_v9 = vld [vmem:[%s318_s4] sm:$0xf] }
   0x4   :  { %v58_v4 = vsub.s32 0, %v251_v1  ;;  %v64_v5 = vsub.s32 1, %v251_v1  ;;  %v71_v6 = vsub.s32 2, %v251_v1  ;;  %v78_v7 = vsub.s32 3, %v251_v1  ;;  %v75_v16 = vld [vmem:[%s319_s5] sm:$0xf] }
   0x5   :  { %v85_v10 = vsub.s32 4, %v251_v1  ;;  %v92_v11 = vsub.s32 5, %v251_v1  ;;  %v99_v17 = vsub.s32 6, %v251_v1  ;;  %v82_v22 = vld [vmem:[%s320_s6] sm:$0xf]  ;;  %v106_v26 = vsub.s32 7, %v251_v1 }
   0x6   :  { %v89_v27 = vld [vmem:[%s321_s7] sm:$0xf] }
   0x7   :  { %v96_v32 = vld [vmem:[%s322_s8] sm:$0xf] }
   0x8   :  { %v53_v2 = vld [vmem:[%s334_s23] sm:$0xff]  ;;  %v54_v31 = vld [vmem:[%s334_s23 + $0x8] sm:$0x3f] }
   0x9   :  { %v59_v12 = vrot.slane %v53_v2, %v58_v4  ;;  %v65_v13 = vrot.slane %v53_v2, %v64_v5  ;;  %v72_v14 = vrot.slane %v53_v2, %v71_v6  ;;  %v79_v15 = vrot.slane %v53_v2, %v78_v7  ;;  %v103_v36 = vld [vmem:[%s323_s9] sm:$0xf] }
   0xa   :  { %v86_v21 = vrot.slane %v53_v2, %v85_v10  ;;  %v93_v25 = vrot.slane %v53_v2, %v92_v11  ;;  %v100_v30 = vrot.slane %v53_v2, %v99_v17  ;;  %v107_v35 = vrot.slane %v53_v2, %v106_v26  ;;  %v110_v40 = vld [vmem:[%s324_s10] sm:$0xf] }
   0xb   :  { %v60_v18 = vmul.f32 %v59_v12, %v55_v3  ;;  %v66_v19 = vmul.f32 %v65_v13, %v61_v8  ;;  %v73_v20 = vmul.f32 %v72_v14, %v68_v9  ;;  %v80_v24 = vmul.f32 %v79_v15, %v75_v16  ;;  %v117_v44 = vld [vmem:[%s325_s11] sm:$0xf] }
   0xc   :  { %v87_v29 = vmul.f32 %v86_v21, %v82_v22  ;;  %v94_v34 = vmul.f32 %v93_v25, %v89_v27  ;;  %v101_v38 = vmul.f32 %v100_v30, %v96_v32  ;;  %v114_v39 = vrot.slane %v54_v31, %v58_v4  ;;  %v124_v48 = vld [vmem:[%s326_s12] sm:$0xf] }
   0xd   :  { %v67_v23 = vadd.f32 %v66_v19, %v60_v18  ;;  %v108_v42 = vmul.f32 %v107_v35, %v103_v36  ;;  %v121_v43 = vrot.slane %v54_v31, %v64_v5  ;;  %v128_v47 = vrot.slane %v54_v31, %v71_v6  ;;  %v131_v52 = vld [vmem:[%s327_s13] sm:$0xf] }
   0xe   :  { %v115_v46 = vmul.f32 %v114_v39, %v110_v40  ;;  %v135_v51 = vrot.slane %v54_v31, %v78_v7  ;;  %v142_v55 = vrot.slane %v54_v31, %v85_v10  ;;  %v138_v56 = vld [vmem:[%s328_s14] sm:$0xf]  ;;  %v149_v59 = vrot.slane %v54_v31, %v92_v11 }
   0xf   :  { %v74_v28 = vadd.f32 %v73_v20, %v67_v23  ;;  %v122_v50 = vmul.f32 %v121_v43, %v117_v44  ;;  %v129_v54 = vmul.f32 %v128_v47, %v124_v48  ;;  %v145_v60 = vld [vmem:[%s329_s15] sm:$0xf] }
  0x10   :  { %v136_v58 = vmul.f32 %v135_v51, %v131_v52  ;;  %v143_v62 = vmul.f32 %v142_v55, %v138_v56  ;;  %v150_v0 = vmul.f32 %v149_v59, %v145_v60  ;;  %v165_v2 = vld [vmem:[%s330_s1] ss:$0 sm:$0xff] }
  0x11   :  { %v81_v33 = vadd.f32 %v80_v24, %v74_v28 }
  0x13   :  { %v88_v37 = vadd.f32 %v87_v29, %v81_v33 }
  0x15   :  { %v95_v41 = vadd.f32 %v94_v34, %v88_v37 }
  0x17   :  { %v102_v45 = vadd.f32 %v101_v38, %v95_v41 }
  0x19   :  { %v109_v49 = vadd.f32 %v108_v42, %v102_v45 }
  0x1b   :  { %v116_v53 = vadd.f32 %v115_v46, %v109_v49 }
  0x1d   :  { %v123_v57 = vadd.f32 %v122_v50, %v116_v53 }
  0x1f   :  { %v130_v61 = vadd.f32 %v129_v54, %v123_v57 }
  0x21   :  { %v137_v63 = vadd.f32 %v136_v58, %v130_v61 }
  0x23   :  { %v144_v1 = vadd.f32 %v143_v62, %v137_v63 }
  0x25   :  { %v151_v3 = vadd.f32 %v150_v0, %v144_v1 }
  0x27   :  { %v159_v4 = vadd.f32 %v165_v2, %v151_v3 }
  0x29   :  { %160 = vst [vmem:[%s331_s16] sm:$0xf] %v159_v4 }

// kernel: network_forward.256
= control target key start
LH: loop header
LB: loop body
LE: loop exit
PB: predicated region body
PF: predicated region fallthrough
CT: control target
= control target key end

     0   :  { %s305_s6 = smov 0   ;;  %s307_s7 = smov 0   ;;  %s359_s0 = inlined_call_operand.vmem [shape: f32[2,16,32], index: 0, kind: input, shape index: {}]   ;;  %s360_s1 = inlined_call_operand.vmem [shape: f32[2,2,32], index: 1, kind: output, shape index: {}]  }
   0x1   :  { %s309_s8 = smov 0  }
   0x2 LB: > { %s236_s9 = sadd.s32 4294967295, %s293_s8   ;;  %s322_s10 = sadd.s32 1, %s293_s8   ;;  %s293_s8 = sphi %s309_s8, %s363_s8   ;;  %s289_s7 = sphi %s307_s7, %s362_s7   ;;  %s285_s6 = sphi %s305_s6, %s361_s6  }
   0x3   : > { %s15_s11 = ssub.s32 %s293_s8, %s322_s10  ;;  %s18_s12 = sadd.s32 1, %s289_s7 }
   0x4   : > { %p16_p0 = scmp.eq.s32.totalorder %s15_s11, 0  ;;  %p25_p1 = scmp.ne.s32.totalorder %s289_s7, %s285_s6 }
   0x5   : > { %p26_p2 = scmp.eq.s32.totalorder %s293_s8, 0  ;;  %p239_p4 = scmp.ge.s32.totalorder %s293_s8, 2 }
   0x6   : > { %s331_s13 = scalar_select %p16_p0, %s289_s7, %s18_s12  }
   0x7   : > { %p27_p3 = por %p26_p2, %p25_p1  ;;  %77 = sbr.rel (%p239_p4) target bundleno = 21 (0x15), region = 16 }
   0xe   : > { %80 = sbr.rel (!%p27_p3) target bundleno = 21 (0x15), region = 20  ;;  %s82_s14 = sand.u32 (%p27_p3), 1, %s289_s7  }
   0xf   : > { %s241_s15 = sshll.u32 (%p27_p3), %s293_s8, 3  ;;  %s240_s16 = sshll.u32 (%p27_p3), %s82_s14, 4 }
  0x10   : > { %s86_s19 = scalar_lea.vmem (%p27_p3), %s359_s0, %s241_s15  ;;  %s84_s20 = scalar_lea.vmem (%p27_p3), [#allocation2], %s240_s16 }
  0x11   : > { %v116_v0 = vld [vmem:[%s86_s19] sm:$0xff] (%p27_p3)  ;;  %v118_v1 = vld [vmem:[%s86_s19 + $0x10] sm:$0xff] (%p27_p3) }
  0x12   : > { %117 = vst [vmem:[%s84_s20] sm:$0xff] (%p27_p3), %v116_v0  ;;  %119 = vst [vmem:[%s84_s20 + $0x8] sm:$0xff] (%p27_p3), %v118_v1 }
  0x15 PF: > { %p242_p5 = scmp.ge.s32.totalorder %s293_s8, 1  ;;  %p124_p6 = scmp.lt.s32.totalorder %s293_s8, 3 }
  0x17   : > { %p125_p7 = pnand %p242_p5, %p124_p6 }
  0x18   : > { %s131_s21 = sand.u32 (!%p125_p7), 1, %s285_s6   ;;  %vm155_vm0 = vcmask (!%p125_p7), 261120   ;;  %p149_p8 = scmp.lt.s32.totalorder (!%p125_p7), %s236_s9, 1  ;;  %vm172_vm1 = vcmask (!%p125_p7), 1041409   ;;  %vm175_vm2 = vcmask (!%p125_p7), 254976  }
  0x19   : > { %128 = sbr.rel (%p125_p7) target bundleno = 43 (0x2b), region = 58  ;;  %s243_s22 = sshll.u32 (!%p125_p7), %s131_s21, 4 }
  0x1a   : > { %s133_s23 = scalar_lea.vmem (!%p125_p7), [#allocation2], %s243_s22 }
  0x1b   : > { %v153_v2 = vld [vmem:[%s133_s23] sm:$0xff] (!%p125_p7)  ;;  %v154_v3 = vld [vmem:[%s133_s23 + $0x8] sm:$0xff] (!%p125_p7) }
  0x1c   : > { %v156_v4 = vsel (!%p125_p7), %vm155_vm0, %v153_v2, 0.0  ;;  %v163_v5 = vsel (!%p125_p7), %vm155_vm0, %v154_v3, 0.0 }
  0x1d   : > { %v157_v6 = vrot.slane (!%p125_p7), %v156_v4, 4  ;;  %v164_v7 = vrot.slane (!%p125_p7), %v163_v5, 4 }
  0x1f   : > { %v158_v8 = vadd.f32 (!%p125_p7), %v157_v6, %v156_v4  ;;  %v165_v9 = vadd.f32 (!%p125_p7), %v164_v7, %v163_v5 }
  0x20   : > { %s365_s9 = smov (!%p149_p8, %s236_s9), 1 }
  0x21   : > { %v159_v10 = vrot.slane %v158_v8, 2  ;;  %v166_v11 = vrot.slane %v165_v9, 2  ;;  %s244_s24 = sshll.u32 %s365_s9, 1 }
  0x22   : > { %s152_s27 = scalar_lea.vmem %s360_s1, %s244_s24 }
  0x23   : > { %v160_v12 = vadd.f32 %v159_v10, %v158_v8  ;;  %v167_v13 = vadd.f32 %v166_v11, %v165_v9 }
  0x25   : > { %v161_v14 = vrot.slane %v160_v12, 1  ;;  %v168_v15 = vrot.slane %v167_v13, 1 }
  0x27   : > { %v162_v16 = vadd.f32 %v161_v14, %v160_v12  ;;  %v169_v17 = vadd.f32 %v168_v15, %v167_v13 }
  0x29   : > { %v173_v18 = vsel %vm172_vm1, %v169_v17, %v162_v16 }
  0x2a   : > { %176 = vst.msk [vmem:[%s152_s27] sm:$0x3] %vm175_vm2, %v173_v18 }
  0x2b PF: > { %p8_p9 = scmp.ge.s32.totalorder %s322_s10, 4   ;;  %s361_s6 = smov %s289_s7 }
  0x2c   : > { %s362_s7 = smov %s331_s13  ;;  %s363_s8 = smov %s322_s10 }
  0x2d   :  { %10 = sbr.rel (!%p8_p9) target bundleno = 2 (0x2), region = 97 }

// kernel: network_forward.257
= control target key start
LH: loop header
LB: loop body
LE: loop exit
PB: predicated region body
PF: predicated region fallthrough
CT: control target
= control target key end

     0   :  { %v131_v3 = vmov 0.0   ;;  %vm132_vm0 = vmmov 0   ;;  %s184_s0 = inlined_call_operand.vmem [shape: f32[2,32], index: 0, kind: input, shape index: {}]   ;;  %s185_s1 = inlined_call_operand.vmem [shape: f32[32,10], index: 1, kind: input, shape index: {}]   ;;  %s186_s2 = inlined_call_operand.vmem [shape: f32[1,10], index: 2, kind: input, shape index: {}]   ;;  %s187_s3 = inlined_call_operand.hbm [shape: f32[2,10], index: 3, kind: output, shape index: {}]  }
   0x1   :  { %v18_v0 = vld [vmem:[%s185_s1] sm:$0xff]  ;;  %v19_v1 = vld [vmem:[%s185_s1 + $0x8] sm:$0xff]  ;;  %v20_v2 = vld [vmem:[%s185_s1 + $0x10] sm:$0xff]  ;;  %96 = vmatprep.subr.bf16.mxu0 %v131_v3  ;;  %100 = vmatprep.mubr.msk.bf16.mxu0 %vm132_vm0, %v131_v3 }
   0x2   :  { %v22_v4 = vpack.c.bf16 %v19_v1, %v18_v0  ;;  %v21_v5 = vld [vmem:[%s185_s1 + $0x18] sm:$0xff] }
   0x3   :  { %8 = vsyncpa [#allocation3], 0  ;;  %v23_v6 = vpack.c.bf16 %v21_v5, %v20_v2  ;;  %v16_v7 = vld [vmem:[%s184_s0] sm:$0x3]  ;;  %vm31_vm1 = vcmask 261120   ;;  %s133_s24 = smov [#allocation2]  }
   0x4   :  { %97 = vmatpush3.bf16.msra.mxu0 %v22_v4  ;;  %v17_v8 = vpack.c.bf16 %v16_v7, %v16_v7  ;;  %v91_v9 = vld [vmem:[%s186_s2] ss:$0 sm:$0xff]  ;;  %s83_s1 = sshll.u32 %s133_s24, 4  ;;  %vm75_vm2 = vcmask 74752   ;;  %s84_s1 = int_to_ptr.vmem [resolvable:$true] %s83_s1 }
   0x5   :  { %98 = vmatprep.subr.bf16.mxu0 %v131_v3  ;;  %s107_s0 = scalar_lea.vmem %s84_s1, 32  ;;  %p112_p1 = scmp.lt.s32.totalorder %s84_s1, %s84_s1 }
   0x6   :  { %p108_p0 = scmp.ne.s32.totalorder %s84_s1, %s107_s0  ;;  %p113_p2 = scmp.lt.s32.totalorder %s107_s0, %s107_s0 }
   0x8   :  { %99 = vmatpush3.bf16.msra.mxu0 %v23_v6  ;;  %p114_p3 = por %p113_p2, %p112_p1 }
   0xa   :  { %p115_p4 = pnand %p114_p3, %p108_p0 }
   0xb   :  { %101 = vmatmul.mubr.msk.bf16.vlgmr.msra.gmra.mrb[0].mxu0 %vm31_vm1, %v17_v8 }
  0xde   :  { %v69_v10 = vpop.f32.mrb[0].mxu0 }
  0xdf   :  { %v70_v11 = vadd.f32 %v91_v9, %v69_v10  ;;  %v102_v12 = vpop.f32.mrb[1].mxu0 }
  0xe0   :  { %v72_v13 = vpop.f32.mrb[2].mxu0 }
  0xe1   :  { %v103_v14 = vpop.f32.mrb[3].mxu0  ;;  %76 = vst.msk [vmem:[#allocation2] sm:$0x3] %vm75_vm2, %v70_v11 }
  0xe2   :  { %118 = shalt.err (!%p115_p4)
}
  0xe3   :  { %s119_s2 = scalar_lea.hbm %s187_s3, 32 }
  0xe4   :  { %p120_p5 = scmp.ne.s32.totalorder %s187_s3, %s119_s2  ;;  %p123_p6 = scmp.lt.u32.totalorder %s119_s2, %s187_s3 }
  0xe6   :  { %p125_p7 = pnand %p123_p6, %p120_p5 }
  0xe8   :  { %128 = shalt.err (!%p125_p7)
}
  0xe9   :  { %86 = dma.vmem_to_hbm [thread:$0]  %s84_s1, 32, %s187_s3, [#allocation3]  }
  0xea   :  { %129 = dma.done.wait [#allocation3], 32  }
  0xeb   :  { %130 = vsyncadd [#allocation3], 4294967264 }
  0xec   :  { %90 = vsyncpa [#allocation3], 1 }

// kernel: network_forward.255
= control target key start
LH: loop header
LB: loop body
LE: loop exit
PB: predicated region body
PF: predicated region fallthrough
CT: control target
= control target key end

     0   :  { %v78_v0 = vlaneseq  ;;  %s470_s0 = inlined_call_operand.vmem [shape: f32[21,128], index: 0, kind: input, shape index: {}]   ;;  %s471_s2 = inlined_call_operand.vmem [shape: f32[4,128], index: 2, kind: input, shape index: {}]   ;;  %s472_s3 = inlined_call_operand.vmem [shape: f32[4,128], index: 3, kind: input, shape index: {}]   ;;  %s473_s4 = inlined_call_operand.vmem [shape: f32[4,128], index: 4, kind: input, shape index: {}]   ;;  %s474_s5 = inlined_call_operand.vmem [shape: f32[4,128], index: 5, kind: input, shape index: {}]   ;;  %s475_s6 = inlined_call_operand.vmem [shape: f32[4,128], index: 6, kind: input, shape index: {}]   ;;  %s476_s7 = inlined_call_operand.vmem [shape: f32[4,128], index: 7, kind: input, shape index: {}]   ;;  %s477_s8 = inlined_call_operand.vmem [shape: f32[4,128], index: 8, kind: input, shape index: {}]   ;;  %s478_s9 = inlined_call_operand.vmem [shape: f32[4,128], index: 9, kind: input, shape index: {}]   ;;  %s479_s10 = inlined_call_operand.vmem [shape: f32[4,128], index: 10, kind: input, shape index: {}]   ;;  %s480_s11 = inlined_call_operand.vmem [shape: f32[4,128], index: 11, kind: input, shape index: {}]   ;;  %s481_s12 = inlined_call_operand.vmem [shape: f32[4,128], index: 12, kind: input, shape index: {}]   ;;  %s482_s13 = inlined_call_operand.vmem [shape: f32[4,128], index: 13, kind: input, shape index: {}]   ;;  %s483_s14 = inlined_call_operand.vmem [shape: f32[4,128], index: 14, kind: input, shape index: {}]   ;;  %s484_s15 = inlined_call_operand.vmem [shape: f32[4,128], index: 15, kind: input, shape index: {}]   ;;  %s485_s16 = inlined_call_operand.vmem [shape: f32[4,128], index: 16, kind: input, shape index: {}]   ;;  %s486_s17 = inlined_call_operand.vmem [shape: f32[4,128], index: 17, kind: input, shape index: {}]   ;;  %s487_s18 = inlined_call_operand.vmem [shape: f32[4,128], index: 18, kind: input, shape index: {}]   ;;  %s488_s19 = inlined_call_operand.vmem [shape: f32[4,128], index: 19, kind: input, shape index: {}]   ;;  %s489_s20 = inlined_call_operand.vmem [shape: f32[4,128], index: 20, kind: input, shape index: {}]   ;;  %s490_s21 = inlined_call_operand.vmem [shape: f32[4,128], index: 21, kind: input, shape index: {}]   ;;  %s491_s22 = inlined_call_operand.vmem [shape: f32[4,128], index: 22, kind: input, shape index: {}]   ;;  %s492_s1 = inlined_call_operand.vmem [shape: f32[1,128], index: 1, kind: input, shape index: {}]   ;;  %s493_s23 = inlined_call_operand.vmem [shape: f32[4,128], index: 23, kind: output, shape index: {}]  }
   0x1   :  { %495 = sst [smem:[#allocation2_spill]] %s470_s0  ;;  %v125_v36 = vld [vmem:[%s478_s9] sm:$0xf] }
   0x2   :  { %496 = sst [smem:[#allocation3_spill]] %s471_s2  ;;  %v357_v1 = vshrl.u32 %v78_v0, 7  ;;  %s503_s24 = sld [smem:[#allocation2_spill]]  ;;  %v132_v40 = vld [vmem:[%s479_s10] sm:$0xf] }
   0x3   :  { %497 = sst [smem:[#allocation4_spill]] %s472_s3  ;;  %s504_s2 = sld [smem:[#allocation3_spill]]  ;;  %v139_v44 = vld [vmem:[%s480_s11] sm:$0xf] }
   0x4   :  { %498 = sst [smem:[#allocation5_spill]] %s473_s4  ;;  %v366_v4 = vsub.s32 0, %v357_v1  ;;  %v369_v5 = vsub.s32 1, %v357_v1  ;;  %v372_v6 = vsub.s32 2, %v357_v1  ;;  %v375_v7 = vsub.s32 3, %v357_v1 }
   0x5   :  { %499 = sst [smem:[#allocation6_spill]] %s474_s5  ;;  %s506_s28 = sld [smem:[#allocation5_spill]]  ;;  %v384_v10 = vsub.s32 4, %v357_v1  ;;  %v114_v11 = vsub.s32 5, %v357_v1  ;;  %v121_v17 = vsub.s32 6, %v357_v1  ;;  %v128_v26 = vsub.s32 7, %v357_v1 }
   0x6   :  { %500 = sst [smem:[#allocation7_spill]] %s475_s6  ;;  %s507_s0 = sld [smem:[#allocation6_spill]]  ;;  %v146_v48 = vld [vmem:[%s481_s12] sm:$0xf] }
   0x7   :  { %501 = sst [smem:[#allocation8_spill]] %s476_s7  ;;  %s505_s7 = sld [smem:[#allocation4_spill]]  ;;  %v153_v52 = vld [vmem:[%s482_s13] sm:$0xf] }
   0x8   :  { %502 = sst [smem:[#allocation9_spill]] %s477_s8  ;;  %v74_v2 = vld [vmem:[%s503_s24] sm:$0xff]  ;;  %s508_s25 = sld [smem:[#allocation7_spill]]  ;;  %v75_v31 = vld [vmem:[%s503_s24 + $0x8] sm:$0xff]  ;;  %v76_v0 = vld [vmem:[%s503_s24 + $0x10] sm:$0x1f] }
   0x9   :  { %v77_v3 = vld [vmem:[%s504_s2] sm:$0xf]  ;;  %v81_v12 = vrot.slane %v74_v2, %v366_v4  ;;  %v87_v13 = vrot.slane %v74_v2, %v369_v5  ;;  %v94_v14 = vrot.slane %v74_v2, %v372_v6  ;;  %v101_v15 = vrot.slane %v74_v2, %v375_v7  ;;  %s509_s26 = sld [smem:[#allocation8_spill]] }
   0xa   :  { %v108_v21 = vrot.slane %v74_v2, %v384_v10  ;;  %v115_v25 = vrot.slane %v74_v2, %v114_v11  ;;  %v122_v30 = vrot.slane %v74_v2, %v121_v17  ;;  %v129_v35 = vrot.slane %v74_v2, %v128_v26  ;;  %v160_v56 = vld [vmem:[%s483_s14] sm:$0xf] }
   0xb   :  { %v90_v9 = vld [vmem:[%s506_s28] sm:$0xf]  ;;  %v82_v18 = vmul.f32 %v81_v12, %v77_v3  ;;  %s510_s28 = sld [smem:[#allocation9_spill]]  ;;  %v136_v39 = vrot.slane %v75_v31, %v366_v4  ;;  %v143_v43 = vrot.slane %v75_v31, %v369_v5  ;;  %v150_v47 = vrot.slane %v75_v31, %v372_v6 }
   0xc   :  { %v97_v16 = vld [vmem:[%s507_s0] sm:$0xf]  ;;  %v95_v20 = vmul.f32 %v94_v14, %v90_v9  ;;  %v130_v42 = vmul.f32 %v129_v35, %v125_v36  ;;  %v157_v51 = vrot.slane %v75_v31, %v375_v7  ;;  %v164_v55 = vrot.slane %v75_v31, %v384_v10 }
   0xd   :  { %v83_v8 = vld [vmem:[%s505_s7] sm:$0xf]  ;;  %v102_v24 = vmul.f32 %v101_v15, %v97_v16  ;;  %v137_v46 = vmul.f32 %v136_v39, %v132_v40  ;;  %v144_v50 = vmul.f32 %v143_v43, %v139_v44  ;;  %v151_v54 = vmul.f32 %v150_v47, %v146_v48 }
   0xe   :  { %v88_v19 = vmul.f32 %v87_v13, %v83_v8  ;;  %v104_v22 = vld [vmem:[%s508_s25] sm:$0xf]  ;;  %v158_v58 = vmul.f32 %v157_v51, %v153_v52  ;;  %v171_v59 = vrot.slane %v75_v31, %v114_v11  ;;  %v165_v62 = vmul.f32 %v164_v55, %v160_v56 }
   0xf   :  { %v111_v27 = vld [vmem:[%s509_s26] sm:$0xf]  ;;  %v109_v29 = vmul.f32 %v108_v21, %v104_v22  ;;  %v178_v63 = vrot.slane %v75_v31, %v121_v17  ;;  %v185_v8 = vrot.slane %v75_v31, %v128_v26  ;;  %v192_v13 = vrot.slane %v76_v0, %v366_v4 }
  0x10   :  { %v89_v23 = vadd.f32 %v88_v19, %v82_v18  ;;  %v116_v34 = vmul.f32 %v115_v25, %v111_v27  ;;  %v167_v60 = vld [vmem:[%s484_s15] sm:$0xf]  ;;  %v199_v17 = vrot.slane %v76_v0, %v369_v5  ;;  %v206_v21 = vrot.slane %v76_v0, %v372_v6 }
  0x11   :  { %v118_v32 = vld [vmem:[%s510_s28] sm:$0xf]  ;;  %v172_v3 = vmul.f32 %v171_v59, %v167_v60  ;;  %v220_v27 = vrot.slane %v76_v0, %v384_v10 }
  0x12   :  { %v96_v28 = vadd.f32 %v95_v20, %v89_v23  ;;  %v123_v38 = vmul.f32 %v122_v30, %v118_v32  ;;  %v174_v1 = vld [vmem:[%s485_s16] sm:$0xf] }
  0x13   :  { %v181_v9 = vld [vmem:[%s486_s17] sm:$0xf]  ;;  %v179_v12 = vmul.f32 %v178_v63, %v174_v1 }
  0x14   :  { %v103_v33 = vadd.f32 %v102_v24, %v96_v28  ;;  %v188_v14 = vld [vmem:[%s487_s18] sm:$0xf]  ;;  %v186_v16 = vmul.f32 %v185_v8, %v181_v9  ;;  %v213_v24 = vrot.slane %v76_v0, %v375_v7 }
  0x15   :  { %v195_v18 = vld [vmem:[%s488_s19] sm:$0xf]  ;;  %v193_v20 = vmul.f32 %v192_v13, %v188_v14 }
  0x16   :  { %v110_v37 = vadd.f32 %v109_v29, %v103_v33  ;;  %v202_v4 = vld [vmem:[%s489_s20] sm:$0xf]  ;;  %v200_v23 = vmul.f32 %v199_v17, %v195_v18 }
  0x17   :  { %v209_v5 = vld [vmem:[%s490_s21] sm:$0xf]  ;;  %v207_v26 = vmul.f32 %v206_v21, %v202_v4 }
  0x18   :  { %v117_v41 = vadd.f32 %v116_v34, %v110_v37  ;;  %v216_v6 = vld [vmem:[%s491_s22] sm:$0xf]  ;;  %v214_v29 = vmul.f32 %v213_v24, %v209_v5 }
  0x19   :  { %v221_v31 = vmul.f32 %v220_v27, %v216_v6  ;;  %v236_v7 = vld [vmem:[%s492_s1] ss:$0 sm:$0xff] }
  0x1a   :  { %v124_v45 = vadd.f32 %v123_v38, %v117_v41 }
  0x1c   :  { %v131_v49 = vadd.f32 %v130_v42, %v124_v45 }
  0x1e   :  { %v138_v53 = vadd.f32 %v137_v46, %v131_v49 }
  0x20   :  { %v145_v57 = vadd.f32 %v144_v50, %v138_v53 }
  0x22   :  { %v152_v61 = vadd.f32 %v151_v54, %v145_v57 }
  0x24   :  { %v159_v2 = vadd.f32 %v158_v58, %v152_v61 }
  0x26   :  { %v166_v11 = vadd.f32 %v165_v62, %v159_v2 }
  0x28   :  { %v173_v15 = vadd.f32 %v172_v3, %v166_v11 }
  0x2a   :  { %v180_v19 = vadd.f32 %v179_v12, %v173_v15 }
  0x2c   :  { %v187_v22 = vadd.f32 %v186_v16, %v180_v19 }
  0x2e   :  { %v194_v25 = vadd.f32 %v193_v20, %v187_v22 }
  0x30   :  { %v201_v28 = vadd.f32 %v200_v23, %v194_v25 }
  0x32   :  { %v208_v30 = vadd.f32 %v207_v26, %v201_v28 }
  0x34   :  { %v215_v32 = vadd.f32 %v214_v29, %v208_v30 }
  0x36   :  { %v222_v33 = vadd.f32 %v221_v31, %v215_v32 }
  0x38   :  { %v230_v34 = vadd.f32 %v236_v7, %v222_v33 }
  0x3a   :  { %231 = vst [vmem:[%s493_s23] sm:$0xf] %v230_v34 }

</bundles_post_ra>
